<compile_context>
chip_gen: v7x
topology: tpu7x:2x2x1
jax: 0.10.0
libtpu: 0.0.40
codegen_flags: <defaults>
</compile_context>

<pallas_src>
import functools

import numpy as np
import jax
import jax.numpy as jnp
from jax.experimental import pallas as pl
from jax.experimental.pallas import tpu as pltpu

# ----------------------------- configuration (small demo sizes) -----------------------------
NUM_CLASSES = 10
BLOCK_SIZE  = 3                      # number of regional classifiers
IMG_SIZE    = 32                     # real FSRA uses 224; small demo size
PATCH       = 16
IN_CHANS    = 3
EMBED_DIM   = 384                    # fixed by ClassBlock(input_dim=384)
DEPTH       = 2                      # TODO(synk): vit_small_patch16_224 uses depth=12; reduced for demo speed
NUM_HEADS   = 6
HEAD_DIM    = EMBED_DIM // NUM_HEADS
MLP_DIM     = 4 * EMBED_DIM
BOTTLENECK  = 512                    # ClassBlock num_bottleneck
LN_EPS      = 1e-6
BN_EPS      = 1e-5
N_PATCHES   = (IMG_SIZE // PATCH) ** 2
SEQ_LEN     = N_PATCHES + 1

MAX_TILE_M  = 256                    # M tile for row-wise kernels (fits v7x 64 MiB VMEM easily)
VMEM_LIMIT  = 64 * 1024 * 1024


def _tile_m(m):
    # Full-array block for small M (exempt from the 8-divisibility rule), 256-row tiles otherwise.
    return m if m <= MAX_TILE_M else MAX_TILE_M


# ----------------------------------- Pallas kernels -----------------------------------------
def _linear_kernel(x_ref, w_ref, b_ref, o_ref):
    """y = x @ w + b (bf16 MXU inputs, f32 accumulate)."""
    x = x_ref[...].astype(jnp.bfloat16)
    y = jnp.dot(x, w_ref[...], preferred_element_type=jnp.float32)
    o_ref[...] = y + b_ref[...]


def linear_pallas(x, w, b):
    """x: (M,K) f32, w: (K,N) bf16, b: (N,) f32 -> (M,N) f32, tiled over M."""
    M, K = x.shape
    N = w.shape[1]
    tm = _tile_m(M)
    return pl.pallas_call(
        _linear_kernel,
        out_shape=jax.ShapeDtypeStruct((M, N), jnp.float32),
        grid=(pl.cdiv(M, tm),),
        in_specs=[pl.BlockSpec((tm, K), lambda i: (i, 0)),
                  pl.BlockSpec((K, N), lambda i: (0, 0)),
                  pl.BlockSpec((1, N), lambda i: (0, 0))],
        out_specs=pl.BlockSpec((tm, N), lambda i: (i, 0)),
        compiler_params=pltpu.CompilerParams(
            dimension_semantics=("parallel",), vmem_limit_bytes=VMEM_LIMIT),
    )(x, w, b.reshape(1, N))


def _layernorm_kernel(x_ref, g_ref, b_ref, o_ref):
    x = x_ref[...]
    mu = jnp.mean(x, axis=-1, keepdims=True)
    var = jnp.mean(jnp.square(x - mu), axis=-1, keepdims=True)
    xn = (x - mu) * jax.lax.rsqrt(var + LN_EPS)
    o_ref[...] = xn * g_ref[...] + b_ref[...]


def layernorm_pallas(x, gamma, beta):
    M, D = x.shape
    tm = _tile_m(M)
    return pl.pallas_call(
        _layernorm_kernel,
        out_shape=jax.ShapeDtypeStruct((M, D), jnp.float32),
        grid=(pl.cdiv(M, tm),),
        in_specs=[pl.BlockSpec((tm, D), lambda i: (i, 0)),
                  pl.BlockSpec((1, D), lambda i: (0, 0)),
                  pl.BlockSpec((1, D), lambda i: (0, 0))],
        out_specs=pl.BlockSpec((tm, D), lambda i: (i, 0)),
        compiler_params=pltpu.CompilerParams(
            dimension_semantics=("parallel",), vmem_limit_bytes=VMEM_LIMIT),
    )(x, gamma.reshape(1, D), beta.reshape(1, D))


def _ln_linear_kernel(x_ref, g_ref, bt_ref, w_ref, b_ref, o_ref):
    """y = LayerNorm(x) @ w + b  (LN stats in f32, matmul in bf16)."""
    x = x_ref[...]
    mu = jnp.mean(x, axis=-1, keepdims=True)
    var = jnp.mean(jnp.square(x - mu), axis=-1, keepdims=True)
    xn = (x - mu) * jax.lax.rsqrt(var + LN_EPS)
    xn = xn * g_ref[...] + bt_ref[...]
    y = jnp.dot(xn.astype(jnp.bfloat16), w_ref[...], preferred_element_type=jnp.float32)
    o_ref[...] = y + b_ref[...]


def ln_linear_pallas(x, gamma, beta, w, b):
    M, K = x.shape
    N = w.shape[1]
    tm = _tile_m(M)
    return pl.pallas_call(
        _ln_linear_kernel,
        out_shape=jax.ShapeDtypeStruct((M, N), jnp.float32),
        grid=(pl.cdiv(M, tm),),
        in_specs=[pl.BlockSpec((tm, K), lambda i: (i, 0)),
                  pl.BlockSpec((1, K), lambda i: (0, 0)),
                  pl.BlockSpec((1, K), lambda i: (0, 0)),
                  pl.BlockSpec((K, N), lambda i: (0, 0)),
                  pl.BlockSpec((1, N), lambda i: (0, 0))],
        out_specs=pl.BlockSpec((tm, N), lambda i: (i, 0)),
        compiler_params=pltpu.CompilerParams(
            dimension_semantics=("parallel",), vmem_limit_bytes=VMEM_LIMIT),
    )(x, gamma.reshape(1, K), beta.reshape(1, K), w, b.reshape(1, N))


def _ln_mlp_kernel(x_ref, g_ref, bt_ref, w1_ref, b1_ref, w2_ref, b2_ref, o_ref):
    """out = x + fc2(GELU(fc1(LayerNorm(x))))  — whole MLP branch fused."""
    x = x_ref[...]
    mu = jnp.mean(x, axis=-1, keepdims=True)
    var = jnp.mean(jnp.square(x - mu), axis=-1, keepdims=True)
    xn = (x - mu) * jax.lax.rsqrt(var + LN_EPS)
    xn = xn * g_ref[...] + bt_ref[...]
    h = jnp.dot(xn.astype(jnp.bfloat16), w1_ref[...],
                preferred_element_type=jnp.float32) + b1_ref[...]
    # TODO(synk): PyTorch nn.GELU default is exact erf; tanh-approximate GELU used in-kernel (EUP path).
    h = jax.nn.gelu(h, approximate=True)
    y = jnp.dot(h.astype(jnp.bfloat16), w2_ref[...],
                preferred_element_type=jnp.float32) + b2_ref[...]
    o_ref[...] = x + y


def ln_mlp_residual_pallas(x, gamma, beta, w1, b1, w2, b2):
    M, D = x.shape
    Dm = w1.shape[1]
    tm = _tile_m(M)
    return pl.pallas_call(
        _ln_mlp_kernel,
        out_shape=jax.ShapeDtypeStruct((M, D), jnp.float32),
        grid=(pl.cdiv(M, tm),),
        in_specs=[pl.BlockSpec((tm, D), lambda i: (i, 0)),
                  pl.BlockSpec((1, D), lambda i: (0, 0)),
                  pl.BlockSpec((1, D), lambda i: (0, 0)),
                  pl.BlockSpec((D, Dm), lambda i: (0, 0)),
                  pl.BlockSpec((1, Dm), lambda i: (0, 0)),
                  pl.BlockSpec((Dm, D), lambda i: (0, 0)),
                  pl.BlockSpec((1, D), lambda i: (0, 0))],
        out_specs=pl.BlockSpec((tm, D), lambda i: (i, 0)),
        compiler_params=pltpu.CompilerParams(
            dimension_semantics=("parallel",), vmem_limit_bytes=VMEM_LIMIT),
    )(x, gamma.reshape(1, D), beta.reshape(1, D), w1, b1.reshape(1, Dm), w2, b2.reshape(1, D))


def _attn_proj_kernel(qkv_ref, x_ref, wp_ref, bp_ref, o_ref, *, num_heads, head_dim, scale):
    """out = x + MHSA(qkv) @ Wp + bp for one batch element.

    qkv is the fused (T, 3*D) projection; Q/K/V for each head are sliced in-kernel,
    so no (3,B,H,T,hd) transpose ever touches HBM. Softmax stays in f32, matmuls in bf16.
    """
    d = num_heads * head_dim
    ctxs = []
    for h in range(num_heads):                       # static unroll over heads
        q = qkv_ref[0, :, h * head_dim:(h + 1) * head_dim].astype(jnp.bfloat16)
        k = qkv_ref[0, :, d + h * head_dim:d + (h + 1) * head_dim].astype(jnp.bfloat16)
        v = qkv_ref[0, :, 2 * d + h * head_dim:2 * d + (h + 1) * head_dim].astype(jnp.bfloat16)
        s = jax.lax.dot_general(q, k, (((1,), (1,)), ((), ())),
                                preferred_element_type=jnp.float32) * scale   # (T, T)
        s = s - jnp.max(s, axis=-1, keepdims=True)
        p = jnp.exp(s)
        p = p * pl.reciprocal(jnp.sum(p, axis=-1, keepdims=True), approx=True)
        ctxs.append(jnp.dot(p.astype(jnp.bfloat16), v, preferred_element_type=jnp.float32))
    ctx = jnp.concatenate(ctxs, axis=-1).astype(jnp.bfloat16)                 # (T, D) lane-dense
    y = jnp.dot(ctx, wp_ref[...], preferred_element_type=jnp.float32) + bp_ref[...]
    o_ref[0] = x_ref[0] + y


def attn_proj_residual_pallas(qkv, x, wp, bp):
    """qkv: (B,T,3D) f32, x: (B,T,D) f32 (residual), wp: (D,D) bf16, bp: (D,) f32."""
    B, T, D3 = qkv.shape
    D = x.shape[-1]
    return pl.pallas_call(
        functools.partial(_attn_proj_kernel, num_heads=NUM_HEADS, head_dim=HEAD_DIM,
                          scale=HEAD_DIM ** -0.5),
        out_shape=jax.ShapeDtypeStruct((B, T, D), jnp.float32),
        grid=(B,),
        in_specs=[pl.BlockSpec((1, T, D3), lambda i: (i, 0, 0)),
                  pl.BlockSpec((1, T, D), lambda i: (i, 0, 0)),
                  pl.BlockSpec((D, D), lambda i: (0, 0)),
                  pl.BlockSpec((1, D), lambda i: (0, 0))],
        out_specs=pl.BlockSpec((1, T, D), lambda i: (i, 0, 0)),
        compiler_params=pltpu.CompilerParams(
            dimension_semantics=("parallel",), vmem_limit_bytes=VMEM_LIMIT),
    )(qkv, x, wp, bp.reshape(1, D))


def _heads_kernel(seq_ref, m_ref, w1_ref, b1_ref, sc_ref, sh_ref, w2_ref, b2_ref, o_ref):
    """One classifier head: pooling (cls-token or regional mean via a weight vector over
    tokens) fused with ClassBlock (Linear 384->512, BatchNorm1d eval folded to affine,
    Dropout=identity, Linear 512->C)."""
    seq = seq_ref[...]                                  # (B, T, D) f32
    feat = jnp.sum(seq * m_ref[...], axis=1)            # (B, D) pooled feature (f32)
    h = jnp.dot(feat.astype(jnp.bfloat16), w1_ref[0],
                preferred_element_type=jnp.float32) + b1_ref[0]
    h = h * sc_ref[0] + sh_ref[0]                       # folded BatchNorm1d (eval)
    o_ref[0] = jnp.dot(h.astype(jnp.bfloat16), w2_ref[0],
                       preferred_element_type=jnp.float32) + b2_ref[0]


def heads_pallas(seq, pool_mask, heads):
    """seq: (B,T,D) LayerNorm'd tokens; pool_mask: (K,T,1); heads: per-head params.
    K = 1 global + BLOCK_SIZE regional classifiers. Returns (K, B, C) logits."""
    B, T, D = seq.shape
    K = pool_mask.shape[0]
    Dbn = heads["w1"].shape[-1]
    C = heads["w2"].shape[-1]
    return pl.pallas_call(
        _heads_kernel,
        out_shape=jax.ShapeDtypeStruct((K, B, C), jnp.float32),
        grid=(K,),
        in_specs=[
            pl.BlockSpec((B, T, D),   lambda i: (0, 0, 0)),
            pl.BlockSpec((1, T, 1),   lambda i: (i, 0, 0)),
            pl.BlockSpec((1, D, Dbn), lambda i: (i, 0, 0)),
            pl.BlockSpec((1, 1, Dbn), lambda i: (i, 0, 0)),
            pl.BlockSpec((1, 1, Dbn), lambda i: (i, 0, 0)),
            pl.BlockSpec((1, 1, Dbn), lambda i: (i, 0, 0)),
            pl.BlockSpec((1, Dbn, C), lambda i: (i, 0, 0)),
            pl.BlockSpec((1, 1, C),   lambda i: (i, 0, 0)),
        ],
        out_specs=pl.BlockSpec((1, B, C), lambda i: (i, 0, 0)),
        compiler_params=pltpu.CompilerParams(
            dimension_semantics=("parallel",), vmem_limit_bytes=VMEM_LIMIT),
    )(seq, pool_mask, heads["w1"], heads["b1"], heads["scale"], heads["shift"],
      heads["w2"], heads["b2"])


# ----------------------------------- model forward ------------------------------------------
def transformer_block(seq, bp):
    B, T, D = seq.shape
    # 1) fused LN1 + QKV projection (rows tiled, parallel grid)
    qkv = ln_linear_pallas(seq.reshape(B * T, D), bp["ln1_g"], bp["ln1_b"],
                           bp["qkv_w"], bp["qkv_b"]).reshape(B, T, 3 * D)
    # 2) fused attention + output projection + residual (no 5-D transposes)
    seq = attn_proj_residual_pallas(qkv, seq, bp["proj_w"], bp["proj_b"])
    # 3) fused LN2 + fc1 + GELU + fc2 + residual
    seq = ln_mlp_residual_pallas(seq.reshape(B * T, D), bp["ln2_g"], bp["ln2_b"],
                                 bp["fc1_w"], bp["fc1_b"],
                                 bp["fc2_w"], bp["fc2_b"]).reshape(B, T, D)
    return seq


def vit_backbone(x_nchw, params):
    B = x_nchw.shape[0]
    g = IMG_SIZE // PATCH
    # im2col: (B, C, H, W) -> (B*Np, C*p*p), pixel order (C, kh, kw) == Conv2d weight flattening
    patches = x_nchw.reshape(B, IN_CHANS, g, PATCH, g, PATCH)
    patches = patches.transpose(0, 2, 4, 1, 3, 5).reshape(B * N_PATCHES, IN_CHANS * PATCH * PATCH)
    tok = linear_pallas(patches, params["patch_w"], params["patch_b"]).reshape(B, N_PATCHES, EMBED_DIM)
    cls = jnp.broadcast_to(params["cls_token"], (B, 1, EMBED_DIM))
    seq = jnp.concatenate([cls, tok], axis=1) + params["pos_embed"]
    for bp in params["blocks"]:
        seq = transformer_block(seq, bp)
    seq = layernorm_pallas(seq.reshape(B * SEQ_LEN, EMBED_DIM),
                           params["ln_f_g"], params["ln_f_b"]).reshape(B, SEQ_LEN, EMBED_DIM)
    # TODO(synk): exact return convention of FSRA's vit_pytorch backbone unavailable;
    # assuming cls-token feature = seq[:,0] and local (patch) features = seq[:,1:].
    return seq


def fsra_forward(x, params):
    seq = vit_backbone(x, params)                         # (B, SEQ_LEN, 384), final-LN'd tokens
    # Global cls-token pooling + regional-mean pooling + both ClassBlock layers fused per head.
    logits = heads_pallas(seq, params["pool_mask"], params["heads"])   # (1+R, B, C)
    # return_f=False path: [global_output] + regional_outputs
    return [logits[i] for i in range(1 + BLOCK_SIZE)]


# ----------------------------------- parameter init -----------------------------------------
def init_params(key):
    keys = iter(jax.random.split(key, 128))

    def nrm(shape, std=0.02):
        return std * jax.random.normal(next(keys), shape, dtype=jnp.float32)

    bf = lambda a: a.astype(jnp.bfloat16)   # matmul weights stored bf16 (MXU input dtype)

    params = {
        "patch_w":   bf(nrm((IN_CHANS * PATCH * PATCH, EMBED_DIM))),
        "patch_b":   nrm((EMBED_DIM,)),
        "cls_token": nrm((1, 1, EMBED_DIM)),
        "pos_embed": nrm((1, SEQ_LEN, EMBED_DIM)),
        "blocks":    [],
        "ln_f_g":    1.0 + nrm((EMBED_DIM,)),
        "ln_f_b":    nrm((EMBED_DIM,)),
    }
    for _ in range(DEPTH):
        params["blocks"].append({
            "ln1_g": 1.0 + nrm((EMBED_DIM,)), "ln1_b": nrm((EMBED_DIM,)),
            "qkv_w": bf(nrm((EMBED_DIM, 3 * EMBED_DIM))), "qkv_b": nrm((3 * EMBED_DIM,)),
            "proj_w": bf(nrm((EMBED_DIM, EMBED_DIM))), "proj_b": nrm((EMBED_DIM,)),
            "ln2_g": 1.0 + nrm((EMBED_DIM,)), "ln2_b": nrm((EMBED_DIM,)),
            "fc1_w": bf(nrm((EMBED_DIM, MLP_DIM))), "fc1_b": nrm((MLP_DIM,)),
            "fc2_w": bf(nrm((MLP_DIM, EMBED_DIM))), "fc2_b": nrm((EMBED_DIM,)),
        })

    # classifier heads: index 0 = global_classifier, 1..BLOCK_SIZE = regional_classifiers
    K = 1 + BLOCK_SIZE
    w1 = nrm((K, EMBED_DIM, BOTTLENECK))
    b1 = nrm((K, 1, BOTTLENECK))
    gamma = 1.0 + nrm((K, 1, BOTTLENECK))
    beta  = nrm((K, 1, BOTTLENECK))
    rmean = nrm((K, 1, BOTTLENECK))
    rvar  = 1.0 + jnp.abs(nrm((K, 1, BOTTLENECK)))
    scale = gamma * jax.lax.rsqrt(rvar + BN_EPS)     # BatchNorm1d (eval) folded into affine
    shift = beta - rmean * scale
    params["heads"] = {
        "w1": bf(w1), "b1": b1, "scale": scale, "shift": shift,
        "w2": bf(nrm((K, BOTTLENECK, NUM_CLASSES))),
        "b2": nrm((K, 1, NUM_CLASSES)),
    }

    # token-pooling weights (K, SEQ_LEN, 1):
    #  row 0 = one-hot on cls token (global feature); rows 1..R = normalized regional means
    #  over patch tokens (last region absorbs the remainder), matching the PyTorch slicing.
    mask = np.zeros((K, SEQ_LEN, 1), np.float32)
    mask[0, 0, 0] = 1.0
    ppr = N_PATCHES // BLOCK_SIZE
    for i in range(BLOCK_SIZE):
        s = i * ppr
        e = s + ppr if i < BLOCK_SIZE - 1 else N_PATCHES
        mask[1 + i, 1 + s:1 + e, 0] = 1.0 / (e - s)
    params["pool_mask"] = jnp.asarray(mask)
    return params


# ---------------------------------------- main -----------------------------------------------
if __name__ == "__main__":
    params = init_params(jax.random.PRNGKey(42))
    x = jax.random.normal(jax.random.PRNGKey(0), (2, IN_CHANS, IMG_SIZE, IMG_SIZE), jnp.float32)

    fwd = jax.jit(fsra_forward)
    outs = fwd(x, params)
    outs = [jax.block_until_ready(o) for o in outs]

    assert len(outs) == 1 + BLOCK_SIZE
    assert all(o.shape == (2, NUM_CLASSES) for o in outs)
    assert all(bool(jnp.all(jnp.isfinite(o))) for o in outs)
    print("KERNEL_OK")
</pallas_src>

<mosaic_0001>
module attributes {stable_mosaic.version = 11 : i64} {
  func.func @_ln_linear_kernel(%arg0: i32, %arg1: memref<10x384xf32, #tpu.memory_space<vmem>>, %arg2: memref<1x384xf32, #tpu.memory_space<vmem>>, %arg3: memref<1x384xf32, #tpu.memory_space<vmem>>, %arg4: memref<384x1152xbf16, #tpu.memory_space<vmem>>, %arg5: memref<1x1152xf32, #tpu.memory_space<vmem>>, %arg6: memref<10x1152xf32, #tpu.memory_space<vmem>>) attributes {dimension_semantics = [#tpu.dimension_semantics<parallel>], iteration_bounds = array<i64: 1>, scalar_prefetch = 0 : i64, scratch_operands = 0 : i64, tpu.core_type = #tpu.core_type<tc>, window_params = [{transform_indices = @transform_0, window_bounds = array<i64: 10, 384>}, {pipeline_mode = #tpu.pipeline_mode<synchronous>, transform_indices = @transform_1, window_bounds = array<i64: 1, 384>}, {pipeline_mode = #tpu.pipeline_mode<synchronous>, transform_indices = @transform_2, window_bounds = array<i64: 1, 384>}, {pipeline_mode = #tpu.pipeline_mode<synchronous>, transform_indices = @transform_3, window_bounds = array<i64: 384, 1152>}, {pipeline_mode = #tpu.pipeline_mode<synchronous>, transform_indices = @transform_4, window_bounds = array<i64: 1, 1152>}, {transform_indices = @transform_5, window_bounds = array<i64: 10, 1152>}]} {
    %c0 = arith.constant 0 : index
    %c0_0 = arith.constant 0 : index
    %0 = vector.load %arg1[%c0, %c0_0] : memref<10x384xf32, #tpu.memory_space<vmem>>, vector<10x384xf32>
    %cst = arith.constant dense<0.000000e+00> : vector<10xf32>
    %1 = vector.multi_reduction <add>, %0, %cst [1] : vector<10x384xf32> to vector<10xf32>
    %2 = vector.shape_cast %1 : vector<10xf32> to vector<10x1xf32>
    %cst_1 = arith.constant 3.840000e+02 : f32
    %3 = vector.broadcast %cst_1 : f32 to vector<10x1xf32>
    %4 = arith.divf %2, %3 : vector<10x1xf32>
    %5 = vector.broadcast %4 : vector<10x1xf32> to vector<10x384xf32>
    %6 = arith.subf %0, %5 : vector<10x384xf32>
    %7 = arith.mulf %6, %6 : vector<10x384xf32>
    %cst_2 = arith.constant dense<0.000000e+00> : vector<10xf32>
    %8 = vector.multi_reduction <add>, %7, %cst_2 [1] : vector<10x384xf32> to vector<10xf32>
    %9 = vector.shape_cast %8 : vector<10xf32> to vector<10x1xf32>
    %cst_3 = arith.constant 3.840000e+02 : f32
    %10 = vector.broadcast %cst_3 : f32 to vector<10x1xf32>
    %11 = arith.divf %9, %10 : vector<10x1xf32>
    %12 = vector.broadcast %4 : vector<10x1xf32> to vector<10x384xf32>
    %13 = arith.subf %0, %12 : vector<10x384xf32>
    %cst_4 = arith.constant 9.99999997E-7 : f32
    %14 = vector.broadcast %cst_4 : f32 to vector<10x1xf32>
    %15 = arith.addf %11, %14 : vector<10x1xf32>
    %16 = math.rsqrt %15 : vector<10x1xf32>
    %17 = vector.broadcast %16 : vector<10x1xf32> to vector<10x384xf32>
    %18 = arith.mulf %13, %17 : vector<10x384xf32>
    %c0_5 = arith.constant 0 : index
    %c0_6 = arith.constant 0 : index
    %19 = vector.load %arg2[%c0_5, %c0_6] : memref<1x384xf32, #tpu.memory_space<vmem>>, vector<1x384xf32>
    %20 = vector.broadcast %19 : vector<1x384xf32> to vector<10x384xf32>
    %21 = arith.mulf %18, %20 : vector<10x384xf32>
    %c0_7 = arith.constant 0 : index
    %c0_8 = arith.constant 0 : index
    %22 = vector.load %arg3[%c0_7, %c0_8] : memref<1x384xf32, #tpu.memory_space<vmem>>, vector<1x384xf32>
    %23 = vector.broadcast %22 : vector<1x384xf32> to vector<10x384xf32>
    %24 = arith.addf %21, %23 : vector<10x384xf32>
    %25 = arith.truncf %24 : vector<10x384xf32> to vector<10x384xbf16>
    %c0_9 = arith.constant 0 : index
    %c0_10 = arith.constant 0 : index
    %26 = vector.load %arg4[%c0_9, %c0_10] : memref<384x1152xbf16, #tpu.memory_space<vmem>>, vector<384x1152xbf16>
    %cst_11 = arith.constant dense<0.000000e+00> : vector<10x1152xf32>
    %27 = tpu.matmul %25, %26, %cst_11 {dimension_numbers = #tpu.dot_dimension_numbers<[1], [0], [0], [1], [0, 0, 1, 1], [], []>} : vector<10x384xbf16>, vector<384x1152xbf16>, vector<10x1152xf32> -> vector<10x1152xf32>
    %c0_12 = arith.constant 0 : index
    %c0_13 = arith.constant 0 : index
    %28 = vector.load %arg5[%c0_12, %c0_13] : memref<1x1152xf32, #tpu.memory_space<vmem>>, vector<1x1152xf32>
    %29 = vector.broadcast %28 : vector<1x1152xf32> to vector<10x1152xf32>
    %30 = arith.addf %27, %29 : vector<10x1152xf32>
    %c0_14 = arith.constant 0 : index
    %c0_15 = arith.constant 0 : index
    %31 = vector.load %arg6[%c0_14, %c0_15] : memref<10x1152xf32, #tpu.memory_space<vmem>>, vector<10x1152xf32>
    tpu.vector_store %arg6[%c0_14, %c0_15], %30 {strides = array<i32>} : memref<10x1152xf32, #tpu.memory_space<vmem>>, vector<10x1152xf32>,
    return
  }
  func.func @transform_0(%arg0: i32) -> (i32, i32) {
    %c0_i32 = arith.constant 0 : i32
    %c0_i32_0 = arith.constant 0 : i32
    return %arg0, %c0_i32 : i32, i32
  }
  func.func @transform_1(%arg0: i32) -> (i32, i32) {
    %c0_i32 = arith.constant 0 : i32
    %c0_i32_0 = arith.constant 0 : i32
    %c0_i32_1 = arith.constant 0 : i32
    return %c0_i32, %c0_i32_0 : i32, i32
  }
  func.func @transform_2(%arg0: i32) -> (i32, i32) {
    %c0_i32 = arith.constant 0 : i32
    %c0_i32_0 = arith.constant 0 : i32
    %c0_i32_1 = arith.constant 0 : i32
    return %c0_i32, %c0_i32_0 : i32, i32
  }
  func.func @transform_3(%arg0: i32) -> (i32, i32) {
    %c0_i32 = arith.constant 0 : i32
    %c0_i32_0 = arith.constant 0 : i32
    %c0_i32_1 = arith.constant 0 : i32
    return %c0_i32, %c0_i32_0 : i32, i32
  }
  func.func @transform_4(%arg0: i32) -> (i32, i32) {
    %c0_i32 = arith.constant 0 : i32
    %c0_i32_0 = arith.constant 0 : i32
    %c0_i32_1 = arith.constant 0 : i32
    return %c0_i32, %c0_i32_0 : i32, i32
  }
  func.func @transform_5(%arg0: i32) -> (i32, i32) {
    %c0_i32 = arith.constant 0 : i32
    %c0_i32_0 = arith.constant 0 : i32
    return %arg0, %c0_i32 : i32, i32
  }
}

module attributes {stable_mosaic.version = 11 : i64} {
  func.func @_linear_kernel(%arg0: i32, %arg1: memref<8x768xf32, #tpu.memory_space<vmem>>, %arg2: memref<768x384xbf16, #tpu.memory_space<vmem>>, %arg3: memref<1x384xf32, #tpu.memory_space<vmem>>, %arg4: memref<8x384xf32, #tpu.memory_space<vmem>>) attributes {dimension_semantics = [#tpu.dimension_semantics<parallel>], iteration_bounds = array<i64: 1>, scalar_prefetch = 0 : i64, scratch_operands = 0 : i64, tpu.core_type = #tpu.core_type<tc>, window_params = [{transform_indices = @transform_0, window_bounds = array<i64: 8, 768>}, {pipeline_mode = #tpu.pipeline_mode<synchronous>, transform_indices = @transform_1, window_bounds = array<i64: 768, 384>}, {pipeline_mode = #tpu.pipeline_mode<synchronous>, transform_indices = @transform_2, window_bounds = array<i64: 1, 384>}, {transform_indices = @transform_3, window_bounds = array<i64: 8, 384>}]} {
    %c0 = arith.constant 0 : index
    %c0_0 = arith.constant 0 : index
    %0 = vector.load %arg1[%c0, %c0_0] : memref<8x768xf32, #tpu.memory_space<vmem>>, vector<8x768xf32>
    %1 = arith.truncf %0 : vector<8x768xf32> to vector<8x768xbf16>
    %c0_1 = arith.constant 0 : index
    %c0_2 = arith.constant 0 : index
    %2 = vector.load %arg2[%c0_1, %c0_2] : memref<768x384xbf16, #tpu.memory_space<vmem>>, vector<768x384xbf16>
    %cst = arith.constant dense<0.000000e+00> : vector<8x384xf32>
    %3 = tpu.matmul %1, %2, %cst {dimension_numbers = #tpu.dot_dimension_numbers<[1], [0], [0], [1], [0, 0, 1, 1], [], []>} : vector<8x768xbf16>, vector<768x384xbf16>, vector<8x384xf32> -> vector<8x384xf32>
    %c0_3 = arith.constant 0 : index
    %c0_4 = arith.constant 0 : index
    %4 = vector.load %arg3[%c0_3, %c0_4] : memref<1x384xf32, #tpu.memory_space<vmem>>, vector<1x384xf32>
    %5 = vector.broadcast %4 : vector<1x384xf32> to vector<8x384xf32>
    %6 = arith.addf %3, %5 : vector<8x384xf32>
    %c0_5 = arith.constant 0 : index
    %c0_6 = arith.constant 0 : index
    %7 = vector.load %arg4[%c0_5, %c0_6] : memref<8x384xf32, #tpu.memory_space<vmem>>, vector<8x384xf32>
    tpu.vector_store %arg4[%c0_5, %c0_6], %6 {strides = array<i32>} : memref<8x384xf32, #tpu.memory_space<vmem>>, vector<8x384xf32>,
    return
  }
  func.func @transform_0(%arg0: i32) -> (i32, i32) {
    %c0_i32 = arith.constant 0 : i32
    %c0_i32_0 = arith.constant 0 : i32
    return %arg0, %c0_i32 : i32, i32
  }
  func.func @transform_1(%arg0: i32) -> (i32, i32) {
    %c0_i32 = arith.constant 0 : i32
    %c0_i32_0 = arith.constant 0 : i32
    %c0_i32_1 = arith.constant 0 : i32
    return %c0_i32, %c0_i32_0 : i32, i32
  }
  func.func @transform_2(%arg0: i32) -> (i32, i32) {
    %c0_i32 = arith.constant 0 : i32
    %c0_i32_0 = arith.constant 0 : i32
    %c0_i32_1 = arith.constant 0 : i32
    return %c0_i32, %c0_i32_0 : i32, i32
  }
  func.func @transform_3(%arg0: i32) -> (i32, i32) {
    %c0_i32 = arith.constant 0 : i32
    %c0_i32_0 = arith.constant 0 : i32
    return %arg0, %c0_i32 : i32, i32
  }
}

module attributes {stable_mosaic.version = 11 : i64} {
  func.func @_ln_mlp_kernel(%arg0: i32, %arg1: memref<10x384xf32, #tpu.memory_space<vmem>>, %arg2: memref<1x384xf32, #tpu.memory_space<vmem>>, %arg3: memref<1x384xf32, #tpu.memory_space<vmem>>, %arg4: memref<384x1536xbf16, #tpu.memory_space<vmem>>, %arg5: memref<1x1536xf32, #tpu.memory_space<vmem>>, %arg6: memref<1536x384xbf16, #tpu.memory_space<vmem>>, %arg7: memref<1x384xf32, #tpu.memory_space<vmem>>, %arg8: memref<10x384xf32, #tpu.memory_space<vmem>>) attributes {dimension_semantics = [#tpu.dimension_semantics<parallel>], iteration_bounds = array<i64: 1>, scalar_prefetch = 0 : i64, scratch_operands = 0 : i64, tpu.core_type = #tpu.core_type<tc>, window_params = [{transform_indices = @transform_0, window_bounds = array<i64: 10, 384>}, {pipeline_mode = #tpu.pipeline_mode<synchronous>, transform_indices = @transform_1, window_bounds = array<i64: 1, 384>}, {pipeline_mode = #tpu.pipeline_mode<synchronous>, transform_indices = @transform_2, window_bounds = array<i64: 1, 384>}, {pipeline_mode = #tpu.pipeline_mode<synchronous>, transform_indices = @transform_3, window_bounds = array<i64: 384, 1536>}, {pipeline_mode = #tpu.pipeline_mode<synchronous>, transform_indices = @transform_4, window_bounds = array<i64: 1, 1536>}, {pipeline_mode = #tpu.pipeline_mode<synchronous>, transform_indices = @transform_5, window_bounds = array<i64: 1536, 384>}, {pipeline_mode = #tpu.pipeline_mode<synchronous>, transform_indices = @transform_6, window_bounds = array<i64: 1, 384>}, {transform_indices = @transform_7, window_bounds = array<i64: 10, 384>}]} {
    %c0 = arith.constant 0 : index
    %c0_0 = arith.constant 0 : index
    %0 = vector.load %arg1[%c0, %c0_0] : memref<10x384xf32, #tpu.memory_space<vmem>>, vector<10x384xf32>
    %cst = arith.constant dense<0.000000e+00> : vector<10xf32>
    %1 = vector.multi_reduction <add>, %0, %cst [1] : vector<10x384xf32> to vector<10xf32>
    %2 = vector.shape_cast %1 : vector<10xf32> to vector<10x1xf32>
    %cst_1 = arith.constant 3.840000e+02 : f32
    %3 = vector.broadcast %cst_1 : f32 to vector<10x1xf32>
    %4 = arith.divf %2, %3 : vector<10x1xf32>
    %5 = vector.broadcast %4 : vector<10x1xf32> to vector<10x384xf32>
    %6 = arith.subf %0, %5 : vector<10x384xf32>
    %7 = arith.mulf %6, %6 : vector<10x384xf32>
    %cst_2 = arith.constant dense<0.000000e+00> : vector<10xf32>
    %8 = vector.multi_reduction <add>, %7, %cst_2 [1] : vector<10x384xf32> to vector<10xf32>
    %9 = vector.shape_cast %8 : vector<10xf32> to vector<10x1xf32>
    %cst_3 = arith.constant 3.840000e+02 : f32
    %10 = vector.broadcast %cst_3 : f32 to vector<10x1xf32>
    %11 = arith.divf %9, %10 : vector<10x1xf32>
    %12 = vector.broadcast %4 : vector<10x1xf32> to vector<10x384xf32>
    %13 = arith.subf %0, %12 : vector<10x384xf32>
    %cst_4 = arith.constant 9.99999997E-7 : f32
    %14 = vector.broadcast %cst_4 : f32 to vector<10x1xf32>
    %15 = arith.addf %11, %14 : vector<10x1xf32>
    %16 = math.rsqrt %15 : vector<10x1xf32>
    %17 = vector.broadcast %16 : vector<10x1xf32> to vector<10x384xf32>
    %18 = arith.mulf %13, %17 : vector<10x384xf32>
    %c0_5 = arith.constant 0 : index
    %c0_6 = arith.constant 0 : index
    %19 = vector.load %arg2[%c0_5, %c0_6] : memref<1x384xf32, #tpu.memory_space<vmem>>, vector<1x384xf32>
    %20 = vector.broadcast %19 : vector<1x384xf32> to vector<10x384xf32>
    %21 = arith.mulf %18, %20 : vector<10x384xf32>
    %c0_7 = arith.constant 0 : index
    %c0_8 = arith.constant 0 : index
    %22 = vector.load %arg3[%c0_7, %c0_8] : memref<1x384xf32, #tpu.memory_space<vmem>>, vector<1x384xf32>
    %23 = vector.broadcast %22 : vector<1x384xf32> to vector<10x384xf32>
    %24 = arith.addf %21, %23 : vector<10x384xf32>
    %25 = arith.truncf %24 : vector<10x384xf32> to vector<10x384xbf16>
    %c0_9 = arith.constant 0 : index
    %c0_10 = arith.constant 0 : index
    %26 = vector.load %arg4[%c0_9, %c0_10] : memref<384x1536xbf16, #tpu.memory_space<vmem>>, vector<384x1536xbf16>
    %cst_11 = arith.constant dense<0.000000e+00> : vector<10x1536xf32>
    %27 = tpu.matmul %25, %26, %cst_11 {dimension_numbers = #tpu.dot_dimension_numbers<[1], [0], [0], [1], [0, 0, 1, 1], [], []>} : vector<10x384xbf16>, vector<384x1536xbf16>, vector<10x1536xf32> -> vector<10x1536xf32>
    %c0_12 = arith.constant 0 : index
    %c0_13 = arith.constant 0 : index
    %28 = vector.load %arg5[%c0_12, %c0_13] : memref<1x1536xf32, #tpu.memory_space<vmem>>, vector<1x1536xf32>
    %29 = vector.broadcast %28 : vector<1x1536xf32> to vector<10x1536xf32>
    %30 = arith.addf %27, %29 : vector<10x1536xf32>
    %31 = arith.mulf %30, %30 : vector<10x1536xf32>
    %32 = arith.mulf %30, %31 : vector<10x1536xf32>
    %cst_14 = arith.constant 4.471500e-02 : f32
    %33 = vector.broadcast %cst_14 : f32 to vector<10x1536xf32>
    %34 = arith.mulf %33, %32 : vector<10x1536xf32>
    %35 = arith.addf %30, %34 : vector<10x1536xf32>
    %cst_15 = arith.constant 0.797884583 : f32
    %36 = vector.broadcast %cst_15 : f32 to vector<10x1536xf32>
    %37 = arith.mulf %36, %35 : vector<10x1536xf32>
    %38 = math.tanh %37 : vector<10x1536xf32>
    %cst_16 = arith.constant 1.000000e+00 : f32
    %39 = vector.broadcast %cst_16 : f32 to vector<10x1536xf32>
    %40 = arith.addf %39, %38 : vector<10x1536xf32>
    %cst_17 = arith.constant 5.000000e-01 : f32
    %41 = vector.broadcast %cst_17 : f32 to vector<10x1536xf32>
    %42 = arith.mulf %41, %40 : vector<10x1536xf32>
    %43 = arith.mulf %30, %42 : vector<10x1536xf32>
    %44 = arith.truncf %43 : vector<10x1536xf32> to vector<10x1536xbf16>
    %c0_18 = arith.constant 0 : index
    %c0_19 = arith.constant 0 : index
    %45 = vector.load %arg6[%c0_18, %c0_19] : memref<1536x384xbf16, #tpu.memory_space<vmem>>, vector<1536x384xbf16>
    %cst_20 = arith.constant dense<0.000000e+00> : vector<10x384xf32>
    %46 = tpu.matmul %44, %45, %cst_20 {dimension_numbers = #tpu.dot_dimension_numbers<[1], [0], [0], [1], [0, 0, 1, 1], [], []>} : vector<10x1536xbf16>, vector<1536x384xbf16>, vector<10x384xf32> -> vector<10x384xf32>
    %c0_21 = arith.constant 0 : index
    %c0_22 = arith.constant 0 : index
    %47 = vector.load %arg7[%c0_21, %c0_22] : memref<1x384xf32, #tpu.memory_space<vmem>>, vector<1x384xf32>
    %48 = vector.broadcast %47 : vector<1x384xf32> to vector<10x384xf32>
    %49 = arith.addf %46, %48 : vector<10x384xf32>
    %50 = arith.addf %0, %49 : vector<10x384xf32>
    %c0_23 = arith.constant 0 : index
    %c0_24 = arith.constant 0 : index
    %51 = vector.load %arg8[%c0_23, %c0_24] : memref<10x384xf32, #tpu.memory_space<vmem>>, vector<10x384xf32>
    tpu.vector_store %arg8[%c0_23, %c0_24], %50 {strides = array<i32>} : memref<10x384xf32, #tpu.memory_space<vmem>>, vector<10x384xf32>,
    return
  }
  func.func @transform_0(%arg0: i32) -> (i32, i32) {
    %c0_i32 = arith.constant 0 : i32
    %c0_i32_0 = arith.constant 0 : i32
    return %arg0, %c0_i32 : i32, i32
  }
  func.func @transform_1(%arg0: i32) -> (i32, i32) {
    %c0_i32 = arith.constant 0 : i32
    %c0_i32_0 = arith.constant 0 : i32
    %c0_i32_1 = arith.constant 0 : i32
    return %c0_i32, %c0_i32_0 : i32, i32
  }
  func.func @transform_2(%arg0: i32) -> (i32, i32) {
    %c0_i32 = arith.constant 0 : i32
    %c0_i32_0 = arith.constant 0 : i32
    %c0_i32_1 = arith.constant 0 : i32
    return %c0_i32, %c0_i32_0 : i32, i32
  }
  func.func @transform_3(%arg0: i32) -> (i32, i32) {
    %c0_i32 = arith.constant 0 : i32
    %c0_i32_0 = arith.constant 0 : i32
    %c0_i32_1 = arith.constant 0 : i32
    return %c0_i32, %c0_i32_0 : i32, i32
  }
  func.func @transform_4(%arg0: i32) -> (i32, i32) {
    %c0_i32 = arith.constant 0 : i32
    %c0_i32_0 = arith.constant 0 : i32
    %c0_i32_1 = arith.constant 0 : i32
    return %c0_i32, %c0_i32_0 : i32, i32
  }
  func.func @transform_5(%arg0: i32) -> (i32, i32) {
    %c0_i32 = arith.constant 0 : i32
    %c0_i32_0 = arith.constant 0 : i32
    %c0_i32_1 = arith.constant 0 : i32
    return %c0_i32, %c0_i32_0 : i32, i32
  }
  func.func @transform_6(%arg0: i32) -> (i32, i32) {
    %c0_i32 = arith.constant 0 : i32
    %c0_i32_0 = arith.constant 0 : i32
    %c0_i32_1 = arith.constant 0 : i32
    return %c0_i32, %c0_i32_0 : i32, i32
  }
  func.func @transform_7(%arg0: i32) -> (i32, i32) {
    %c0_i32 = arith.constant 0 : i32
    %c0_i32_0 = arith.constant 0 : i32
    return %arg0, %c0_i32 : i32, i32
  }
}

module attributes {stable_mosaic.version = 11 : i64} {
  func.func @_attn_proj_kernel(%arg0: i32, %arg1: memref<1x5x1152xf32, #tpu.memory_space<vmem>>, %arg2: memref<1x5x384xf32, #tpu.memory_space<vmem>>, %arg3: memref<384x384xbf16, #tpu.memory_space<vmem>>, %arg4: memref<1x384xf32, #tpu.memory_space<vmem>>, %arg5: memref<1x5x384xf32, #tpu.memory_space<vmem>>) attributes {dimension_semantics = [#tpu.dimension_semantics<parallel>], iteration_bounds = array<i64: 2>, scalar_prefetch = 0 : i64, scratch_operands = 0 : i64, tpu.core_type = #tpu.core_type<tc>, window_params = [{transform_indices = @transform_0, window_bounds = array<i64: 1, 5, 1152>}, {transform_indices = @transform_1, window_bounds = array<i64: 1, 5, 384>}, {pipeline_mode = #tpu.pipeline_mode<synchronous>, transform_indices = @transform_2, window_bounds = array<i64: 384, 384>}, {pipeline_mode = #tpu.pipeline_mode<synchronous>, transform_indices = @transform_3, window_bounds = array<i64: 1, 384>}, {transform_indices = @transform_4, window_bounds = array<i64: 1, 5, 384>}]} {
    %c0 = arith.constant 0 : index
    %c0_0 = arith.constant 0 : index
    %c0_1 = arith.constant 0 : index
    %0 = vector.load %arg1[%c0, %c0_0, %c0_1] : memref<1x5x1152xf32, #tpu.memory_space<vmem>>, vector<1x5x64xf32>
    %1 = vector.shape_cast %0 : vector<1x5x64xf32> to vector<5x64xf32>
    %2 = arith.truncf %1 : vector<5x64xf32> to vector<5x64xbf16>
    %c0_2 = arith.constant 0 : index
    %c0_3 = arith.constant 0 : index
    %c384 = arith.constant 384 : index
    %3 = vector.load %arg1[%c0_2, %c0_3, %c384] : memref<1x5x1152xf32, #tpu.memory_space<vmem>>, vector<1x5x64xf32>
    %4 = vector.shape_cast %3 : vector<1x5x64xf32> to vector<5x64xf32>
    %5 = arith.truncf %4 : vector<5x64xf32> to vector<5x64xbf16>
    %c0_4 = arith.constant 0 : index
    %c0_5 = arith.constant 0 : index
    %c768 = arith.constant 768 : index
    %6 = vector.load %arg1[%c0_4, %c0_5, %c768] : memref<1x5x1152xf32, #tpu.memory_space<vmem>>, vector<1x5x64xf32>
    %7 = vector.shape_cast %6 : vector<1x5x64xf32> to vector<5x64xf32>
    %8 = arith.truncf %7 : vector<5x64xf32> to vector<5x64xbf16>
    %cst = arith.constant dense<0.000000e+00> : vector<5x5xf32>
    %9 = tpu.matmul %2, %5, %cst {dimension_numbers = #tpu.dot_dimension_numbers<[1], [1], [0], [0], [0, 0, 1, 0], [], []>} : vector<5x64xbf16>, vector<5x64xbf16>, vector<5x5xf32> -> vector<5x5xf32>
    %cst_6 = arith.constant 1.250000e-01 : f32
    %10 = vector.broadcast %cst_6 : f32 to vector<5x5xf32>
    %11 = arith.mulf %9, %10 : vector<5x5xf32>
    %cst_7 = arith.constant dense<0xFF800000> : vector<5xf32>
    %12 = vector.multi_reduction <maximumf>, %11, %cst_7 [1] : vector<5x5xf32> to vector<5xf32>
    %13 = vector.shape_cast %12 : vector<5xf32> to vector<5x1xf32>
    %14 = vector.broadcast %13 : vector<5x1xf32> to vector<5x5xf32>
    %15 = arith.subf %11, %14 : vector<5x5xf32>
    %16 = math.exp %15 : vector<5x5xf32>
    %cst_8 = arith.constant dense<0.000000e+00> : vector<5xf32>
    %17 = vector.multi_reduction <add>, %16, %cst_8 [1] : vector<5x5xf32> to vector<5xf32>
    %18 = vector.shape_cast %17 : vector<5xf32> to vector<5x1xf32>
    %19 = tpu.reciprocal %18 {approx = true} : vector<5x1xf32> -> vector<5x1xf32>
    %20 = vector.broadcast %19 : vector<5x1xf32> to vector<5x5xf32>
    %21 = arith.mulf %16, %20 : vector<5x5xf32>
    %22 = arith.truncf %21 : vector<5x5xf32> to vector<5x5xbf16>
    %cst_9 = arith.constant dense<0.000000e+00> : vector<5x64xf32>
    %23 = tpu.matmul %22, %8, %cst_9 {dimension_numbers = #tpu.dot_dimension_numbers<[1], [0], [0], [1], [0, 0, 1, 1], [], []>} : vector<5x5xbf16>, vector<5x64xbf16>, vector<5x64xf32> -> vector<5x64xf32>
    %c0_10 = arith.constant 0 : index
    %c0_11 = arith.constant 0 : index
    %c64 = arith.constant 64 : index
    %24 = vector.load %arg1[%c0_10, %c0_11, %c64] : memref<1x5x1152xf32, #tpu.memory_space<vmem>>, vector<1x5x64xf32>
    %25 = vector.shape_cast %24 : vector<1x5x64xf32> to vector<5x64xf32>
    %26 = arith.truncf %25 : vector<5x64xf32> to vector<5x64xbf16>
    %c0_12 = arith.constant 0 : index
    %c0_13 = arith.constant 0 : index
    %c448 = arith.constant 448 : index
    %27 = vector.load %arg1[%c0_12, %c0_13, %c448] : memref<1x5x1152xf32, #tpu.memory_space<vmem>>, vector<1x5x64xf32>
    %28 = vector.shape_cast %27 : vector<1x5x64xf32> to vector<5x64xf32>
    %29 = arith.truncf %28 : vector<5x64xf32> to vector<5x64xbf16>
    %c0_14 = arith.constant 0 : index
    %c0_15 = arith.constant 0 : index
    %c832 = arith.constant 832 : index
    %30 = vector.load %arg1[%c0_14, %c0_15, %c832] : memref<1x5x1152xf32, #tpu.memory_space<vmem>>, vector<1x5x64xf32>
    %31 = vector.shape_cast %30 : vector<1x5x64xf32> to vector<5x64xf32>
    %32 = arith.truncf %31 : vector<5x64xf32> to vector<5x64xbf16>
    %cst_16 = arith.constant dense<0.000000e+00> : vector<5x5xf32>
    %33 = tpu.matmul %26, %29, %cst_16 {dimension_numbers = #tpu.dot_dimension_numbers<[1], [1], [0], [0], [0, 0, 1, 0], [], []>} : vector<5x64xbf16>, vector<5x64xbf16>, vector<5x5xf32> -> vector<5x5xf32>
    %cst_17 = arith.constant 1.250000e-01 : f32
    %34 = vector.broadcast %cst_17 : f32 to vector<5x5xf32>
    %35 = arith.mulf %33, %34 : vector<5x5xf32>
    %cst_18 = arith.constant dense<0xFF800000> : vector<5xf32>
    %36 = vector.multi_reduction <maximumf>, %35, %cst_18 [1] : vector<5x5xf32> to vector<5xf32>
    %37 = vector.shape_cast %36 : vector<5xf32> to vector<5x1xf32>
    %38 = vector.broadcast %37 : vector<5x1xf32> to vector<5x5xf32>
    %39 = arith.subf %35, %38 : vector<5x5xf32>
    %40 = math.exp %39 : vector<5x5xf32>
    %cst_19 = arith.constant dense<0.000000e+00> : vector<5xf32>
    %41 = vector.multi_reduction <add>, %40, %cst_19 [1] : vector<5x5xf32> to vector<5xf32>
    %42 = vector.shape_cast %41 : vector<5xf32> to vector<5x1xf32>
    %43 = tpu.reciprocal %42 {approx = true} : vector<5x1xf32> -> vector<5x1xf32>
    %44 = vector.broadcast %43 : vector<5x1xf32> to vector<5x5xf32>
    %45 = arith.mulf %40, %44 : vector<5x5xf32>
    %46 = arith.truncf %45 : vector<5x5xf32> to vector<5x5xbf16>
    %cst_20 = arith.constant dense<0.000000e+00> : vector<5x64xf32>
    %47 = tpu.matmul %46, %32, %cst_20 {dimension_numbers = #tpu.dot_dimension_numbers<[1], [0], [0], [1], [0, 0, 1, 1], [], []>} : vector<5x5xbf16>, vector<5x64xbf16>, vector<5x64xf32> -> vector<5x64xf32>
    %c0_21 = arith.constant 0 : index
    %c0_22 = arith.constant 0 : index
    %c128 = arith.constant 128 : index
    %48 = vector.load %arg1[%c0_21, %c0_22, %c128] : memref<1x5x1152xf32, #tpu.memory_space<vmem>>, vector<1x5x64xf32>
    %49 = vector.shape_cast %48 : vector<1x5x64xf32> to vector<5x64xf32>
    %50 = arith.truncf %49 : vector<5x64xf32> to vector<5x64xbf16>
    %c0_23 = arith.constant 0 : index
    %c0_24 = arith.constant 0 : index
    %c512 = arith.constant 512 : index
    %51 = vector.load %arg1[%c0_23, %c0_24, %c512] : memref<1x5x1152xf32, #tpu.memory_space<vmem>>, vector<1x5x64xf32>
    %52 = vector.shape_cast %51 : vector<1x5x64xf32> to vector<5x64xf32>
    %53 = arith.truncf %52 : vector<5x64xf32> to vector<5x64xbf16>
    %c0_25 = arith.constant 0 : index
    %c0_26 = arith.constant 0 : index
    %c896 = arith.constant 896 : index
    %54 = vector.load %arg1[%c0_25, %c0_26, %c896] : memref<1x5x1152xf32, #tpu.memory_space<vmem>>, vector<1x5x64xf32>
    %55 = vector.shape_cast %54 : vector<1x5x64xf32> to vector<5x64xf32>
    %56 = arith.truncf %55 : vector<5x64xf32> to vector<5x64xbf16>
    %cst_27 = arith.constant dense<0.000000e+00> : vector<5x5xf32>
    %57 = tpu.matmul %50, %53, %cst_27 {dimension_numbers = #tpu.dot_dimension_numbers<[1], [1], [0], [0], [0, 0, 1, 0], [], []>} : vector<5x64xbf16>, vector<5x64xbf16>, vector<5x5xf32> -> vector<5x5xf32>
    %cst_28 = arith.constant 1.250000e-01 : f32
    %58 = vector.broadcast %cst_28 : f32 to vector<5x5xf32>
    %59 = arith.mulf %57, %58 : vector<5x5xf32>
    %cst_29 = arith.constant dense<0xFF800000> : vector<5xf32>
    %60 = vector.multi_reduction <maximumf>, %59, %cst_29 [1] : vector<5x5xf32> to vector<5xf32>
    %61 = vector.shape_cast %60 : vector<5xf32> to vector<5x1xf32>
    %62 = vector.broadcast %61 : vector<5x1xf32> to vector<5x5xf32>
    %63 = arith.subf %59, %62 : vector<5x5xf32>
    %64 = math.exp %63 : vector<5x5xf32>
    %cst_30 = arith.constant dense<0.000000e+00> : vector<5xf32>
    %65 = vector.multi_reduction <add>, %64, %cst_30 [1] : vector<5x5xf32> to vector<5xf32>
    %66 = vector.shape_cast %65 : vector<5xf32> to vector<5x1xf32>
    %67 = tpu.reciprocal %66 {approx = true} : vector<5x1xf32> -> vector<5x1xf32>
    %68 = vector.broadcast %67 : vector<5x1xf32> to vector<5x5xf32>
    %69 = arith.mulf %64, %68 : vector<5x5xf32>
    %70 = arith.truncf %69 : vector<5x5xf32> to vector<5x5xbf16>
    %cst_31 = arith.constant dense<0.000000e+00> : vector<5x64xf32>
    %71 = tpu.matmul %70, %56, %cst_31 {dimension_numbers = #tpu.dot_dimension_numbers<[1], [0], [0], [1], [0, 0, 1, 1], [], []>} : vector<5x5xbf16>, vector<5x64xbf16>, vector<5x64xf32> -> vector<5x64xf32>
    %c0_32 = arith.constant 0 : index
    %c0_33 = arith.constant 0 : index
    %c192 = arith.constant 192 : index
    %72 = vector.load %arg1[%c0_32, %c0_33, %c192] : memref<1x5x1152xf32, #tpu.memory_space<vmem>>, vector<1x5x64xf32>
    %73 = vector.shape_cast %72 : vector<1x5x64xf32> to vector<5x64xf32>
    %74 = arith.truncf %73 : vector<5x64xf32> to vector<5x64xbf16>
    %c0_34 = arith.constant 0 : index
    %c0_35 = arith.constant 0 : index
    %c576 = arith.constant 576 : index
    %75 = vector.load %arg1[%c0_34, %c0_35, %c576] : memref<1x5x1152xf32, #tpu.memory_space<vmem>>, vector<1x5x64xf32>
    %76 = vector.shape_cast %75 : vector<1x5x64xf32> to vector<5x64xf32>
    %77 = arith.truncf %76 : vector<5x64xf32> to vector<5x64xbf16>
    %c0_36 = arith.constant 0 : index
    %c0_37 = arith.constant 0 : index
    %c960 = arith.constant 960 : index
    %78 = vector.load %arg1[%c0_36, %c0_37, %c960] : memref<1x5x1152xf32, #tpu.memory_space<vmem>>, vector<1x5x64xf32>
    %79 = vector.shape_cast %78 : vector<1x5x64xf32> to vector<5x64xf32>
    %80 = arith.truncf %79 : vector<5x64xf32> to vector<5x64xbf16>
    %cst_38 = arith.constant dense<0.000000e+00> : vector<5x5xf32>
    %81 = tpu.matmul %74, %77, %cst_38 {dimension_numbers = #tpu.dot_dimension_numbers<[1], [1], [0], [0], [0, 0, 1, 0], [], []>} : vector<5x64xbf16>, vector<5x64xbf16>, vector<5x5xf32> -> vector<5x5xf32>
    %cst_39 = arith.constant 1.250000e-01 : f32
    %82 = vector.broadcast %cst_39 : f32 to vector<5x5xf32>
    %83 = arith.mulf %81, %82 : vector<5x5xf32>
    %cst_40 = arith.constant dense<0xFF800000> : vector<5xf32>
    %84 = vector.multi_reduction <maximumf>, %83, %cst_40 [1] : vector<5x5xf32> to vector<5xf32>
    %85 = vector.shape_cast %84 : vector<5xf32> to vector<5x1xf32>
    %86 = vector.broadcast %85 : vector<5x1xf32> to vector<5x5xf32>
    %87 = arith.subf %83, %86 : vector<5x5xf32>
    %88 = math.exp %87 : vector<5x5xf32>
    %cst_41 = arith.constant dense<0.000000e+00> : vector<5xf32>
    %89 = vector.multi_reduction <add>, %88, %cst_41 [1] : vector<5x5xf32> to vector<5xf32>
    %90 = vector.shape_cast %89 : vector<5xf32> to vector<5x1xf32>
    %91 = tpu.reciprocal %90 {approx = true} : vector<5x1xf32> -> vector<5x1xf32>
    %92 = vector.broadcast %91 : vector<5x1xf32> to vector<5x5xf32>
    %93 = arith.mulf %88, %92 : vector<5x5xf32>
    %94 = arith.truncf %93 : vector<5x5xf32> to vector<5x5xbf16>
    %cst_42 = arith.constant dense<0.000000e+00> : vector<5x64xf32>
    %95 = tpu.matmul %94, %80, %cst_42 {dimension_numbers = #tpu.dot_dimension_numbers<[1], [0], [0], [1], [0, 0, 1, 1], [], []>} : vector<5x5xbf16>, vector<5x64xbf16>, vector<5x64xf32> -> vector<5x64xf32>
    %c0_43 = arith.constant 0 : index
    %c0_44 = arith.constant 0 : index
    %c256 = arith.constant 256 : index
    %96 = vector.load %arg1[%c0_43, %c0_44, %c256] : memref<1x5x1152xf32, #tpu.memory_space<vmem>>, vector<1x5x64xf32>
    %97 = vector.shape_cast %96 : vector<1x5x64xf32> to vector<5x64xf32>
    %98 = arith.truncf %97 : vector<5x64xf32> to vector<5x64xbf16>
    %c0_45 = arith.constant 0 : index
    %c0_46 = arith.constant 0 : index
    %c640 = arith.constant 640 : index
    %99 = vector.load %arg1[%c0_45, %c0_46, %c640] : memref<1x5x1152xf32, #tpu.memory_space<vmem>>, vector<1x5x64xf32>
    %100 = vector.shape_cast %99 : vector<1x5x64xf32> to vector<5x64xf32>
    %101 = arith.truncf %100 : vector<5x64xf32> to vector<5x64xbf16>
    %c0_47 = arith.constant 0 : index
    %c0_48 = arith.constant 0 : index
    %c1024 = arith.constant 1024 : index
    %102 = vector.load %arg1[%c0_47, %c0_48, %c1024] : memref<1x5x1152xf32, #tpu.memory_space<vmem>>, vector<1x5x64xf32>
    %103 = vector.shape_cast %102 : vector<1x5x64xf32> to vector<5x64xf32>
    %104 = arith.truncf %103 : vector<5x64xf32> to vector<5x64xbf16>
    %cst_49 = arith.constant dense<0.000000e+00> : vector<5x5xf32>
    %105 = tpu.matmul %98, %101, %cst_49 {dimension_numbers = #tpu.dot_dimension_numbers<[1], [1], [0], [0], [0, 0, 1, 0], [], []>} : vector<5x64xbf16>, vector<5x64xbf16>, vector<5x5xf32> -> vector<5x5xf32>
    %cst_50 = arith.constant 1.250000e-01 : f32
    %106 = vector.broadcast %cst_50 : f32 to vector<5x5xf32>
    %107 = arith.mulf %105, %106 : vector<5x5xf32>
    %cst_51 = arith.constant dense<0xFF800000> : vector<5xf32>
    %108 = vector.multi_reduction <maximumf>, %107, %cst_51 [1] : vector<5x5xf32> to vector<5xf32>
    %109 = vector.shape_cast %108 : vector<5xf32> to vector<5x1xf32>
    %110 = vector.broadcast %109 : vector<5x1xf32> to vector<5x5xf32>
    %111 = arith.subf %107, %110 : vector<5x5xf32>
    %112 = math.exp %111 : vector<5x5xf32>
    %cst_52 = arith.constant dense<0.000000e+00> : vector<5xf32>
    %113 = vector.multi_reduction <add>, %112, %cst_52 [1] : vector<5x5xf32> to vector<5xf32>
    %114 = vector.shape_cast %113 : vector<5xf32> to vector<5x1xf32>
    %115 = tpu.reciprocal %114 {approx = true} : vector<5x1xf32> -> vector<5x1xf32>
    %116 = vector.broadcast %115 : vector<5x1xf32> to vector<5x5xf32>
    %117 = arith.mulf %112, %116 : vector<5x5xf32>
    %118 = arith.truncf %117 : vector<5x5xf32> to vector<5x5xbf16>
    %cst_53 = arith.constant dense<0.000000e+00> : vector<5x64xf32>
    %119 = tpu.matmul %118, %104, %cst_53 {dimension_numbers = #tpu.dot_dimension_numbers<[1], [0], [0], [1], [0, 0, 1, 1], [], []>} : vector<5x5xbf16>, vector<5x64xbf16>, vector<5x64xf32> -> vector<5x64xf32>
    %c0_54 = arith.constant 0 : index
    %c0_55 = arith.constant 0 : index
    %c320 = arith.constant 320 : index
    %120 = vector.load %arg1[%c0_54, %c0_55, %c320] : memref<1x5x1152xf32, #tpu.memory_space<vmem>>, vector<1x5x64xf32>
    %121 = vector.shape_cast %120 : vector<1x5x64xf32> to vector<5x64xf32>
    %122 = arith.truncf %121 : vector<5x64xf32> to vector<5x64xbf16>
    %c0_56 = arith.constant 0 : index
    %c0_57 = arith.constant 0 : index
    %c704 = arith.constant 704 : index
    %123 = vector.load %arg1[%c0_56, %c0_57, %c704] : memref<1x5x1152xf32, #tpu.memory_space<vmem>>, vector<1x5x64xf32>
    %124 = vector.shape_cast %123 : vector<1x5x64xf32> to vector<5x64xf32>
    %125 = arith.truncf %124 : vector<5x64xf32> to vector<5x64xbf16>
    %c0_58 = arith.constant 0 : index
    %c0_59 = arith.constant 0 : index
    %c1088 = arith.constant 1088 : index
    %126 = vector.load %arg1[%c0_58, %c0_59, %c1088] : memref<1x5x1152xf32, #tpu.memory_space<vmem>>, vector<1x5x64xf32>
    %127 = vector.shape_cast %126 : vector<1x5x64xf32> to vector<5x64xf32>
    %128 = arith.truncf %127 : vector<5x64xf32> to vector<5x64xbf16>
    %cst_60 = arith.constant dense<0.000000e+00> : vector<5x5xf32>
    %129 = tpu.matmul %122, %125, %cst_60 {dimension_numbers = #tpu.dot_dimension_numbers<[1], [1], [0], [0], [0, 0, 1, 0], [], []>} : vector<5x64xbf16>, vector<5x64xbf16>, vector<5x5xf32> -> vector<5x5xf32>
    %cst_61 = arith.constant 1.250000e-01 : f32
    %130 = vector.broadcast %cst_61 : f32 to vector<5x5xf32>
    %131 = arith.mulf %129, %130 : vector<5x5xf32>
    %cst_62 = arith.constant dense<0xFF800000> : vector<5xf32>
    %132 = vector.multi_reduction <maximumf>, %131, %cst_62 [1] : vector<5x5xf32> to vector<5xf32>
    %133 = vector.shape_cast %132 : vector<5xf32> to vector<5x1xf32>
    %134 = vector.broadcast %133 : vector<5x1xf32> to vector<5x5xf32>
    %135 = arith.subf %131, %134 : vector<5x5xf32>
    %136 = math.exp %135 : vector<5x5xf32>
    %cst_63 = arith.constant dense<0.000000e+00> : vector<5xf32>
    %137 = vector.multi_reduction <add>, %136, %cst_63 [1] : vector<5x5xf32> to vector<5xf32>
    %138 = vector.shape_cast %137 : vector<5xf32> to vector<5x1xf32>
    %139 = tpu.reciprocal %138 {approx = true} : vector<5x1xf32> -> vector<5x1xf32>
    %140 = vector.broadcast %139 : vector<5x1xf32> to vector<5x5xf32>
    %141 = arith.mulf %136, %140 : vector<5x5xf32>
    %142 = arith.truncf %141 : vector<5x5xf32> to vector<5x5xbf16>
    %cst_64 = arith.constant dense<0.000000e+00> : vector<5x64xf32>
    %143 = tpu.matmul %142, %128, %cst_64 {dimension_numbers = #tpu.dot_dimension_numbers<[1], [0], [0], [1], [0, 0, 1, 1], [], []>} : vector<5x5xbf16>, vector<5x64xbf16>, vector<5x64xf32> -> vector<5x64xf32>
    %144 = tpu.concatenate %23, %47, %71, %95, %119, %143 in 1 : vector<5x64xf32>, vector<5x64xf32>, vector<5x64xf32>, vector<5x64xf32>, vector<5x64xf32>, vector<5x64xf32> -> vector<5x384xf32>
    %145 = arith.truncf %144 : vector<5x384xf32> to vector<5x384xbf16>
    %c0_65 = arith.constant 0 : index
    %c0_66 = arith.constant 0 : index
    %146 = vector.load %arg3[%c0_65, %c0_66] : memref<384x384xbf16, #tpu.memory_space<vmem>>, vector<384x384xbf16>
    %cst_67 = arith.constant dense<0.000000e+00> : vector<5x384xf32>
    %147 = tpu.matmul %145, %146, %cst_67 {dimension_numbers = #tpu.dot_dimension_numbers<[1], [0], [0], [1], [0, 0, 1, 1], [], []>} : vector<5x384xbf16>, vector<384x384xbf16>, vector<5x384xf32> -> vector<5x384xf32>
    %c0_68 = arith.constant 0 : index
    %c0_69 = arith.constant 0 : index
    %148 = vector.load %arg4[%c0_68, %c0_69] : memref<1x384xf32, #tpu.memory_space<vmem>>, vector<1x384xf32>
    %149 = vector.broadcast %148 : vector<1x384xf32> to vector<5x384xf32>
    %150 = arith.addf %147, %149 : vector<5x384xf32>
    %c0_70 = arith.constant 0 : index
    %c0_71 = arith.constant 0 : index
    %c0_72 = arith.constant 0 : index
    %151 = vector.load %arg2[%c0_70, %c0_71, %c0_72] : memref<1x5x384xf32, #tpu.memory_space<vmem>>, vector<1x5x384xf32>
    %152 = vector.shape_cast %151 : vector<1x5x384xf32> to vector<5x384xf32>
    %153 = arith.addf %152, %150 : vector<5x384xf32>
    %c0_73 = arith.constant 0 : index
    %c0_74 = arith.constant 0 : index
    %c0_75 = arith.constant 0 : index
    %154 = vector.load %arg5[%c0_73, %c0_74, %c0_75] : memref<1x5x384xf32, #tpu.memory_space<vmem>>, vector<1x5x384xf32>
    %155 = vector.shape_cast %154 : vector<1x5x384xf32> to vector<5x384xf32>
    %156 = vector.shape_cast %153 : vector<5x384xf32> to vector<1x5x384xf32>
    tpu.vector_store %arg5[%c0_73, %c0_74, %c0_75], %156 {strides = array<i32>} : memref<1x5x384xf32, #tpu.memory_space<vmem>>, vector<1x5x384xf32>,
    return
  }
  func.func @transform_0(%arg0: i32) -> (i32, i32, i32) {
    %c0_i32 = arith.constant 0 : i32
    %c0_i32_0 = arith.constant 0 : i32
    %c0_i32_1 = arith.constant 0 : i32
    return %arg0, %c0_i32, %c0_i32_0 : i32, i32, i32
  }
  func.func @transform_1(%arg0: i32) -> (i32, i32, i32) {
    %c0_i32 = arith.constant 0 : i32
    %c0_i32_0 = arith.constant 0 : i32
    %c0_i32_1 = arith.constant 0 : i32
    return %arg0, %c0_i32, %c0_i32_0 : i32, i32, i32
  }
  func.func @transform_2(%arg0: i32) -> (i32, i32) {
    %c0_i32 = arith.constant 0 : i32
    %c0_i32_0 = arith.constant 0 : i32
    %c0_i32_1 = arith.constant 0 : i32
    return %c0_i32, %c0_i32_0 : i32, i32
  }
  func.func @transform_3(%arg0: i32) -> (i32, i32) {
    %c0_i32 = arith.constant 0 : i32
    %c0_i32_0 = arith.constant 0 : i32
    %c0_i32_1 = arith.constant 0 : i32
    return %c0_i32, %c0_i32_0 : i32, i32
  }
  func.func @transform_4(%arg0: i32) -> (i32, i32, i32) {
    %c0_i32 = arith.constant 0 : i32
    %c0_i32_0 = arith.constant 0 : i32
    %c0_i32_1 = arith.constant 0 : i32
    return %arg0, %c0_i32, %c0_i32_0 : i32, i32, i32
  }
}

module attributes {stable_mosaic.version = 11 : i64} {
  func.func @_heads_kernel(%arg0: i32, %arg1: memref<2x5x384xf32, #tpu.memory_space<vmem>>, %arg2: memref<1x5x1xf32, #tpu.memory_space<vmem>>, %arg3: memref<1x384x512xbf16, #tpu.memory_space<vmem>>, %arg4: memref<1x1x512xf32, #tpu.memory_space<vmem>>, %arg5: memref<1x1x512xf32, #tpu.memory_space<vmem>>, %arg6: memref<1x1x512xf32, #tpu.memory_space<vmem>>, %arg7: memref<1x512x10xbf16, #tpu.memory_space<vmem>>, %arg8: memref<1x1x10xf32, #tpu.memory_space<vmem>>, %arg9: memref<1x2x10xf32, #tpu.memory_space<vmem>>) attributes {dimension_semantics = [#tpu.dimension_semantics<parallel>], iteration_bounds = array<i64: 4>, scalar_prefetch = 0 : i64, scratch_operands = 0 : i64, tpu.core_type = #tpu.core_type<tc>, window_params = [{pipeline_mode = #tpu.pipeline_mode<synchronous>, transform_indices = @transform_0, window_bounds = array<i64: 2, 5, 384>}, {transform_indices = @transform_1, window_bounds = array<i64: 1, 5, 1>}, {transform_indices = @transform_2, window_bounds = array<i64: 1, 384, 512>}, {transform_indices = @transform_3, window_bounds = array<i64: 1, 1, 512>}, {transform_indices = @transform_4, window_bounds = array<i64: 1, 1, 512>}, {transform_indices = @transform_5, window_bounds = array<i64: 1, 1, 512>}, {transform_indices = @transform_6, window_bounds = array<i64: 1, 512, 10>}, {transform_indices = @transform_7, window_bounds = array<i64: 1, 1, 10>}, {transform_indices = @transform_8, window_bounds = array<i64: 1, 2, 10>}]} {
    %c0 = arith.constant 0 : index
    %c0_0 = arith.constant 0 : index
    %c0_1 = arith.constant 0 : index
    %0 = vector.load %arg1[%c0, %c0_0, %c0_1] : memref<2x5x384xf32, #tpu.memory_space<vmem>>, vector<2x5x384xf32>
    %c0_2 = arith.constant 0 : index
    %c0_3 = arith.constant 0 : index
    %c0_4 = arith.constant 0 : index
    %1 = vector.load %arg2[%c0_2, %c0_3, %c0_4] : memref<1x5x1xf32, #tpu.memory_space<vmem>>, vector<1x5x1xf32>
    %2 = vector.broadcast %1 : vector<1x5x1xf32> to vector<2x5x384xf32>
    %3 = arith.mulf %0, %2 : vector<2x5x384xf32>
    %cst = arith.constant dense<0.000000e+00> : vector<2x384xf32>
    %4 = vector.multi_reduction <add>, %3, %cst [1] : vector<2x5x384xf32> to vector<2x384xf32>
    %5 = arith.truncf %4 : vector<2x384xf32> to vector<2x384xbf16>
    %c0_5 = arith.constant 0 : index
    %c0_6 = arith.constant 0 : index
    %c0_7 = arith.constant 0 : index
    %6 = vector.load %arg3[%c0_5, %c0_6, %c0_7] : memref<1x384x512xbf16, #tpu.memory_space<vmem>>, vector<1x384x512xbf16>
    %7 = vector.shape_cast %6 : vector<1x384x512xbf16> to vector<384x512xbf16>
    %cst_8 = arith.constant dense<0.000000e+00> : vector<2x512xf32>
    %8 = tpu.matmul %5, %7, %cst_8 {dimension_numbers = #tpu.dot_dimension_numbers<[1], [0], [0], [1], [0, 0, 1, 1], [], []>} : vector<2x384xbf16>, vector<384x512xbf16>, vector<2x512xf32> -> vector<2x512xf32>
    %c0_9 = arith.constant 0 : index
    %c0_10 = arith.constant 0 : index
    %c0_11 = arith.constant 0 : index
    %9 = vector.load %arg4[%c0_9, %c0_10, %c0_11] : memref<1x1x512xf32, #tpu.memory_space<vmem>>, vector<1x1x512xf32>
    %10 = vector.shape_cast %9 : vector<1x1x512xf32> to vector<1x512xf32>
    %11 = vector.broadcast %10 : vector<1x512xf32> to vector<2x512xf32>
    %12 = arith.addf %8, %11 : vector<2x512xf32>
    %c0_12 = arith.constant 0 : index
    %c0_13 = arith.constant 0 : index
    %c0_14 = arith.constant 0 : index
    %13 = vector.load %arg5[%c0_12, %c0_13, %c0_14] : memref<1x1x512xf32, #tpu.memory_space<vmem>>, vector<1x1x512xf32>
    %14 = vector.shape_cast %13 : vector<1x1x512xf32> to vector<1x512xf32>
    %15 = vector.broadcast %14 : vector<1x512xf32> to vector<2x512xf32>
    %16 = arith.mulf %12, %15 : vector<2x512xf32>
    %c0_15 = arith.constant 0 : index
    %c0_16 = arith.constant 0 : index
    %c0_17 = arith.constant 0 : index
    %17 = vector.load %arg6[%c0_15, %c0_16, %c0_17] : memref<1x1x512xf32, #tpu.memory_space<vmem>>, vector<1x1x512xf32>
    %18 = vector.shape_cast %17 : vector<1x1x512xf32> to vector<1x512xf32>
    %19 = vector.broadcast %18 : vector<1x512xf32> to vector<2x512xf32>
    %20 = arith.addf %16, %19 : vector<2x512xf32>
    %21 = arith.truncf %20 : vector<2x512xf32> to vector<2x512xbf16>
    %c0_18 = arith.constant 0 : index
    %c0_19 = arith.constant 0 : index
    %c0_20 = arith.constant 0 : index
    %22 = vector.load %arg7[%c0_18, %c0_19, %c0_20] : memref<1x512x10xbf16, #tpu.memory_space<vmem>>, vector<1x512x10xbf16>
    %23 = vector.shape_cast %22 : vector<1x512x10xbf16> to vector<512x10xbf16>
    %cst_21 = arith.constant dense<0.000000e+00> : vector<2x10xf32>
    %24 = tpu.matmul %21, %23, %cst_21 {dimension_numbers = #tpu.dot_dimension_numbers<[1], [0], [0], [1], [0, 0, 1, 1], [], []>} : vector<2x512xbf16>, vector<512x10xbf16>, vector<2x10xf32> -> vector<2x10xf32>
    %c0_22 = arith.constant 0 : index
    %c0_23 = arith.constant 0 : index
    %c0_24 = arith.constant 0 : index
    %25 = vector.load %arg8[%c0_22, %c0_23, %c0_24] : memref<1x1x10xf32, #tpu.memory_space<vmem>>, vector<1x1x10xf32>
    %26 = vector.shape_cast %25 : vector<1x1x10xf32> to vector<1x10xf32>
    %27 = vector.broadcast %26 : vector<1x10xf32> to vector<2x10xf32>
    %28 = arith.addf %24, %27 : vector<2x10xf32>
    %c0_25 = arith.constant 0 : index
    %c0_26 = arith.constant 0 : index
    %c0_27 = arith.constant 0 : index
    %29 = vector.load %arg9[%c0_25, %c0_26, %c0_27] : memref<1x2x10xf32, #tpu.memory_space<vmem>>, vector<1x2x10xf32>
    %30 = vector.shape_cast %29 : vector<1x2x10xf32> to vector<2x10xf32>
    %31 = vector.shape_cast %28 : vector<2x10xf32> to vector<1x2x10xf32>
    tpu.vector_store %arg9[%c0_25, %c0_26, %c0_27], %31 {strides = array<i32>} : memref<1x2x10xf32, #tpu.memory_space<vmem>>, vector<1x2x10xf32>,
    return
  }
  func.func @transform_0(%arg0: i32) -> (i32, i32, i32) {
    %c0_i32 = arith.constant 0 : i32
    %c0_i32_0 = arith.constant 0 : i32
    %c0_i32_1 = arith.constant 0 : i32
    %c0_i32_2 = arith.constant 0 : i32
    return %c0_i32, %c0_i32_0, %c0_i32_1 : i32, i32, i32
  }
  func.func @transform_1(%arg0: i32) -> (i32, i32, i32) {
    %c0_i32 = arith.constant 0 : i32
    %c0_i32_0 = arith.constant 0 : i32
    %c0_i32_1 = arith.constant 0 : i32
    return %arg0, %c0_i32, %c0_i32_0 : i32, i32, i32
  }
  func.func @transform_2(%arg0: i32) -> (i32, i32, i32) {
    %c0_i32 = arith.constant 0 : i32
    %c0_i32_0 = arith.constant 0 : i32
    %c0_i32_1 = arith.constant 0 : i32
    return %arg0, %c0_i32, %c0_i32_0 : i32, i32, i32
  }
  func.func @transform_3(%arg0: i32) -> (i32, i32, i32) {
    %c0_i32 = arith.constant 0 : i32
    %c0_i32_0 = arith.constant 0 : i32
    %c0_i32_1 = arith.constant 0 : i32
    return %arg0, %c0_i32, %c0_i32_0 : i32, i32, i32
  }
  func.func @transform_4(%arg0: i32) -> (i32, i32, i32) {
    %c0_i32 = arith.constant 0 : i32
    %c0_i32_0 = arith.constant 0 : i32
    %c0_i32_1 = arith.constant 0 : i32
    return %arg0, %c0_i32, %c0_i32_0 : i32, i32, i32
  }
  func.func @transform_5(%arg0: i32) -> (i32, i32, i32) {
    %c0_i32 = arith.constant 0 : i32
    %c0_i32_0 = arith.constant 0 : i32
    %c0_i32_1 = arith.constant 0 : i32
    return %arg0, %c0_i32, %c0_i32_0 : i32, i32, i32
  }
  func.func @transform_6(%arg0: i32) -> (i32, i32, i32) {
    %c0_i32 = arith.constant 0 : i32
    %c0_i32_0 = arith.constant 0 : i32
    %c0_i32_1 = arith.constant 0 : i32
    return %arg0, %c0_i32, %c0_i32_0 : i32, i32, i32
  }
  func.func @transform_7(%arg0: i32) -> (i32, i32, i32) {
    %c0_i32 = arith.constant 0 : i32
    %c0_i32_0 = arith.constant 0 : i32
    %c0_i32_1 = arith.constant 0 : i32
    return %arg0, %c0_i32, %c0_i32_0 : i32, i32, i32
  }
  func.func @transform_8(%arg0: i32) -> (i32, i32, i32) {
    %c0_i32 = arith.constant 0 : i32
    %c0_i32_0 = arith.constant 0 : i32
    %c0_i32_1 = arith.constant 0 : i32
    return %arg0, %c0_i32, %c0_i32_0 : i32, i32, i32
  }
}

module attributes {stable_mosaic.version = 11 : i64} {
  func.func @_layernorm_kernel(%arg0: i32, %arg1: memref<10x384xf32, #tpu.memory_space<vmem>>, %arg2: memref<1x384xf32, #tpu.memory_space<vmem>>, %arg3: memref<1x384xf32, #tpu.memory_space<vmem>>, %arg4: memref<10x384xf32, #tpu.memory_space<vmem>>) attributes {dimension_semantics = [#tpu.dimension_semantics<parallel>], iteration_bounds = array<i64: 1>, scalar_prefetch = 0 : i64, scratch_operands = 0 : i64, tpu.core_type = #tpu.core_type<tc>, window_params = [{transform_indices = @transform_0, window_bounds = array<i64: 10, 384>}, {pipeline_mode = #tpu.pipeline_mode<synchronous>, transform_indices = @transform_1, window_bounds = array<i64: 1, 384>}, {pipeline_mode = #tpu.pipeline_mode<synchronous>, transform_indices = @transform_2, window_bounds = array<i64: 1, 384>}, {transform_indices = @transform_3, window_bounds = array<i64: 10, 384>}]} {
    %c0 = arith.constant 0 : index
    %c0_0 = arith.constant 0 : index
    %0 = vector.load %arg1[%c0, %c0_0] : memref<10x384xf32, #tpu.memory_space<vmem>>, vector<10x384xf32>
    %cst = arith.constant dense<0.000000e+00> : vector<10xf32>
    %1 = vector.multi_reduction <add>, %0, %cst [1] : vector<10x384xf32> to vector<10xf32>
    %2 = vector.shape_cast %1 : vector<10xf32> to vector<10x1xf32>
    %cst_1 = arith.constant 3.840000e+02 : f32
    %3 = vector.broadcast %cst_1 : f32 to vector<10x1xf32>
    %4 = arith.divf %2, %3 : vector<10x1xf32>
    %5 = vector.broadcast %4 : vector<10x1xf32> to vector<10x384xf32>
    %6 = arith.subf %0, %5 : vector<10x384xf32>
    %7 = arith.mulf %6, %6 : vector<10x384xf32>
    %cst_2 = arith.constant dense<0.000000e+00> : vector<10xf32>
    %8 = vector.multi_reduction <add>, %7, %cst_2 [1] : vector<10x384xf32> to vector<10xf32>
    %9 = vector.shape_cast %8 : vector<10xf32> to vector<10x1xf32>
    %cst_3 = arith.constant 3.840000e+02 : f32
    %10 = vector.broadcast %cst_3 : f32 to vector<10x1xf32>
    %11 = arith.divf %9, %10 : vector<10x1xf32>
    %12 = vector.broadcast %4 : vector<10x1xf32> to vector<10x384xf32>
    %13 = arith.subf %0, %12 : vector<10x384xf32>
    %cst_4 = arith.constant 9.99999997E-7 : f32
    %14 = vector.broadcast %cst_4 : f32 to vector<10x1xf32>
    %15 = arith.addf %11, %14 : vector<10x1xf32>
    %16 = math.rsqrt %15 : vector<10x1xf32>
    %17 = vector.broadcast %16 : vector<10x1xf32> to vector<10x384xf32>
    %18 = arith.mulf %13, %17 : vector<10x384xf32>
    %c0_5 = arith.constant 0 : index
    %c0_6 = arith.constant 0 : index
    %19 = vector.load %arg2[%c0_5, %c0_6] : memref<1x384xf32, #tpu.memory_space<vmem>>, vector<1x384xf32>
    %20 = vector.broadcast %19 : vector<1x384xf32> to vector<10x384xf32>
    %21 = arith.mulf %18, %20 : vector<10x384xf32>
    %c0_7 = arith.constant 0 : index
    %c0_8 = arith.constant 0 : index
    %22 = vector.load %arg3[%c0_7, %c0_8] : memref<1x384xf32, #tpu.memory_space<vmem>>, vector<1x384xf32>
    %23 = vector.broadcast %22 : vector<1x384xf32> to vector<10x384xf32>
    %24 = arith.addf %21, %23 : vector<10x384xf32>
    %c0_9 = arith.constant 0 : index
    %c0_10 = arith.constant 0 : index
    %25 = vector.load %arg4[%c0_9, %c0_10] : memref<10x384xf32, #tpu.memory_space<vmem>>, vector<10x384xf32>
    tpu.vector_store %arg4[%c0_9, %c0_10], %24 {strides = array<i32>} : memref<10x384xf32, #tpu.memory_space<vmem>>, vector<10x384xf32>,
    return
  }
  func.func @transform_0(%arg0: i32) -> (i32, i32) {
    %c0_i32 = arith.constant 0 : i32
    %c0_i32_0 = arith.constant 0 : i32
    return %arg0, %c0_i32 : i32, i32
  }
  func.func @transform_1(%arg0: i32) -> (i32, i32) {
    %c0_i32 = arith.constant 0 : i32
    %c0_i32_0 = arith.constant 0 : i32
    %c0_i32_1 = arith.constant 0 : i32
    return %c0_i32, %c0_i32_0 : i32, i32
  }
  func.func @transform_2(%arg0: i32) -> (i32, i32) {
    %c0_i32 = arith.constant 0 : i32
    %c0_i32_0 = arith.constant 0 : i32
    %c0_i32_1 = arith.constant 0 : i32
    return %c0_i32, %c0_i32_0 : i32, i32
  }
  func.func @transform_3(%arg0: i32) -> (i32, i32) {
    %c0_i32 = arith.constant 0 : i32
    %c0_i32_0 = arith.constant 0 : i32
    return %arg0, %c0_i32 : i32, i32
  }
}

</mosaic_0001>

<bundles_post_ra>
// kernel: fsra_forward.10
= control target key start
LH: loop header
LB: loop body
LE: loop exit
PB: predicated region body
PF: predicated region fallthrough
CT: control target
= control target key end

     0   :  { %10 = vsyncpa [#allocation3], 0  ;;  %s3070_s0 = inlined_call_operand.hbm [shape: f32[10,384], index: 0, kind: input, shape index: {}]   ;;  %s3071_s1 = inlined_call_operand.hbm [shape: f32[1,384], index: 1, kind: input, shape index: {}]   ;;  %s3072_s2 = inlined_call_operand.hbm [shape: f32[1,384], index: 2, kind: input, shape index: {}]   ;;  %s3073_s3 = inlined_call_operand.hbm [shape: bf16[384,1152], index: 3, kind: input, shape index: {}]   ;;  %s3074_s4 = inlined_call_operand.hbm [shape: f32[1,1152], index: 4, kind: input, shape index: {}]   ;;  %s3075_s5 = inlined_call_operand.hbm [shape: f32[10,1152], index: 5, kind: output, shape index: {}]  }
   0x1   :  { %11 = vsyncpa [#allocation6], 0 }
   0x2   :  { %12 = vsyncpa [#allocation9], 0 }
   0x3   :  { %13 = vsyncpa [#allocation4], 0  ;;  %s2816_s18 = smov [#allocation5]   ;;  %s2817_s20 = smov [#allocation8]  }
   0x4   :  { %s32_s19 = sshll.u32 %s2816_s18, 4  ;;  %s51_s21 = sshll.u32 %s2817_s20, 4  ;;  %s33_s19 = int_to_ptr.vmem [resolvable:$true] %s32_s19  ;;  %s2861_s21 = int_to_ptr.vmem [resolvable:$true] %s51_s21 }
   0x5   :  { %s2676_s24 = scalar_lea.hbm %s3071_s1, 48 }
   0x6   :  { %p2677_p0 = scmp.ne.s32.totalorder %s3071_s1, %s2676_s24  ;;  %p2680_p1 = scmp.lt.u32.totalorder %s2676_s24, %s3071_s1 }
   0x8   :  { %p2682_p2 = pnand %p2680_p1, %p2677_p0 }
   0xa   :  { %2685 = shalt.err (!%p2682_p2)
}
   0xb   :  { %s2686_s29 = scalar_lea.vmem %s33_s19, 48  ;;  %s2690_s30 = scalar_lea.vmem %s33_s19, 64 }
   0xc   :  { %p2687_p3 = scmp.ne.s32.totalorder %s33_s19, %s2686_s29  ;;  %p2691_p4 = scmp.lt.s32.totalorder %s33_s19, %s33_s19 }
   0xd   :  { %p2692_p5 = scmp.lt.s32.totalorder %s2690_s30, %s2686_s29 }
   0xf   :  { %p2693_p6 = por %p2692_p5, %p2691_p4 }
  0x11   :  { %p2694_p7 = pnand %p2693_p6, %p2687_p3 }
  0x13   :  { %2697 = shalt.err (!%p2694_p7)
}
  0x14   :  { %35 = dma.hbm_to_vmem [thread:$0]  %s3071_s1, 48, %s33_s19, [#allocation6]  }
  0x15   :  { %s2698_s10 = scalar_lea.hbm %s3073_s3, 27648 }
  0x16   :  { %p2699_p8 = scmp.ne.s32.totalorder %s3073_s3, %s2698_s10  ;;  %p2702_p9 = scmp.lt.u32.totalorder %s2698_s10, %s3073_s3 }
  0x18   :  { %p2704_p10 = pnand %p2702_p9, %p2699_p8 }
  0x1a   :  { %2707 = shalt.err (!%p2704_p10)
}
  0x1b   :  { %s2708_s15 = scalar_lea.vmem %s2861_s21, 27648  ;;  %p2713_p12 = scmp.lt.s32.totalorder %s2861_s21, %s2861_s21 }
  0x1c   :  { %p2709_p11 = scmp.ne.s32.totalorder %s2861_s21, %s2708_s15  ;;  %p2714_p13 = scmp.lt.s32.totalorder %s2708_s15, %s2708_s15 }
  0x1e   :  { %p2715_p0 = por %p2714_p13, %p2713_p12 }
  0x20   :  { %p2716_p1 = pnand %p2715_p0, %p2709_p11 }
  0x22   :  { %2719 = shalt.err (!%p2716_p1)
}
  0x23   :  { %s2818_s1 = smov 576   ;;  %s2819_s16 = smov 36  }
  0x24   :  { %57 = dma.hbm_to_vmem [thread:$0]  %s3073_s3, 27648, %s2861_s21, [#allocation9], %s2818_s1, %s2818_s1, %s2819_s16  }
  0x25   :  { %s2820_s19 = smov [#allocation2]   ;;  %s2720_s24 = scalar_lea.hbm %s3070_s0, 768 }
  0x26   :  { %s19_s20 = sshll.u32 %s2820_s19, 4  ;;  %p2721_p2 = scmp.ne.s32.totalorder %s3070_s0, %s2720_s24  ;;  %s20_s20 = int_to_ptr.vmem [resolvable:$true] %s19_s20 }
  0x27   :  { %p2724_p3 = scmp.lt.u32.totalorder %s2720_s24, %s3070_s0 }
  0x29   :  { %p2726_p4 = pnand %p2724_p3, %p2721_p2 }
  0x2b   :  { %2729 = shalt.err (!%p2726_p4)
}
  0x2c   :  { %s2730_s29 = scalar_lea.vmem %s20_s20, 768  ;;  %p2735_p6 = scmp.lt.s32.totalorder %s20_s20, %s20_s20 }
  0x2d   :  { %p2731_p5 = scmp.ne.s32.totalorder %s20_s20, %s2730_s29  ;;  %p2736_p7 = scmp.lt.s32.totalorder %s2730_s29, %s2730_s29 }
  0x2f   :  { %p2737_p8 = por %p2736_p7, %p2735_p6 }
  0x31   :  { %p2738_p9 = pnand %p2737_p8, %p2731_p5 }
  0x33   :  { %2741 = shalt.err (!%p2738_p9)
}
  0x34   :  { %s2821_s3 = smov 384   ;;  %s2822_s21 = smov 24  }
  0x35   :  { %25 = dma.hbm_to_vmem [thread:$0]  %s3070_s0, 768, %s20_s20, [#allocation3], %s2821_s3, %s2821_s3, %s2822_s21  }
  0x36   :  { %s2823_s7 = smov [#allocation7]   ;;  %s2824_s9 = smov [#allocation10]  }
  0x37   :  { %s42_s8 = sshll.u32 %s2823_s7, 4  ;;  %s64_s10 = sshll.u32 %s2824_s9, 4  ;;  %s43_s8 = int_to_ptr.vmem [resolvable:$true] %s42_s8  ;;  %s65_s10 = int_to_ptr.vmem [resolvable:$true] %s64_s10 }
  0x38   :  { %s2742_s13 = scalar_lea.hbm %s3072_s2, 48 }
  0x39   :  { %p2743_p10 = scmp.ne.s32.totalorder %s3072_s2, %s2742_s13  ;;  %p2746_p11 = scmp.lt.u32.totalorder %s2742_s13, %s3072_s2 }
  0x3b   :  { %p2748_p12 = pnand %p2746_p11, %p2743_p10 }
  0x3d   :  { %2751 = shalt.err (!%p2748_p12)
}
  0x3e   :  { %s2752_s0 = scalar_lea.vmem %s43_s8, 48  ;;  %s2756_s17 = scalar_lea.vmem %s43_s8, 64 }
  0x3f   :  { %p2753_p13 = scmp.ne.s32.totalorder %s43_s8, %s2752_s0  ;;  %p2757_p0 = scmp.lt.s32.totalorder %s43_s8, %s43_s8 }
  0x40   :  { %p2758_p1 = scmp.lt.s32.totalorder %s2756_s17, %s2752_s0 }
  0x42   :  { %p2759_p2 = por %p2758_p1, %p2757_p0 }
  0x44   :  { %p2760_p3 = pnand %p2759_p2, %p2753_p13 }
  0x46   :  { %2763 = shalt.err (!%p2760_p3)
}
  0x47   :  { %45 = dma.hbm_to_vmem [thread:$0]  %s3072_s2, 48, %s43_s8, [#allocation6]  }
  0x48   :  { %s2764_s23 = scalar_lea.hbm %s3074_s4, 144 }
  0x49   :  { %p2765_p4 = scmp.ne.s32.totalorder %s3074_s4, %s2764_s23  ;;  %p2768_p5 = scmp.lt.u32.totalorder %s2764_s23, %s3074_s4 }
  0x4b   :  { %p2770_p6 = pnand %p2768_p5, %p2765_p4 }
  0x4d   :  { %2773 = shalt.err (!%p2770_p6)
}
  0x4e   :  { %s2774_s28 = scalar_lea.vmem %s65_s10, 144  ;;  %s2778_s29 = scalar_lea.vmem %s65_s10, 160 }
  0x4f   :  { %p2775_p7 = scmp.ne.s32.totalorder %s65_s10, %s2774_s28  ;;  %p2779_p8 = scmp.lt.s32.totalorder %s65_s10, %s65_s10 }
  0x50   :  { %p2780_p9 = scmp.lt.s32.totalorder %s2778_s29, %s2774_s28 }
  0x52   :  { %p2781_p10 = por %p2780_p9, %p2779_p8 }
  0x54   :  { %p2782_p11 = pnand %p2781_p10, %p2775_p7 }
  0x56   :  { %2785 = shalt.err (!%p2782_p11)
}
  0x57   :  { %67 = dma.hbm_to_vmem [thread:$0]  %s3074_s4, 144, %s65_s10, [#allocation9]  }
  0x58   :  { %2808 = dma.done.wait [#allocation3], 768  }
  0x59   :  { %2809 = vsyncadd [#allocation3], 4294966528 }
  0x5a   :  { %2810 = dma.done.wait [#allocation6], 96  }
  0x5b   :  { %2811 = vsyncadd [#allocation6], 4294967200 }
  0x5c   :  { %2812 = dma.done.wait [#allocation9], 27792  }
  0x5d   :  { %2813 = vsyncadd [#allocation9], 4294939504  ;;  %vm94_vm0 = vcmask 1041408   ;;  %v2928_v0 = vld [vmem:[#allocation2 + $0x18] sm:$0x3]  ;;  %v2940_v6 = vld [vmem:[#allocation2] sm:$0xff] }
  0x5e   :  { %v2930_v1 = vld [vmem:[#allocation2 + $0x20] sm:$0x3]  ;;  %v2932_v2 = vld [vmem:[#allocation2 + $0x28] sm:$0x3]  ;;  %v95_v3 = vsel %vm94_vm0, %v2928_v0, 0.0  ;;  %v2944_v8 = vld [vmem:[#allocation2 + $0x10] sm:$0xff] }
  0x5f   :  { %v96_v4 = vsel %vm94_vm0, %v2930_v1, 0.0  ;;  %v98_v5 = vsel %vm94_vm0, %v2932_v2, 0.0  ;;  %v2942_v7 = vld [vmem:[#allocation2 + $0x8] sm:$0xff]  ;;  %v2360_v13 = vld [vmem:[#allocation8 + $0x4] ss:$36 sps:$4 sm:$0xff]   ;;  %vm2827_vm1 = vmmov 0  }
  0x60   :  { %v97_v9 = vadd.f32 %v96_v4, %v95_v3  ;;  %v90_v10 = vadd.f32 %v2942_v7, %v2940_v6  ;;  %v2362_v14 = vld [vmem:[#allocation8 + $0xc] ss:$36 sps:$4 sm:$0xff]   ;;  %v2364_v15 = vld [vmem:[#allocation8] ss:$36 sps:$4 sm:$0xff]   ;;  %v2368_v18 = vld [vmem:[#allocation8 + $0x54] ss:$36 sps:$4 sm:$0xff]   ;;  %1582 = vmatprep.subr.bf16.mxu0 %v2360_v13 }
  0x61   :  { %v2365_v16 = vld [vmem:[#allocation8 + $0x8] ss:$36 sps:$4 sm:$0xff]   ;;  %1668 = vmatprep.subr.bf16.mxu1 %v2362_v14  ;;  %1583 = vmatpush1.bf16.msra.mxu0 %v2364_v15  ;;  %v2371_v20 = vld [vmem:[#allocation8 + $0x50] ss:$36 sps:$4 sm:$0xff]   ;;  %v2374_v22 = vld [vmem:[#allocation8 + $0x9c] ss:$36 sps:$4 sm:$0xff]  }
  0x62   :  { %v99_v11 = vadd.f32 %v98_v5, %v97_v9  ;;  %v91_v12 = vadd.f32 %v90_v10, %v2944_v8  ;;  %v2366_v17 = vld [vmem:[#allocation8 + $0x4c] ss:$36 sps:$4 sm:$0xff]   ;;  %1669 = vmatpush1.bf16.msra.mxu1 %v2365_v16  ;;  %v2372_v21 = vld [vmem:[#allocation8 + $0x94] ss:$36 sps:$4 sm:$0xff]   ;;  %v2378_v25 = vld [vmem:[#allocation8 + $0xdc] ss:$36 sps:$4 sm:$0xff]  }
  0x63   :  { %v2370_v19 = vld [vmem:[#allocation8 + $0x48] ss:$36 sps:$4 sm:$0xff]   ;;  %1584 = vmatprep.subr.bf16.mxu0 %v2366_v17  ;;  %1670 = vmatprep.subr.bf16.mxu1 %v2368_v18  ;;  %v2376_v23 = vld [vmem:[#allocation8 + $0x90] ss:$36 sps:$4 sm:$0xff]   ;;  %v2377_v24 = vld [vmem:[#allocation8 + $0x98] ss:$36 sps:$4 sm:$0xff]  }
  0x64   :  { %100 = vadd.xlane.f32.xlu0 %v99_v11  ;;  %v2380_v26 = vld [vmem:[#allocation8 + $0xe4] ss:$36 sps:$4 sm:$0xff]   ;;  %v2382_v27 = vld [vmem:[#allocation8 + $0xd8] ss:$36 sps:$4 sm:$0xff]   ;;  %v2386_v30 = vld [vmem:[#allocation8 + $0x12c] ss:$36 sps:$4 sm:$0xff]  }
  0x65   :  { %1585 = vmatpush1.bf16.msra.mxu0 %v2370_v19  ;;  %v2383_v28 = vld [vmem:[#allocation8 + $0xe0] ss:$36 sps:$4 sm:$0xff]   ;;  %v2389_v32 = vld [vmem:[#allocation8 + $0x128] ss:$36 sps:$4 sm:$0xff]   ;;  %v2392_v34 = vld [vmem:[#allocation8 + $0x174] ss:$36 sps:$4 sm:$0xff]  }
  0x66   :  { %1671 = vmatpush1.bf16.msra.mxu1 %v2371_v20  ;;  %1586 = vmatprep.subr.bf16.mxu0 %v2372_v21  ;;  %v2384_v29 = vld [vmem:[#allocation8 + $0x124] ss:$36 sps:$4 sm:$0xff]   ;;  %v2390_v33 = vld [vmem:[#allocation8 + $0x16c] ss:$36 sps:$4 sm:$0xff]   ;;  %v2396_v37 = vld [vmem:[#allocation8 + $0x1b4] ss:$36 sps:$4 sm:$0xff]  }
  0x67   :  { %1672 = vmatprep.subr.bf16.mxu1 %v2374_v22  ;;  %v2388_v31 = vld [vmem:[#allocation8 + $0x120] ss:$36 sps:$4 sm:$0xff]   ;;  %v2394_v35 = vld [vmem:[#allocation8 + $0x168] ss:$36 sps:$4 sm:$0xff]   ;;  %v2395_v36 = vld [vmem:[#allocation8 + $0x170] ss:$36 sps:$4 sm:$0xff]  }
  0x68   :  { %92 = vadd.xlane.f32.xlu0 %v91_v12  ;;  %v2398_v38 = vld [vmem:[#allocation8 + $0x1bc] ss:$36 sps:$4 sm:$0xff]   ;;  %v2400_v39 = vld [vmem:[#allocation8 + $0x1b0] ss:$36 sps:$4 sm:$0xff]   ;;  %v2404_v42 = vld [vmem:[#allocation8 + $0x204] ss:$36 sps:$4 sm:$0xff]  }
  0x69   :  { %1587 = vmatpush1.bf16.msra.mxu0 %v2376_v23  ;;  %v2401_v40 = vld [vmem:[#allocation8 + $0x1b8] ss:$36 sps:$4 sm:$0xff]   ;;  %v2407_v44 = vld [vmem:[#allocation8 + $0x200] ss:$36 sps:$4 sm:$0xff]   ;;  %v2410_v46 = vld [vmem:[#allocation8 + $0x24c] ss:$36 sps:$4 sm:$0xff]  }
  0x6a   :  { %1673 = vmatpush1.bf16.msra.mxu1 %v2377_v24  ;;  %1588 = vmatprep.subr.bf16.mxu0 %v2378_v25  ;;  %v2402_v41 = vld [vmem:[#allocation8 + $0x1fc] ss:$36 sps:$4 sm:$0xff]   ;;  %v2408_v45 = vld [vmem:[#allocation8 + $0x244] ss:$36 sps:$4 sm:$0xff]   ;;  %v2414_v49 = vld [vmem:[#allocation8 + $0x28c] ss:$36 sps:$4 sm:$0xff]  }
  0x6b   :  { %1674 = vmatprep.subr.bf16.mxu1 %v2380_v26  ;;  %v2406_v43 = vld [vmem:[#allocation8 + $0x1f8] ss:$36 sps:$4 sm:$0xff]   ;;  %v2412_v47 = vld [vmem:[#allocation8 + $0x240] ss:$36 sps:$4 sm:$0xff]   ;;  %v2413_v48 = vld [vmem:[#allocation8 + $0x248] ss:$36 sps:$4 sm:$0xff]  }
  0x6c   :  { %v2416_v50 = vld [vmem:[#allocation8 + $0x294] ss:$36 sps:$4 sm:$0xff]   ;;  %v2418_v10 = vld [vmem:[#allocation8 + $0x288] ss:$36 sps:$4 sm:$0xff]   ;;  %v2422_v13 = vld [vmem:[#allocation8 + $0x2dc] ss:$36 sps:$4 sm:$0xff]  }
  0x6d   :  { %1589 = vmatpush1.bf16.msra.mxu0 %v2382_v27  ;;  %v2419_v11 = vld [vmem:[#allocation8 + $0x290] ss:$36 sps:$4 sm:$0xff]   ;;  %v2425_v15 = vld [vmem:[#allocation8 + $0x2d8] ss:$36 sps:$4 sm:$0xff]   ;;  %v2428_v17 = vld [vmem:[#allocation8 + $0x324] ss:$36 sps:$4 sm:$0xff]  }
  0x6e   :  { %1675 = vmatpush1.bf16.msra.mxu1 %v2383_v28  ;;  %1590 = vmatprep.subr.bf16.mxu0 %v2384_v29  ;;  %v2420_v12 = vld [vmem:[#allocation8 + $0x2d4] ss:$36 sps:$4 sm:$0xff]   ;;  %v2426_v16 = vld [vmem:[#allocation8 + $0x31c] ss:$36 sps:$4 sm:$0xff]   ;;  %v2432_v20 = vld [vmem:[#allocation8 + $0x364] ss:$36 sps:$4 sm:$0xff]  }
  0x6f   :  { %1676 = vmatprep.subr.bf16.mxu1 %v2386_v30  ;;  %v2424_v14 = vld [vmem:[#allocation8 + $0x2d0] ss:$36 sps:$4 sm:$0xff]   ;;  %v2430_v18 = vld [vmem:[#allocation8 + $0x318] ss:$36 sps:$4 sm:$0xff]   ;;  %v2431_v19 = vld [vmem:[#allocation8 + $0x320] ss:$36 sps:$4 sm:$0xff]  }
  0x70   :  { %v2434_v21 = vld [vmem:[#allocation8 + $0x36c] ss:$36 sps:$4 sm:$0xff]   ;;  %v2436_v22 = vld [vmem:[#allocation8 + $0x360] ss:$36 sps:$4 sm:$0xff]   ;;  %v2440_v25 = vld [vmem:[#allocation8 + $0x3b4] ss:$36 sps:$4 sm:$0xff]  }
  0x71   :  { %1591 = vmatpush1.bf16.msra.mxu0 %v2388_v31  ;;  %v2437_v23 = vld [vmem:[#allocation8 + $0x368] ss:$36 sps:$4 sm:$0xff]   ;;  %v2443_v27 = vld [vmem:[#allocation8 + $0x3b0] ss:$36 sps:$4 sm:$0xff]   ;;  %v2446_v29 = vld [vmem:[#allocation8 + $0x3fc] ss:$36 sps:$4 sm:$0xff]  }
  0x72   :  { %1677 = vmatpush1.bf16.msra.mxu1 %v2389_v32  ;;  %1592 = vmatprep.subr.bf16.mxu0 %v2390_v33  ;;  %v2438_v24 = vld [vmem:[#allocation8 + $0x3ac] ss:$36 sps:$4 sm:$0xff]   ;;  %v2444_v28 = vld [vmem:[#allocation8 + $0x3f4] ss:$36 sps:$4 sm:$0xff]   ;;  %v2450_v32 = vld [vmem:[#allocation8 + $0x43c] ss:$36 sps:$4 sm:$0xff]  }
  0x73   :  { %1678 = vmatprep.subr.bf16.mxu1 %v2392_v34  ;;  %v2442_v26 = vld [vmem:[#allocation8 + $0x3a8] ss:$36 sps:$4 sm:$0xff]   ;;  %v2448_v30 = vld [vmem:[#allocation8 + $0x3f0] ss:$36 sps:$4 sm:$0xff]   ;;  %v2449_v31 = vld [vmem:[#allocation8 + $0x3f8] ss:$36 sps:$4 sm:$0xff]  }
  0x74   :  { %v2452_v33 = vld [vmem:[#allocation8 + $0x444] ss:$36 sps:$4 sm:$0xff]   ;;  %v2454_v34 = vld [vmem:[#allocation8 + $0x438] ss:$36 sps:$4 sm:$0xff]   ;;  %s2828_s4 = smov [#allocation11]  }
  0x75   :  { %1593 = vmatpush1.bf16.msra.mxu0 %v2394_v35  ;;  %v2455_v35 = vld [vmem:[#allocation8 + $0x440] ss:$36 sps:$4 sm:$0xff]   ;;  %s2031_s21 = sshll.u32 %s2828_s4, 4  ;;  %s2032_s21 = int_to_ptr.vmem [resolvable:$true] %s2031_s21 }
  0x76   :  { %1679 = vmatpush1.bf16.msra.mxu1 %v2395_v36  ;;  %1594 = vmatprep.subr.bf16.mxu0 %v2396_v37  ;;  %v2458_v36 = vld [vmem:[#allocation8 + $0x484] ss:$36 sps:$4 sm:$0xff]   ;;  %v2461_v37 = vld [vmem:[#allocation8 + $0x48c] ss:$36 sps:$4 sm:$0xff]   ;;  %s2786_s30 = scalar_lea.vmem %s2032_s21, 2304  ;;  %p2791_p13 = scmp.lt.s32.totalorder %s2032_s21, %s2032_s21 }
  0x77   :  { %1680 = vmatprep.subr.bf16.mxu1 %v2398_v38  ;;  %p2787_p12 = scmp.ne.s32.totalorder %s2032_s21, %s2786_s30  ;;  %p2792_p0 = scmp.lt.s32.totalorder %s2786_s30, %s2786_s30 }
  0x79   :  { %1595 = vmatpush1.bf16.msra.mxu0 %v2400_v39  ;;  %p2793_p1 = por %p2792_p0, %p2791_p13 }
  0x7a   :  { %1681 = vmatpush1.bf16.msra.mxu1 %v2401_v40  ;;  %1596 = vmatprep.subr.bf16.mxu0 %v2402_v41 }
  0x7b   :  { %1682 = vmatprep.subr.bf16.mxu1 %v2404_v42  ;;  %v142_v42 = vlaneseq  ;;  %p2794_p2 = pnand %p2793_p1, %p2787_p12 }
  0x7d   :  { %1597 = vmatpush1.bf16.msra.mxu0 %v2406_v43 }
  0x7e   :  { %1683 = vmatpush1.bf16.msra.mxu1 %v2407_v44  ;;  %1598 = vmatprep.subr.bf16.mxu0 %v2408_v45  ;;  %v2982_v45 = vshrl.u32 %v142_v42, 7 }
  0x7f   :  { %1684 = vmatprep.subr.bf16.mxu1 %v2410_v46 }
  0x80   :  { %v2985_v46 = vsub.s32 1, %v2982_v45 }
  0x81   :  { %1599 = vmatpush1.bf16.msra.mxu0 %v2412_v47  ;;  %v2988_v47 = vsub.s32 0, %v2982_v45 }
  0x82   :  { %1685 = vmatpush1.bf16.msra.mxu1 %v2413_v48  ;;  %1600 = vmatprep.subr.bf16.mxu0 %v2414_v49  ;;  %v2990_v48 = vld [vmem:[#allocation5] sm:$0x7] }
  0x83   :  { %1686 = vmatprep.subr.bf16.mxu1 %v2416_v50 }
  0x85   :  { %1601 = vmatpush1.bf16.msra.mxu0 %v2418_v10  ;;  %v2459_v10 = vld [vmem:[#allocation8 + $0x488] ss:$36 sps:$4 sm:$0xff]  }
  0x86   :  { %1687 = vmatpush1.bf16.msra.mxu1 %v2419_v11  ;;  %1602 = vmatprep.subr.bf16.mxu0 %v2420_v12  ;;  %v2464_v12 = vld [vmem:[#allocation8 + $0x4cc] ss:$36 sps:$4 sm:$0xff]  }
  0x87   :  { %1688 = vmatprep.subr.bf16.mxu1 %v2422_v13  ;;  %v2467_v13 = vld [vmem:[#allocation8 + $0x4d4] ss:$36 sps:$4 sm:$0xff]  }
  0x89   :  { %1603 = vmatpush1.bf16.msra.mxu0 %v2424_v14  ;;  %v2470_v14 = vld [vmem:[#allocation8 + $0x514] ss:$36 sps:$4 sm:$0xff]  }
  0x8a   :  { %1689 = vmatpush1.bf16.msra.mxu1 %v2425_v15  ;;  %1604 = vmatprep.subr.bf16.mxu0 %v2426_v16  ;;  %v2473_v15 = vld [vmem:[#allocation8 + $0x51c] ss:$36 sps:$4 sm:$0xff]   ;;  %v2825_v16 = vmov 0  }
  0x8b   :  { %1690 = vmatprep.subr.bf16.mxu1 %v2428_v17  ;;  %v2468_v17 = vld [vmem:[#allocation8 + $0x510] ss:$36 sps:$4 sm:$0xff]  }
  0x8d   :  { %1605 = vmatpush1.bf16.msra.mxu0 %v2430_v18  ;;  %v2471_v18 = vld [vmem:[#allocation8 + $0x518] ss:$36 sps:$4 sm:$0xff]  }
  0x8e   :  { %1691 = vmatpush1.bf16.msra.mxu1 %v2431_v19  ;;  %1606 = vmatprep.subr.bf16.mxu0 %v2432_v20  ;;  %v2476_v19 = vld [vmem:[#allocation8 + $0x55c] ss:$36 sps:$4 sm:$0xff]   ;;  %v2479_v20 = vld [vmem:[#allocation8 + $0x564] ss:$36 sps:$4 sm:$0xff]  }
  0x8f   :  { %1692 = vmatprep.subr.bf16.mxu1 %v2434_v21  ;;  %v2474_v21 = vld [vmem:[#allocation8 + $0x558] ss:$36 sps:$4 sm:$0xff]  }
  0x91   :  { %1607 = vmatpush1.bf16.msra.mxu0 %v2436_v22  ;;  %v2477_v22 = vld [vmem:[#allocation8 + $0x560] ss:$36 sps:$4 sm:$0xff]  }
  0x92   :  { %1693 = vmatpush1.bf16.msra.mxu1 %v2437_v23  ;;  %1608 = vmatprep.subr.bf16.mxu0 %v2438_v24  ;;  %v2482_v23 = vld [vmem:[#allocation8 + $0x5a4] ss:$36 sps:$4 sm:$0xff]   ;;  %v2485_v24 = vld [vmem:[#allocation8 + $0x5ac] ss:$36 sps:$4 sm:$0xff]  }
  0x93   :  { %1694 = vmatprep.subr.bf16.mxu1 %v2440_v25  ;;  %v2480_v25 = vld [vmem:[#allocation8 + $0x5a0] ss:$36 sps:$4 sm:$0xff]  }
  0x95   :  { %1609 = vmatpush1.bf16.msra.mxu0 %v2442_v26  ;;  %v2483_v26 = vld [vmem:[#allocation8 + $0x5a8] ss:$36 sps:$4 sm:$0xff]  }
  0x96   :  { %1695 = vmatpush1.bf16.msra.mxu1 %v2443_v27  ;;  %1610 = vmatprep.subr.bf16.mxu0 %v2444_v28  ;;  %v2488_v27 = vld [vmem:[#allocation8 + $0x5ec] ss:$36 sps:$4 sm:$0xff]   ;;  %v2491_v28 = vld [vmem:[#allocation8 + $0x5f4] ss:$36 sps:$4 sm:$0xff]  }
  0x97   :  { %1696 = vmatprep.subr.bf16.mxu1 %v2446_v29  ;;  %v3025_v29 = vsub.s32 2, %v2982_v45 }
  0x99   :  { %1611 = vmatpush1.bf16.msra.mxu0 %v2448_v30  ;;  %v2486_v30 = vld [vmem:[#allocation8 + $0x5e8] ss:$36 sps:$4 sm:$0xff]  }
  0x9a   :  { %1697 = vmatpush1.bf16.msra.mxu1 %v2449_v31  ;;  %1612 = vmatprep.subr.bf16.mxu0 %v2450_v32  ;;  %v2489_v31 = vld [vmem:[#allocation8 + $0x5f0] ss:$36 sps:$4 sm:$0xff]  }
  0x9b   :  { %1698 = vmatprep.subr.bf16.mxu1 %v2452_v33  ;;  %v2494_v32 = vld [vmem:[#allocation8 + $0x634] ss:$36 sps:$4 sm:$0xff]   ;;  %v2497_v33 = vld [vmem:[#allocation8 + $0x63c] ss:$36 sps:$4 sm:$0xff]  }
  0x9d   :  { %1613 = vmatpush1.bf16.msra.mxu0 %v2454_v34 }
  0x9e   :  { %1699 = vmatpush1.bf16.msra.mxu1 %v2455_v35  ;;  %1625 = vmatprep.subr.bf16.mxu0 %v2458_v36  ;;  %v153_v36 = vrot.slane %v2990_v48, %v3025_v29 }
  0x9f   :  { %1711 = vmatprep.subr.bf16.mxu1 %v2461_v37  ;;  %v2492_v37 = vld [vmem:[#allocation8 + $0x630] ss:$36 sps:$4 sm:$0xff]  }
  0xf1   :  { %v101_v51 = vpop.xlane.xlu0 %100 }
  0xf2   :  { %v104_v52 = vmul.f32 0.0026041667, %v101_v51  ;;  %v149_v51 = vrot.slane %v2990_v48, %v2985_v46 }
  0xf4   :  { %v2950_v53 = vsub.f32 %v2928_v0, %v104_v52  ;;  %v2953_v54 = vsub.f32 %v2930_v1, %v104_v52  ;;  %v2969_v62 = vsub.f32 %v2932_v2, %v104_v52  ;;  %v2998_v52 = vld [vmem:[#allocation7] sm:$0x7] }
  0xf5   :  { %v93_v55 = vpop.xlane.xlu0 %92 }
  0xf6   :  { %v103_v56 = vmul.f32 0.0026041667, %v93_v55  ;;  %v114_v57 = vmul.f32 %v2950_v53, %v2950_v53  ;;  %v115_v58 = vmul.f32 %v2953_v54, %v2953_v54 }
  0xf8   :  { %v2960_v59 = vsub.f32 %v2940_v6, %v103_v56  ;;  %v2963_v60 = vsub.f32 %v2942_v7, %v103_v56  ;;  %v2966_v61 = vsub.f32 %v2944_v8, %v103_v56  ;;  %v121_v1 = vsel %vm94_vm0, %v114_v57, 0.0 }
  0xf9   :  { %v122_v3 = vsel %vm94_vm0, %v115_v58, 0.0  ;;  %v116_v6 = vmul.f32 %v2969_v62, %v2969_v62  ;;  %v145_v56 = vrot.slane %v2990_v48, %v2988_v47  ;;  %v172_v58 = vrot.slane %v2998_v52, %v2985_v46  ;;  %v2506_v48 = vld [vmem:[#allocation8 + $0x14] ss:$36 sps:$4 sm:$0xff]  }
  0xfa   :  { %v111_v63 = vmul.f32 %v2960_v59, %v2960_v59  ;;  %v112_v0 = vmul.f32 %v2963_v60, %v2963_v60  ;;  %v113_v4 = vmul.f32 %v2966_v61, %v2966_v61  ;;  %v123_v2 = vadd.f32 %v122_v3, %v121_v1 }
  0xfb   :  { %v124_v8 = vsel %vm94_vm0, %v116_v6, 0.0 }
  0xfc   :  { %v117_v5 = vadd.f32 %v112_v0, %v111_v63  ;;  %v125_v9 = vadd.f32 %v124_v8, %v123_v2  ;;  %v168_v63 = vrot.slane %v2998_v52, %v2988_v47 }
  0xfe   :  { %v118_v7 = vadd.f32 %v117_v5, %v113_v4 }
 0x100   :  { %119 = vadd.xlane.f32.xlu1 %v118_v7 }
 0x104   :  { %126 = vadd.xlane.f32.xlu1 %v125_v9  ;;  %v2456_v9 = vld [vmem:[#allocation8 + $0x480] ss:$36 sps:$4 sm:$0xff]  }
 0x18d   :  { %v120_v38 = vpop.xlane.xlu1 %119 }
 0x18e   :  { %v128_v39 = vmul.f32 0.0026041667, %v120_v38  ;;  %v2495_v38 = vld [vmem:[#allocation8 + $0x638] ss:$36 sps:$4 sm:$0xff]  }
 0x190   :  { %v130_v40 = vadd.f32 1e-06, %v128_v39  ;;  %v2500_v39 = vld [vmem:[#allocation8 + $0x67c] ss:$36 sps:$4 sm:$0xff]  }
 0x191   :  { %v127_v41 = vpop.xlane.xlu1 %126 }
 0x192   :  { %2672 = vrsqrt.f32 %v130_v40  ;;  %v129_v43 = vmul.f32 0.0026041667, %v127_v41  ;;  %v2503_v40 = vld [vmem:[#allocation8 + $0x684] ss:$36 sps:$4 sm:$0xff]  }
 0x194   :  { %v131_v44 = vadd.f32 1e-06, %v129_v43  ;;  %v176_v43 = vrot.slane %v2998_v52, %v3025_v29  ;;  %v2515_v52 = vld [vmem:[#allocation8 + $0x64] ss:$36 sps:$4 sm:$0xff]  }
 0x196   :  { %2674 = vrsqrt.f32 %v131_v44 }
 0x19c   :  { %v2992_v49 = vpop.eup %2672 }
 0x19d   :  { %v135_v50 = vmul.f32 %v2992_v49, %v2963_v60  ;;  %v134_v55 = vmul.f32 %v2992_v49, %v2960_v59  ;;  %v136_v35 = vmul.f32 %v2992_v49, %v2966_v61  ;;  %v2501_v61 = vld [vmem:[#allocation8 + $0x680] ss:$36 sps:$4 sm:$0xff]  }
 0x19e   :  { %v2509_v49 = vld [vmem:[#allocation8 + $0x1c] ss:$36 sps:$4 sm:$0xff]  }
 0x19f   :  { %v158_v0 = vmul.f32 %v149_v51, %v135_v50  ;;  %v157_v3 = vmul.f32 %v145_v56, %v134_v55  ;;  %v159_v42 = vmul.f32 %v153_v36, %v136_v35  ;;  %v2567_v35 = vld [vmem:[#allocation8 + $0x2e8] ss:$36 sps:$4 sm:$0xff]  }
 0x1a0   :  { %v3004_v57 = vpop.eup %2674 }
 0x1a1   :  { %v138_v60 = vmul.f32 %v3004_v57, %v2953_v54  ;;  %v137_v1 = vmul.f32 %v3004_v57, %v2950_v53  ;;  %v181_v5 = vadd.f32 %v172_v58, %v158_v0  ;;  %v180_v7 = vadd.f32 %v168_v63, %v157_v3  ;;  %v2462_v53 = vld [vmem:[#allocation8 + $0x4c8] ss:$36 sps:$4 sm:$0xff]   ;;  %v2465_v54 = vld [vmem:[#allocation8 + $0x4d0] ss:$36 sps:$4 sm:$0xff]  }
 0x1a2   :  { %v139_v34 = vmul.f32 %v3004_v57, %v2969_v62  ;;  %v2498_v62 = vld [vmem:[#allocation8 + $0x678] ss:$36 sps:$4 sm:$0xff]   ;;  %v182_v50 = vadd.f32 %v176_v43, %v159_v42  ;;  %v2521_v0 = vld [vmem:[#allocation8 + $0xac] ss:$36 sps:$4 sm:$0xff]  }
 0x1a3   :  { %v161_v59 = vmul.f32 %v149_v51, %v138_v60  ;;  %v160_v4 = vmul.f32 %v145_v56, %v137_v1  ;;  %v2504_v51 = vld [vmem:[#allocation8 + $0x10] ss:$36 sps:$4 sm:$0xff]   ;;  %v2507_v56 = vld [vmem:[#allocation8 + $0x18] ss:$36 sps:$4 sm:$0xff]   ;;  %v2518_v60 = vld [vmem:[#allocation8 + $0xa4] ss:$36 sps:$4 sm:$0xff]  }
 0x1a4   :  { %v162_v41 = vmul.f32 %v153_v36, %v139_v34  ;;  %v2512_v57 = vld [vmem:[#allocation8 + $0x5c] ss:$36 sps:$4 sm:$0xff]   ;;  %v2519_v3 = vld [vmem:[#allocation8 + $0xa8] ss:$36 sps:$4 sm:$0xff]   ;;  %v2576_v42 = vld [vmem:[#allocation8 + $0x370] ss:$36 sps:$4 sm:$0xff]  }
 0x1a5   :  { %v184_v6 = vadd.f32 %v172_v58, %v161_v59  ;;  %v183_v2 = vadd.f32 %v168_v63, %v160_v4  ;;  %v2510_v58 = vld [vmem:[#allocation8 + $0x58] ss:$36 sps:$4 sm:$0xff]   ;;  %v2513_v63 = vld [vmem:[#allocation8 + $0x60] ss:$36 sps:$4 sm:$0xff]   ;;  %v2524_v59 = vld [vmem:[#allocation8 + $0xec] ss:$36 sps:$4 sm:$0xff]  }
 0x1a6   :  { %v185_v44 = vadd.f32 %v176_v43, %v162_v41  ;;  %v2516_v1 = vld [vmem:[#allocation8 + $0xa0] ss:$36 sps:$4 sm:$0xff]   ;;  %v2527_v4 = vld [vmem:[#allocation8 + $0xf4] ss:$36 sps:$4 sm:$0xff]   ;;  %v2572_v36 = vld [vmem:[#allocation8 + $0x32c] ss:$36 sps:$4 sm:$0xff]  }
 0x1a7   :  { %v3014_v8 = vpack.c.bf16 %v184_v6, %v181_v5  ;;  %v3016_v11 = vpack.c.bf16 %v183_v2, %v180_v7  ;;  %v2522_v5 = vld [vmem:[#allocation8 + $0xe8] ss:$36 sps:$4 sm:$0xff]   ;;  %v2525_v6 = vld [vmem:[#allocation8 + $0xf0] ss:$36 sps:$4 sm:$0xff]   ;;  %v2533_v2 = vld [vmem:[#allocation8 + $0x13c] ss:$36 sps:$4 sm:$0xff]  }
 0x1a8   :  { %v3035_v55 = vpack.c.bf16 %v185_v44, %v182_v50  ;;  %v2530_v7 = vld [vmem:[#allocation8 + $0x134] ss:$36 sps:$4 sm:$0xff]   ;;  %v2564_v34 = vld [vmem:[#allocation8 + $0x2e0] ss:$36 sps:$4 sm:$0xff]   ;;  %v2593_v50 = vld [vmem:[#allocation8 + $0x40c] ss:$36 sps:$4 sm:$0xff]  }
 0x1a9   :  { %1614 = vmatprep.mubr.bf16.mxu0 %v3014_v8  ;;  %1700 = vmatprep.mubr.bf16.mxu1 %v3014_v8  ;;  %v2581_v41 = vld [vmem:[#allocation8 + $0x37c] ss:$36 sps:$4 sm:$0xff]  }
 0x1aa   :  { %1615 = vmatmul.mubr.bf16.vlgmr.msra.gmra.mrb[0].mxu0 %v3016_v11  ;;  %1701 = vmatmul.mubr.bf16.vlgmr.msra.gmra.mrb[0].mxu1 %v3016_v11  ;;  %v2579_v43 = vld [vmem:[#allocation8 + $0x378] ss:$36 sps:$4 sm:$0xff]  }
 0x1ab   :  { %1626 = vmatpush1.bf16.msra.mxu0 %v2456_v9  ;;  %1712 = vmatpush1.bf16.msra.mxu1 %v2459_v10  ;;  %v2528_v9 = vld [vmem:[#allocation8 + $0x130] ss:$36 sps:$4 sm:$0xff]   ;;  %v2531_v10 = vld [vmem:[#allocation8 + $0x138] ss:$36 sps:$4 sm:$0xff]  }
 0x1ac   :  { %1627 = vmatprep.subr.bf16.mxu0 %v2464_v12  ;;  %1713 = vmatprep.subr.bf16.mxu1 %v2467_v13  ;;  %v2536_v12 = vld [vmem:[#allocation8 + $0x17c] ss:$36 sps:$4 sm:$0xff]   ;;  %v2539_v13 = vld [vmem:[#allocation8 + $0x184] ss:$36 sps:$4 sm:$0xff]  }
 0x1ad   :  { %1657 = vmatprep.mubr.bf16.mxu0 %v2825_v16  ;;  %1743 = vmatprep.mubr.bf16.mxu1 %v2825_v16  ;;  %v2582_v44 = vld [vmem:[#allocation8 + $0x3b8] ss:$36 sps:$4 sm:$0xff]  }
 0x1af   :  { %1628 = vmatpush1.bf16.msra.mxu0 %v2462_v53  ;;  %1714 = vmatpush1.bf16.msra.mxu1 %v2465_v54  ;;  %v2534_v53 = vld [vmem:[#allocation8 + $0x178] ss:$36 sps:$4 sm:$0xff]   ;;  %v2537_v54 = vld [vmem:[#allocation8 + $0x180] ss:$36 sps:$4 sm:$0xff]  }
 0x1b0   :  { %1629 = vmatprep.subr.bf16.mxu0 %v2470_v14  ;;  %1715 = vmatprep.subr.bf16.mxu1 %v2473_v15  ;;  %v2542_v14 = vld [vmem:[#allocation8 + $0x1c4] ss:$36 sps:$4 sm:$0xff]   ;;  %v2545_v15 = vld [vmem:[#allocation8 + $0x1cc] ss:$36 sps:$4 sm:$0xff]  }
 0x1b3   :  { %1630 = vmatpush1.bf16.msra.mxu0 %v2468_v17  ;;  %1716 = vmatpush1.bf16.msra.mxu1 %v2471_v18  ;;  %v2540_v17 = vld [vmem:[#allocation8 + $0x1c0] ss:$36 sps:$4 sm:$0xff]   ;;  %v2543_v18 = vld [vmem:[#allocation8 + $0x1c8] ss:$36 sps:$4 sm:$0xff]  }
 0x1b4   :  { %1631 = vmatprep.subr.bf16.mxu0 %v2476_v19  ;;  %1717 = vmatprep.subr.bf16.mxu1 %v2479_v20  ;;  %v2548_v19 = vld [vmem:[#allocation8 + $0x20c] ss:$36 sps:$4 sm:$0xff]   ;;  %v2551_v20 = vld [vmem:[#allocation8 + $0x214] ss:$36 sps:$4 sm:$0xff]  }
 0x1b7   :  { %1632 = vmatpush1.bf16.msra.mxu0 %v2474_v21  ;;  %1718 = vmatpush1.bf16.msra.mxu1 %v2477_v22  ;;  %v2546_v21 = vld [vmem:[#allocation8 + $0x208] ss:$36 sps:$4 sm:$0xff]   ;;  %v2549_v22 = vld [vmem:[#allocation8 + $0x210] ss:$36 sps:$4 sm:$0xff]  }
 0x1b8   :  { %1633 = vmatprep.subr.bf16.mxu0 %v2482_v23  ;;  %1719 = vmatprep.subr.bf16.mxu1 %v2485_v24  ;;  %v2554_v23 = vld [vmem:[#allocation8 + $0x254] ss:$36 sps:$4 sm:$0xff]   ;;  %v2557_v24 = vld [vmem:[#allocation8 + $0x25c] ss:$36 sps:$4 sm:$0xff]  }
 0x1bb   :  { %1634 = vmatpush1.bf16.msra.mxu0 %v2480_v25  ;;  %1720 = vmatpush1.bf16.msra.mxu1 %v2483_v26  ;;  %v2552_v25 = vld [vmem:[#allocation8 + $0x250] ss:$36 sps:$4 sm:$0xff]   ;;  %v2555_v26 = vld [vmem:[#allocation8 + $0x258] ss:$36 sps:$4 sm:$0xff]  }
 0x1bc   :  { %1635 = vmatprep.subr.bf16.mxu0 %v2488_v27  ;;  %1721 = vmatprep.subr.bf16.mxu1 %v2491_v28  ;;  %v2560_v27 = vld [vmem:[#allocation8 + $0x29c] ss:$36 sps:$4 sm:$0xff]   ;;  %v2563_v28 = vld [vmem:[#allocation8 + $0x2a4] ss:$36 sps:$4 sm:$0xff]  }
 0x1bf   :  { %1636 = vmatpush1.bf16.msra.mxu0 %v2486_v30  ;;  %1722 = vmatpush1.bf16.msra.mxu1 %v2489_v31  ;;  %v2558_v30 = vld [vmem:[#allocation8 + $0x298] ss:$36 sps:$4 sm:$0xff]   ;;  %v2561_v31 = vld [vmem:[#allocation8 + $0x2a0] ss:$36 sps:$4 sm:$0xff]  }
 0x1c0   :  { %1637 = vmatprep.subr.bf16.mxu0 %v2494_v32  ;;  %1723 = vmatprep.subr.bf16.mxu1 %v2497_v33  ;;  %v2566_v32 = vld [vmem:[#allocation8 + $0x2e4] ss:$36 sps:$4 sm:$0xff]   ;;  %v2569_v33 = vld [vmem:[#allocation8 + $0x2ec] ss:$36 sps:$4 sm:$0xff]  }
 0x1c3   :  { %1638 = vmatpush1.bf16.msra.mxu0 %v2492_v37  ;;  %1724 = vmatpush1.bf16.msra.mxu1 %v2495_v38  ;;  %v2575_v37 = vld [vmem:[#allocation8 + $0x334] ss:$36 sps:$4 sm:$0xff]   ;;  %v2570_v38 = vld [vmem:[#allocation8 + $0x328] ss:$36 sps:$4 sm:$0xff]  }
 0x1c4   :  { %1639 = vmatprep.subr.bf16.mxu0 %v2500_v39  ;;  %1725 = vmatprep.subr.bf16.mxu1 %v2503_v40  ;;  %v2573_v39 = vld [vmem:[#allocation8 + $0x330] ss:$36 sps:$4 sm:$0xff]  }
 0x1c5   :  { %v2578_v40 = vld [vmem:[#allocation8 + $0x374] ss:$36 sps:$4 sm:$0xff]  }
 0x1c7   :  { %1640 = vmatpush1.bf16.msra.mxu0 %v2498_v62  ;;  %1726 = vmatpush1.bf16.msra.mxu1 %v2501_v61  ;;  %v2584_v62 = vld [vmem:[#allocation8 + $0x3bc] ss:$36 sps:$4 sm:$0xff]   ;;  %v2587_v61 = vld [vmem:[#allocation8 + $0x3c4] ss:$36 sps:$4 sm:$0xff]  }
 0x1c8   :  { %1754 = vmatprep.subr.bf16.mxu0 %v2506_v48  ;;  %1840 = vmatprep.subr.bf16.mxu1 %v2509_v49  ;;  %v2585_v48 = vld [vmem:[#allocation8 + $0x3c0] ss:$36 sps:$4 sm:$0xff]  }
 0x1c9   :  { %v2590_v49 = vld [vmem:[#allocation8 + $0x404] ss:$36 sps:$4 sm:$0xff]  }
 0x1ca   :  { %1658 = vmatmul.mubr.bf16.vlgmr.msra.gmra.mrb[0].mxu0 %v3035_v55  ;;  %1744 = vmatmul.mubr.bf16.vlgmr.msra.gmra.mrb[0].mxu1 %v3035_v55 }
 0x1cb   :  { %1755 = vmatpush1.bf16.msra.mxu0 %v2504_v51  ;;  %1786 = vmatprep.mubr.bf16.mxu0 %v3014_v8  ;;  %v2588_v51 = vld [vmem:[#allocation8 + $0x400] ss:$36 sps:$4 sm:$0xff]  }
 0x1cc   :  { %1841 = vmatpush1.bf16.msra.mxu1 %v2507_v56  ;;  %1872 = vmatprep.mubr.bf16.mxu1 %v3014_v8  ;;  %v2591_v56 = vld [vmem:[#allocation8 + $0x408] ss:$36 sps:$4 sm:$0xff]  }
 0x1cd   :  { %1756 = vmatprep.subr.bf16.mxu0 %v2512_v57  ;;  %1842 = vmatprep.subr.bf16.mxu1 %v2515_v52  ;;  %v2596_v57 = vld [vmem:[#allocation8 + $0x44c] ss:$36 sps:$4 sm:$0xff]   ;;  %v2599_v52 = vld [vmem:[#allocation8 + $0x454] ss:$36 sps:$4 sm:$0xff]  }
 0x1cf   :  { %1757 = vmatpush1.bf16.msra.mxu0 %v2510_v58  ;;  %v2594_v58 = vld [vmem:[#allocation8 + $0x448] ss:$36 sps:$4 sm:$0xff]  }
 0x1d0   :  { %1843 = vmatpush1.bf16.msra.mxu1 %v2513_v63  ;;  %1758 = vmatprep.subr.bf16.mxu0 %v2518_v60  ;;  %v2597_v63 = vld [vmem:[#allocation8 + $0x450] ss:$36 sps:$4 sm:$0xff]  }
 0x1d1   :  { %1844 = vmatprep.subr.bf16.mxu1 %v2521_v0  ;;  %v2602_v60 = vld [vmem:[#allocation8 + $0x494] ss:$36 sps:$4 sm:$0xff]   ;;  %v2605_v0 = vld [vmem:[#allocation8 + $0x49c] ss:$36 sps:$4 sm:$0xff]  }
 0x1d3   :  { %1759 = vmatpush1.bf16.msra.mxu0 %v2516_v1  ;;  %v2600_v1 = vld [vmem:[#allocation8 + $0x490] ss:$36 sps:$4 sm:$0xff]  }
 0x1d4   :  { %1845 = vmatpush1.bf16.msra.mxu1 %v2519_v3  ;;  %1760 = vmatprep.subr.bf16.mxu0 %v2524_v59  ;;  %v2603_v3 = vld [vmem:[#allocation8 + $0x498] ss:$36 sps:$4 sm:$0xff]  }
 0x1d5   :  { %1846 = vmatprep.subr.bf16.mxu1 %v2527_v4  ;;  %v2608_v59 = vld [vmem:[#allocation8 + $0x4dc] ss:$36 sps:$4 sm:$0xff]   ;;  %v2611_v4 = vld [vmem:[#allocation8 + $0x4e4] ss:$36 sps:$4 sm:$0xff]  }
 0x1d7   :  { %1761 = vmatpush1.bf16.msra.mxu0 %v2522_v5  ;;  %v2606_v5 = vld [vmem:[#allocation8 + $0x4d8] ss:$36 sps:$4 sm:$0xff]  }
 0x1d8   :  { %1847 = vmatpush1.bf16.msra.mxu1 %v2525_v6  ;;  %1762 = vmatprep.subr.bf16.mxu0 %v2530_v7  ;;  %v2609_v6 = vld [vmem:[#allocation8 + $0x4e0] ss:$36 sps:$4 sm:$0xff]  }
 0x1d9   :  { %1848 = vmatprep.subr.bf16.mxu1 %v2533_v2  ;;  %v2614_v7 = vld [vmem:[#allocation8 + $0x524] ss:$36 sps:$4 sm:$0xff]   ;;  %v2617_v2 = vld [vmem:[#allocation8 + $0x52c] ss:$36 sps:$4 sm:$0xff]  }
 0x1db   :  { %1763 = vmatpush1.bf16.msra.mxu0 %v2528_v9  ;;  %v2612_v9 = vld [vmem:[#allocation8 + $0x520] ss:$36 sps:$4 sm:$0xff]  }
 0x1dc   :  { %1849 = vmatpush1.bf16.msra.mxu1 %v2531_v10  ;;  %1764 = vmatprep.subr.bf16.mxu0 %v2536_v12  ;;  %v2615_v10 = vld [vmem:[#allocation8 + $0x528] ss:$36 sps:$4 sm:$0xff]  }
 0x1dd   :  { %1850 = vmatprep.subr.bf16.mxu1 %v2539_v13  ;;  %v2620_v12 = vld [vmem:[#allocation8 + $0x56c] ss:$36 sps:$4 sm:$0xff]   ;;  %v2623_v13 = vld [vmem:[#allocation8 + $0x574] ss:$36 sps:$4 sm:$0xff]  }
 0x1df   :  { %1765 = vmatpush1.bf16.msra.mxu0 %v2534_v53  ;;  %v2618_v53 = vld [vmem:[#allocation8 + $0x568] ss:$36 sps:$4 sm:$0xff]  }
 0x1e0   :  { %1851 = vmatpush1.bf16.msra.mxu1 %v2537_v54  ;;  %1766 = vmatprep.subr.bf16.mxu0 %v2542_v14  ;;  %v2621_v54 = vld [vmem:[#allocation8 + $0x570] ss:$36 sps:$4 sm:$0xff]  }
 0x1e1   :  { %1852 = vmatprep.subr.bf16.mxu1 %v2545_v15  ;;  %v2626_v14 = vld [vmem:[#allocation8 + $0x5b4] ss:$36 sps:$4 sm:$0xff]   ;;  %v2629_v15 = vld [vmem:[#allocation8 + $0x5bc] ss:$36 sps:$4 sm:$0xff]  }
 0x1e3   :  { %1767 = vmatpush1.bf16.msra.mxu0 %v2540_v17  ;;  %v2624_v17 = vld [vmem:[#allocation8 + $0x5b0] ss:$36 sps:$4 sm:$0xff]  }
 0x1e4   :  { %1853 = vmatpush1.bf16.msra.mxu1 %v2543_v18  ;;  %1768 = vmatprep.subr.bf16.mxu0 %v2548_v19  ;;  %v2632_v18 = vld [vmem:[#allocation8 + $0x5fc] ss:$36 sps:$4 sm:$0xff]   ;;  %v2635_v19 = vld [vmem:[#allocation8 + $0x604] ss:$36 sps:$4 sm:$0xff]  }
 0x1e5   :  { %1854 = vmatprep.subr.bf16.mxu1 %v2551_v20  ;;  %v2630_v20 = vld [vmem:[#allocation8 + $0x5f8] ss:$36 sps:$4 sm:$0xff]  }
 0x1e7   :  { %1769 = vmatpush1.bf16.msra.mxu0 %v2546_v21  ;;  %v2633_v21 = vld [vmem:[#allocation8 + $0x600] ss:$36 sps:$4 sm:$0xff]  }
 0x1e8   :  { %1855 = vmatpush1.bf16.msra.mxu1 %v2549_v22  ;;  %1770 = vmatprep.subr.bf16.mxu0 %v2554_v23  ;;  %v2638_v22 = vld [vmem:[#allocation8 + $0x644] ss:$36 sps:$4 sm:$0xff]   ;;  %v2641_v23 = vld [vmem:[#allocation8 + $0x64c] ss:$36 sps:$4 sm:$0xff]  }
 0x1e9   :  { %1856 = vmatprep.subr.bf16.mxu1 %v2557_v24  ;;  %v2636_v24 = vld [vmem:[#allocation8 + $0x640] ss:$36 sps:$4 sm:$0xff]  }
 0x1eb   :  { %1771 = vmatpush1.bf16.msra.mxu0 %v2552_v25  ;;  %v2639_v25 = vld [vmem:[#allocation8 + $0x648] ss:$36 sps:$4 sm:$0xff]  }
 0x1ec   :  { %1857 = vmatpush1.bf16.msra.mxu1 %v2555_v26  ;;  %1772 = vmatprep.subr.bf16.mxu0 %v2560_v27  ;;  %v2644_v26 = vld [vmem:[#allocation8 + $0x68c] ss:$36 sps:$4 sm:$0xff]   ;;  %v2647_v27 = vld [vmem:[#allocation8 + $0x694] ss:$36 sps:$4 sm:$0xff]  }
 0x1ed   :  { %1858 = vmatprep.subr.bf16.mxu1 %v2563_v28  ;;  %v2642_v28 = vld [vmem:[#allocation8 + $0x688] ss:$36 sps:$4 sm:$0xff]  }
 0x1ef   :  { %1773 = vmatpush1.bf16.msra.mxu0 %v2558_v30  ;;  %v2645_v30 = vld [vmem:[#allocation8 + $0x690] ss:$36 sps:$4 sm:$0xff]  }
 0x1f0   :  { %1859 = vmatpush1.bf16.msra.mxu1 %v2561_v31  ;;  %1774 = vmatprep.subr.bf16.mxu0 %v2566_v32  ;;  %v2648_v31 = vld [vmem:[#allocation8 + $0x260] ss:$36 sps:$4 sm:$0xff]  }
 0x1f1   :  { %1860 = vmatprep.subr.bf16.mxu1 %v2569_v33  ;;  %v2649_v32 = vld [vmem:[#allocation8 + $0x20] ss:$36 sps:$4 sm:$0xff]  }
 0x1f2   :  { %v2650_v33 = vld [vmem:[#allocation8 + $0x4a0] ss:$36 sps:$4 sm:$0xff]  }
 0x1f3   :  { %1775 = vmatpush1.bf16.msra.mxu0 %v2564_v34  ;;  %v2826_v34 = vmov 0.0  }
 0x1f4   :  { %1861 = vmatpush1.bf16.msra.mxu1 %v2567_v35  ;;  %1776 = vmatprep.subr.bf16.mxu0 %v2572_v36  ;;  %v2651_v35 = vld [vmem:[#allocation8 + $0x2a8] ss:$36 sps:$4 sm:$0xff]  }
 0x1f5   :  { %1862 = vmatprep.subr.bf16.mxu1 %v2575_v37  ;;  %v2652_v36 = vld [vmem:[#allocation8 + $0x68] ss:$36 sps:$4 sm:$0xff]  }
 0x1f6   :  { %v2653_v37 = vld [vmem:[#allocation8 + $0x4e8] ss:$36 sps:$4 sm:$0xff]  }
 0x1f7   :  { %1777 = vmatpush1.bf16.msra.mxu0 %v2570_v38  ;;  %v2654_v38 = vld [vmem:[#allocation8 + $0x2f0] ss:$36 sps:$4 sm:$0xff]  }
 0x1f8   :  { %1863 = vmatpush1.bf16.msra.mxu1 %v2573_v39  ;;  %1778 = vmatprep.subr.bf16.mxu0 %v2578_v40  ;;  %v2655_v39 = vld [vmem:[#allocation8 + $0xb0] ss:$36 sps:$4 sm:$0xff]  }
 0x1f9   :  { %1864 = vmatprep.subr.bf16.mxu1 %v2581_v41  ;;  %v2656_v40 = vld [vmem:[#allocation8 + $0x530] ss:$36 sps:$4 sm:$0xff]   ;;  %v2657_v41 = vld [vmem:[#allocation8 + $0x338] ss:$36 sps:$4 sm:$0xff]  }
 0x1fb   :  { %1779 = vmatpush1.bf16.msra.mxu0 %v2576_v42  ;;  %v2658_v42 = vld [vmem:[#allocation8 + $0xf8] ss:$36 sps:$4 sm:$0xff]  }
 0x1fc   :  { %1865 = vmatpush1.bf16.msra.mxu1 %v2579_v43  ;;  %1780 = vmatprep.subr.bf16.mxu0 %v2584_v62  ;;  %v2659_v43 = vld [vmem:[#allocation8 + $0x578] ss:$36 sps:$4 sm:$0xff]   ;;  %v2661_v62 = vld [vmem:[#allocation8 + $0x140] ss:$36 sps:$4 sm:$0xff]  }
 0x1fd   :  { %1866 = vmatprep.subr.bf16.mxu1 %v2587_v61  ;;  %v2662_v61 = vld [vmem:[#allocation8 + $0x5c0] ss:$36 sps:$4 sm:$0xff]  }
 0x1ff   :  { %1781 = vmatpush1.bf16.msra.mxu0 %v2582_v44  ;;  %v2663_v44 = vld [vmem:[#allocation8 + $0x3c8] ss:$36 sps:$4 sm:$0xff]  }
 0x200   :  { %1867 = vmatpush1.bf16.msra.mxu1 %v2585_v48  ;;  %1782 = vmatprep.subr.bf16.mxu0 %v2590_v49  ;;  %v2664_v48 = vld [vmem:[#allocation8 + $0x188] ss:$36 sps:$4 sm:$0xff]  }
 0x201   :  { %1868 = vmatprep.subr.bf16.mxu1 %v2593_v50  ;;  %v2665_v49 = vld [vmem:[#allocation8 + $0x608] ss:$36 sps:$4 sm:$0xff]   ;;  %v2666_v50 = vld [vmem:[#allocation8 + $0x410] ss:$36 sps:$4 sm:$0xff]  }
 0x203   :  { %1783 = vmatpush1.bf16.msra.mxu0 %v2588_v51  ;;  %v2667_v51 = vld [vmem:[#allocation8 + $0x1d0] ss:$36 sps:$4 sm:$0xff]  }
 0x204   :  { %1869 = vmatpush1.bf16.msra.mxu1 %v2591_v56  ;;  %1784 = vmatprep.subr.bf16.mxu0 %v2596_v57  ;;  %v2668_v56 = vld [vmem:[#allocation8 + $0x650] ss:$36 sps:$4 sm:$0xff]   ;;  %v2669_v57 = vld [vmem:[#allocation8 + $0x458] ss:$36 sps:$4 sm:$0xff]  }
 0x205   :  { %1870 = vmatprep.subr.bf16.mxu1 %v2599_v52  ;;  %v2670_v52 = vld [vmem:[#allocation8 + $0x218] ss:$36 sps:$4 sm:$0xff]  }
 0x207   :  { %1785 = vmatpush1.bf16.msra.mxu0 %v2594_v58  ;;  %v2671_v58 = vld [vmem:[#allocation8 + $0x698] ss:$36 sps:$4 sm:$0xff]  }
 0x208   :  { %1871 = vmatpush1.bf16.msra.mxu1 %v2597_v63  ;;  %1797 = vmatprep.subr.bf16.mxu0 %v2602_v60  ;;  %v429_v63 = vld [vmem:[#allocation10] sm:$0xff]  ;;  %v447_v60 = vsub.s32 3, %v2982_v45 }
 0x209   :  { %1883 = vmatprep.subr.bf16.mxu1 %v2605_v0  ;;  %v436_v0 = vrot.slane %v429_v63, %v2988_v47 }
 0x20a   :  { %1787 = vmatmul.mubr.bf16.vlgmr.msra.gmra.mrb[4].mxu0 %v3016_v11 }
 0x20b   :  { %1873 = vmatmul.mubr.bf16.vlgmr.msra.gmra.mrb[4].mxu1 %v3016_v11  ;;  %1798 = vmatpush1.bf16.msra.mxu0 %v2600_v1  ;;  %v444_v1 = vrot.slane %v429_v63, %v3025_v29 }
 0x20c   :  { %1884 = vmatpush1.bf16.msra.mxu1 %v2603_v3  ;;  %1799 = vmatprep.subr.bf16.mxu0 %v2608_v59  ;;  %v440_v3 = vrot.slane %v429_v63, %v2985_v46  ;;  %v448_v59 = vrot.slane %v429_v63, %v447_v60 }
 0x20d   :  { %1885 = vmatprep.subr.bf16.mxu1 %v2611_v4  ;;  %1829 = vmatprep.mubr.bf16.mxu0 %v2825_v16 }
 0x20e   :  { %1915 = vmatprep.mubr.bf16.mxu1 %v2825_v16  ;;  %v2627_v16 = vld [vmem:[#allocation8 + $0x5b8] ss:$36 sps:$4 sm:$0xff]  }
 0x20f   :  { %1800 = vmatpush1.bf16.msra.mxu0 %v2606_v5 }
 0x210   :  { %1886 = vmatpush1.bf16.msra.mxu1 %v2609_v6  ;;  %1801 = vmatprep.subr.bf16.mxu0 %v2614_v7 }
 0x211   :  { %1887 = vmatprep.subr.bf16.mxu1 %v2617_v2 }
 0x213   :  { %1802 = vmatpush1.bf16.msra.mxu0 %v2612_v9 }
 0x214   :  { %1888 = vmatpush1.bf16.msra.mxu1 %v2615_v10  ;;  %1803 = vmatprep.subr.bf16.mxu0 %v2620_v12 }
 0x215   :  { %1889 = vmatprep.subr.bf16.mxu1 %v2623_v13 }
 0x217   :  { %1804 = vmatpush1.bf16.msra.mxu0 %v2618_v53 }
 0x218   :  { %1890 = vmatpush1.bf16.msra.mxu1 %v2621_v54  ;;  %1805 = vmatprep.subr.bf16.mxu0 %v2626_v14  ;;  %v451_v14 = vsub.s32 4, %v2982_v45 }
 0x219   :  { %1891 = vmatprep.subr.bf16.mxu1 %v2629_v15  ;;  %v459_v15 = vsub.s32 6, %v2982_v45 }
 0x21b   :  { %1806 = vmatpush1.bf16.msra.mxu0 %v2624_v17  ;;  %v455_v17 = vsub.s32 5, %v2982_v45 }
 0x21c   :  { %1892 = vmatpush1.bf16.msra.mxu1 %v2627_v16  ;;  %1807 = vmatprep.subr.bf16.mxu0 %v2632_v18  ;;  %v463_v16 = vsub.s32 7, %v2982_v45  ;;  %v452_v18 = vrot.slane %v429_v63, %v451_v14 }
 0x21d   :  { %1893 = vmatprep.subr.bf16.mxu1 %v2635_v19  ;;  %v460_v19 = vrot.slane %v429_v63, %v459_v15 }
 0x21f   :  { %1808 = vmatpush1.bf16.msra.mxu0 %v2630_v20  ;;  %v456_v20 = vrot.slane %v429_v63, %v455_v17 }
 0x220   :  { %1894 = vmatpush1.bf16.msra.mxu1 %v2633_v21  ;;  %1809 = vmatprep.subr.bf16.mxu0 %v2638_v22  ;;  %v464_v21 = vrot.slane %v429_v63, %v463_v16 }
 0x221   :  { %1895 = vmatprep.subr.bf16.mxu1 %v2641_v23 }
 0x223   :  { %1810 = vmatpush1.bf16.msra.mxu0 %v2636_v24 }
 0x224   :  { %1896 = vmatpush1.bf16.msra.mxu1 %v2639_v25  ;;  %1811 = vmatprep.subr.bf16.mxu0 %v2644_v26 }
 0x225   :  { %1897 = vmatprep.subr.bf16.mxu1 %v2647_v27 }
 0x227   :  { %1812 = vmatpush1.bf16.msra.mxu0 %v2642_v28 }
 0x228   :  { %1898 = vmatpush1.bf16.msra.mxu1 %v2645_v30  ;;  %2262 = vmatprep.subr.bf16.mxu0 %v2648_v31 }
 0x229   :  { %2293 = vmatprep.subr.bf16.mxu1 %v2826_v34 }
 0x22a   :  { %1830 = vmatmul.mubr.bf16.vlgmr.msra.gmra.mrb[4].mxu0 %v3035_v55 }
 0x22b   :  { %1916 = vmatmul.mubr.bf16.vlgmr.msra.gmra.mrb[4].mxu1 %v3035_v55  ;;  %2263 = vmatpush3.bf16.msra.mxu0 %v2649_v32 }
 0x22c   :  { %1958 = vmatprep.mubr.bf16.mxu0 %v3014_v8  ;;  %2294 = vmatpush3.bf16.msra.mxu1 %v2650_v33  ;;  %v2660_v8 = vld [vmem:[#allocation8 + $0x380] ss:$36 sps:$4 sm:$0xff]  }
 0x22d   :  { %2264 = vmatprep.subr.bf16.mxu0 %v2651_v35  ;;  %2295 = vmatprep.subr.bf16.mxu1 %v2826_v34 }
 0x22e   :  { %2309 = vmatprep.mubr.msk.bf16.mxu1 %vm2827_vm1, %v2826_v34 }
 0x22f   :  { %2265 = vmatpush3.bf16.msra.mxu0 %v2652_v36 }
 0x230   :  { %2296 = vmatpush3.bf16.msra.mxu1 %v2653_v37  ;;  %2266 = vmatprep.subr.bf16.mxu0 %v2654_v38 }
 0x231   :  { %2297 = vmatprep.subr.bf16.mxu1 %v2826_v34 }
 0x233   :  { %2267 = vmatpush3.bf16.msra.mxu0 %v2655_v39 }
 0x234   :  { %2298 = vmatpush3.bf16.msra.mxu1 %v2656_v40  ;;  %2268 = vmatprep.subr.bf16.mxu0 %v2657_v41  ;;  %v2045_v40 = vld [vmem:[#allocation10 + $0x8] ss:$0 sm:$0xff] }
 0x235   :  { %2299 = vmatprep.subr.bf16.mxu1 %v2826_v34 }
 0x237   :  { %2269 = vmatpush3.bf16.msra.mxu0 %v2658_v42 }
 0x238   :  { %2300 = vmatpush3.bf16.msra.mxu1 %v2659_v43  ;;  %2270 = vmatprep.subr.bf16.mxu0 %v2660_v8 }
 0x239   :  { %2301 = vmatprep.subr.bf16.mxu1 %v2826_v34 }
 0x23b   :  { %2271 = vmatpush3.bf16.msra.mxu0 %v2661_v62 }
 0x23c   :  { %2302 = vmatpush3.bf16.msra.mxu1 %v2662_v61  ;;  %2272 = vmatprep.subr.bf16.mxu0 %v2663_v44 }
 0x23d   :  { %2303 = vmatprep.subr.bf16.mxu1 %v2826_v34 }
 0x23f   :  { %2273 = vmatpush3.bf16.msra.mxu0 %v2664_v48 }
 0x240   :  { %2304 = vmatpush3.bf16.msra.mxu1 %v2665_v49  ;;  %2274 = vmatprep.subr.bf16.mxu0 %v2666_v50 }
 0x241   :  { %2305 = vmatprep.subr.bf16.mxu1 %v2826_v34 }
 0x243   :  { %2275 = vmatpush3.bf16.msra.mxu0 %v2667_v51 }
 0x244   :  { %2306 = vmatpush3.bf16.msra.mxu1 %v2668_v56  ;;  %2276 = vmatprep.subr.bf16.mxu0 %v2669_v57 }
 0x245   :  { %2307 = vmatprep.subr.bf16.mxu1 %v2826_v34 }
 0x247   :  { %2277 = vmatpush3.bf16.msra.mxu0 %v2670_v52 }
 0x248   :  { %2308 = vmatpush3.bf16.msra.mxu1 %v2671_v58 }
 0x24a   :  { %1959 = vmatmul.mubr.bf16.vlgmr.msra.gmra.mrb[8].mxu0 %v3016_v11 }
 0x24b   :  { %2310 = vmatmul.mubr.bf16.vlgmr.msra.gmra.mrb[8].mxu1 %v3035_v55 }
 0x29d   :  { %v1659_v4 = vpop.f32.mrb[0].mxu0  ;;  %v1745_v5 = vpop.f32.mrb[0].mxu1 }
 0x29e   :  { %v2313_v6 = vadd.f32 %v1659_v4, %v436_v0  ;;  %v2317_v7 = vadd.f32 %v1745_v5, %v444_v1  ;;  %v1661_v2 = vpop.f32.mrb[1].mxu0  ;;  %v1747_v9 = vpop.f32.mrb[1].mxu1 }
 0x29f   :  { %v2314_v10 = vadd.f32 %v1661_v2, %v440_v3  ;;  %v2318_v11 = vadd.f32 %v1747_v9, %v448_v59  ;;  %v1663_v12 = vpop.f32.mrb[2].mxu0  ;;  %v1749_v55 = vpop.f32.mrb[2].mxu1 }
 0x2a0   :  { %2008 = vst [vmem:[#allocation11] sm:$0xff] %v2313_v6  ;;  %2010 = vst [vmem:[#allocation11 + $0x10] sm:$0xff] %v2317_v7  ;;  %v2315_v13 = vadd.f32 %v1663_v12, %v436_v0  ;;  %v2319_v53 = vadd.f32 %v1749_v55, %v444_v1  ;;  %v1665_v47 = vpop.f32.mrb[3].mxu0  ;;  %v1751_v54 = vpop.f32.mrb[3].mxu1 }
 0x2a1   :  { %2009 = vst [vmem:[#allocation11 + $0x8] sm:$0xff] %v2314_v10  ;;  %2011 = vst [vmem:[#allocation11 + $0x18] sm:$0xff] %v2318_v11  ;;  %v2316_v46 = vadd.f32 %v1665_v47, %v440_v3  ;;  %v2320_v29 = vadd.f32 %v1751_v54, %v448_v59 }
 0x2a2   :  { %2017 = vst [vmem:[#allocation11 + $0x48] sm:$0x3] %v2315_v13  ;;  %2019 = vst [vmem:[#allocation11 + $0x58] sm:$0x3] %v2319_v53 }
 0x2a3   :  { %2018 = vst [vmem:[#allocation11 + $0x50] sm:$0x3] %v2316_v46  ;;  %2020 = vst [vmem:[#allocation11 + $0x60] sm:$0x3] %v2320_v29 }
 0x2fd   :  { %v1831_v22 = vpop.f32.mrb[4].mxu0 }
 0x2fe   :  { %v2321_v23 = vadd.f32 %v1831_v22, %v452_v18  ;;  %v1917_v24 = vpop.f32.mrb[4].mxu1  ;;  %v1833_v25 = vpop.f32.mrb[5].mxu0 }
 0x2ff   :  { %v2325_v26 = vadd.f32 %v1917_v24, %v460_v19  ;;  %v2322_v27 = vadd.f32 %v1833_v25, %v456_v20  ;;  %v1919_v28 = vpop.f32.mrb[5].mxu1  ;;  %v1835_v30 = vpop.f32.mrb[6].mxu0 }
 0x300   :  { %2012 = vst [vmem:[#allocation11 + $0x20] sm:$0xff] %v2321_v23  ;;  %v2326_v31 = vadd.f32 %v1919_v28, %v464_v21  ;;  %v2323_v32 = vadd.f32 %v1835_v30, %v452_v18  ;;  %v1921_v33 = vpop.f32.mrb[6].mxu1  ;;  %v1837_v34 = vpop.f32.mrb[7].mxu0 }
 0x301   :  { %2014 = vst [vmem:[#allocation11 + $0x30] sm:$0xff] %v2325_v26  ;;  %2013 = vst [vmem:[#allocation11 + $0x28] sm:$0xff] %v2322_v27  ;;  %v2327_v45 = vadd.f32 %v1921_v33, %v460_v19  ;;  %v2324_v35 = vadd.f32 %v1837_v34, %v456_v20  ;;  %v1923_v36 = vpop.f32.mrb[7].mxu1 }
 0x302   :  { %2015 = vst [vmem:[#allocation11 + $0x38] sm:$0xff] %v2326_v31  ;;  %2021 = vst [vmem:[#allocation11 + $0x68] sm:$0x3] %v2323_v32  ;;  %v2328_v37 = vadd.f32 %v1923_v36, %v464_v21 }
 0x303   :  { %2023 = vst [vmem:[#allocation11 + $0x78] sm:$0x3] %v2327_v45  ;;  %2022 = vst [vmem:[#allocation11 + $0x70] sm:$0x3] %v2324_v35 }
 0x304   :  { %2024 = vst [vmem:[#allocation11 + $0x80] sm:$0x3] %v2328_v37 }
 0x31d   :  { %v2278_v38 = vpop.f32.mrb[8].mxu0 }
 0x31e   :  { %v2001_v39 = vpop.f32.mrb[8].mxu1  ;;  %v2279_v41 = vpop.f32.mrb[9].mxu0 }
 0x31f   :  { %v2280_v42 = vadd.f32 %v2279_v41, %v2278_v38  ;;  %v2311_v43 = vpop.f32.mrb[9].mxu1  ;;  %v2281_v8 = vpop.f32.mrb[10].mxu0 }
 0x320   :  { %v2004_v62 = vpop.f32.mrb[10].mxu1  ;;  %v2282_v61 = vpop.f32.mrb[11].mxu0 }
 0x321   :  { %v1961_v44 = vadd.f32 %v2280_v42, %v2045_v40  ;;  %v2283_v48 = vadd.f32 %v2282_v61, %v2281_v8  ;;  %v2312_v49 = vpop.f32.mrb[11].mxu1 }
 0x323   :  { %v2002_v50 = vadd.f32 %v2001_v39, %v1961_v44  ;;  %v1964_v51 = vadd.f32 %v2283_v48, %v2045_v40 }
 0x325   :  { %2016 = vst [vmem:[#allocation11 + $0x40] sm:$0xff] %v2002_v50  ;;  %v2005_v56 = vadd.f32 %v2004_v62, %v1964_v51 }
 0x327   :  { %2025 = vst [vmem:[#allocation11 + $0x88] sm:$0x3] %v2005_v56 }
 0x328   :  { %2797 = shalt.err (!%p2794_p2)
}
 0x329   :  { %s2798_s8 = scalar_lea.hbm %s3075_s5, 2304 }
 0x32a   :  { %p2799_p3 = scmp.ne.s32.totalorder %s3075_s5, %s2798_s8  ;;  %p2802_p4 = scmp.lt.u32.totalorder %s2798_s8, %s3075_s5 }
 0x32c   :  { %p2804_p5 = pnand %p2802_p4, %p2799_p3 }
 0x32e   :  { %2807 = shalt.err (!%p2804_p5)
}
 0x32f   :  { %s2829_s13 = smov 1152   ;;  %s2830_s14 = smov 72  }
 0x330   :  { %2037 = dma.vmem_to_hbm [thread:$0]  %s2032_s21, 2304, %s3075_s5, [#allocation4], %s2829_s13, %s2829_s13, %s2830_s14  }
 0x331   :  { %2814 = dma.done.wait [#allocation4], 2304  }
 0x332   :  { %2815 = vsyncadd [#allocation4], 4294964992 }
 0x333   :  { %2041 = vsyncpa [#allocation3], 1 }
 0x334   :  { %2042 = vsyncpa [#allocation6], 1 }
 0x335   :  { %2043 = vsyncpa [#allocation9], 1 }
 0x336   :  { %2044 = vsyncpa [#allocation4], 1 }

// kernel: fsra_forward.9
= control target key start
LH: loop header
LB: loop body
LE: loop exit
PB: predicated region body
PF: predicated region fallthrough
CT: control target
= control target key end

     0   :  { %8 = vsyncpa [#allocation3], 0  ;;  %s1908_s0 = inlined_call_operand.hbm [shape: f32[8,768], index: 0, kind: input, shape index: {}]   ;;  %s1909_s1 = inlined_call_operand.hbm [shape: bf16[768,384], index: 1, kind: input, shape index: {}]   ;;  %s1910_s2 = inlined_call_operand.hbm [shape: f32[1,384], index: 2, kind: input, shape index: {}]   ;;  %s1911_s3 = inlined_call_operand.hbm [shape: f32[8,384], index: 3, kind: output, shape index: {}]  }
   0x1   :  { %9 = vsyncpa [#allocation6], 0 }
   0x2   :  { %10 = vsyncpa [#allocation4], 0  ;;  %s1814_s12 = smov [#allocation5]   ;;  %s1720_s16 = scalar_lea.hbm %s1909_s1, 18432 }
   0x3   :  { %s26_s13 = sshll.u32 %s1814_s12, 4  ;;  %p1721_p0 = scmp.ne.s32.totalorder %s1909_s1, %s1720_s16  ;;  %s27_s13 = int_to_ptr.vmem [resolvable:$true] %s26_s13 }
   0x4   :  { %p1724_p1 = scmp.lt.u32.totalorder %s1720_s16, %s1909_s1 }
   0x6   :  { %p1726_p2 = pnand %p1724_p1, %p1721_p0 }
   0x8   :  { %1729 = shalt.err (!%p1726_p2)
}
   0x9   :  { %s1730_s21 = scalar_lea.vmem %s27_s13, 18432  ;;  %p1735_p4 = scmp.lt.s32.totalorder %s27_s13, %s27_s13 }
   0xa   :  { %p1731_p3 = scmp.ne.s32.totalorder %s27_s13, %s1730_s21  ;;  %p1736_p5 = scmp.lt.s32.totalorder %s1730_s21, %s1730_s21 }
   0xc   :  { %p1737_p6 = por %p1736_p5, %p1735_p4 }
   0xe   :  { %p1738_p7 = pnand %p1737_p6, %p1731_p3 }
  0x10   :  { %1741 = shalt.err (!%p1738_p7)
}
  0x11   :  { %s1815_s22 = smov 192   ;;  %s1816_s23 = smov 12  }
  0x12   :  { %32 = dma.hbm_to_vmem [thread:$0]  %s1909_s1, 18432, %s27_s13, [#allocation6], %s1815_s22, %s1815_s22, %s1816_s23  }
  0x13   :  { %s1817_s26 = smov [#allocation2]   ;;  %s1818_s28 = smov [#allocation7]  }
  0x14   :  { %s17_s27 = sshll.u32 %s1817_s26, 4  ;;  %s39_s29 = sshll.u32 %s1818_s28, 4  ;;  %s18_s27 = int_to_ptr.vmem [resolvable:$true] %s17_s27  ;;  %s40_s29 = int_to_ptr.vmem [resolvable:$true] %s39_s29 }
  0x15   :  { %s1742_s5 = scalar_lea.hbm %s1908_s0, 768 }
  0x16   :  { %p1743_p8 = scmp.ne.s32.totalorder %s1908_s0, %s1742_s5  ;;  %p1746_p9 = scmp.lt.u32.totalorder %s1742_s5, %s1908_s0 }
  0x18   :  { %p1748_p10 = pnand %p1746_p9, %p1743_p8 }
  0x1a   :  { %1751 = shalt.err (!%p1748_p10)
}
  0x1b   :  { %s1752_s1 = scalar_lea.vmem %s18_s27, 768  ;;  %p1757_p12 = scmp.lt.s32.totalorder %s18_s27, %s18_s27 }
  0x1c   :  { %p1753_p11 = scmp.ne.s32.totalorder %s18_s27, %s1752_s1  ;;  %p1758_p13 = scmp.lt.s32.totalorder %s1752_s1, %s1752_s1 }
  0x1e   :  { %p1759_p0 = por %p1758_p13, %p1757_p12 }
  0x20   :  { %p1760_p1 = pnand %p1759_p0, %p1753_p11 }
  0x22   :  { %1763 = shalt.err (!%p1760_p1)
}
  0x23   :  { %20 = dma.hbm_to_vmem [thread:$0]  %s1908_s0, 768, %s18_s27, [#allocation3]  }
  0x24   :  { %s1764_s14 = scalar_lea.hbm %s1910_s2, 48 }
  0x25   :  { %p1765_p2 = scmp.ne.s32.totalorder %s1910_s2, %s1764_s14  ;;  %p1768_p3 = scmp.lt.u32.totalorder %s1764_s14, %s1910_s2 }
  0x27   :  { %p1770_p4 = pnand %p1768_p3, %p1765_p2 }
  0x29   :  { %1773 = shalt.err (!%p1770_p4)
}
  0x2a   :  { %s1774_s19 = scalar_lea.vmem %s40_s29, 48  ;;  %s1778_s20 = scalar_lea.vmem %s40_s29, 64 }
  0x2b   :  { %p1775_p5 = scmp.ne.s32.totalorder %s40_s29, %s1774_s19  ;;  %p1779_p6 = scmp.lt.s32.totalorder %s40_s29, %s40_s29 }
  0x2c   :  { %p1780_p7 = scmp.lt.s32.totalorder %s1778_s20, %s1774_s19 }
  0x2e   :  { %p1781_p8 = por %p1780_p7, %p1779_p6 }
  0x30   :  { %p1782_p9 = pnand %p1781_p8, %p1775_p5 }
  0x32   :  { %1785 = shalt.err (!%p1782_p9)
}
  0x33   :  { %42 = dma.hbm_to_vmem [thread:$0]  %s1910_s2, 48, %s40_s29, [#allocation6]  }
  0x34   :  { %1808 = dma.done.wait [#allocation3], 768  }
  0x35   :  { %1809 = vsyncadd [#allocation3], 4294966528 }
  0x36   :  { %1810 = dma.done.wait [#allocation6], 18480  }
  0x37   :  { %1811 = vsyncadd [#allocation6], 4294948816  ;;  %v1528_v0 = vld [vmem:[#allocation5 + $0x4] ss:$12 sps:$4 sm:$0xff]   ;;  %v1532_v2 = vld [vmem:[#allocation5] ss:$12 sps:$4 sm:$0xff]  }
  0x38   :  { %v1530_v1 = vld [vmem:[#allocation5 + $0x184] ss:$12 sps:$4 sm:$0xff]   ;;  %1042 = vmatprep.subr.bf16.mxu1 %v1528_v0  ;;  %v1533_v3 = vld [vmem:[#allocation5 + $0x180] ss:$12 sps:$4 sm:$0xff]   ;;  %v1534_v4 = vld [vmem:[#allocation5 + $0x1c] ss:$12 sps:$4 sm:$0xff]  }
  0x39   :  { %1083 = vmatprep.subr.bf16.mxu0 %v1530_v1  ;;  %1043 = vmatpush1.bf16.msra.mxu1 %v1532_v2  ;;  %v1536_v5 = vld [vmem:[#allocation5 + $0x19c] ss:$12 sps:$4 sm:$0xff]   ;;  %v1538_v6 = vld [vmem:[#allocation5 + $0x18] ss:$12 sps:$4 sm:$0xff]   ;;  %v1540_v8 = vld [vmem:[#allocation5 + $0x34] ss:$12 sps:$4 sm:$0xff]  }
  0x3a   :  { %1084 = vmatpush1.bf16.msra.mxu0 %v1533_v3  ;;  %1044 = vmatprep.subr.bf16.mxu1 %v1534_v4  ;;  %v1539_v7 = vld [vmem:[#allocation5 + $0x198] ss:$12 sps:$4 sm:$0xff]   ;;  %v1542_v9 = vld [vmem:[#allocation5 + $0x1b4] ss:$12 sps:$4 sm:$0xff]   ;;  %v1544_v10 = vld [vmem:[#allocation5 + $0x30] ss:$12 sps:$4 sm:$0xff]  }
  0x3b   :  { %1085 = vmatprep.subr.bf16.mxu0 %v1536_v5  ;;  %v1545_v11 = vld [vmem:[#allocation5 + $0x1b0] ss:$12 sps:$4 sm:$0xff]   ;;  %v1546_v12 = vld [vmem:[#allocation5 + $0x4c] ss:$12 sps:$4 sm:$0xff]   ;;  %v1550_v14 = vld [vmem:[#allocation5 + $0x48] ss:$12 sps:$4 sm:$0xff]  }
  0x3c   :  { %v1548_v13 = vld [vmem:[#allocation5 + $0x1cc] ss:$12 sps:$4 sm:$0xff]   ;;  %v1551_v15 = vld [vmem:[#allocation5 + $0x1c8] ss:$12 sps:$4 sm:$0xff]   ;;  %v1552_v16 = vld [vmem:[#allocation5 + $0x64] ss:$12 sps:$4 sm:$0xff]  }
  0x3d   :  { %1045 = vmatpush1.bf16.msra.mxu1 %v1538_v6  ;;  %v1554_v17 = vld [vmem:[#allocation5 + $0x1e4] ss:$12 sps:$4 sm:$0xff]   ;;  %v1556_v18 = vld [vmem:[#allocation5 + $0x60] ss:$12 sps:$4 sm:$0xff]   ;;  %v1558_v20 = vld [vmem:[#allocation5 + $0x7c] ss:$12 sps:$4 sm:$0xff]  }
  0x3e   :  { %1086 = vmatpush1.bf16.msra.mxu0 %v1539_v7  ;;  %1046 = vmatprep.subr.bf16.mxu1 %v1540_v8  ;;  %v1557_v19 = vld [vmem:[#allocation5 + $0x1e0] ss:$12 sps:$4 sm:$0xff]   ;;  %v1560_v21 = vld [vmem:[#allocation5 + $0x1fc] ss:$12 sps:$4 sm:$0xff]   ;;  %v1562_v22 = vld [vmem:[#allocation5 + $0x78] ss:$12 sps:$4 sm:$0xff]  }
  0x3f   :  { %1087 = vmatprep.subr.bf16.mxu0 %v1542_v9  ;;  %v1563_v23 = vld [vmem:[#allocation5 + $0x1f8] ss:$12 sps:$4 sm:$0xff]   ;;  %v1564_v24 = vld [vmem:[#allocation5 + $0x94] ss:$12 sps:$4 sm:$0xff]   ;;  %v1568_v26 = vld [vmem:[#allocation5 + $0x90] ss:$12 sps:$4 sm:$0xff]  }
  0x40   :  { %v1566_v25 = vld [vmem:[#allocation5 + $0x214] ss:$12 sps:$4 sm:$0xff]   ;;  %v1569_v27 = vld [vmem:[#allocation5 + $0x210] ss:$12 sps:$4 sm:$0xff]   ;;  %v1570_v28 = vld [vmem:[#allocation5 + $0xac] ss:$12 sps:$4 sm:$0xff]  }
  0x41   :  { %1047 = vmatpush1.bf16.msra.mxu1 %v1544_v10  ;;  %v1572_v29 = vld [vmem:[#allocation5 + $0x22c] ss:$12 sps:$4 sm:$0xff]   ;;  %v1574_v30 = vld [vmem:[#allocation5 + $0xa8] ss:$12 sps:$4 sm:$0xff]   ;;  %v1576_v32 = vld [vmem:[#allocation5 + $0xc4] ss:$12 sps:$4 sm:$0xff]  }
  0x42   :  { %1088 = vmatpush1.bf16.msra.mxu0 %v1545_v11  ;;  %1048 = vmatprep.subr.bf16.mxu1 %v1546_v12  ;;  %v1575_v31 = vld [vmem:[#allocation5 + $0x228] ss:$12 sps:$4 sm:$0xff]   ;;  %v1578_v33 = vld [vmem:[#allocation5 + $0x244] ss:$12 sps:$4 sm:$0xff]   ;;  %v1580_v34 = vld [vmem:[#allocation5 + $0xc0] ss:$12 sps:$4 sm:$0xff]  }
  0x43   :  { %1089 = vmatprep.subr.bf16.mxu0 %v1548_v13  ;;  %v1581_v35 = vld [vmem:[#allocation5 + $0x240] ss:$12 sps:$4 sm:$0xff]   ;;  %v1582_v36 = vld [vmem:[#allocation5 + $0xdc] ss:$12 sps:$4 sm:$0xff]   ;;  %v1586_v38 = vld [vmem:[#allocation5 + $0xd8] ss:$12 sps:$4 sm:$0xff]  }
  0x44   :  { %v1584_v37 = vld [vmem:[#allocation5 + $0x25c] ss:$12 sps:$4 sm:$0xff]   ;;  %v1587_v39 = vld [vmem:[#allocation5 + $0x258] ss:$12 sps:$4 sm:$0xff]   ;;  %v1588_v40 = vld [vmem:[#allocation5 + $0xf4] ss:$12 sps:$4 sm:$0xff]  }
  0x45   :  { %1049 = vmatpush1.bf16.msra.mxu1 %v1550_v14  ;;  %v1590_v41 = vld [vmem:[#allocation5 + $0x274] ss:$12 sps:$4 sm:$0xff]   ;;  %v1592_v42 = vld [vmem:[#allocation5 + $0xf0] ss:$12 sps:$4 sm:$0xff]   ;;  %v1594_v44 = vld [vmem:[#allocation5 + $0x10c] ss:$12 sps:$4 sm:$0xff]  }
  0x46   :  { %1090 = vmatpush1.bf16.msra.mxu0 %v1551_v15  ;;  %1050 = vmatprep.subr.bf16.mxu1 %v1552_v16  ;;  %v1593_v43 = vld [vmem:[#allocation5 + $0x270] ss:$12 sps:$4 sm:$0xff]   ;;  %v1596_v45 = vld [vmem:[#allocation5 + $0x28c] ss:$12 sps:$4 sm:$0xff]   ;;  %v1598_v47 = vld [vmem:[#allocation5 + $0x108] ss:$12 sps:$4 sm:$0xff]  }
  0x47   :  { %1091 = vmatprep.subr.bf16.mxu0 %v1554_v17  ;;  %v54_v46 = vld [vmem:[#allocation2 + $0x8] sm:$0xff]  ;;  %v56_v49 = vld [vmem:[#allocation2 + $0x18] sm:$0xff]  ;;  %v1600_v51 = vld [vmem:[#allocation5 + $0x124] ss:$12 sps:$4 sm:$0xff]   ;;  %s1819_s2 = smov [#allocation8]  }
  0x48   :  { %v1876_v48 = vpack.c.bf16 %v54_v46, %v54_v46  ;;  %v1599_v50 = vld [vmem:[#allocation5 + $0x288] ss:$12 sps:$4 sm:$0xff]   ;;  %v1878_v52 = vpack.c.bf16 %v56_v49, %v56_v49  ;;  %v1602_v53 = vld [vmem:[#allocation5 + $0x2a4] ss:$12 sps:$4 sm:$0xff]   ;;  %v1604_v54 = vld [vmem:[#allocation5 + $0x120] ss:$12 sps:$4 sm:$0xff]  }
  0x49   :  { %1051 = vmatpush1.bf16.msra.mxu1 %v1556_v18  ;;  %v1605_v55 = vld [vmem:[#allocation5 + $0x2a0] ss:$12 sps:$4 sm:$0xff]   ;;  %v1606_v56 = vld [vmem:[#allocation5 + $0x13c] ss:$12 sps:$4 sm:$0xff]   ;;  %v1610_v58 = vld [vmem:[#allocation5 + $0x138] ss:$12 sps:$4 sm:$0xff]  }
  0x4a   :  { %1092 = vmatpush1.bf16.msra.mxu0 %v1557_v19  ;;  %1052 = vmatprep.subr.bf16.mxu1 %v1558_v20  ;;  %v1608_v57 = vld [vmem:[#allocation5 + $0x2bc] ss:$12 sps:$4 sm:$0xff]   ;;  %v1611_v59 = vld [vmem:[#allocation5 + $0x2b8] ss:$12 sps:$4 sm:$0xff]   ;;  %v1612_v60 = vld [vmem:[#allocation5 + $0x154] ss:$12 sps:$4 sm:$0xff]  }
  0x4b   :  { %1093 = vmatprep.subr.bf16.mxu0 %v1560_v21  ;;  %1074 = vmatprep.mubr.bf16.mxu1 %v1876_v48  ;;  %v1614_v61 = vld [vmem:[#allocation5 + $0x2d4] ss:$12 sps:$4 sm:$0xff]   ;;  %v1616_v62 = vld [vmem:[#allocation5 + $0x150] ss:$12 sps:$4 sm:$0xff]   ;;  %v1618_v0 = vld [vmem:[#allocation5 + $0x16c] ss:$12 sps:$4 sm:$0xff]  }
  0x4c   :  { %1115 = vmatprep.mubr.bf16.mxu0 %v1878_v52  ;;  %v1617_v63 = vld [vmem:[#allocation5 + $0x2d0] ss:$12 sps:$4 sm:$0xff]   ;;  %v1620_v1 = vld [vmem:[#allocation5 + $0x2ec] ss:$12 sps:$4 sm:$0xff]   ;;  %v1622_v2 = vld [vmem:[#allocation5 + $0x168] ss:$12 sps:$4 sm:$0xff]  }
  0x4d   :  { %1053 = vmatpush1.bf16.msra.mxu1 %v1562_v22  ;;  %v1623_v3 = vld [vmem:[#allocation5 + $0x2e8] ss:$12 sps:$4 sm:$0xff]   ;;  %v55_v5 = vld [vmem:[#allocation2 + $0x10] sm:$0xff]  ;;  %v1634_v18 = vld [vmem:[#allocation5 + $0x330] ss:$12 sps:$4 sm:$0xff]   ;;  %s1294_s22 = sshll.u32 %s1819_s2, 4  ;;  %s1295_s22 = int_to_ptr.vmem [resolvable:$true] %s1294_s22 }
  0x4e   :  { %1094 = vmatpush1.bf16.msra.mxu0 %v1563_v23  ;;  %1054 = vmatprep.subr.bf16.mxu1 %v1564_v24  ;;  %v53_v4 = vld [vmem:[#allocation2] sm:$0xff]  ;;  %v1624_v8 = vld [vmem:[#allocation5 + $0x300] ss:$12 sps:$4 sm:$0xff]   ;;  %v1884_v10 = vpack.c.bf16 %v55_v5, %v55_v5  ;;  %v1631_v12 = vld [vmem:[#allocation5 + $0x31c] ss:$12 sps:$4 sm:$0xff]   ;;  %s1786_s23 = scalar_lea.vmem %s1295_s22, 384  ;;  %p1791_p11 = scmp.lt.s32.totalorder %s1295_s22, %s1295_s22 }
  0x4f   :  { %1095 = vmatprep.subr.bf16.mxu0 %v1566_v25  ;;  %v1626_v6 = vld [vmem:[#allocation5 + $0x304] ss:$12 sps:$4 sm:$0xff]   ;;  %v1627_v7 = vld [vmem:[#allocation5 + $0xc8] ss:$12 sps:$4 sm:$0xff]   ;;  %v1882_v9 = vpack.c.bf16 %v53_v4, %v53_v4  ;;  %v1632_v13 = vld [vmem:[#allocation5 + $0xe0] ss:$12 sps:$4 sm:$0xff]   ;;  %p1787_p10 = scmp.ne.s32.totalorder %s1295_s22, %s1786_s23  ;;  %p1792_p12 = scmp.lt.s32.totalorder %s1786_s23, %s1786_s23 }
  0x50   :  { %v1628_v11 = vld [vmem:[#allocation5 + $0x8] ss:$12 sps:$4 sm:$0xff]   ;;  %v1629_v14 = vld [vmem:[#allocation5 + $0x318] ss:$12 sps:$4 sm:$0xff]   ;;  %v1633_v15 = vld [vmem:[#allocation5 + $0x20] ss:$12 sps:$4 sm:$0xff]  }
  0x51   :  { %1055 = vmatpush1.bf16.msra.mxu1 %v1568_v26  ;;  %v1636_v16 = vld [vmem:[#allocation5 + $0x334] ss:$12 sps:$4 sm:$0xff]   ;;  %v1637_v17 = vld [vmem:[#allocation5 + $0xf8] ss:$12 sps:$4 sm:$0xff]   ;;  %v1642_v21 = vld [vmem:[#allocation5 + $0x110] ss:$12 sps:$4 sm:$0xff]   ;;  %p1793_p13 = por %p1792_p12, %p1791_p11 }
  0x52   :  { %1096 = vmatpush1.bf16.msra.mxu0 %v1569_v27  ;;  %1056 = vmatprep.subr.bf16.mxu1 %v1570_v28  ;;  %v1638_v19 = vld [vmem:[#allocation5 + $0x38] ss:$12 sps:$4 sm:$0xff]   ;;  %v1639_v22 = vld [vmem:[#allocation5 + $0x348] ss:$12 sps:$4 sm:$0xff]   ;;  %v1643_v23 = vld [vmem:[#allocation5 + $0x50] ss:$12 sps:$4 sm:$0xff]  }
  0x53   :  { %1097 = vmatprep.subr.bf16.mxu0 %v1572_v29  ;;  %v1641_v20 = vld [vmem:[#allocation5 + $0x34c] ss:$12 sps:$4 sm:$0xff]   ;;  %v1646_v24 = vld [vmem:[#allocation5 + $0x364] ss:$12 sps:$4 sm:$0xff]   ;;  %v1647_v25 = vld [vmem:[#allocation5 + $0x128] ss:$12 sps:$4 sm:$0xff]   ;;  %p1794_p0 = pnand %p1793_p13, %p1787_p10 }
  0x54   :  { %v1644_v26 = vld [vmem:[#allocation5 + $0x360] ss:$12 sps:$4 sm:$0xff]   ;;  %v1648_v27 = vld [vmem:[#allocation5 + $0x68] ss:$12 sps:$4 sm:$0xff]   ;;  %v58_v46 = vld [vmem:[#allocation2 + $0x28] sm:$0xff] }
  0x55   :  { %1057 = vmatpush1.bf16.msra.mxu1 %v1574_v30  ;;  %v1651_v28 = vld [vmem:[#allocation5 + $0x37c] ss:$12 sps:$4 sm:$0xff]   ;;  %v1652_v29 = vld [vmem:[#allocation5 + $0x140] ss:$12 sps:$4 sm:$0xff]   ;;  %v1649_v30 = vld [vmem:[#allocation5 + $0x378] ss:$12 sps:$4 sm:$0xff]  }
  0x56   :  { %1098 = vmatpush1.bf16.msra.mxu0 %v1575_v31  ;;  %1058 = vmatprep.subr.bf16.mxu1 %v1576_v32  ;;  %v1653_v31 = vld [vmem:[#allocation5 + $0x80] ss:$12 sps:$4 sm:$0xff]   ;;  %v1694_v4 = vld [vmem:[#allocation5 + $0x450] ss:$12 sps:$4 sm:$0xff]   ;;  %v1698_v5 = vld [vmem:[#allocation5 + $0x218] ss:$12 sps:$4 sm:$0xff]  }
  0x57   :  { %1099 = vmatprep.subr.bf16.mxu0 %v1578_v33  ;;  %v1656_v32 = vld [vmem:[#allocation5 + $0x394] ss:$12 sps:$4 sm:$0xff]   ;;  %v1657_v33 = vld [vmem:[#allocation5 + $0x158] ss:$12 sps:$4 sm:$0xff]  }
  0x58   :  { %v1673_v49 = vld [vmem:[#allocation5 + $0x1a0] ss:$12 sps:$4 sm:$0xff]  }
  0x59   :  { %1059 = vmatpush1.bf16.msra.mxu1 %v1580_v34  ;;  %v1654_v34 = vld [vmem:[#allocation5 + $0x390] ss:$12 sps:$4 sm:$0xff]  }
  0x5a   :  { %1100 = vmatpush1.bf16.msra.mxu0 %v1581_v35  ;;  %1060 = vmatprep.subr.bf16.mxu1 %v1582_v36  ;;  %v1658_v35 = vld [vmem:[#allocation5 + $0x98] ss:$12 sps:$4 sm:$0xff]  }
  0x5b   :  { %1101 = vmatprep.subr.bf16.mxu0 %v1584_v37  ;;  %v1661_v36 = vld [vmem:[#allocation5 + $0x3ac] ss:$12 sps:$4 sm:$0xff]   ;;  %v1662_v37 = vld [vmem:[#allocation5 + $0x170] ss:$12 sps:$4 sm:$0xff]  }
  0x5d   :  { %1061 = vmatpush1.bf16.msra.mxu1 %v1586_v38  ;;  %v1659_v38 = vld [vmem:[#allocation5 + $0x3a8] ss:$12 sps:$4 sm:$0xff]  }
  0x5e   :  { %1102 = vmatpush1.bf16.msra.mxu0 %v1587_v39  ;;  %1062 = vmatprep.subr.bf16.mxu1 %v1588_v40  ;;  %v1663_v39 = vld [vmem:[#allocation5 + $0xb0] ss:$12 sps:$4 sm:$0xff]  }
  0x5f   :  { %1103 = vmatprep.subr.bf16.mxu0 %v1590_v41  ;;  %v1666_v40 = vld [vmem:[#allocation5 + $0x3c4] ss:$12 sps:$4 sm:$0xff]   ;;  %v1667_v41 = vld [vmem:[#allocation5 + $0x248] ss:$12 sps:$4 sm:$0xff]  }
  0x61   :  { %1063 = vmatpush1.bf16.msra.mxu1 %v1592_v42  ;;  %v1664_v42 = vld [vmem:[#allocation5 + $0x3c0] ss:$12 sps:$4 sm:$0xff]  }
  0x62   :  { %1104 = vmatpush1.bf16.msra.mxu0 %v1593_v43  ;;  %1064 = vmatprep.subr.bf16.mxu1 %v1594_v44  ;;  %v1668_v43 = vld [vmem:[#allocation5 + $0x188] ss:$12 sps:$4 sm:$0xff]  }
  0x63   :  { %1105 = vmatprep.subr.bf16.mxu0 %v1596_v45  ;;  %v1671_v44 = vld [vmem:[#allocation5 + $0x3dc] ss:$12 sps:$4 sm:$0xff]   ;;  %v1672_v45 = vld [vmem:[#allocation5 + $0x260] ss:$12 sps:$4 sm:$0xff]  }
  0x65   :  { %1065 = vmatpush1.bf16.msra.mxu1 %v1598_v47  ;;  %v1669_v47 = vld [vmem:[#allocation5 + $0x3d8] ss:$12 sps:$4 sm:$0xff]  }
  0x66   :  { %1106 = vmatpush1.bf16.msra.mxu0 %v1599_v50  ;;  %1066 = vmatprep.subr.bf16.mxu1 %v1600_v51  ;;  %v1676_v50 = vld [vmem:[#allocation5 + $0x3f4] ss:$12 sps:$4 sm:$0xff]   ;;  %v1677_v51 = vld [vmem:[#allocation5 + $0x278] ss:$12 sps:$4 sm:$0xff]  }
  0x67   :  { %1107 = vmatprep.subr.bf16.mxu0 %v1602_v53  ;;  %v1674_v53 = vld [vmem:[#allocation5 + $0x3f0] ss:$12 sps:$4 sm:$0xff]  }
  0x69   :  { %1067 = vmatpush1.bf16.msra.mxu1 %v1604_v54  ;;  %v1678_v54 = vld [vmem:[#allocation5 + $0x1b8] ss:$12 sps:$4 sm:$0xff]  }
  0x6a   :  { %1108 = vmatpush1.bf16.msra.mxu0 %v1605_v55  ;;  %1068 = vmatprep.subr.bf16.mxu1 %v1606_v56  ;;  %v1681_v55 = vld [vmem:[#allocation5 + $0x40c] ss:$12 sps:$4 sm:$0xff]   ;;  %v1682_v56 = vld [vmem:[#allocation5 + $0x290] ss:$12 sps:$4 sm:$0xff]  }
  0x6b   :  { %1109 = vmatprep.subr.bf16.mxu0 %v1608_v57  ;;  %v1679_v57 = vld [vmem:[#allocation5 + $0x408] ss:$12 sps:$4 sm:$0xff]  }
  0x6d   :  { %1069 = vmatpush1.bf16.msra.mxu1 %v1610_v58  ;;  %v1683_v58 = vld [vmem:[#allocation5 + $0x1d0] ss:$12 sps:$4 sm:$0xff]  }
  0x6e   :  { %1110 = vmatpush1.bf16.msra.mxu0 %v1611_v59  ;;  %1070 = vmatprep.subr.bf16.mxu1 %v1612_v60  ;;  %v1686_v59 = vld [vmem:[#allocation5 + $0x424] ss:$12 sps:$4 sm:$0xff]   ;;  %v1687_v60 = vld [vmem:[#allocation5 + $0x2a8] ss:$12 sps:$4 sm:$0xff]  }
  0x6f   :  { %1111 = vmatprep.subr.bf16.mxu0 %v1614_v61  ;;  %v1684_v61 = vld [vmem:[#allocation5 + $0x420] ss:$12 sps:$4 sm:$0xff]  }
  0x71   :  { %1071 = vmatpush1.bf16.msra.mxu1 %v1616_v62  ;;  %v1688_v62 = vld [vmem:[#allocation5 + $0x1e8] ss:$12 sps:$4 sm:$0xff]  }
  0x72   :  { %1112 = vmatpush1.bf16.msra.mxu0 %v1617_v63  ;;  %1072 = vmatprep.subr.bf16.mxu1 %v1618_v0  ;;  %v1692_v63 = vld [vmem:[#allocation5 + $0x2c0] ss:$12 sps:$4 sm:$0xff]   ;;  %v1689_v0 = vld [vmem:[#allocation5 + $0x438] ss:$12 sps:$4 sm:$0xff]  }
  0x73   :  { %1113 = vmatprep.subr.bf16.mxu0 %v1620_v1  ;;  %v1693_v1 = vld [vmem:[#allocation5 + $0x200] ss:$12 sps:$4 sm:$0xff]  }
  0x75   :  { %1073 = vmatpush1.bf16.msra.mxu1 %v1622_v2  ;;  %v1696_v2 = vld [vmem:[#allocation5 + $0x454] ss:$12 sps:$4 sm:$0xff]  }
  0x76   :  { %1114 = vmatpush1.bf16.msra.mxu0 %v1623_v3  ;;  %1448 = vmatprep.subr.bf16.mxu1 %v1627_v7  ;;  %v1697_v3 = vld [vmem:[#allocation5 + $0x2d8] ss:$12 sps:$4 sm:$0xff]   ;;  %v1702_v7 = vld [vmem:[#allocation5 + $0x2f0] ss:$12 sps:$4 sm:$0xff]  }
  0x77   :  { %1124 = vmatprep.subr.bf16.mxu0 %v1626_v6  ;;  %v1701_v6 = vld [vmem:[#allocation5 + $0x46c] ss:$12 sps:$4 sm:$0xff]  }
  0x78   :  { %1075 = vmatmul.mubr.bf16.vlgmr.msra.gmra.mrb[0].mxu1 %v1882_v9 }
  0x79   :  { %1116 = vmatmul.mubr.bf16.vlgmr.msra.gmra.mrb[0].mxu0 %v1884_v10  ;;  %1449 = vmatpush3.bf16.msra.mxu1 %v1628_v11  ;;  %v57_v11 = vld [vmem:[#allocation2 + $0x20] sm:$0xff] }
  0x7a   :  { %1125 = vmatpush1.bf16.msra.mxu0 %v1624_v8  ;;  %1450 = vmatprep.subr.bf16.mxu1 %v1632_v13  ;;  %v1699_v8 = vld [vmem:[#allocation5 + $0x468] ss:$12 sps:$4 sm:$0xff]   ;;  %v63_v13 = vpack.c.bf16 %v57_v11, %v57_v11 }
  0x7b   :  { %1126 = vmatprep.subr.bf16.mxu0 %v1631_v12  ;;  %1197 = vmatprep.mubr.bf16.mxu1 %v1876_v48  ;;  %v1889_v48 = vpack.c.bf16 %v58_v46, %v58_v46  ;;  %v1704_v12 = vld [vmem:[#allocation5 + $0x3c8] ss:$12 sps:$4 sm:$0xff]  }
  0x7d   :  { %1451 = vmatpush3.bf16.msra.mxu1 %v1633_v15  ;;  %1156 = vmatprep.mubr.bf16.mxu0 %v1889_v48  ;;  %v1706_v15 = vld [vmem:[#allocation5 + $0x3e0] ss:$12 sps:$4 sm:$0xff]  }
  0x7e   :  { %1127 = vmatpush1.bf16.msra.mxu0 %v1629_v14  ;;  %1452 = vmatprep.subr.bf16.mxu1 %v1637_v17  ;;  %v1705_v14 = vld [vmem:[#allocation5 + $0x308] ss:$12 sps:$4 sm:$0xff]   ;;  %v1708_v17 = vld [vmem:[#allocation5 + $0x3f8] ss:$12 sps:$4 sm:$0xff]  }
  0x7f   :  { %1128 = vmatprep.subr.bf16.mxu0 %v1636_v16  ;;  %v1707_v16 = vld [vmem:[#allocation5 + $0x320] ss:$12 sps:$4 sm:$0xff]  }
  0x81   :  { %1453 = vmatpush3.bf16.msra.mxu1 %v1638_v19  ;;  %v1710_v19 = vld [vmem:[#allocation5 + $0x410] ss:$12 sps:$4 sm:$0xff]  }
  0x82   :  { %1129 = vmatpush1.bf16.msra.mxu0 %v1634_v18  ;;  %1454 = vmatprep.subr.bf16.mxu1 %v1642_v21  ;;  %v1709_v18 = vld [vmem:[#allocation5 + $0x338] ss:$12 sps:$4 sm:$0xff]   ;;  %v1712_v21 = vld [vmem:[#allocation5 + $0x428] ss:$12 sps:$4 sm:$0xff]  }
  0x83   :  { %1130 = vmatprep.subr.bf16.mxu0 %v1641_v20  ;;  %v1711_v20 = vld [vmem:[#allocation5 + $0x350] ss:$12 sps:$4 sm:$0xff]  }
  0x85   :  { %1455 = vmatpush3.bf16.msra.mxu1 %v1643_v23  ;;  %v1714_v23 = vld [vmem:[#allocation5 + $0x440] ss:$12 sps:$4 sm:$0xff]  }
  0x86   :  { %1131 = vmatpush1.bf16.msra.mxu0 %v1639_v22  ;;  %1456 = vmatprep.subr.bf16.mxu1 %v1647_v25  ;;  %v1713_v22 = vld [vmem:[#allocation5 + $0x368] ss:$12 sps:$4 sm:$0xff]   ;;  %v1717_v25 = vld [vmem:[#allocation5 + $0x398] ss:$12 sps:$4 sm:$0xff]  }
  0x87   :  { %1132 = vmatprep.subr.bf16.mxu0 %v1646_v24  ;;  %v1716_v24 = vld [vmem:[#allocation5 + $0x458] ss:$12 sps:$4 sm:$0xff]  }
  0x89   :  { %1457 = vmatpush3.bf16.msra.mxu1 %v1648_v27  ;;  %v1719_v27 = vld [vmem:[#allocation5 + $0x3b0] ss:$12 sps:$4 sm:$0xff]  }
  0x8a   :  { %1133 = vmatpush1.bf16.msra.mxu0 %v1644_v26  ;;  %1458 = vmatprep.subr.bf16.mxu1 %v1652_v29  ;;  %v1718_v26 = vld [vmem:[#allocation5 + $0x470] ss:$12 sps:$4 sm:$0xff]  }
  0x8b   :  { %1134 = vmatprep.subr.bf16.mxu0 %v1651_v28 }
  0x8d   :  { %1459 = vmatpush3.bf16.msra.mxu1 %v1653_v31 }
  0x8e   :  { %1135 = vmatpush1.bf16.msra.mxu0 %v1649_v30  ;;  %1460 = vmatprep.subr.bf16.mxu1 %v1657_v33 }
  0x8f   :  { %1136 = vmatprep.subr.bf16.mxu0 %v1656_v32 }
  0x91   :  { %1461 = vmatpush3.bf16.msra.mxu1 %v1658_v35 }
  0x92   :  { %1137 = vmatpush1.bf16.msra.mxu0 %v1654_v34  ;;  %1462 = vmatprep.subr.bf16.mxu1 %v1662_v37  ;;  %v259_v37 = vlaneseq }
  0x93   :  { %1138 = vmatprep.subr.bf16.mxu0 %v1661_v36 }
  0x95   :  { %1463 = vmatpush3.bf16.msra.mxu1 %v1663_v39 }
  0x96   :  { %1139 = vmatpush1.bf16.msra.mxu0 %v1659_v38  ;;  %1470 = vmatprep.subr.bf16.mxu1 %v1667_v41  ;;  %v260_v38 = vshrl.u32 %v259_v37, 7 }
  0x97   :  { %1140 = vmatprep.subr.bf16.mxu0 %v1666_v40  ;;  %v257_v40 = vld [vmem:[#allocation7] sm:$0x7] }
  0x98   :  { %1198 = vmatmul.mubr.bf16.vlgmr.msra.gmra.mrb[4].mxu1 %v1882_v9  ;;  %v1703_v9 = vld [vmem:[#allocation5 + $0x230] ss:$12 sps:$4 sm:$0xff]   ;;  %v261_v39 = vsub.s32 0, %v260_v38  ;;  %v265_v41 = vsub.s32 1, %v260_v38 }
  0x99   :  { %1471 = vmatpush3.bf16.msra.mxu1 %v1668_v43  ;;  %1237 = vmatprep.mubr.bf16.mxu1 %v1878_v52  ;;  %v1691_v52 = vld [vmem:[#allocation5 + $0x43c] ss:$12 sps:$4 sm:$0xff]  }
  0x9a   :  { %1141 = vmatpush1.bf16.msra.mxu0 %v1664_v42  ;;  %1472 = vmatprep.subr.bf16.mxu1 %v1672_v45  ;;  %v269_v42 = vsub.s32 2, %v260_v38  ;;  %v262_v43 = vrot.slane %v257_v40, %v261_v39 }
  0x9b   :  { %1142 = vmatprep.subr.bf16.mxu0 %v1671_v44  ;;  %v266_v44 = vrot.slane %v257_v40, %v265_v41 }
  0x9c   :  { %v270_v45 = vrot.slane %v257_v40, %v269_v42 }
  0x9d   :  { %1473 = vmatpush3.bf16.msra.mxu1 %v1673_v49 }
  0x9e   :  { %1143 = vmatpush1.bf16.msra.mxu0 %v1669_v47  ;;  %1474 = vmatprep.subr.bf16.mxu1 %v1677_v51 }
  0x9f   :  { %1144 = vmatprep.subr.bf16.mxu0 %v1676_v50 }
  0xa1   :  { %1475 = vmatpush3.bf16.msra.mxu1 %v1678_v54 }
  0xa2   :  { %1145 = vmatpush1.bf16.msra.mxu0 %v1674_v53  ;;  %1476 = vmatprep.subr.bf16.mxu1 %v1682_v56 }
  0xa3   :  { %1146 = vmatprep.subr.bf16.mxu0 %v1681_v55 }
  0xa5   :  { %1477 = vmatpush3.bf16.msra.mxu1 %v1683_v58 }
  0xa6   :  { %1147 = vmatpush1.bf16.msra.mxu0 %v1679_v57  ;;  %1478 = vmatprep.subr.bf16.mxu1 %v1687_v60 }
  0xa7   :  { %1148 = vmatprep.subr.bf16.mxu0 %v1686_v59 }
  0xa9   :  { %1479 = vmatpush3.bf16.msra.mxu1 %v1688_v62 }
  0xaa   :  { %1149 = vmatpush1.bf16.msra.mxu0 %v1684_v61  ;;  %1480 = vmatprep.subr.bf16.mxu1 %v1692_v63 }
  0xab   :  { %1150 = vmatprep.subr.bf16.mxu0 %v1691_v52 }
  0xad   :  { %1481 = vmatpush3.bf16.msra.mxu1 %v1693_v1 }
  0xae   :  { %1151 = vmatpush1.bf16.msra.mxu0 %v1689_v0  ;;  %1482 = vmatprep.subr.bf16.mxu1 %v1697_v3 }
  0xaf   :  { %1152 = vmatprep.subr.bf16.mxu0 %v1696_v2 }
  0xb1   :  { %1483 = vmatpush3.bf16.msra.mxu1 %v1698_v5 }
  0xb2   :  { %1153 = vmatpush1.bf16.msra.mxu0 %v1694_v4  ;;  %1484 = vmatprep.subr.bf16.mxu1 %v1702_v7 }
  0xb3   :  { %1154 = vmatprep.subr.bf16.mxu0 %v1701_v6 }
  0xb5   :  { %1485 = vmatpush3.bf16.msra.mxu1 %v1703_v9 }
  0xb6   :  { %1155 = vmatpush1.bf16.msra.mxu0 %v1699_v8  ;;  %1492 = vmatprep.subr.bf16.mxu1 %v1704_v12 }
  0xb8   :  { %1238 = vmatmul.mubr.bf16.vlgmr.msra.gmra.mrb[8].mxu1 %v1884_v10  ;;  %v1715_v10 = vld [vmem:[#allocation5 + $0x380] ss:$12 sps:$4 sm:$0xff]  }
  0xb9   :  { %1157 = vmatmul.mubr.bf16.vlgmr.msra.gmra.mrb[0].mxu0 %v63_v13  ;;  %1493 = vmatpush3.bf16.msra.mxu1 %v1705_v14 }
  0xba   :  { %1277 = vmatprep.mubr.bf16.mxu1 %v1889_v48  ;;  %1494 = vmatprep.subr.bf16.mxu1 %v1706_v15 }
  0xbd   :  { %1495 = vmatpush3.bf16.msra.mxu1 %v1707_v16 }
  0xbe   :  { %1496 = vmatprep.subr.bf16.mxu1 %v1708_v17 }
  0xc1   :  { %1497 = vmatpush3.bf16.msra.mxu1 %v1709_v18 }
  0xc2   :  { %1498 = vmatprep.subr.bf16.mxu1 %v1710_v19 }
  0xc5   :  { %1499 = vmatpush3.bf16.msra.mxu1 %v1711_v20 }
  0xc6   :  { %1500 = vmatprep.subr.bf16.mxu1 %v1712_v21 }
  0xc9   :  { %1501 = vmatpush3.bf16.msra.mxu1 %v1713_v22 }
  0xca   :  { %1502 = vmatprep.subr.bf16.mxu1 %v1714_v23 }
  0xcd   :  { %1503 = vmatpush3.bf16.msra.mxu1 %v1715_v10 }
  0xce   :  { %1504 = vmatprep.subr.bf16.mxu1 %v1716_v24 }
  0xd1   :  { %1505 = vmatpush3.bf16.msra.mxu1 %v1717_v25 }
  0xd2   :  { %1506 = vmatprep.subr.bf16.mxu1 %v1718_v26 }
  0xd5   :  { %1507 = vmatpush3.bf16.msra.mxu1 %v1719_v27 }
  0xd8   :  { %1278 = vmatmul.mubr.bf16.vlgmr.msra.gmra.mrb[12].mxu1 %v63_v13 }
 0x14b   :  { %v1076_v28 = vpop.f32.mrb[0].mxu1 }
 0x14c   :  { %v1078_v29 = vpop.f32.mrb[1].mxu1  ;;  %v1077_v46 = vadd.f32 %v1076_v28, %v262_v43 }
 0x14d   :  { %v1080_v30 = vpop.f32.mrb[2].mxu1  ;;  %v1079_v47 = vadd.f32 %v1078_v29, %v266_v44 }
 0x14e   :  { %v1081_v31 = vpop.f32.mrb[3].mxu1 }
 0x16b   :  { %v1464_v32 = vpop.f32.mrb[4].mxu1 }
 0x16c   :  { %v1465_v33 = vpop.f32.mrb[5].mxu1 }
 0x16d   :  { %v1466_v34 = vadd.f32 %v1465_v33, %v1464_v32  ;;  %v1467_v35 = vpop.f32.mrb[6].mxu1 }
 0x16e   :  { %v1468_v36 = vpop.f32.mrb[7].mxu1 }
 0x16f   :  { %v1200_v54 = vadd.f32 %v1466_v34, %v270_v45 }
 0x18b   :  { %v1486_v49 = vpop.f32.mrb[8].mxu1 }
 0x18c   :  { %v1158_v48 = vpop.f32.mrb[0].mxu0  ;;  %v1487_v53 = vpop.f32.mrb[9].mxu1 }
 0x18d   :  { %v1515_v50 = vadd.f32 %v1158_v48, %v1077_v46  ;;  %v1160_v51 = vpop.f32.mrb[1].mxu0  ;;  %v1488_v56 = vadd.f32 %v1487_v53, %v1486_v49  ;;  %v1489_v58 = vpop.f32.mrb[10].mxu1 }
 0x18e   :  { %v1517_v55 = vadd.f32 %v1160_v51, %v1079_v47  ;;  %v1162_v57 = vpop.f32.mrb[2].mxu0  ;;  %v1490_v60 = vpop.f32.mrb[11].mxu1 }
 0x18f   :  { %1285 = vst [vmem:[#allocation8] sm:$0xff] %v1515_v50  ;;  %v1163_v59 = vpop.f32.mrb[3].mxu0  ;;  %v1240_v61 = vadd.f32 %v1488_v56, %v1200_v54 }
 0x190   :  { %1286 = vst [vmem:[#allocation8 + $0x8] sm:$0xff] %v1517_v55 }
 0x1ab   :  { %v1508_v62 = vpop.f32.mrb[12].mxu1 }
 0x1ac   :  { %v1509_v52 = vpop.f32.mrb[13].mxu1 }
 0x1ad   :  { %v1510_v63 = vadd.f32 %v1509_v52, %v1508_v62  ;;  %v1511_v0 = vpop.f32.mrb[14].mxu1 }
 0x1ae   :  { %v1512_v1 = vpop.f32.mrb[15].mxu1 }
 0x1af   :  { %v1280_v2 = vadd.f32 %v1510_v63, %v1240_v61 }
 0x1b1   :  { %1287 = vst [vmem:[#allocation8 + $0x10] sm:$0xff] %v1280_v2 }
 0x1b2   :  { %1797 = shalt.err (!%p1794_p0)
}
 0x1b3   :  { %s1798_s26 = scalar_lea.hbm %s1911_s3, 384 }
 0x1b4   :  { %p1799_p1 = scmp.ne.s32.totalorder %s1911_s3, %s1798_s26  ;;  %p1802_p2 = scmp.lt.u32.totalorder %s1798_s26, %s1911_s3 }
 0x1b6   :  { %p1804_p3 = pnand %p1802_p2, %p1799_p1 }
 0x1b8   :  { %1807 = shalt.err (!%p1804_p3)
}
 0x1b9   :  { %1297 = dma.vmem_to_hbm [thread:$0]  %s1295_s22, 384, %s1911_s3, [#allocation4]  }
 0x1ba   :  { %1812 = dma.done.wait [#allocation4], 384  }
 0x1bb   :  { %1813 = vsyncadd [#allocation4], 4294966912 }
 0x1bc   :  { %1301 = vsyncpa [#allocation3], 1 }
 0x1bd   :  { %1302 = vsyncpa [#allocation6], 1 }
 0x1be   :  { %1303 = vsyncpa [#allocation4], 1 }

// kernel: fsra_forward.11
= control target key start
LH: loop header
LB: loop body
LE: loop exit
PB: predicated region body
PF: predicated region fallthrough
CT: control target
= control target key end

     0   :  { %9 = vsyncpa [#allocation3], 0  ;;  %s2869_s0 = inlined_call_operand.hbm [shape: f32[2,5,1152], index: 0, kind: input, shape index: {}]   ;;  %s2870_s1 = inlined_call_operand.hbm [shape: f32[2,5,384], index: 1, kind: input, shape index: {}]   ;;  %s2871_s2 = inlined_call_operand.hbm [shape: bf16[384,384], index: 2, kind: input, shape index: {}]   ;;  %s2872_s3 = inlined_call_operand.hbm [shape: f32[1,384], index: 3, kind: input, shape index: {}]   ;;  %s2873_s4 = inlined_call_operand.hbm [shape: f32[2,5,384], index: 4, kind: output, shape index: {}]  }
   0x1   :  { %11 = vsyncpa [#allocation3 + $0x1], 0 }
   0x2   :  { %12 = vsyncpa [#allocation6], 0 }
   0x3   :  { %14 = vsyncpa [#allocation6 + $0x1], 0 }
   0x4   :  { %15 = vsyncpa [#allocation9], 0 }
   0x5   :  { %16 = vsyncpa [#allocation4], 0 }
   0x6   :  { %18 = vsyncpa [#allocation4 + $0x1], 0  ;;  %s2463_s15 = smov 0   ;;  %s2465_s16 = smov 0  }
   0x7   :  { %s2467_s17 = smov 0   ;;  %s2469_s18 = smov 0  }
   0x8 LB: > { %s2484_s19 = sadd.s32 4294967295, %s2424_s18   ;;  %s1775_s20 = sadd.s32 4294967294, %s2424_s18   ;;  %s2424_s18 = sphi %s2469_s18, %s2897_s18   ;;  %s2420_s17 = sphi %s2467_s17, %s2896_s17   ;;  %s2416_s16 = sphi %s2465_s16, %s2895_s16   ;;  %s2412_s15 = sphi %s2463_s15, %s2894_s15  }
   0x9   : > { %p44_p0 = scmp.ne.s32.totalorder %s2416_s16, %s2412_s15  ;;  %p2874_p1 = scmp.eq.s32.totalorder %s2484_s19, 0 }
   0xa   : > { %p142_p3 = scmp.eq.s32.totalorder %s1775_s20, 1  ;;  %p1776_p5 = scmp.ge.s32.totalorder %s2424_s18, 1 }
   0xb   : > { %p2493_p4 = por %p2874_p1, %p44_p0  ;;  %p149_p7 = scmp.lt.s32.totalorder %s2424_s18, 3 }
   0xc   : > { %p2498_p6 = por %p142_p3, %p44_p0  ;;  %s2426_s24 = smov [#allocation7]  }
   0xd   : > { %s2878_s21 = scalar_select %p2493_p4, 1, 0 }
   0xe   : > { %s2879_s22 = scalar_select %p2498_p6, 1, 0 }
   0xf   : > { %p2503_p8 = pnand %p1776_p5, %p149_p7  ;;  %s161_s25 = sshll.u32 %s2426_s24, 4  ;;  %s2507_s25 = int_to_ptr.vmem [resolvable:$true] %s161_s25 }
  0x10   : > { %s2427_s27 = smov [#allocation8]   ;;  %s2230_s5 = scalar_lea.hbm %s2871_s2, 9216 }
  0x11   : > { %s2880_s23 = scalar_select %p2503_p8, 1, 0 }
  0x12   : > { %p2040_p9 = pneg %p2503_p8  ;;  %s175_s28 = sshll.u32 %s2427_s27, 4  ;;  %s2518_s28 = int_to_ptr.vmem [resolvable:$true] %s175_s28 }
  0x13   : > { %p2231_p12 = scmp.ne.s32.totalorder %s2871_s2, %s2230_s5  ;;  %p2237_p5 = scmp.lt.u32.totalorder %s2230_s5, %s2871_s2 }
  0x14   : > { %p2514_p11 = pnand %p2040_p9, %p2874_p1 }
  0x16   : > { %p2232_p13 = pneg %p2514_p11 }
  0x18   : > { %p2233_p0 = pnand %p2232_p13, %p2231_p12 }
  0x1a   : > { %p2234_p3 = pneg %p2233_p0 }
  0x1c   : > { %p2239_p7 = pnand %p2237_p5, %p2234_p3 }
  0x1e   : > { %2242 = shalt.err (!%p2239_p7)
}
  0x1f   : > { %s2243_s10 = scalar_lea.vmem %s2507_s25, 9216  ;;  %p2251_p2 = scmp.lt.s32.totalorder %s2507_s25, %s2507_s25 }
  0x20   : > { %p2244_p9 = scmp.ne.s32.totalorder %s2507_s25, %s2243_s10  ;;  %p2252_p12 = scmp.lt.s32.totalorder %s2243_s10, %s2243_s10 }
  0x22   : > { %p2246_p10 = pnand %p2244_p9, %p2232_p13  ;;  %p2253_p0 = por %p2252_p12, %p2251_p2 }
  0x24   : > { %p2247_p1 = pneg %p2246_p10 }
  0x26   : > { %p2254_p6 = pnand %p2253_p0, %p2247_p1 }
  0x28   : > { %2257 = shalt.err (!%p2254_p6)
}
  0x29   : > { %s2428_s11 = smov 192   ;;  %s2429_s12 = smov 12  }
  0x2a   : > { %2043 = dma.hbm_to_vmem [thread:$0]  (!%p2514_p11), %s2871_s2, 9216, %s2507_s25, [#allocation6], %s2428_s11, %s2428_s11, %s2429_s12  }
  0x2b   : > { %s2258_s27 = scalar_lea.hbm %s2872_s3, 48 }
  0x2c   : > { %p2259_p2 = scmp.ne.s32.totalorder %s2872_s3, %s2258_s27  ;;  %p2265_p10 = scmp.lt.u32.totalorder %s2258_s27, %s2872_s3 }
  0x2e   : > { %p2261_p1 = pnand %p2259_p2, %p2232_p13 }
  0x30   : > { %p2262_p6 = pneg %p2261_p1 }
  0x32   : > { %p2267_p3 = pnand %p2265_p10, %p2262_p6 }
  0x34   : > { %2270 = shalt.err (!%p2267_p3)
}
  0x35   : > { %s2271_s25 = scalar_lea.vmem %s2518_s28, 48  ;;  %s2278_s7 = scalar_lea.vmem %s2518_s28, 64 }
  0x36   : > { %p2272_p5 = scmp.ne.s32.totalorder %s2518_s28, %s2271_s25  ;;  %p2279_p12 = scmp.lt.s32.totalorder %s2518_s28, %s2518_s28 }
  0x37   : > { %p2280_p0 = scmp.lt.s32.totalorder %s2278_s7, %s2271_s25 }
  0x38   : > { %p2274_p7 = pnand %p2272_p5, %p2232_p13 }
  0x39   : > { %p2281_p2 = por %p2280_p0, %p2279_p12 }
  0x3a   : > { %p2275_p9 = pneg %p2274_p7 }
  0x3c   : > { %p2282_p1 = pnand %p2281_p2, %p2275_p9 }
  0x3e   : > { %2285 = shalt.err (!%p2282_p1)
}
  0x3f   : > { %2046 = dma.hbm_to_vmem [thread:$0]  (!%p2514_p11), %s2872_s3, 48, %s2518_s28, [#allocation9]  }
  0x40   : > { %s2574_s10 = sadd.s32 1, %s2424_s18   ;;  %s31_s26 = sadd.s32 1, %s2420_s17 }
  0x41   : > { %s28_s11 = ssub.s32 %s2424_s18, %s2574_s10  ;;  %p38_p13 = scmp.ne.s32.totalorder %s2420_s17, %s2416_s16 }
  0x42   : > { %p29_p6 = scmp.eq.s32.totalorder %s28_s11, 0  ;;  %p39_p10 = scmp.eq.s32.totalorder %s2424_s18, 0 }
  0x43   : > { %p2882_p3 = scmp.eq.s32.totalorder %s2484_s19, 1  ;;  %p2060_p7 = scmp.lt.s32.totalorder %s2424_s18, 2 }
  0x44   : > { %s2590_s13 = scalar_select %p29_p6, %s2420_s17, %s31_s26  }
  0x45   : > { %p2584_p5 = por %p2882_p3, %p38_p13  ;;  %p40_p9 = por %p39_p10, %p38_p13 }
  0x46   : > { %s2593_s14 = sand.u32 1, %s2420_s17   ;;  %s2020_s20 = smul.u32 1152, %s2424_s18 }
  0x47   : > { %s2883_s12 = scalar_select %p2584_p5, 1, 0 }
  0x48   : > { %s2019_s28 = smul.u32 72, %s2593_s14  ;;  %p2597_p11 = pnand %p2060_p7, %p40_p9 }
  0x49   : > { %s205_s27 = sand.u32 1, %s2424_s18   ;;  %s2605_s5 = scalar_lea.hbm %s2869_s0, %s2020_s20 }
  0x4a   : > { %s190_s6 = scalar_lea.vmem [#allocation2], %s2019_s28  ;;  %s187_s7 = scalar_lea.sflag [#allocation3], %s2593_s14 }
  0x4b   : > { %s198_s25 = sshll.u32 %s190_s6, 4  ;;  %s2286_s8 = scalar_lea.hbm %s2605_s5, 1152  ;;  %s2607_s25 = int_to_ptr.vmem [resolvable:$true] %s198_s25 }
  0x4c   : > { %p2287_p12 = scmp.ne.s32.totalorder %s2605_s5, %s2286_s8  ;;  %p2288_p0 = pneg %p2597_p11 }
  0x4d   : > { %s2291_s11 = scalar_lea.hbm %s2869_s0, 2304  ;;  %p2292_p13 = scmp.lt.u32.totalorder %s2605_s5, %s2869_s0 }
  0x4e   : > { %p2289_p2 = pnand %p2288_p0, %p2287_p12  ;;  %p2293_p6 = scmp.lt.u32.totalorder %s2291_s11, %s2286_s8 }
  0x4f   : > { %p2295_p3 = scmp.lt.u32.totalorder %s2286_s8, %s2605_s5 }
  0x50   : > { %p2290_p1 = pneg %p2289_p2  ;;  %p2294_p10 = por %p2293_p6, %p2292_p13 }
  0x52   : > { %p2296_p7 = por %p2295_p3, %p2294_p10 }
  0x54   : > { %p2297_p9 = pnand %p2296_p7, %p2290_p1 }
  0x56   : > { %2300 = shalt.err (!%p2297_p9)
}
  0x57   : > { %s2301_s28 = scalar_lea.vmem %s2607_s25, 1152  ;;  %s2430_s30 = smov [#allocation2]  }
  0x58   : > { %p2302_p12 = scmp.ne.s32.totalorder %s2607_s25, %s2301_s28  ;;  %s2306_s6 = sshll.u32 %s2430_s30, 4  ;;  %s2307_s6 = int_to_ptr.vmem [resolvable:$false] %s2306_s6 }
  0x59   : > { %s2308_s9 = scalar_lea.vmem %s2307_s6, 2304  ;;  %p2309_p4 = scmp.lt.s32.totalorder %s2607_s25, %s2307_s6 }
  0x5a   : > { %p2304_p2 = pnand %p2302_p12, %p2288_p0  ;;  %p2310_p13 = scmp.lt.s32.totalorder %s2308_s9, %s2301_s28 }
  0x5c   : > { %p2305_p5 = pneg %p2304_p2  ;;  %p2311_p6 = por %p2310_p13, %p2309_p4 }
  0x5e   : > { %p2312_p10 = pnand %p2311_p6, %p2305_p5 }
  0x60   : > { %2315 = shalt.err (!%p2312_p10)
}
  0x61   : > { %2050 = dma.hbm_to_vmem [thread:$0]  (!%p2597_p11), %s2605_s5, 1152, %s2607_s25, %s187_s7  }
  0x62   : > { %s2021_s8 = smul.u32 24, %s2593_s14  ;;  %s206_s6 = scalar_lea.sflag [#allocation6], %s205_s27 }
  0x63   : > { %s2022_s26 = smul.u32 384, %s2424_s18  ;;  %s2321_s25 = scalar_lea.hbm %s2870_s1, 768 }
  0x64   : > { %s209_s28 = scalar_lea.vmem [#allocation5], %s2021_s8 }
  0x65   : > { %s2640_s29 = scalar_lea.hbm %s2870_s1, %s2022_s26  ;;  %s217_s30 = sshll.u32 %s209_s28, 4  ;;  %s218_s30 = int_to_ptr.vmem [resolvable:$true] %s217_s30 }
  0x66   : > { %s2316_s9 = scalar_lea.hbm %s2640_s29, 384  ;;  %p2322_p3 = scmp.lt.u32.totalorder %s2640_s29, %s2870_s1 }
  0x67   : > { %p2317_p4 = scmp.ne.s32.totalorder %s2640_s29, %s2316_s9  ;;  %p2323_p7 = scmp.lt.u32.totalorder %s2321_s25, %s2316_s9 }
  0x68   : > { %p2325_p12 = scmp.lt.u32.totalorder %s2316_s9, %s2640_s29 }
  0x69   : > { %p2319_p5 = pnand %p2317_p4, %p2288_p0  ;;  %p2324_p9 = por %p2323_p7, %p2322_p3 }
  0x6b   : > { %p2320_p1 = pneg %p2319_p5  ;;  %p2326_p2 = por %p2325_p12, %p2324_p9 }
  0x6d   : > { %p2327_p13 = pnand %p2326_p2, %p2320_p1 }
  0x6f   : > { %2330 = shalt.err (!%p2327_p13)
}
  0x70   : > { %s2331_s27 = scalar_lea.vmem %s218_s30, 384  ;;  %s2431_s8 = smov [#allocation5]  }
  0x71   : > { %p2332_p6 = scmp.ne.s32.totalorder %s218_s30, %s2331_s27  ;;  %s2336_s11 = sshll.u32 %s2431_s8, 4  ;;  %s2337_s11 = int_to_ptr.vmem [resolvable:$false] %s2336_s11 }
  0x72   : > { %s2338_s20 = scalar_lea.vmem %s2337_s11, 768  ;;  %p2339_p5 = scmp.lt.s32.totalorder %s218_s30, %s2337_s11 }
  0x73   : > { %p2334_p10 = pnand %p2332_p6, %p2288_p0  ;;  %p2340_p8 = scmp.lt.s32.totalorder %s2338_s20, %s2331_s27 }
  0x75   : > { %p2335_p4 = pneg %p2334_p10  ;;  %p2341_p3 = por %p2340_p8, %p2339_p5 }
  0x77   : > { %p2342_p7 = pnand %p2341_p3, %p2335_p4 }
  0x79   : > { %2345 = shalt.err (!%p2342_p7)
}
  0x7a   : > { %2053 = dma.hbm_to_vmem [thread:$0]  (!%p2597_p11), %s2640_s29, 384, %s218_s30, %s206_s6  }
  0x7b   : > { %p2885_p1 = scmp.ne.s32.totalorder %s2880_s23, 0 }
  0x7c   : > { %s2666_s28 = sand.u32 (!%p2885_p1), 1, %s2416_s16   ;;  %p2886_p8 = scmp.ne.s32.totalorder (!%p2885_p1), %s2878_s21, 0 }
  0x7d   : > { %226 = sbr.rel (%p2885_p1) target bundleno = 1864 (0x748), region = 36  ;;  %s229_s14 = scalar_lea.sflag (!%p2885_p1), [#allocation3], %s2666_s28 }
  0x7e   : > { %s2023_s9 = smul.u32 (!%p2885_p1), 72, %s2666_s28 }
  0x80   : > { %s2670_s5 = scalar_lea.vmem (!%p2885_p1), [#allocation2], %s2023_s9 }
  0x84   : > { %2391 = dma.done.wait (%p2886_p8), %s229_s14, 1152  }
  0x85   : > { %2393 = vsyncadd (%p2886_p8), %s229_s14, 4294966144  ;;  %s237_s23 = sand.u32 1, %s2484_s19   ;;  %s2024_s24 = smul.u32 24, %s2666_s28 }
  0x86   : > { %s238_s29 = scalar_lea.sflag [#allocation6], %s237_s23 }
  0x87   : > { %s2680_s30 = scalar_lea.vmem [#allocation5], %s2024_s24 }
  0x88   : > { %2395 = dma.done.wait (%p2886_p8), %s238_s29, 384  }
  0x89   : > { %2397 = vsyncadd (%p2886_p8), %s238_s29, 4294966912  ;;  %p2887_p11 = scmp.eq.s32.totalorder %s2484_s19, 0 }
  0x8b   : > { %2399 = dma.done.wait (%p2887_p11), [#allocation6], 9216   ;;  %p2888_p0 = pmov %p2887_p11 }
  0x8d   : > { %2401 = vsyncadd (%p2888_p0), [#allocation6], 4294958080  ;;  %p2889_p9 = pmov %p2888_p0 }
  0x8e   : > { %p2890_p12 = pmov %p2888_p0 }
  0x8f   : > { %2403 = dma.done.wait (%p2889_p9), [#allocation9], 48  }
  0x90   : > { %2405 = vsyncadd (%p2890_p12), [#allocation9], 4294967248  ;;  %v2432_v0 = vmov 0.0   ;;  %vm2433_vm0 = vmmov 0   ;;  %v282_v1 = vld [vmem:[%s2670_s5 + $0x18] sm:$0x1f] }
  0x91   : > { %1927 = vmatprep.subr.bf16.mxu0 %v2432_v0  ;;  %1929 = vmatprep.mubr.msk.bf16.mxu0 %vm2433_vm0, %v2432_v0  ;;  %vm286_vm1 = vcmask 523264   ;;  %v283_v2 = vpack.c.bf16 %v282_v1, %v282_v1  ;;  %v280_v3 = vld [vmem:[%s2670_s5] sm:$0x1f]  ;;  %vm334_vm2 = vcmask 36864   ;;  %s2434_s21 = smov 64   ;;  %vm351_vm3 = vcmask 1041408  }
  0x92   : > { %1951 = vmatprep.subr.bf16.mxu1 %v2432_v0  ;;  %1953 = vmatprep.mubr.msk.bf16.mxu1 %vm2433_vm0, %v2432_v0  ;;  %v281_v5 = vpack.c.bf16 %v280_v3, %v280_v3  ;;  %v514_v12 = vld [vmem:[%s2670_s5 + $0x20] sm:$0x1f]  ;;  %v512_v15 = vld [vmem:[%s2670_s5 + $0x8] sm:$0x1f]  ;;  %v737_v18 = vld [vmem:[%s2670_s5 + $0x10] sm:$0x1f] }
  0x93   : > { %v291_v4 = vsel %vm286_vm1, %v283_v2, 0  ;;  %v515_v13 = vpack.c.bf16 %v514_v12, %v514_v12  ;;  %402 = vrot.lane.b32.xlu1 %v283_v2, %s2434_s21  ;;  %v513_v16 = vpack.c.bf16 %v512_v15, %v512_v15  ;;  %v739_v17 = vld [vmem:[%s2670_s5 + $0x28] sm:$0x1f]  ;;  %v738_v20 = vpack.c.bf16 %v737_v18, %v737_v18  ;;  %v284_v26 = vld [vmem:[%s2670_s5 + $0x30] sm:$0x1f]  ;;  %s278_s6 = scalar_lea.vmem [#allocation10], %s2024_s24 }
  0x94   : > { %1928 = vmatpush3.bf16.xpose.msra.mxu0 %v291_v4  ;;  %v740_v19 = vpack.c.bf16 %v739_v17, %v739_v17  ;;  %v2724_v27 = vpack.c.bf16 %v284_v26, %v284_v26  ;;  %vm352_vm4 = vcmask 1042432   ;;  %v2435_v28 = vmov 65535   ;;  %s2025_s25 = smul.u32 384, %s2484_s19  ;;  %s1663_s7 = sshll.u32 %s278_s6, 4  ;;  %s2827_s7 = int_to_ptr.vmem [resolvable:$true] %s1663_s7 }
  0x95   : > { %1933 = vmatprep.subr.bf16.mxu0 %v2432_v0  ;;  %v522_v14 = vsel %vm286_vm1, %v515_v13, 0  ;;  %v353_v29 = vsel %vm351_vm3, 4294967295, %v2435_v28  ;;  %vm347_vm5 = vcmask 39936   ;;  %s1649_s11 = scalar_lea.sflag [#allocation4], %s2666_s28  ;;  %s2346_s20 = scalar_lea.vmem %s2827_s7, 384 }
  0x96   : > { %1952 = vmatpush3.bf16.xpose.msra.mxu1 %v522_v14  ;;  %v2726_v30 = vsel %vm352_vm4, %v353_v29, 0  ;;  %v747_v45 = vsel %vm286_vm1, %v740_v19, 0  ;;  %s2825_s8 = scalar_lea.hbm %s2873_s4, %s2025_s25  ;;  %p2347_p2 = scmp.ne.s32.totalorder %s2827_s7, %s2346_s20 }
  0x97   : > { %399 = vrot.lane.b32.xlu1 %v281_v5, %s2434_s21  ;;  %1963 = vmatprep.subr.bf16.mxu1 %v2432_v0  ;;  %v356_v31 = vand.u32 %v2726_v30, %v2724_v27  ;;  %p2891_p13 = scmp.ne.s32.totalorder %s2883_s12, 0  ;;  %s2437_s19 = smov [#allocation10]  }
  0x98   : > { %s2350_s9 = sshll.u32 %s2437_s19, 4  ;;  %s2351_s9 = int_to_ptr.vmem [resolvable:$false] %s2350_s9 }
  0x99   : > { %p2348_p6 = pnand %p2347_p2, %p2891_p13  ;;  %s2352_s14 = scalar_lea.vmem %s2351_s9, 768 }
  0x9a   : > { %p2353_p4 = scmp.lt.s32.totalorder %s2827_s7, %s2351_s9  ;;  %p2354_p5 = scmp.lt.s32.totalorder %s2352_s14, %s2346_s20 }
  0x9b   : > { %1930 = vmatmul.mubr.msk.bf16.vlgmr.msra.gmra.mrb[0].mxu0 %vm286_vm1, %v281_v5  ;;  %624 = vrot.lane.b32.xlu1 %v513_v16, %s2434_s21  ;;  %p2349_p10 = pneg %p2348_p6 }
  0x9c   : > { %1935 = vmatprep.mubr.msk.bf16.mxu0 %vm2433_vm0, %v2432_v0  ;;  %1934 = vmatpush3.bf16.msra.mxu0 %v356_v31  ;;  %p2355_p3 = por %p2354_p5, %p2353_p4 }
  0x9d   : > { %1954 = vmatmul.mubr.msk.bf16.vlgmr.msra.gmra.mrb[0].mxu1 %vm286_vm1, %v513_v16  ;;  %1939 = vmatprep.subr.bf16.mxu0 %v2432_v0 }
  0x9e   : > { %1965 = vmatprep.mubr.msk.bf16.mxu1 %vm2433_vm0, %v2432_v0  ;;  %p2356_p7 = pnand %p2355_p3, %p2349_p10 }
  0x9f   : > { %852 = vrot.lane.b32.xlu1 %v740_v19, %s2434_s21 }
  0xa3   : > { %849 = vrot.lane.b32.xlu1 %v738_v20, %s2434_s21 }
 0x105   : > { %v403_v38 = vpop.permute.xlu1 %402 }
 0x106   : > { %v408_v47 = vsel %vm286_vm1, %v403_v38, 0 }
 0x109   : > { %v400_v41 = vpop.permute.xlu1 %399 }
 0x10d   : > { %v625_v43 = vpop.permute.xlu1 %624 }
 0x111   : > { %v853_v49 = vpop.permute.xlu1 %852 }
 0x112   : > { %v858_v50 = vsel %vm286_vm1, %v853_v49, 0 }
 0x115   : > { %v850_v51 = vpop.permute.xlu1 %849 }
 0x16e   : > { %v327_v6 = vpop.f32.mrb[0].mxu0 }
 0x16f   : > { %v333_v7 = vmul.f32 0.125, %v327_v6  ;;  %v1931_v8 = vpop.f32.mrb[1].mxu0 }
 0x170   : > { %v330_v9 = vpop.f32.mrb[2].mxu0  ;;  %v558_v32 = vpop.f32.mrb[0].mxu1 }
 0x171   : > { %v1932_v10 = vpop.f32.mrb[3].mxu0  ;;  %v335_v11 = vsel %vm334_vm2, %v333_v7, -inf  ;;  %v564_v33 = vmul.f32 0.125, %v558_v32  ;;  %v1955_v34 = vpop.f32.mrb[1].mxu1 }
 0x172   : > { %336 = vmax.xlane.f32.xlu0 %v335_v11  ;;  %v561_v35 = vpop.f32.mrb[2].mxu1 }
 0x173   : > { %v565_v36 = vsel %vm334_vm2, %v564_v33, -inf  ;;  %v1956_v37 = vpop.f32.mrb[3].mxu1 }
 0x1ff   : > { %v337_v21 = vpop.xlane.xlu0 %336 }
 0x200   : > { %v338_v22 = vsub.f32 %v333_v7, %v337_v21 }
 0x202   : > { %v339_v23 = vmul.f32 1.442695, %v338_v22  ;;  %v741_v22 = vld [vmem:[%s2670_s5 + $0x40] sm:$0x1f] }
 0x204   : > { %2206 = vpow2.f32 %v339_v23  ;;  %v2763_v23 = vpack.c.bf16 %v741_v22, %v741_v22  ;;  %v2149_v22 = vld [vmem:[#allocation7 + $0x198] ss:$12 sps:$4 sm:$0xff]  }
 0x20e   : > { %v2207_v24 = vpop.eup %2206 }
 0x20f   : > { %v341_v25 = vsel %vm334_vm2, %v2207_v24, 0.0 }
 0x210   : > { %342 = vadd.xlane.f32.xlu0 %v341_v25 }
 0x226   : > { %627 = vrot.lane.b32.xlu0 %v515_v13, %s2434_s21 }
 0x245   : > { %566 = vmax.xlane.f32.xlu0 %v565_v36 }
 0x29d   : > { %v343_v39 = vpop.xlane.xlu0 %342 }
 0x29e   : > { %2208 = vrcp.f32 %v343_v39 }
 0x2a1   : > { %v628_v40 = vpop.permute.xlu0 %627 }
 0x2a2   : > { %v633_v42 = vsel %vm286_vm1, %v628_v40, 0 }
 0x2a3   : > { %1964 = vmatpush3.bf16.xpose.msra.mxu1 %v633_v42 }
 0x2a4   : > { %1975 = vmatprep.subr.bf16.mxu1 %v2432_v0 }
 0x2a8   : > { %v2209_v44 = vpop.eup %2208 }
 0x2a9   : > { %v345_v46 = vmul.f32 %v2209_v44, %v2207_v24 }
 0x2aa   : > { %1966 = vmatmul.mubr.msk.bf16.vlgmr.msra.gmra.mrb[4].mxu1 %vm286_vm1, %v625_v43 }
 0x2ab   : > { %1976 = vmatpush3.bf16.xpose.msra.mxu1 %v747_v45  ;;  %v346_v48 = vpack.c.bf16 %v345_v46, %v345_v46  ;;  %1977 = vmatprep.mubr.msk.bf16.mxu1 %vm2433_vm0, %v2432_v0  ;;  %v516_v45 = vld [vmem:[%s2670_s5 + $0x38] sm:$0x1f] }
 0x2ac   : > { %1987 = vmatprep.subr.bf16.mxu1 %v2432_v0  ;;  %v517_v46 = vpack.c.bf16 %v516_v45, %v516_v45  ;;  %v2154_v45 = vld [vmem:[#allocation7 + $0x124] ss:$12 sps:$4 sm:$0xff]  }
 0x2ad   : > { %1936 = vmatmul.mubr.msk.bf16.vlgmr.msra.gmra.mrb[4].mxu0 %vm347_vm5, %v346_v48 }
 0x2ae   : > { %1940 = vmatpush3.bf16.xpose.msra.mxu0 %v408_v47  ;;  %1941 = vmatprep.mubr.msk.bf16.mxu0 %vm2433_vm0, %v2432_v0 }
 0x2af   : > { %1945 = vmatprep.subr.bf16.mxu0 %v2432_v0 }
 0x2b2   : > { %1978 = vmatmul.mubr.msk.bf16.vlgmr.msra.gmra.mrb[8].mxu1 %vm286_vm1, %v738_v20 }
 0x2b3   : > { %1988 = vmatpush3.bf16.xpose.msra.mxu1 %v858_v50  ;;  %1989 = vmatprep.mubr.msk.bf16.mxu1 %vm2433_vm0, %v2432_v0 }
 0x2b5   : > { %1942 = vmatmul.mubr.msk.bf16.vlgmr.msra.gmra.mrb[8].mxu0 %vm286_vm1, %v400_v41 }
 0x2b6   : > { %1947 = vmatprep.mubr.msk.bf16.mxu0 %vm2433_vm0, %v2432_v0 }
 0x2ba   : > { %1990 = vmatmul.mubr.msk.bf16.vlgmr.msra.gmra.mrb[12].mxu1 %vm286_vm1, %v850_v51 }
 0x2d2   : > { %v567_v52 = vpop.xlane.xlu0 %566 }
 0x2d3   : > { %v568_v55 = vsub.f32 %v564_v33, %v567_v52 }
 0x2d5   : > { %v569_v61 = vmul.f32 1.442695, %v568_v55  ;;  %v581_v55 = vand.u32 %v517_v46, %v2726_v30 }
 0x2d7   : > { %2210 = vpow2.f32 %v569_v61 }
 0x2e1   : > { %v2211_v19 = vpop.eup %2210 }
 0x2e2   : > { %v571_v21 = vsel %vm334_vm2, %v2211_v19, 0.0 }
 0x37d   : > { %v669_v53 = vpop.f32.mrb[4].mxu1 }
 0x37e   : > { %v1967_v54 = vpop.f32.mrb[5].mxu1  ;;  %v675_v8 = vmul.f32 0.125, %v669_v53 }
 0x37f   : > { %v672_v56 = vpop.f32.mrb[6].mxu1 }
 0x380   : > { %v2753_v57 = vpop.f32.mrb[4].mxu0  ;;  %v1968_v58 = vpop.f32.mrb[7].mxu1  ;;  %v676_v15 = vsel %vm334_vm2, %v675_v8, -inf }
 0x381   : > { %v1937_v59 = vpop.f32.mrb[5].mxu0 }
 0x382   : > { %v395_v60 = vpop.f32.mrb[6].mxu0 }
 0x383   : > { %v1938_v62 = vpop.f32.mrb[7].mxu0 }
 0x385   : > { %v783_v63 = vpop.f32.mrb[8].mxu1 }
 0x386   : > { %v1979_v1 = vpop.f32.mrb[9].mxu1  ;;  %v789_v11 = vmul.f32 0.125, %v783_v63 }
 0x387   : > { %v786_v2 = vpop.f32.mrb[10].mxu1 }
 0x388   : > { %v444_v3 = vpop.f32.mrb[8].mxu0  ;;  %v1980_v4 = vpop.f32.mrb[11].mxu1  ;;  %v790_v20 = vsel %vm334_vm2, %v789_v11, -inf }
 0x389   : > { %v450_v5 = vmul.f32 0.125, %v444_v3  ;;  %v1943_v6 = vpop.f32.mrb[9].mxu0  ;;  %v806_v3 = vand.u32 %v2763_v23, %v2726_v30 }
 0x38a   : > { %v447_v7 = vpop.f32.mrb[10].mxu0 }
 0x38b   : > { %v1944_v9 = vpop.f32.mrb[11].mxu0  ;;  %v451_v10 = vsel %vm334_vm2, %v450_v5, -inf }
 0x38c   : > { %452 = vmax.xlane.f32.xlu1 %v451_v10 }
 0x38d   : > { %v894_v12 = vpop.f32.mrb[12].mxu1 }
 0x38e   : > { %v900_v13 = vmul.f32 0.125, %v894_v12  ;;  %v1991_v14 = vpop.f32.mrb[13].mxu1 }
 0x38f   : > { %v897_v16 = vpop.f32.mrb[14].mxu1  ;;  %v2112_v14 = vld [vmem:[#allocation7 + $0x4] ss:$12 sps:$4 sm:$0xff]  }
 0x390   : > { %677 = vmax.xlane.f32.xlu1 %v676_v15  ;;  %v901_v17 = vsel %vm334_vm2, %v900_v13, -inf  ;;  %v1992_v18 = vpop.f32.mrb[15].mxu1  ;;  %v2115_v15 = vld [vmem:[#allocation7 + $0x1c] ss:$12 sps:$4 sm:$0xff]   ;;  %1477 = vmatprep.subr.bf16.mxu1 %v2112_v14  ;;  %v2113_v16 = vld [vmem:[#allocation7 + $0x18] ss:$12 sps:$4 sm:$0xff]  }
 0x391   : > { %902 = vmax.xlane.f32.xlu0 %v901_v17  ;;  %v2116_v17 = vld [vmem:[#allocation7 + $0x30] ss:$12 sps:$4 sm:$0xff]   ;;  %v2143_v18 = vld [vmem:[#allocation7 + $0x180] ss:$12 sps:$4 sm:$0xff]  }
 0x394   : > { %791 = vmax.xlane.f32.xlu1 %v790_v20  ;;  %v2121_v20 = vld [vmem:[#allocation7 + $0x4c] ss:$12 sps:$4 sm:$0xff]  }
 0x395   : > { %572 = vadd.xlane.f32.xlu0 %v571_v21  ;;  %v2151_v21 = vld [vmem:[#allocation7 + $0x19c] ss:$12 sps:$4 sm:$0xff]  }
 0x3ab   : > { %464 = vrot.lane.b32.xlu0 %v2724_v27, %s2434_s21 }
 0x3af   : > { %914 = vrot.lane.b32.xlu0 %v2763_v23, %s2434_s21  ;;  %v2119_v23 = vld [vmem:[#allocation7 + $0x48] ss:$12 sps:$4 sm:$0xff]  }
 0x419   : > { %v453_v24 = vpop.xlane.xlu1 %452 }
 0x41a   : > { %v454_v28 = vsub.f32 %v450_v5, %v453_v24  ;;  %v2157_v24 = vld [vmem:[#allocation7 + $0x1b4] ss:$12 sps:$4 sm:$0xff]  }
 0x41c   : > { %v455_v34 = vmul.f32 1.442695, %v454_v28  ;;  %v2122_v28 = vld [vmem:[#allocation7 + $0x60] ss:$12 sps:$4 sm:$0xff]  }
 0x41d   : > { %v678_v25 = vpop.xlane.xlu1 %677 }
 0x41e   : > { %v679_v26 = vsub.f32 %v675_v8, %v678_v25  ;;  %v903_v31 = vpop.xlane.xlu0 %902  ;;  %v2124_v25 = vld [vmem:[#allocation7 + $0x64] ss:$12 sps:$4 sm:$0xff]  }
 0x41f   : > { %v904_v35 = vsub.f32 %v900_v13, %v903_v31  ;;  %v2110_v13 = vld [vmem:[#allocation7] ss:$12 sps:$4 sm:$0xff]   ;;  %v2127_v31 = vld [vmem:[#allocation7 + $0x7c] ss:$12 sps:$4 sm:$0xff]  }
 0x420   : > { %v680_v29 = vmul.f32 1.442695, %v679_v26  ;;  %1478 = vmatpush1.bf16.msra.mxu1 %v2110_v13  ;;  %v2155_v26 = vld [vmem:[#allocation7 + $0x1b0] ss:$12 sps:$4 sm:$0xff]   ;;  %v2436_v13 = vmov 0  }
 0x421   : > { %v792_v32 = vpop.xlane.xlu1 %791  ;;  %v905_v27 = vmul.f32 1.442695, %v904_v35  ;;  %1479 = vmatprep.subr.bf16.mxu1 %v2115_v15  ;;  %v2128_v35 = vld [vmem:[#allocation7 + $0x90] ss:$12 sps:$4 sm:$0xff]  }
 0x422   : > { %2212 = vpow2.f32 %v680_v29  ;;  %v793_v33 = vsub.f32 %v789_v11, %v792_v32  ;;  %v573_v47 = vpop.xlane.xlu0 %572  ;;  %v2163_v29 = vld [vmem:[#allocation7 + $0x1cc] ss:$12 sps:$4 sm:$0xff]   ;;  %v2161_v32 = vld [vmem:[#allocation7 + $0x1c8] ss:$12 sps:$4 sm:$0xff]  }
 0x424   : > { %v794_v36 = vmul.f32 1.442695, %v793_v33  ;;  %1480 = vmatpush1.bf16.msra.mxu1 %v2113_v16  ;;  %v2125_v33 = vld [vmem:[#allocation7 + $0x78] ss:$12 sps:$4 sm:$0xff]  }
 0x426   : > { %2214 = vpow2.f32 %v794_v36  ;;  %v465_v48 = vpop.permute.xlu0 %464  ;;  %v2133_v36 = vld [vmem:[#allocation7 + $0xac] ss:$12 sps:$4 sm:$0xff]  }
 0x427   : > { %2216 = vpow2.f32 %v455_v34  ;;  %v470_v49 = vand.u32 %v465_v48, %v2726_v30  ;;  %v2130_v34 = vld [vmem:[#allocation7 + $0x94] ss:$12 sps:$4 sm:$0xff]   ;;  %v2158_v48 = vld [vmem:[#allocation7 + $0x138] ss:$12 sps:$4 sm:$0xff]  }
 0x428   : > { %2218 = vpow2.f32 %v905_v27  ;;  %v2131_v27 = vld [vmem:[#allocation7 + $0xa8] ss:$12 sps:$4 sm:$0xff]  }
 0x429   : > { %1946 = vmatpush3.bf16.msra.mxu0 %v470_v49  ;;  %v2166_v49 = vld [vmem:[#allocation7 + $0x154] ss:$12 sps:$4 sm:$0xff]  }
 0x42a   : > { %1957 = vmatprep.subr.bf16.mxu0 %v2432_v0  ;;  %v915_v7 = vpop.permute.xlu0 %914 }
 0x42b   : > { %v920_v8 = vand.u32 %v915_v7, %v2726_v30 }
 0x42c   : > { %v2213_v37 = vpop.eup %2212 }
 0x42d   : > { %v682_v38 = vsel %vm334_vm2, %v2213_v37, 0.0 }
 0x42e   : > { %683 = vadd.xlane.f32.xlu1 %v682_v38  ;;  %v2134_v38 = vld [vmem:[#allocation7 + $0xc0] ss:$12 sps:$4 sm:$0xff]  }
 0x430   : > { %v2215_v39 = vpop.eup %2214 }
 0x431   : > { %v796_v40 = vsel %vm334_vm2, %v2215_v39, 0.0  ;;  %v2217_v41 = vpop.eup %2216 }
 0x432   : > { %797 = vadd.xlane.f32.xlu1 %v796_v40  ;;  %v457_v42 = vsel %vm334_vm2, %v2217_v41, 0.0  ;;  %v2219_v43 = vpop.eup %2218  ;;  %v2137_v40 = vld [vmem:[#allocation7 + $0xd8] ss:$12 sps:$4 sm:$0xff]  }
 0x433   : > { %v907_v44 = vsel %vm334_vm2, %v2219_v43, 0.0 }
 0x436   : > { %458 = vadd.xlane.f32.xlu1 %v457_v42  ;;  %v2140_v42 = vld [vmem:[#allocation7 + $0xf0] ss:$12 sps:$4 sm:$0xff]  }
 0x43a   : > { %908 = vadd.xlane.f32.xlu1 %v907_v44  ;;  %v2146_v44 = vld [vmem:[#allocation7 + $0x108] ss:$12 sps:$4 sm:$0xff]  }
 0x44b   : > { %689 = vrot.lane.b32.xlu1 %v517_v46, %s2434_s21  ;;  %v2152_v46 = vld [vmem:[#allocation7 + $0x120] ss:$12 sps:$4 sm:$0xff]  }
 0x4bb   : > { %v684_v50 = vpop.xlane.xlu1 %683 }
 0x4bf   : > { %v798_v51 = vpop.xlane.xlu1 %797 }
 0x4c3   : > { %v459_v52 = vpop.xlane.xlu1 %458 }
 0x4c4   : > { %2220 = vrcp.f32 %v459_v52 }
 0x4c5   : > { %2222 = vrcp.f32 %v573_v47  ;;  %v2160_v47 = vld [vmem:[#allocation7 + $0x13c] ss:$12 sps:$4 sm:$0xff]  }
 0x4c6   : > { %2224 = vrcp.f32 %v684_v50  ;;  %v2164_v50 = vld [vmem:[#allocation7 + $0x150] ss:$12 sps:$4 sm:$0xff]  }
 0x4c7   : > { %v909_v56 = vpop.xlane.xlu1 %908  ;;  %2226 = vrcp.f32 %v798_v51 }
 0x4c8   : > { %2228 = vrcp.f32 %v909_v56  ;;  %v2167_v56 = vld [vmem:[#allocation7 + $0x1e0] ss:$12 sps:$4 sm:$0xff]  }
 0x4cb   : > { %v690_v61 = vpop.permute.xlu1 %689 }
 0x4cc   : > { %v695_v62 = vand.u32 %v690_v61, %v2726_v30  ;;  %v2118_v30 = vld [vmem:[#allocation7 + $0x34] ss:$12 sps:$4 sm:$0xff]  }
 0x4cd   : > { %1481 = vmatprep.subr.bf16.mxu1 %v2118_v30 }
 0x4ce   : > { %v2221_v53 = vpop.eup %2220  ;;  %1482 = vmatpush1.bf16.msra.mxu1 %v2116_v17 }
 0x4cf   : > { %v461_v54 = vmul.f32 %v2221_v53, %v2217_v41  ;;  %v2223_v59 = vpop.eup %2222  ;;  %1483 = vmatprep.subr.bf16.mxu1 %v2121_v20  ;;  %v2142_v41 = vld [vmem:[#allocation7 + $0xf4] ss:$12 sps:$4 sm:$0xff]  }
 0x4d0   : > { %v575_v60 = vmul.f32 %v2223_v59, %v2211_v19  ;;  %v2225_v1 = vpop.eup %2224  ;;  %v2145_v19 = vld [vmem:[#allocation7 + $0x184] ss:$12 sps:$4 sm:$0xff]   ;;  %v2170_v59 = vld [vmem:[#allocation7 + $0x168] ss:$12 sps:$4 sm:$0xff]  }
 0x4d1   : > { %v462_v58 = vpack.c.bf16 %v461_v54, %v461_v54  ;;  %v686_v2 = vmul.f32 %v2225_v1, %v2213_v37  ;;  %v2227_v5 = vpop.eup %2226  ;;  %v2136_v37 = vld [vmem:[#allocation7 + $0xc4] ss:$12 sps:$4 sm:$0xff]  }
 0x4d2   : > { %v576_v63 = vpack.c.bf16 %v575_v60, %v575_v60  ;;  %v800_v6 = vmul.f32 %v2227_v5, %v2215_v39  ;;  %v2229_v10 = vpop.eup %2228  ;;  %1484 = vmatpush1.bf16.msra.mxu1 %v2119_v23  ;;  %v2139_v39 = vld [vmem:[#allocation7 + $0xdc] ss:$12 sps:$4 sm:$0xff]  }
 0x4d3   : > { %1948 = vmatmul.mubr.msk.bf16.vlgmr.msra.gmra.mrb[12].mxu0 %vm347_vm5, %v462_v58  ;;  %v687_v4 = vpack.c.bf16 %v686_v2, %v686_v2  ;;  %v911_v11 = vmul.f32 %v2229_v10, %v2219_v43  ;;  %1485 = vmatprep.subr.bf16.mxu1 %v2124_v25  ;;  %v2148_v43 = vld [vmem:[#allocation7 + $0x10c] ss:$12 sps:$4 sm:$0xff]  }
 0x4d4   : > { %1958 = vmatpush3.bf16.msra.mxu0 %v581_v55  ;;  %1959 = vmatprep.mubr.msk.bf16.mxu0 %vm2433_vm0, %v2432_v0  ;;  %v801_v9 = vpack.c.bf16 %v800_v6, %v800_v6  ;;  %v2169_v55 = vld [vmem:[#allocation7 + $0x1e4] ss:$12 sps:$4 sm:$0xff]   ;;  %v2172_v58 = vld [vmem:[#allocation7 + $0x16c] ss:$12 sps:$4 sm:$0xff]  }
 0x4d5   : > { %1969 = vmatprep.subr.bf16.mxu0 %v2432_v0  ;;  %v912_v12 = vpack.c.bf16 %v911_v11, %v911_v11 }
 0x4d6   : > { %1486 = vmatpush1.bf16.msra.mxu1 %v2122_v28 }
 0x4d7   : > { %1487 = vmatprep.subr.bf16.mxu1 %v2127_v31  ;;  %v2180_v31 = vld [vmem:[#allocation7 + $0x1a0] ss:$12 sps:$4 sm:$0xff]  }
 0x4da   : > { %1488 = vmatpush1.bf16.msra.mxu1 %v2125_v33 }
 0x4db   : > { %1960 = vmatmul.mubr.msk.bf16.vlgmr.msra.gmra.mrb[16].mxu0 %vm347_vm5, %v576_v63  ;;  %1489 = vmatprep.subr.bf16.mxu1 %v2130_v34  ;;  %v2175_v63 = vld [vmem:[#allocation7 + $0x1fc] ss:$12 sps:$4 sm:$0xff]  }
 0x4dc   : > { %1970 = vmatpush3.bf16.msra.mxu0 %v695_v62  ;;  %1971 = vmatprep.mubr.msk.bf16.mxu0 %vm2433_vm0, %v2432_v0  ;;  %v2173_v62 = vld [vmem:[#allocation7 + $0x1f8] ss:$12 sps:$4 sm:$0xff]   ;;  %v2186_v34 = vld [vmem:[#allocation7 + $0x8] ss:$12 sps:$4 sm:$0xff]  }
 0x4dd   : > { %1981 = vmatprep.subr.bf16.mxu0 %v2432_v0 }
 0x4de   : > { %1490 = vmatpush1.bf16.msra.mxu1 %v2128_v35 }
 0x4df   : > { %1491 = vmatprep.subr.bf16.mxu1 %v2133_v36  ;;  %v2187_v36 = vld [vmem:[#allocation7 + $0x1d0] ss:$12 sps:$4 sm:$0xff]  }
 0x4e2   : > { %1492 = vmatpush1.bf16.msra.mxu1 %v2131_v27  ;;  %v2188_v27 = vld [vmem:[#allocation7 + $0xe0] ss:$12 sps:$4 sm:$0xff]  }
 0x4e3   : > { %1972 = vmatmul.mubr.msk.bf16.vlgmr.msra.gmra.mrb[20].mxu0 %vm347_vm5, %v687_v4  ;;  %1493 = vmatprep.subr.bf16.mxu1 %v2136_v37  ;;  %v2179_v4 = vld [vmem:[#allocation7 + $0x214] ss:$12 sps:$4 sm:$0xff]  }
 0x4e4   : > { %1982 = vmatpush3.bf16.msra.mxu0 %v806_v3  ;;  %1983 = vmatprep.mubr.msk.bf16.mxu0 %vm2433_vm0, %v2432_v0  ;;  %v2177_v3 = vld [vmem:[#allocation7 + $0x210] ss:$12 sps:$4 sm:$0xff]   ;;  %v2189_v37 = vld [vmem:[#allocation7 + $0x20] ss:$12 sps:$4 sm:$0xff]  }
 0x4e5   : > { %1993 = vmatprep.subr.bf16.mxu0 %v2432_v0 }
 0x4e6   : > { %1494 = vmatpush1.bf16.msra.mxu1 %v2134_v38  ;;  %v2190_v38 = vld [vmem:[#allocation7 + $0x1e8] ss:$12 sps:$4 sm:$0xff]  }
 0x4e7   : > { %1495 = vmatprep.subr.bf16.mxu1 %v2139_v39  ;;  %v2191_v39 = vld [vmem:[#allocation7 + $0xf8] ss:$12 sps:$4 sm:$0xff]  }
 0x4ea   : > { %1496 = vmatpush1.bf16.msra.mxu1 %v2137_v40  ;;  %v2192_v40 = vld [vmem:[#allocation7 + $0x38] ss:$12 sps:$4 sm:$0xff]  }
 0x4eb   : > { %1984 = vmatmul.mubr.msk.bf16.vlgmr.msra.gmra.mrb[24].mxu0 %vm347_vm5, %v801_v9  ;;  %1497 = vmatprep.subr.bf16.mxu1 %v2142_v41  ;;  %v2183_v9 = vld [vmem:[#allocation7 + $0x22c] ss:$12 sps:$4 sm:$0xff]  }
 0x4ec   : > { %1994 = vmatpush3.bf16.msra.mxu0 %v920_v8  ;;  %1995 = vmatprep.mubr.msk.bf16.mxu0 %vm2433_vm0, %v2432_v0  ;;  %v2181_v8 = vld [vmem:[#allocation7 + $0x228] ss:$12 sps:$4 sm:$0xff]   ;;  %v2193_v41 = vld [vmem:[#allocation7 + $0x200] ss:$12 sps:$4 sm:$0xff]  }
 0x4ed   : > { %1518 = vmatprep.subr.bf16.mxu0 %v2145_v19 }
 0x4ee   : > { %1498 = vmatpush1.bf16.msra.mxu1 %v2140_v42  ;;  %v2194_v42 = vld [vmem:[#allocation7 + $0x110] ss:$12 sps:$4 sm:$0xff]  }
 0x4ef   : > { %1499 = vmatprep.subr.bf16.mxu1 %v2148_v43  ;;  %v2195_v43 = vld [vmem:[#allocation7 + $0x50] ss:$12 sps:$4 sm:$0xff]  }
 0x4f2   : > { %1500 = vmatpush1.bf16.msra.mxu1 %v2146_v44  ;;  %v2196_v44 = vld [vmem:[#allocation7 + $0x218] ss:$12 sps:$4 sm:$0xff]  }
 0x4f3   : > { %1996 = vmatmul.mubr.msk.bf16.vlgmr.msra.gmra.mrb[28].mxu0 %vm347_vm5, %v912_v12  ;;  %1501 = vmatprep.subr.bf16.mxu1 %v2154_v45  ;;  %v2185_v12 = vld [vmem:[#allocation7 + $0xc8] ss:$12 sps:$4 sm:$0xff]  }
 0x4f4   : > { %1519 = vmatpush1.bf16.msra.mxu0 %v2143_v18  ;;  %1550 = vmatprep.mubr.bf16.mxu0 %v2436_v13  ;;  %v2197_v45 = vld [vmem:[#allocation7 + $0x128] ss:$12 sps:$4 sm:$0xff]  }
 0x4f5   : > { %1520 = vmatprep.subr.bf16.mxu0 %v2151_v21 }
 0x4f6   : > { %1502 = vmatpush1.bf16.msra.mxu1 %v2152_v46  ;;  %v2198_v46 = vld [vmem:[#allocation7 + $0x68] ss:$12 sps:$4 sm:$0xff]  }
 0x4f7   : > { %1503 = vmatprep.subr.bf16.mxu1 %v2160_v47  ;;  %v2199_v47 = vld [vmem:[#allocation7 + $0x230] ss:$12 sps:$4 sm:$0xff]  }
 0x4f8   : > { %1521 = vmatpush1.bf16.msra.mxu0 %v2149_v22 }
 0x4f9   : > { %1522 = vmatprep.subr.bf16.mxu0 %v2157_v24 }
 0x4fa   : > { %1504 = vmatpush1.bf16.msra.mxu1 %v2158_v48  ;;  %v2200_v48 = vld [vmem:[#allocation7 + $0x140] ss:$12 sps:$4 sm:$0xff]  }
 0x4fb   : > { %1505 = vmatprep.subr.bf16.mxu1 %v2166_v49  ;;  %v2201_v49 = vld [vmem:[#allocation7 + $0x80] ss:$12 sps:$4 sm:$0xff]  }
 0x4fc   : > { %1523 = vmatpush1.bf16.msra.mxu0 %v2155_v26 }
 0x4fd   : > { %1524 = vmatprep.subr.bf16.mxu0 %v2163_v29  ;;  %v2176_v29 = vld [vmem:[#allocation7 + $0x188] ss:$12 sps:$4 sm:$0xff]  }
 0x4fe   : > { %1506 = vmatpush1.bf16.msra.mxu1 %v2164_v50  ;;  %v2202_v50 = vld [vmem:[#allocation7 + $0x158] ss:$12 sps:$4 sm:$0xff]  }
 0x4ff   : > { %1507 = vmatprep.subr.bf16.mxu1 %v2172_v58 }
 0x500   : > { %1525 = vmatpush1.bf16.msra.mxu0 %v2161_v32  ;;  %v2184_v32 = vld [vmem:[#allocation7 + $0x1b8] ss:$12 sps:$4 sm:$0xff]  }
 0x501   : > { %1526 = vmatprep.subr.bf16.mxu0 %v2169_v55 }
 0x502   : > { %1508 = vmatpush1.bf16.msra.mxu1 %v2170_v59 }
 0x503   : > { %1999 = vmatprep.subr.bf16.mxu1 %v2432_v0 }
 0x504   : > { %1527 = vmatpush1.bf16.msra.mxu0 %v2167_v56 }
 0x505   : > { %1528 = vmatprep.subr.bf16.mxu0 %v2175_v63 }
 0x508   : > { %1529 = vmatpush1.bf16.msra.mxu0 %v2173_v62 }
 0x509   : > { %1530 = vmatprep.subr.bf16.mxu0 %v2179_v4 }
 0x50c   : > { %1531 = vmatpush1.bf16.msra.mxu0 %v2177_v3 }
 0x50d   : > { %1532 = vmatprep.subr.bf16.mxu0 %v2183_v9 }
 0x510   : > { %1533 = vmatpush1.bf16.msra.mxu0 %v2181_v8  ;;  %v1640_v8 = vld [vmem:[%s2680_s30 + $0x8] sm:$0x1f] }
 0x511   : > { %1896 = vmatprep.subr.bf16.mxu0 %v2185_v12 }
 0x5a6   : > { %v506_v51 = vpop.f32.mrb[12].mxu0 }
 0x5a7   : > { %v1949_v52 = vpop.f32.mrb[13].mxu0 }
 0x5a8   : > { %v509_v53 = vpop.f32.mrb[14].mxu0  ;;  %v2204_v52 = vld [vmem:[#allocation7 + $0x170] ss:$12 sps:$4 sm:$0xff]  }
 0x5a9   : > { %v1950_v54 = vpop.f32.mrb[15].mxu0  ;;  %v2205_v53 = vld [vmem:[#allocation7 + $0xb0] ss:$12 sps:$4 sm:$0xff]  }
 0x5aa   : > { %v1078_v54 = vlaneseq }
 0x5ac   : > { %v1079_v55 = vshrl.u32 %v1078_v54, 7 }
 0x5ae   : > { %v617_v60 = vpop.f32.mrb[16].mxu0  ;;  %v1080_v58 = vsub.s32 0, %v1079_v55 }
 0x5af   : > { %v1961_v61 = vpop.f32.mrb[17].mxu0 }
 0x5b0   : > { %v620_v1 = vpop.f32.mrb[18].mxu0  ;;  %v1084_v61 = vsub.s32 1, %v1079_v55 }
 0x5b1   : > { %v1962_v2 = vpop.f32.mrb[19].mxu0 }
 0x5b6   : > { %v731_v5 = vpop.f32.mrb[20].mxu0 }
 0x5b7   : > { %v2105_v6 = vpack.i.bf16 %v506_v51, %v731_v5  ;;  %v1973_v7 = vpop.f32.mrb[21].mxu0  ;;  %v2203_v51 = vld [vmem:[#allocation7 + $0x98] ss:$12 sps:$4 sm:$0xff]   ;;  %v1639_v5 = vld [vmem:[%s2680_s30] sm:$0x1f] }
 0x5b8   : > { %v734_v10 = vpop.f32.mrb[22].mxu0 }
 0x5b9   : > { %2106 = vrot.lane.b32.xlu1 %v2105_v6, %s2434_s21  ;;  %v1974_v11 = vpop.f32.mrb[23].mxu0 }
 0x5be   : > { %v842_v14 = vpop.f32.mrb[24].mxu0 }
 0x5bf   : > { %v1985_v15 = vpop.f32.mrb[25].mxu0 }
 0x5c0   : > { %v845_v16 = vpop.f32.mrb[26].mxu0 }
 0x5c1   : > { %v1986_v30 = vpop.f32.mrb[27].mxu0 }
 0x5c6   : > { %v956_v17 = vpop.f32.mrb[28].mxu0 }
 0x5c7   : > { %971 = vrot.lane.b32.xlu0 %v956_v17, %s2434_s21  ;;  %v1997_v18 = vpop.f32.mrb[29].mxu0  ;;  %v1088_v17 = vsub.s32 2, %v1079_v55 }
 0x5c8   : > { %v959_v19 = vpop.f32.mrb[30].mxu0 }
 0x5c9   : > { %v1998_v20 = vpop.f32.mrb[31].mxu0 }
 0x62b   : > { %v2107_v21 = vpop.permute.xlu1 %2106 }
 0x62c   : > { %v2109_v22 = vunpack.i.h.bf16 %v2107_v21  ;;  %v2108_v23 = vunpack.i.l.bf16 %v2107_v21 }
 0x62e   : > { %v974_v24 = vsel %vm286_vm1, %v2753_v57, %v2109_v22  ;;  %v975_v25 = vsel %vm286_vm1, %v617_v60, %v2108_v23  ;;  %v1076_v60 = vld [vmem:[#allocation8] sm:$0x7] }
 0x62f   : > { %v2802_v26 = vpack.c.bf16 %v974_v24, %v974_v24  ;;  %v978_v28 = vpack.c.bf16 %v975_v25, %v975_v25  ;;  %v1081_v63 = vrot.slane %v1076_v60, %v1080_v58  ;;  %v1085_v1 = vrot.slane %v1076_v60, %v1084_v61  ;;  %v1641_v25 = vld [vmem:[%s2680_s30 + $0x10] sm:$0x1f] }
 0x630   : > { %v1089_v19 = vrot.slane %v1076_v60, %v1088_v17 }
 0x631   : > { %1509 = vmatprep.mubr.bf16.mxu1 %v978_v28 }
 0x632   : > { %1510 = vmatmul.mubr.bf16.vlgmr.msra.gmra.mrb[16].mxu1 %v2802_v26 }
 0x633   : > { %2000 = vmatpush3.bf16.msra.mxu1 %v2176_v29  ;;  %2015 = vmatprep.mubr.msk.bf16.mxu1 %vm2433_vm0, %v2432_v0 }
 0x634   : > { %2001 = vmatprep.subr.bf16.mxu1 %v2432_v0 }
 0x637   : > { %2002 = vmatpush3.bf16.msra.mxu1 %v2180_v31 }
 0x638   : > { %2003 = vmatprep.subr.bf16.mxu1 %v2432_v0 }
 0x639   : > { %v972_v57 = vpop.permute.xlu0 %971 }
 0x63a   : > { %v976_v33 = vsel %vm286_vm1, %v842_v14, %v972_v57 }
 0x63b   : > { %v979_v35 = vpack.c.bf16 %v976_v33, %v976_v33  ;;  %2004 = vmatpush3.bf16.msra.mxu1 %v2184_v32 }
 0x63c   : > { %2005 = vmatprep.subr.bf16.mxu1 %v2432_v0 }
 0x63d   : > { %1551 = vmatmul.mubr.bf16.vlgmr.msra.gmra.mrb[32].mxu0 %v979_v35 }
 0x63e   : > { %1897 = vmatpush3.bf16.msra.mxu0 %v2186_v34  ;;  %1591 = vmatprep.mubr.bf16.mxu0 %v978_v28 }
 0x63f   : > { %2006 = vmatpush3.bf16.msra.mxu1 %v2187_v36  ;;  %1898 = vmatprep.subr.bf16.mxu0 %v2188_v27 }
 0x640   : > { %2007 = vmatprep.subr.bf16.mxu1 %v2432_v0 }
 0x642   : > { %1899 = vmatpush3.bf16.msra.mxu0 %v2189_v37 }
 0x643   : > { %2008 = vmatpush3.bf16.msra.mxu1 %v2190_v38  ;;  %1900 = vmatprep.subr.bf16.mxu0 %v2191_v39 }
 0x644   : > { %2009 = vmatprep.subr.bf16.mxu1 %v2432_v0 }
 0x646   : > { %1901 = vmatpush3.bf16.msra.mxu0 %v2192_v40 }
 0x647   : > { %2010 = vmatpush3.bf16.msra.mxu1 %v2193_v41  ;;  %1902 = vmatprep.subr.bf16.mxu0 %v2194_v42 }
 0x648   : > { %2011 = vmatprep.subr.bf16.mxu1 %v2432_v0 }
 0x64a   : > { %1903 = vmatpush3.bf16.msra.mxu0 %v2195_v43 }
 0x64b   : > { %2012 = vmatpush3.bf16.msra.mxu1 %v2196_v44  ;;  %1904 = vmatprep.subr.bf16.mxu0 %v2197_v45 }
 0x64c   : > { %2013 = vmatprep.subr.bf16.mxu1 %v2432_v0 }
 0x64e   : > { %1905 = vmatpush3.bf16.msra.mxu0 %v2198_v46 }
 0x64f   : > { %2014 = vmatpush3.bf16.msra.mxu1 %v2199_v47  ;;  %1906 = vmatprep.subr.bf16.mxu0 %v2200_v48 }
 0x652   : > { %1907 = vmatpush3.bf16.msra.mxu0 %v2201_v49  ;;  %2016 = vmatmul.mubr.bf16.vlgmr.msra.gmra.mrb[20].mxu1 %v979_v35 }
 0x653   : > { %1908 = vmatprep.subr.bf16.mxu0 %v2202_v50 }
 0x656   : > { %1909 = vmatpush3.bf16.msra.mxu0 %v2203_v51 }
 0x657   : > { %1910 = vmatprep.subr.bf16.mxu0 %v2204_v52 }
 0x65a   : > { %1911 = vmatpush3.bf16.msra.mxu0 %v2205_v53 }
 0x65d   : > { %1592 = vmatmul.mubr.bf16.vlgmr.msra.gmra.mrb[36].mxu0 %v2802_v26 }
 0x705   : > { %v1511_v0 = vpop.f32.mrb[16].mxu1 }
 0x706   : > { %v1513_v56 = vpop.f32.mrb[17].mxu1  ;;  %v1512_v2 = vadd.f32 %v1511_v0, %v1081_v63 }
 0x707   : > { %v1515_v59 = vpop.f32.mrb[18].mxu1  ;;  %v1514_v3 = vadd.f32 %v1513_v56, %v1085_v1 }
 0x708   : > { %v1516_v62 = vpop.f32.mrb[19].mxu1 }
 0x710   : > { %v1552_v4 = vpop.f32.mrb[32].mxu0 }
 0x711   : > { %v1553_v6 = vadd.f32 %v1552_v4, %v1512_v2  ;;  %v1554_v7 = vpop.f32.mrb[33].mxu0 }
 0x712   : > { %v1555_v9 = vadd.f32 %v1554_v7, %v1514_v3  ;;  %v1556_v10 = vpop.f32.mrb[34].mxu0 }
 0x713   : > { %v1642_v11 = vadd.f32 %v1639_v5, %v1553_v6  ;;  %v1557_v12 = vpop.f32.mrb[35].mxu0 }
 0x714   : > { %v1643_v13 = vadd.f32 %v1640_v8, %v1555_v9 }
 0x715   : > { %1645 = vst [vmem:[%s278_s6] sm:$0x1f] %v1642_v11 }
 0x716   : > { %1646 = vst [vmem:[%s278_s6 + $0x8] sm:$0x1f] %v1643_v13 }
 0x725   : > { %v1633_v14 = vpop.f32.mrb[20].mxu1 }
 0x726   : > { %v2017_v15 = vpop.f32.mrb[21].mxu1 }
 0x727   : > { %v1636_v16 = vpop.f32.mrb[22].mxu1 }
 0x728   : > { %v2018_v30 = vpop.f32.mrb[23].mxu1 }
 0x730   : > { %v1912_v18 = vpop.f32.mrb[36].mxu0 }
 0x731   : > { %v1913_v20 = vpop.f32.mrb[37].mxu0 }
 0x732   : > { %v1914_v21 = vadd.f32 %v1913_v20, %v1912_v18  ;;  %v1915_v22 = vpop.f32.mrb[38].mxu0 }
 0x733   : > { %v1916_v23 = vpop.f32.mrb[39].mxu0 }
 0x734   : > { %v1594_v24 = vadd.f32 %v1914_v21, %v1089_v19 }
 0x736   : > { %v1634_v26 = vadd.f32 %v1633_v14, %v1594_v24 }
 0x738   : > { %v1644_v28 = vadd.f32 %v1641_v25, %v1634_v26 }
 0x73a   : > { %1647 = vst [vmem:[%s278_s6 + $0x10] sm:$0x1f] %v1644_v28 }
 0x73b   : > { %2359 = shalt.err (!%p2356_p7)
}
 0x73c   : > { %s2360_s28 = scalar_lea.hbm %s2825_s8, 384  ;;  %s2364_s24 = scalar_lea.hbm %s2873_s4, 768 }
 0x73d   : > { %p2361_p1 = scmp.ne.s32.totalorder %s2825_s8, %s2360_s28  ;;  %p2365_p0 = scmp.lt.u32.totalorder %s2825_s8, %s2873_s4 }
 0x73e   : > { %p2366_p9 = scmp.lt.u32.totalorder %s2364_s24, %s2360_s28  ;;  %p2368_p2 = scmp.lt.u32.totalorder %s2360_s28, %s2825_s8 }
 0x73f   : > { %p2362_p8 = pnand %p2361_p1, %p2891_p13 }
 0x740   : > { %p2367_p12 = por %p2366_p9, %p2365_p0 }
 0x741   : > { %p2363_p11 = pneg %p2362_p8 }
 0x742   : > { %p2369_p6 = por %p2368_p2, %p2367_p12 }
 0x744   : > { %p2370_p10 = pnand %p2369_p6, %p2363_p11 }
 0x746   : > { %2373 = shalt.err (!%p2370_p10)
}
 0x747   : > { %2038 = dma.vmem_to_hbm [thread:$0]  (%p2891_p13), %s2827_s7, 384, %s2825_s8, %s1649_s11  }
 0x748 PF: > { %s1675_s21 = sand.u32 1, %s2412_s15   ;;  %p2892_p4 = scmp.ne.s32.totalorder %s2879_s22, 0 }
 0x749   : > { %p2893_p5 = scmp.ge.s32.totalorder %s2424_s18, 2  ;;  %s1676_s6 = scalar_lea.sflag [#allocation4], %s1675_s21 }
 0x74b   : > { %p2055_p3 = pnand %p2893_p5, %p2892_p4 }
 0x74d   : > { %2407 = dma.done.wait (!%p2055_p3), %s1676_s6, 384  }
 0x74e   : > { %2409 = vsyncadd (!%p2055_p3), %s1676_s6, 4294966912  ;;  %p21_p7 = scmp.ge.s32.totalorder %s2574_s10, 4   ;;  %s2894_s15 = smov %s2416_s16 }
 0x74f   : > { %s2895_s16 = smov %s2420_s17  ;;  %s2896_s17 = smov %s2590_s13 }
 0x750   : > { %s2897_s18 = smov %s2574_s10  ;;  %23 = sbr.rel (!%p21_p7) target bundleno = 8 (0x8), region = 102 }
 0x757   :  { %1681 = vsyncpa [#allocation3], 1 }
 0x758   :  { %1683 = vsyncpa [#allocation3 + $0x1], 1 }
 0x759   :  { %1684 = vsyncpa [#allocation6], 1 }
 0x75a   :  { %1686 = vsyncpa [#allocation6 + $0x1], 1 }
 0x75b   :  { %1687 = vsyncpa [#allocation9], 1 }
 0x75c   :  { %1688 = vsyncpa [#allocation4], 1 }
 0x75d   :  { %1690 = vsyncpa [#allocation4 + $0x1], 1 }

// kernel: fsra_forward.16
= control target key start
LH: loop header
LB: loop body
LE: loop exit
PB: predicated region body
PF: predicated region fallthrough
CT: control target
= control target key end

     0   :  { %8 = vsyncpa [#allocation3], 0  ;;  %s375_s0 = inlined_call_operand.hbm [shape: f32[10,384], index: 0, kind: input, shape index: {}]   ;;  %s376_s1 = inlined_call_operand.hbm [shape: f32[1,384], index: 1, kind: input, shape index: {}]   ;;  %s377_s2 = inlined_call_operand.hbm [shape: f32[1,384], index: 2, kind: input, shape index: {}]   ;;  %s378_s3 = inlined_call_operand.hbm [shape: f32[10,384], index: 3, kind: output, shape index: {}]  }
   0x1   :  { %9 = vsyncpa [#allocation6], 0 }
   0x2   :  { %10 = vsyncpa [#allocation4], 0  ;;  %s282_s12 = smov [#allocation5]   ;;  %s283_s14 = smov [#allocation2]  }
   0x3   :  { %s29_s13 = sshll.u32 %s282_s12, 4  ;;  %s16_s15 = sshll.u32 %s283_s14, 4  ;;  %s30_s13 = int_to_ptr.vmem [resolvable:$true] %s29_s13  ;;  %s308_s15 = int_to_ptr.vmem [resolvable:$true] %s16_s15 }
   0x4   :  { %s188_s18 = scalar_lea.hbm %s376_s1, 48 }
   0x5   :  { %p189_p0 = scmp.ne.s32.totalorder %s376_s1, %s188_s18  ;;  %p192_p1 = scmp.lt.u32.totalorder %s188_s18, %s376_s1 }
   0x7   :  { %p194_p2 = pnand %p192_p1, %p189_p0 }
   0x9   :  { %197 = shalt.err (!%p194_p2)
}
   0xa   :  { %s198_s23 = scalar_lea.vmem %s30_s13, 48  ;;  %s202_s24 = scalar_lea.vmem %s30_s13, 64 }
   0xb   :  { %p199_p3 = scmp.ne.s32.totalorder %s30_s13, %s198_s23  ;;  %p203_p4 = scmp.lt.s32.totalorder %s30_s13, %s30_s13 }
   0xc   :  { %p204_p5 = scmp.lt.s32.totalorder %s202_s24, %s198_s23 }
   0xe   :  { %p205_p6 = por %p204_p5, %p203_p4 }
  0x10   :  { %p206_p7 = pnand %p205_p6, %p199_p3 }
  0x12   :  { %209 = shalt.err (!%p206_p7)
}
  0x13   :  { %32 = dma.hbm_to_vmem [thread:$0]  %s376_s1, 48, %s30_s13, [#allocation6]  }
  0x14   :  { %s210_s29 = scalar_lea.hbm %s375_s0, 768 }
  0x15   :  { %p211_p8 = scmp.ne.s32.totalorder %s375_s0, %s210_s29  ;;  %p214_p9 = scmp.lt.u32.totalorder %s210_s29, %s375_s0 }
  0x17   :  { %p216_p10 = pnand %p214_p9, %p211_p8 }
  0x19   :  { %219 = shalt.err (!%p216_p10)
}
  0x1a   :  { %s220_s7 = scalar_lea.vmem %s308_s15, 768  ;;  %p225_p12 = scmp.lt.s32.totalorder %s308_s15, %s308_s15 }
  0x1b   :  { %p221_p11 = scmp.ne.s32.totalorder %s308_s15, %s220_s7  ;;  %p226_p13 = scmp.lt.s32.totalorder %s220_s7, %s220_s7 }
  0x1d   :  { %p227_p0 = por %p226_p13, %p225_p12 }
  0x1f   :  { %p228_p1 = pnand %p227_p0, %p221_p11 }
  0x21   :  { %231 = shalt.err (!%p228_p1)
}
  0x22   :  { %s284_s1 = smov 384   ;;  %s285_s8 = smov 24  }
  0x23   :  { %22 = dma.hbm_to_vmem [thread:$0]  %s375_s0, 768, %s308_s15, [#allocation3], %s284_s1, %s284_s1, %s285_s8  }
  0x24   :  { %s286_s11 = smov [#allocation7]   ;;  %s232_s16 = scalar_lea.hbm %s377_s2, 48 }
  0x25   :  { %s39_s12 = sshll.u32 %s286_s11, 4  ;;  %p233_p2 = scmp.ne.s32.totalorder %s377_s2, %s232_s16  ;;  %s40_s12 = int_to_ptr.vmem [resolvable:$true] %s39_s12 }
  0x26   :  { %p236_p3 = scmp.lt.u32.totalorder %s232_s16, %s377_s2 }
  0x28   :  { %p238_p4 = pnand %p236_p3, %p233_p2 }
  0x2a   :  { %241 = shalt.err (!%p238_p4)
}
  0x2b   :  { %s242_s21 = scalar_lea.vmem %s40_s12, 48  ;;  %s246_s0 = scalar_lea.vmem %s40_s12, 64 }
  0x2c   :  { %p243_p5 = scmp.ne.s32.totalorder %s40_s12, %s242_s21  ;;  %p247_p6 = scmp.lt.s32.totalorder %s40_s12, %s40_s12 }
  0x2d   :  { %p248_p7 = scmp.lt.s32.totalorder %s246_s0, %s242_s21 }
  0x2f   :  { %p249_p8 = por %p248_p7, %p247_p6 }
  0x31   :  { %p250_p9 = pnand %p249_p8, %p243_p5 }
  0x33   :  { %253 = shalt.err (!%p250_p9)
}
  0x34   :  { %42 = dma.hbm_to_vmem [thread:$0]  %s377_s2, 48, %s40_s12, [#allocation6]  }
  0x35   :  { %276 = dma.done.wait [#allocation3], 768  }
  0x36   :  { %277 = vsyncadd [#allocation3], 4294966528 }
  0x37   :  { %278 = dma.done.wait [#allocation6], 96  }
  0x38   :  { %279 = vsyncadd [#allocation6], 4294967200  ;;  %vm62_vm0 = vcmask 1041408   ;;  %v55_v0 = vld [vmem:[#allocation2 + $0x18] sm:$0x3]  ;;  %v52_v6 = vld [vmem:[#allocation2] sm:$0xff]  ;;  %v110_v38 = vlaneseq }
  0x39   :  { %v56_v1 = vld [vmem:[#allocation2 + $0x20] sm:$0x3]  ;;  %v57_v2 = vld [vmem:[#allocation2 + $0x28] sm:$0x3]  ;;  %v63_v3 = vsel %vm62_vm0, %v55_v0, 0.0  ;;  %v54_v10 = vld [vmem:[#allocation2 + $0x10] sm:$0xff] }
  0x3a   :  { %v64_v4 = vsel %vm62_vm0, %v56_v1, 0.0  ;;  %v66_v5 = vsel %vm62_vm0, %v57_v2, 0.0  ;;  %v53_v7 = vld [vmem:[#allocation2 + $0x8] sm:$0xff]  ;;  %v111_v42 = vshrl.u32 %v110_v38, 7  ;;  %v108_v47 = vld [vmem:[#allocation5] sm:$0x7] }
  0x3b   :  { %v65_v8 = vadd.f32 %v64_v4, %v63_v3  ;;  %v58_v9 = vadd.f32 %v53_v7, %v52_v6  ;;  %v131_v48 = vld [vmem:[#allocation7] sm:$0x7]  ;;  %s287_s2 = smov [#allocation8]  }
  0x3c   :  { %v112_v44 = vsub.s32 0, %v111_v42  ;;  %v116_v45 = vsub.s32 1, %v111_v42  ;;  %v120_v46 = vsub.s32 2, %v111_v42  ;;  %s165_s23 = sshll.u32 %s287_s2, 4  ;;  %s166_s23 = int_to_ptr.vmem [resolvable:$true] %s165_s23 }
  0x3d   :  { %v67_v11 = vadd.f32 %v66_v5, %v65_v8  ;;  %v59_v12 = vadd.f32 %v58_v9, %v54_v10  ;;  %s254_s24 = scalar_lea.vmem %s166_s23, 768  ;;  %p259_p11 = scmp.lt.s32.totalorder %s166_s23, %s166_s23 }
  0x3e   :  { %v113_v49 = vrot.slane %v108_v47, %v112_v44  ;;  %v117_v50 = vrot.slane %v108_v47, %v116_v45  ;;  %v121_v51 = vrot.slane %v108_v47, %v120_v46  ;;  %v136_v56 = vrot.slane %v131_v48, %v112_v44  ;;  %p255_p10 = scmp.ne.s32.totalorder %s166_s23, %s254_s24  ;;  %p260_p12 = scmp.lt.s32.totalorder %s254_s24, %s254_s24 }
  0x3f   :  { %68 = vadd.xlane.f32.xlu0 %v67_v11  ;;  %v140_v57 = vrot.slane %v131_v48, %v116_v45  ;;  %v144_v58 = vrot.slane %v131_v48, %v120_v46 }
  0x40   :  { %p261_p13 = por %p260_p12, %p259_p11 }
  0x42   :  { %p262_p0 = pnand %p261_p13, %p255_p10 }
  0x43   :  { %60 = vadd.xlane.f32.xlu0 %v59_v12 }
  0xcc   :  { %v69_v13 = vpop.xlane.xlu0 %68 }
  0xcd   :  { %v72_v14 = vmul.f32 0.0026041667, %v69_v13 }
  0xcf   :  { %v76_v15 = vsub.f32 %v55_v0, %v72_v14  ;;  %v77_v16 = vsub.f32 %v56_v1, %v72_v14  ;;  %v78_v24 = vsub.f32 %v57_v2, %v72_v14 }
  0xd0   :  { %v61_v17 = vpop.xlane.xlu0 %60 }
  0xd1   :  { %v71_v18 = vmul.f32 0.0026041667, %v61_v17  ;;  %v82_v19 = vmul.f32 %v76_v15, %v76_v15  ;;  %v83_v20 = vmul.f32 %v77_v16, %v77_v16  ;;  %v84_v31 = vmul.f32 %v78_v24, %v78_v24 }
  0xd3   :  { %v73_v21 = vsub.f32 %v52_v6, %v71_v18  ;;  %v74_v22 = vsub.f32 %v53_v7, %v71_v18  ;;  %v75_v23 = vsub.f32 %v54_v10, %v71_v18  ;;  %v89_v27 = vsel %vm62_vm0, %v82_v19, 0.0 }
  0xd4   :  { %v90_v28 = vsel %vm62_vm0, %v83_v20, 0.0  ;;  %v92_v34 = vsel %vm62_vm0, %v84_v31, 0.0 }
  0xd5   :  { %v79_v25 = vmul.f32 %v73_v21, %v73_v21  ;;  %v80_v26 = vmul.f32 %v74_v22, %v74_v22  ;;  %v81_v29 = vmul.f32 %v75_v23, %v75_v23  ;;  %v91_v33 = vadd.f32 %v90_v28, %v89_v27 }
  0xd7   :  { %v85_v30 = vadd.f32 %v80_v26, %v79_v25  ;;  %v93_v35 = vadd.f32 %v92_v34, %v91_v33 }
  0xd9   :  { %v86_v32 = vadd.f32 %v85_v30, %v81_v29 }
  0xdb   :  { %87 = vadd.xlane.f32.xlu1 %v86_v32 }
  0xdf   :  { %94 = vadd.xlane.f32.xlu1 %v93_v35 }
 0x168   :  { %v88_v36 = vpop.xlane.xlu1 %87 }
 0x169   :  { %v96_v37 = vmul.f32 0.0026041667, %v88_v36 }
 0x16b   :  { %v98_v39 = vadd.f32 1e-06, %v96_v37 }
 0x16c   :  { %v95_v40 = vpop.xlane.xlu1 %94 }
 0x16d   :  { %184 = vrsqrt.f32 %v98_v39  ;;  %v97_v41 = vmul.f32 0.0026041667, %v95_v40 }
 0x16f   :  { %v99_v43 = vadd.f32 1e-06, %v97_v41 }
 0x171   :  { %186 = vrsqrt.f32 %v99_v43 }
 0x177   :  { %v185_v52 = vpop.eup %184 }
 0x178   :  { %v102_v53 = vmul.f32 %v185_v52, %v73_v21  ;;  %v103_v54 = vmul.f32 %v185_v52, %v74_v22  ;;  %v104_v55 = vmul.f32 %v185_v52, %v75_v23 }
 0x17a   :  { %v125_v59 = vmul.f32 %v113_v49, %v102_v53  ;;  %v126_v60 = vmul.f32 %v117_v50, %v103_v54  ;;  %v127_v61 = vmul.f32 %v121_v51, %v104_v55 }
 0x17b   :  { %v187_v62 = vpop.eup %186 }
 0x17c   :  { %v105_v63 = vmul.f32 %v187_v62, %v76_v15  ;;  %v106_v0 = vmul.f32 %v187_v62, %v77_v16  ;;  %v107_v1 = vmul.f32 %v187_v62, %v78_v24  ;;  %v148_v2 = vadd.f32 %v136_v56, %v125_v59 }
 0x17d   :  { %v149_v3 = vadd.f32 %v140_v57, %v126_v60  ;;  %v150_v4 = vadd.f32 %v144_v58, %v127_v61 }
 0x17e   :  { %v128_v5 = vmul.f32 %v113_v49, %v105_v63  ;;  %v129_v6 = vmul.f32 %v117_v50, %v106_v0  ;;  %v130_v7 = vmul.f32 %v121_v51, %v107_v1  ;;  %154 = vst [vmem:[#allocation8] sm:$0xff] %v148_v2 }
 0x17f   :  { %155 = vst [vmem:[#allocation8 + $0x8] sm:$0xff] %v149_v3  ;;  %156 = vst [vmem:[#allocation8 + $0x10] sm:$0xff] %v150_v4 }
 0x180   :  { %v151_v8 = vadd.f32 %v136_v56, %v128_v5  ;;  %v152_v9 = vadd.f32 %v140_v57, %v129_v6  ;;  %v153_v10 = vadd.f32 %v144_v58, %v130_v7 }
 0x182   :  { %157 = vst [vmem:[#allocation8 + $0x18] sm:$0x3] %v151_v8  ;;  %158 = vst [vmem:[#allocation8 + $0x20] sm:$0x3] %v152_v9 }
 0x183   :  { %159 = vst [vmem:[#allocation8 + $0x28] sm:$0x3] %v153_v10 }
 0x184   :  { %265 = shalt.err (!%p262_p0)
}
 0x185   :  { %s266_s27 = scalar_lea.hbm %s378_s3, 768 }
 0x186   :  { %p267_p1 = scmp.ne.s32.totalorder %s378_s3, %s266_s27  ;;  %p270_p2 = scmp.lt.u32.totalorder %s266_s27, %s378_s3 }
 0x188   :  { %p272_p3 = pnand %p270_p2, %p267_p1 }
 0x18a   :  { %275 = shalt.err (!%p272_p3)
}
 0x18b   :  { %171 = dma.vmem_to_hbm [thread:$0]  %s166_s23, 768, %s378_s3, [#allocation4], %s284_s1, %s284_s1, %s285_s8  }
 0x18c   :  { %280 = dma.done.wait [#allocation4], 768  }
 0x18d   :  { %281 = vsyncadd [#allocation4], 4294966528 }
 0x18e   :  { %175 = vsyncpa [#allocation3], 1 }
 0x18f   :  { %176 = vsyncpa [#allocation6], 1 }
 0x190   :  { %177 = vsyncpa [#allocation4], 1 }

// kernel: fsra_forward.17
= control target key start
LH: loop header
LB: loop body
LE: loop exit
PB: predicated region body
PF: predicated region fallthrough
CT: control target
= control target key end

     0   :  { %s3469_s0 = inlined_call_operand.hbm [shape: f32[2,5,384], index: 0, kind: input, shape index: {}]   ;;  %s3470_s1 = inlined_call_operand.hbm [shape: f32[4,5,1], index: 1, kind: input, shape index: {}]   ;;  %s3471_s2 = inlined_call_operand.hbm [shape: bf16[4,384,512], index: 2, kind: input, shape index: {}]   ;;  %s3472_s3 = inlined_call_operand.hbm [shape: f32[4,1,512], index: 3, kind: input, shape index: {}]   ;;  %s3473_s4 = inlined_call_operand.hbm [shape: f32[4,1,512], index: 4, kind: input, shape index: {}]   ;;  %s3474_s5 = inlined_call_operand.hbm [shape: f32[4,1,512], index: 5, kind: input, shape index: {}]   ;;  %s3475_s6 = inlined_call_operand.hbm [shape: bf16[4,512,10], index: 6, kind: input, shape index: {}]   ;;  %s3476_s7 = inlined_call_operand.hbm [shape: f32[4,1,10], index: 7, kind: input, shape index: {}]   ;;  %s3477_s8 = inlined_call_operand.hbm [shape: f32[4,2,10], index: 8, kind: output, shape index: {}]  }
   0x1   :  { %3495 = sst [smem:[#allocation28_spill]] %s3470_s1 }
   0x2   :  { %3496 = sst [smem:[#allocation29_spill]] %s3472_s3 }
   0x3   :  { %3497 = sst [smem:[#allocation30_spill]] %s3474_s5 }
   0x4   :  { %3498 = sst [smem:[#allocation31_spill]] %s3477_s8 }
   0x5   :  { %13 = vsyncpa [#allocation3], 0 }
   0x6   :  { %14 = vsyncpa [#allocation6], 0 }
   0x7   :  { %16 = vsyncpa [#allocation6 + $0x1], 0 }
   0x8   :  { %17 = vsyncpa [#allocation9], 0 }
   0x9   :  { %19 = vsyncpa [#allocation9 + $0x1], 0 }
   0xa   :  { %20 = vsyncpa [#allocation12], 0 }
   0xb   :  { %22 = vsyncpa [#allocation12 + $0x1], 0 }
   0xc   :  { %23 = vsyncpa [#allocation15], 0 }
   0xd   :  { %25 = vsyncpa [#allocation15 + $0x1], 0 }
   0xe   :  { %26 = vsyncpa [#allocation4], 0 }
   0xf   :  { %28 = vsyncpa [#allocation4 + $0x1], 0  ;;  %s2908_s27 = smov 0   ;;  %s2910_s28 = smov 0  }
  0x10   :  { %s2912_s29 = smov 0   ;;  %s2914_s30 = smov 0  }
  0x11 LB: > { %3499 = sst [smem:[#allocation23_spill]] %s2833_s27  ;;  %s2929_s9 = sadd.s32 1, %s2845_s30   ;;  %s2845_s30 = sphi %s2914_s30, %s3535_s30   ;;  %s2841_s29 = sphi %s2912_s29, %s3537_s29   ;;  %s2837_s28 = sphi %s2910_s28, %s3539_s28   ;;  %s2833_s27 = sphi %s2908_s27, %s3538_s27  }
  0x12   : > { %3500 = sst [smem:[#allocation24_spill]] %s2841_s29  ;;  %s62_s10 = sadd.s32 1, %s2841_s29 }
  0x13   : > { %3501 = sst [smem:[#allocation25_spill]] %s2929_s9  ;;  %s59_s11 = ssub.s32 %s2845_s30, %s2929_s9 }
  0x14   : > { %p3478_p0 = scmp.ne.s32.totalorder %s2841_s29, %s2837_s28  ;;  %p60_p1 = scmp.eq.s32.totalorder %s59_s11, 0 }
  0x15   : > { %p70_p2 = scmp.eq.s32.totalorder %s2845_s30, 0  ;;  %p2305_p3 = scmp.lt.s32.totalorder %s2845_s30, 4 }
  0x16   : > { %s2939_s12 = scalar_select %p60_p1, %s2841_s29, %s62_s10  }
  0x17   : > { %p71_p4 = por %p70_p2, %p3478_p0  ;;  %s2945_s13 = sand.u32 1, %s2845_s30  }
  0x18   : > { %3502 = sst [smem:[#allocation26_spill]] %s2939_s12  ;;  %s2948_s14 = sand.u32 1, %s2841_s29  }
  0x19   : > { %s2034_s15 = sshll.u32 %s2948_s14, 3  ;;  %s2035_s16 = sshll.u32 %s2845_s30, 7 }
  0x1a   : > { %s3503_s1 = sld [smem:[#allocation28_spill]]  ;;  %s298_s20 = scalar_lea.vmem [#allocation5], %s2034_s15 }
  0x1b   : > { %s305_s21 = sshll.u32 %s298_s20, 4  ;;  %p2957_p5 = pnand %p2305_p3, %p71_p4  ;;  %s2961_s21 = int_to_ptr.vmem [resolvable:$true] %s305_s21 }
  0x1c   : > { %s2964_s23 = sshll.u32 %s2948_s14, 2  ;;  %s3479_s24 = scalar_lea.sflag [#allocation6], %s2945_s13 }
  0x1d   : > { %s3504_s22 = scalar_select %p2957_p5, 1, 0 }
  0x1e   : > { %p2971_p7 = pneg %p2957_p5 }
  0x20   : > { %s2955_s19 = scalar_lea.hbm %s3503_s1, %s2035_s16  ;;  %s2530_s15 = scalar_lea.hbm %s3503_s1, 512 }
  0x21   : > { %s2525_s25 = scalar_lea.hbm %s2955_s19, 128  ;;  %p2531_p10 = scmp.lt.u32.totalorder %s2955_s19, %s3503_s1 }
  0x22   : > { %p2526_p6 = scmp.ne.s32.totalorder %s2955_s19, %s2525_s25  ;;  %p2532_p11 = scmp.lt.u32.totalorder %s2530_s15, %s2525_s25 }
  0x23   : > { %s3505_s26 = scalar_select %p2971_p7, 1, 0 }
  0x24   : > { %p2528_p8 = pnand %p2971_p7, %p2526_p6  ;;  %p2533_p12 = por %p2532_p11, %p2531_p10 }
  0x25   : > { %p2534_p13 = scmp.lt.u32.totalorder %s2525_s25, %s2955_s19 }
  0x26   : > { %p2529_p9 = pneg %p2528_p8 }
  0x27   : > { %p2535_p1 = por %p2534_p13, %p2533_p12 }
  0x29   : > { %p2536_p2 = pnand %p2535_p1, %p2529_p9 }
  0x2b   : > { %2539 = shalt.err (!%p2536_p2)
}
  0x2c   : > { %s2540_s18 = scalar_lea.vmem %s2961_s21, 128  ;;  %s2847_s20 = smov [#allocation5]  }
  0x2d   : > { %p2541_p3 = scmp.ne.s32.totalorder %s2961_s21, %s2540_s18  ;;  %s2545_s10 = sshll.u32 %s2847_s20, 4  ;;  %s2546_s10 = int_to_ptr.vmem [resolvable:$false] %s2545_s10 }
  0x2e   : > { %s2547_s11 = scalar_lea.vmem %s2546_s10, 256  ;;  %p2548_p8 = scmp.lt.s32.totalorder %s2961_s21, %s2546_s10 }
  0x2f   : > { %p2543_p4 = pnand %p2541_p3, %p2971_p7  ;;  %p2549_p0 = scmp.lt.s32.totalorder %s2547_s11, %s2540_s18 }
  0x31   : > { %p2544_p6 = pneg %p2543_p4  ;;  %p2550_p10 = por %p2549_p0, %p2548_p8 }
  0x33   : > { %p2551_p11 = pnand %p2550_p10, %p2544_p6 }
  0x35   : > { %2554 = shalt.err (!%p2551_p11)
}
  0x36   : > { %2281 = dma.hbm_to_vmem [thread:$0]  (!%p2957_p5), %s2955_s19, 128, %s2961_s21, %s3479_s24  }
  0x37   : > { %s2997_s25 = sshll.u32 %s2845_s30, 6  ;;  %s3506_s3 = sld [smem:[#allocation29_spill]] }
  0x38   : > { %s337_s18 = scalar_lea.vmem [#allocation8], %s2964_s23 }
  0x39   : > { %s345_s20 = sshll.u32 %s337_s18, 4  ;;  %s346_s20 = int_to_ptr.vmem [resolvable:$true] %s345_s20 }
  0x3d   : > { %s3003_s17 = scalar_lea.hbm %s3506_s3, %s2997_s25  ;;  %s2560_s24 = scalar_lea.hbm %s3506_s3, 256 }
  0x3e   : > { %s2555_s11 = scalar_lea.hbm %s3003_s17, 64  ;;  %p2561_p13 = scmp.lt.u32.totalorder %s3003_s17, %s3506_s3 }
  0x3f   : > { %p2556_p0 = scmp.ne.s32.totalorder %s3003_s17, %s2555_s11  ;;  %p2562_p1 = scmp.lt.u32.totalorder %s2560_s24, %s2555_s11 }
  0x40   : > { %p2564_p3 = scmp.lt.u32.totalorder %s2555_s11, %s3003_s17 }
  0x41   : > { %p2558_p9 = pnand %p2556_p0, %p2971_p7  ;;  %p2563_p2 = por %p2562_p1, %p2561_p13 }
  0x43   : > { %p2559_p12 = pneg %p2558_p9  ;;  %p2565_p4 = por %p2564_p3, %p2563_p2 }
  0x45   : > { %p2566_p6 = pnand %p2565_p4, %p2559_p12 }
  0x47   : > { %2569 = shalt.err (!%p2566_p6)
}
  0x48   : > { %s2570_s18 = scalar_lea.vmem %s346_s20, 64  ;;  %s2848_s10 = smov [#allocation8]  }
  0x49   : > { %p2571_p8 = scmp.ne.s32.totalorder %s346_s20, %s2570_s18  ;;  %s2575_s1 = sshll.u32 %s2848_s10, 4  ;;  %s2576_s1 = int_to_ptr.vmem [resolvable:$false] %s2575_s1 }
  0x4a   : > { %s2577_s19 = scalar_lea.vmem %s2576_s1, 128  ;;  %p2578_p0 = scmp.lt.s32.totalorder %s346_s20, %s2576_s1 }
  0x4b   : > { %p2573_p10 = pnand %p2571_p8, %p2971_p7  ;;  %p2579_p9 = scmp.lt.s32.totalorder %s2577_s19, %s2570_s18 }
  0x4d   : > { %p2574_p11 = pneg %p2573_p10  ;;  %p2580_p5 = por %p2579_p9, %p2578_p0 }
  0x4f   : > { %p2581_p1 = pnand %p2580_p5, %p2574_p11 }
  0x51   : > { %2584 = shalt.err (!%p2581_p1)
}
  0x52   : > { %p3507_p13 = scmp.ne.s32.totalorder %s3504_s22, 0  ;;  %s3508_s24 = scalar_lea.sflag [#allocation9], %s2945_s13 }
  0x53   : > { %s3509_s5 = sld [smem:[#allocation30_spill]]  ;;  %s375_s1 = scalar_lea.vmem [#allocation11], %s2964_s23 }
  0x54   : > { %2287 = dma.hbm_to_vmem [thread:$0]  (!%p3507_p13), %s3003_s17, 64, %s346_s20, %s3508_s24  }
  0x55   : > { %s383_s15 = sshll.u32 %s375_s1, 4  ;;  %s384_s15 = int_to_ptr.vmem [resolvable:$true] %s383_s15 }
  0x59   : > { %s3030_s10 = scalar_lea.hbm %s3509_s5, %s2997_s25  ;;  %s2590_s20 = scalar_lea.hbm %s3509_s5, 256 }
  0x5a   : > { %s2585_s18 = scalar_lea.hbm %s3030_s10, 64  ;;  %p2591_p3 = scmp.lt.u32.totalorder %s3030_s10, %s3509_s5 }
  0x5b   : > { %p2586_p5 = scmp.ne.s32.totalorder %s3030_s10, %s2585_s18  ;;  %p2592_p4 = scmp.lt.u32.totalorder %s2590_s20, %s2585_s18 }
  0x5c   : > { %p2594_p8 = scmp.lt.u32.totalorder %s2585_s18, %s3030_s10 }
  0x5d   : > { %p2588_p12 = pnand %p2586_p5, %p2971_p7  ;;  %p2593_p6 = por %p2592_p4, %p2591_p3 }
  0x5f   : > { %p2589_p2 = pneg %p2588_p12  ;;  %p2595_p10 = por %p2594_p8, %p2593_p6 }
  0x61   : > { %p2596_p11 = pnand %p2595_p10, %p2589_p2 }
  0x63   : > { %2599 = shalt.err (!%p2596_p11)
}
  0x64   : > { %s2600_s21 = scalar_lea.vmem %s384_s15, 64  ;;  %s2849_s1 = smov [#allocation11]  }
  0x65   : > { %p2601_p0 = scmp.ne.s32.totalorder %s384_s15, %s2600_s21  ;;  %s2605_s16 = sshll.u32 %s2849_s1, 4  ;;  %s2606_s16 = int_to_ptr.vmem [resolvable:$false] %s2605_s16 }
  0x66   : > { %s2607_s19 = scalar_lea.vmem %s2606_s16, 128  ;;  %p2608_p5 = scmp.lt.s32.totalorder %s384_s15, %s2606_s16 }
  0x67   : > { %p2603_p9 = pnand %p2601_p0, %p2971_p7  ;;  %p2609_p12 = scmp.lt.s32.totalorder %s2607_s19, %s2600_s21 }
  0x69   : > { %p2604_p1 = pneg %p2603_p9  ;;  %p2610_p13 = por %p2609_p12, %p2608_p5 }
  0x6b   : > { %p2611_p3 = pnand %p2610_p13, %p2604_p1 }
  0x6d   : > { %2614 = shalt.err (!%p2611_p3)
}
  0x6e   : > { %p3510_p4 = scmp.ne.s32.totalorder %s3504_s22, 0  ;;  %s3511_s18 = scalar_lea.sflag [#allocation12], %s2945_s13 }
  0x6f   : > { %s3054_s17 = sadd.s32 4294967295, %s2845_s30   ;;  %s2030_s16 = sadd.s32 4294967294, %s2845_s30  }
  0x70   : > { %2293 = dma.hbm_to_vmem [thread:$0]  (!%p3510_p4), %s3030_s10, 64, %s384_s15, %s3511_s18  }
  0x71   : > { %p75_p13 = scmp.ne.s32.totalorder %s2837_s28, %s2833_s27  ;;  %p3488_p2 = scmp.eq.s32.totalorder %s3054_s17, 0 }
  0x72   : > { %p255_p6 = scmp.eq.s32.totalorder %s3054_s17, 3  ;;  %p261_p8 = scmp.eq.s32.totalorder %s2030_s16, 3 }
  0x73   : > { %p3063_p10 = por %p3488_p2, %p75_p13  ;;  %p2031_p11 = scmp.ge.s32.totalorder %s2845_s30, 1 }
  0x74   : > { %p3513_p0 = scmp.ne.s32.totalorder %s2841_s29, %s2837_s28  ;;  %p3075_p1 = por %p261_p8, %p75_p13 }
  0x75   : > { %s3512_s20 = scalar_select %p3063_p10, 1, 0 }
  0x76   : > { %p3071_p9 = por %p255_p6, %p3513_p0  ;;  %p268_p5 = scmp.lt.s32.totalorder %s2845_s30, 5 }
  0x77   : > { %s3515_s15 = scalar_select %p3075_p1, 1, 0 }
  0x78   : > { %s3514_s10 = scalar_select %p3071_p9, 1, 0 }
  0x79   : > { %3516 = sst [smem:[#allocation27_spill]] %s3515_s15  ;;  %p3080_p12 = pnand %p2031_p11, %p268_p5 }
  0x7a   : > { %s2850_s11 = smov [#allocation2]   ;;  %s2251_s1 = smul.u32 768, %s2948_s14 }
  0x7b   : > { %s3517_s24 = scalar_select %p3080_p12, 1, 0 }
  0x7c   : > { %s280_s21 = sshll.u32 %s2850_s11, 4  ;;  %p2274_p3 = pneg %p3080_p12  ;;  %s3084_s21 = int_to_ptr.vmem [resolvable:$true] %s280_s21 }
  0x7d   : > { %s2252_s19 = smul.u32 12288, %s2845_s30  ;;  %s316_s12 = scalar_lea.vmem [#allocation7], %s2251_s1 }
  0x7e   : > { %p3092_p6 = pnand %p2274_p3, %p3488_p2  ;;  %s323_s29 = sshll.u32 %s316_s12, 4  ;;  %s3101_s29 = int_to_ptr.vmem [resolvable:$true] %s323_s29 }
  0x7f   : > { %s3099_s5 = scalar_lea.hbm %s3471_s2, %s2252_s19  ;;  %s2615_s15 = scalar_lea.hbm %s3469_s0, 768 }
  0x80   : > { %p2616_p13 = scmp.ne.s32.totalorder %s3469_s0, %s2615_s15  ;;  %p2617_p8 = pneg %p3092_p6 }
  0x81   : > { %p2622_p5 = scmp.lt.u32.totalorder %s2615_s15, %s3469_s0 }
  0x82   : > { %p2618_p11 = pnand %p2617_p8, %p2616_p13 }
  0x84   : > { %p2619_p0 = pneg %p2618_p11 }
  0x86   : > { %p2624_p3 = pnand %p2622_p5, %p2619_p0 }
  0x88   : > { %2627 = shalt.err (!%p2624_p3)
}
  0x89   : > { %s2628_s12 = scalar_lea.vmem %s3084_s21, 768  ;;  %p2636_p10 = scmp.lt.s32.totalorder %s3084_s21, %s3084_s21 }
  0x8a   : > { %p2629_p2 = scmp.ne.s32.totalorder %s3084_s21, %s2628_s12  ;;  %p2637_p12 = scmp.lt.s32.totalorder %s2628_s12, %s2628_s12 }
  0x8c   : > { %p2631_p1 = pnand %p2629_p2, %p2617_p8  ;;  %p2638_p4 = por %p2637_p12, %p2636_p10 }
  0x8e   : > { %p2632_p9 = pneg %p2631_p1 }
  0x90   : > { %p2639_p7 = pnand %p2638_p4, %p2632_p9 }
  0x92   : > { %2642 = shalt.err (!%p2639_p7)
}
  0x93   : > { %s2851_s8 = smov 384   ;;  %s2852_s27 = smov 24  }
  0x94   : > { %2277 = dma.hbm_to_vmem [thread:$0]  (!%p3092_p6), %s3469_s0, 768, %s3084_s21, [#allocation3], %s2851_s8, %s2851_s8, %s2852_s27  }
  0x95   : > { %s2643_s1 = scalar_lea.hbm %s3099_s5, 12288  ;;  %p3519_p1 = scmp.ne.s32.totalorder %s3505_s26, 0 }
  0x96   : > { %p2644_p2 = scmp.ne.s32.totalorder %s3099_s5, %s2643_s1  ;;  %s2648_s3 = scalar_lea.hbm %s3471_s2, 49152 }
  0x97   : > { %p2649_p7 = scmp.lt.u32.totalorder %s3099_s5, %s3471_s2  ;;  %p2650_p9 = scmp.lt.u32.totalorder %s2648_s3, %s2643_s1 }
  0x98   : > { %p2646_p10 = pnand %p2644_p2, %p3519_p1  ;;  %p2652_p13 = scmp.lt.u32.totalorder %s2643_s1, %s3099_s5 }
  0x99   : > { %p2651_p12 = por %p2650_p9, %p2649_p7 }
  0x9a   : > { %p2647_p4 = pneg %p2646_p10 }
  0x9b   : > { %p2653_p8 = por %p2652_p13, %p2651_p12 }
  0x9d   : > { %p2654_p11 = pnand %p2653_p8, %p2647_p4 }
  0x9f   : > { %2657 = shalt.err (!%p2654_p11)
}
  0xa0   : > { %s2658_s21 = scalar_lea.vmem %s3101_s29, 12288  ;;  %s2853_s18 = smov [#allocation7]  }
  0xa1   : > { %p2659_p6 = scmp.ne.s32.totalorder %s3101_s29, %s2658_s21  ;;  %s2663_s8 = sshll.u32 %s2853_s18, 4  ;;  %s2664_s8 = int_to_ptr.vmem [resolvable:$false] %s2663_s8 }
  0xa2   : > { %s2665_s27 = scalar_lea.vmem %s2664_s8, 24576  ;;  %p2666_p3 = scmp.lt.s32.totalorder %s3101_s29, %s2664_s8 }
  0xa3   : > { %p2661_p0 = pnand %p2659_p6, %p3519_p1  ;;  %p2667_p2 = scmp.lt.s32.totalorder %s2665_s27, %s2658_s21 }
  0xa5   : > { %p2662_p5 = pneg %p2661_p0  ;;  %p2668_p10 = por %p2667_p2, %p2666_p3 }
  0xa7   : > { %p2669_p7 = pnand %p2668_p10, %p2662_p5 }
  0xa9   : > { %2672 = shalt.err (!%p2669_p7)
}
  0xaa   : > { %s2854_s9 = smov 256   ;;  %s2855_s15 = smov 16  }
  0xab   : > { %p3520_p4 = scmp.ne.s32.totalorder %s3504_s22, 0  ;;  %s3521_s1 = scalar_lea.sflag [#allocation6], %s2945_s13 }
  0xac   : > { %s3151_s3 = scalar_lea.hbm %s3473_s4, %s2997_s25  ;;  %s356_s16 = scalar_lea.vmem [#allocation10], %s2964_s23 }
  0xad   : > { %2284 = dma.hbm_to_vmem [thread:$0]  (!%p3520_p4), %s3099_s5, 12288, %s3101_s29, %s3521_s1, %s2854_s9, %s2854_s9, %s2855_s15  }
  0xae   : > { %s364_s12 = sshll.u32 %s356_s16, 4  ;;  %s2046_s21 = sshll.u32 %s2948_s14, 8  ;;  %s365_s12 = int_to_ptr.vmem [resolvable:$true] %s364_s12 }
  0xaf   : > { %s2673_s18 = scalar_lea.hbm %s3151_s3, 64  ;;  %s2678_s29 = scalar_lea.hbm %s3473_s4, 256 }
  0xb0   : > { %p2674_p9 = scmp.ne.s32.totalorder %s3151_s3, %s2673_s18  ;;  %p2679_p8 = scmp.lt.u32.totalorder %s3151_s3, %s3473_s4 }
  0xb1   : > { %p2680_p11 = scmp.lt.u32.totalorder %s2678_s29, %s2673_s18  ;;  %p2682_p0 = scmp.lt.u32.totalorder %s2673_s18, %s3151_s3 }
  0xb2   : > { %p2676_p12 = pnand %p2674_p9, %p3519_p1 }
  0xb3   : > { %p2681_p6 = por %p2680_p11, %p2679_p8 }
  0xb4   : > { %p2677_p13 = pneg %p2676_p12 }
  0xb5   : > { %p2683_p5 = por %p2682_p0, %p2681_p6 }
  0xb7   : > { %p2684_p3 = pnand %p2683_p5, %p2677_p13 }
  0xb9   : > { %2687 = shalt.err (!%p2684_p3)
}
  0xba   : > { %s2688_s23 = scalar_lea.vmem %s365_s12, 64  ;;  %s2856_s9 = smov [#allocation10]  }
  0xbb   : > { %p2689_p2 = scmp.ne.s32.totalorder %s365_s12, %s2688_s23  ;;  %s2693_s15 = sshll.u32 %s2856_s9, 4  ;;  %s2694_s15 = int_to_ptr.vmem [resolvable:$false] %s2693_s15 }
  0xbc   : > { %s2695_s1 = scalar_lea.vmem %s2694_s15, 128  ;;  %p2696_p9 = scmp.lt.s32.totalorder %s365_s12, %s2694_s15 }
  0xbd   : > { %p2691_p10 = pnand %p2689_p2, %p3519_p1  ;;  %p2697_p12 = scmp.lt.s32.totalorder %s2695_s1, %s2688_s23 }
  0xbf   : > { %p2692_p7 = pneg %p2691_p10  ;;  %p2698_p4 = por %p2697_p12, %p2696_p9 }
  0xc1   : > { %p2699_p8 = pnand %p2698_p4, %p2692_p7 }
  0xc3   : > { %2702 = shalt.err (!%p2699_p8)
}
  0xc4   : > { %p3522_p11 = scmp.ne.s32.totalorder %s3504_s22, 0  ;;  %s3523_s19 = scalar_lea.sflag [#allocation9], %s2945_s13 }
  0xc5   : > { %s2194_s11 = sshll.u32 %s2845_s30, 12  ;;  %s394_s5 = scalar_lea.vmem [#allocation13], %s2046_s21 }
  0xc6   : > { %2290 = dma.hbm_to_vmem [thread:$0]  (!%p3522_p11), %s3151_s3, 64, %s365_s12, %s3523_s19  }
  0xc7   : > { %s3178_s8 = scalar_lea.hbm %s3475_s6, %s2194_s11  ;;  %s401_s29 = sshll.u32 %s394_s5, 4  ;;  %s3182_s29 = int_to_ptr.vmem [resolvable:$true] %s401_s29 }
  0xc8   : > { %s2703_s27 = scalar_lea.hbm %s3178_s8, 4096  ;;  %s2708_s25 = scalar_lea.hbm %s3475_s6, 16384 }
  0xc9   : > { %p2704_p4 = scmp.ne.s32.totalorder %s3178_s8, %s2703_s27  ;;  %p2709_p0 = scmp.lt.u32.totalorder %s3178_s8, %s3475_s6 }
  0xca   : > { %p2710_p5 = scmp.lt.u32.totalorder %s2708_s25, %s2703_s27  ;;  %p2712_p2 = scmp.lt.u32.totalorder %s2703_s27, %s3178_s8 }
  0xcb   : > { %p2706_p13 = pnand %p2704_p4, %p3519_p1 }
  0xcc   : > { %p2711_p3 = por %p2710_p5, %p2709_p0 }
  0xcd   : > { %p2707_p6 = pneg %p2706_p13 }
  0xce   : > { %p2713_p10 = por %p2712_p2, %p2711_p3 }
  0xd0   : > { %p2714_p7 = pnand %p2713_p10, %p2707_p6 }
  0xd2   : > { %2717 = shalt.err (!%p2714_p7)
}
  0xd3   : > { %s2718_s21 = scalar_lea.vmem %s3182_s29, 4096  ;;  %s2857_s15 = smov [#allocation13]  }
  0xd4   : > { %p2719_p9 = scmp.ne.s32.totalorder %s3182_s29, %s2718_s21  ;;  %s2723_s1 = sshll.u32 %s2857_s15, 4  ;;  %s2724_s1 = int_to_ptr.vmem [resolvable:$false] %s2723_s1 }
  0xd5   : > { %s2725_s19 = scalar_lea.vmem %s2724_s1, 8192  ;;  %p2726_p4 = scmp.lt.s32.totalorder %s3182_s29, %s2724_s1 }
  0xd6   : > { %p2721_p12 = pnand %p2719_p9, %p3519_p1  ;;  %p2727_p13 = scmp.lt.s32.totalorder %s2725_s19, %s2718_s21 }
  0xd8   : > { %p2722_p8 = pneg %p2721_p12  ;;  %p2728_p0 = por %p2727_p13, %p2726_p4 }
  0xda   : > { %p2729_p5 = pnand %p2728_p0, %p2722_p8 }
  0xdc   : > { %2732 = shalt.err (!%p2729_p5)
}
  0xdd   : > { %s2858_s11 = smov 64   ;;  %s2859_s16 = smov 4  }
  0xde   : > { %s3524_s18 = scalar_lea.sflag [#allocation12], %s2945_s13  ;;  %s2049_s5 = sshll.u32 %s2845_s30, 4 }
  0xdf   : > { %2296 = dma.hbm_to_vmem [thread:$0]  (!%p3522_p11), %s3178_s8, 4096, %s3182_s29, %s3524_s18, %s2858_s11, %s2858_s11, %s2859_s16  }
  0xe0   : > { %s3211_s12 = scalar_lea.hbm %s3476_s7, %s2049_s5  ;;  %s414_s25 = scalar_lea.vmem [#allocation14], %s2948_s14 }
  0xe1   : > { %s421_s23 = sshll.u32 %s414_s25, 4  ;;  %s412_s9 = scalar_lea.sflag [#allocation15], %s2948_s14  ;;  %s422_s23 = int_to_ptr.vmem [resolvable:$true] %s421_s23 }
  0xe2   : > { %s2733_s21 = scalar_lea.hbm %s3211_s12, 16  ;;  %s2738_s29 = scalar_lea.hbm %s3476_s7, 64 }
  0xe3   : > { %p2734_p6 = scmp.ne.s32.totalorder %s3211_s12, %s2733_s21  ;;  %p2739_p10 = scmp.lt.u32.totalorder %s3211_s12, %s3476_s7 }
  0xe4   : > { %p2740_p7 = scmp.lt.u32.totalorder %s2738_s29, %s2733_s21  ;;  %p2742_p12 = scmp.lt.u32.totalorder %s2733_s21, %s3211_s12 }
  0xe5   : > { %p2736_p3 = pnand %p2734_p6, %p3519_p1 }
  0xe6   : > { %p2741_p9 = por %p2740_p7, %p2739_p10 }
  0xe7   : > { %p2737_p2 = pneg %p2736_p3 }
  0xe8   : > { %p2743_p8 = por %p2742_p12, %p2741_p9 }
  0xea   : > { %p2744_p4 = pnand %p2743_p8, %p2737_p2 }
  0xec   : > { %2747 = shalt.err (!%p2744_p4)
}
  0xed   : > { %s2748_s14 = scalar_lea.vmem %s422_s23, 16  ;;  %s2860_s19 = smov [#allocation14]  }
  0xee   : > { %p2749_p13 = scmp.ne.s32.totalorder %s422_s23, %s2748_s14  ;;  %s2753_s11 = sshll.u32 %s2860_s19, 4  ;;  %s2754_s11 = int_to_ptr.vmem [resolvable:$false] %s2753_s11 }
  0xef   : > { %s2755_s16 = scalar_lea.vmem %s2754_s11, 32  ;;  %p2756_p6 = scmp.lt.s32.totalorder %s422_s23, %s2754_s11 }
  0xf0   : > { %p2751_p0 = pnand %p2749_p13, %p3519_p1  ;;  %p2757_p3 = scmp.lt.s32.totalorder %s2755_s16, %s2748_s14 }
  0xf2   : > { %p2752_p5 = pneg %p2751_p0  ;;  %p2758_p11 = por %p2757_p3, %p2756_p6 }
  0xf4   : > { %p2759_p7 = pnand %p2758_p11, %p2752_p5 }
  0xf6   : > { %2762 = shalt.err (!%p2759_p7)
}
  0xf7   : > { %p3525_p10 = scmp.ne.s32.totalorder %s3504_s22, 0  ;;  %p3526_p2 = scmp.ne.s32.totalorder %s3517_s24, 0 }
  0xf8   : > { %p3527_p9 = scmp.eq.s32.totalorder (!%p3526_p2), %s3054_s17, 0 }
  0xf9   : > { %2299 = dma.hbm_to_vmem [thread:$0]  (!%p3525_p10), %s3211_s12, 16, %s422_s23, %s412_s9  }
  0xfa   : > { %430 = sbr.rel (%p3526_p2) target bundleno = 913 (0x391), region = 52 }
 0x101   : > { %2808 = dma.done.wait (%p3527_p9), [#allocation3], 768   ;;  %p3528_p1 = pmov %p3527_p9 }
 0x102   : > { %s436_s26 = sand.u32 1, %s3054_s17   ;;  %s3240_s18 = sand.u32 1, %s2837_s28  }
 0x103   : > { %2810 = vsyncadd (%p3528_p1), [#allocation3], 4294966528  ;;  %s2052_s5 = sshll.u32 %s3240_s18, 3  ;;  %s437_s22 = scalar_lea.sflag [#allocation6], %s436_s26 }
 0x104   : > { %s440_s27 = scalar_lea.vmem [#allocation5], %s2052_s5  ;;  %p3529_p11 = scmp.ne.s32.totalorder %s3512_s20, 0 }
 0x106   : > { %2812 = dma.done.wait (%p3529_p11), %s437_s22, 12416  }
 0x107   : > { %2814 = vsyncadd (%p3529_p11), %s437_s22, 4294954880  ;;  %s2253_s24 = smul.u32 768, %s3240_s18  ;;  %s3249_s3 = sshll.u32 %s3240_s18, 2 }
 0x108   : > { %s455_s25 = scalar_lea.sflag [#allocation9], %s436_s26  ;;  %s458_s23 = scalar_lea.vmem [#allocation8], %s3249_s3 }
 0x109   : > { %s3251_s12 = scalar_lea.vmem [#allocation7], %s2253_s24 }
 0x10a   : > { %2816 = dma.done.wait (%p3529_p11), %s455_s25, 128  }
 0x10b   : > { %2818 = vsyncadd (%p3529_p11), %s455_s25, 4294967168  ;;  %s467_s9 = scalar_lea.vmem [#allocation10], %s3249_s3  ;;  %s473_s21 = scalar_lea.sflag [#allocation12], %s436_s26 }
 0x10c   : > { %s476_s13 = scalar_lea.vmem [#allocation11], %s3249_s3 }
 0x10d   : > { %2820 = dma.done.wait (%p3529_p11), %s473_s21, 4160  }
 0x10e   : > { %2822 = vsyncadd (%p3529_p11), %s473_s21, 4294963136  ;;  %s2056_s8 = sshll.u32 %s3240_s18, 8  ;;  %s491_s15 = scalar_lea.sflag [#allocation15], %s3240_s18 }
 0x10f   : > { %s3265_s29 = scalar_lea.vmem [#allocation13], %s2056_s8  ;;  %s493_s1 = scalar_lea.vmem [#allocation14], %s3240_s18 }
 0x110   : > { %2824 = dma.done.wait (%p3529_p11), %s491_s15, 16  }
 0x111   : > { %2826 = vsyncadd (%p3529_p11), %s491_s15, 4294967280  ;;  %v2861_v0 = vmov 0   ;;  %v562_v1 = vld [vmem:[%s440_s27] sm:$0x1f]  ;;  %vm574_vm0 = vcmask 1044480   ;;  %vm753_vm1 = vcmask 1041409  }
 0x112   : > { %2348 = vset.pattern.permute.xlu0 %v2861_v0  ;;  %v2349_v2 = vld [vmem:[%s3251_s12 + $0x4] ss:$16 sps:$4 sm:$0xff]   ;;  %v2351_v3 = vld [vmem:[%s3251_s12 + $0xc] ss:$16 sps:$4 sm:$0xff]   ;;  %v2353_v4 = vld [vmem:[%s3251_s12] ss:$16 sps:$4 sm:$0xff]  }
 0x113   : > { %565 = vperm.xlu0 %2348, %v562_v1   ;;  %v2354_v5 = vld [vmem:[%s3251_s12 + $0x8] ss:$16 sps:$4 sm:$0xff]   ;;  %1243 = vmatprep.subr.bf16.mxu0 %v2349_v2  ;;  %v2355_v6 = vld [vmem:[%s3251_s12 + $0x24] ss:$16 sps:$4 sm:$0xff]   ;;  %v2357_v7 = vld [vmem:[%s3251_s12 + $0x2c] ss:$16 sps:$4 sm:$0xff]  }
 0x114   : > { %1325 = vmatprep.subr.bf16.mxu1 %v2351_v3  ;;  %1244 = vmatpush1.bf16.msra.mxu0 %v2353_v4  ;;  %v2359_v8 = vld [vmem:[%s3251_s12 + $0x20] ss:$16 sps:$4 sm:$0xff]   ;;  %v2360_v9 = vld [vmem:[%s3251_s12 + $0x28] ss:$16 sps:$4 sm:$0xff]   ;;  %v2361_v10 = vld [vmem:[%s3251_s12 + $0x44] ss:$16 sps:$4 sm:$0xff]  }
 0x115   : > { %1326 = vmatpush1.bf16.msra.mxu1 %v2354_v5  ;;  %1245 = vmatprep.subr.bf16.mxu0 %v2355_v6  ;;  %v2363_v11 = vld [vmem:[%s3251_s12 + $0x4c] ss:$16 sps:$4 sm:$0xff]   ;;  %v2365_v12 = vld [vmem:[%s3251_s12 + $0x40] ss:$16 sps:$4 sm:$0xff]   ;;  %v2366_v13 = vld [vmem:[%s3251_s12 + $0x48] ss:$16 sps:$4 sm:$0xff]  }
 0x116   : > { %1327 = vmatprep.subr.bf16.mxu1 %v2357_v7  ;;  %v2367_v14 = vld [vmem:[%s3251_s12 + $0x64] ss:$16 sps:$4 sm:$0xff]   ;;  %v2369_v15 = vld [vmem:[%s3251_s12 + $0x6c] ss:$16 sps:$4 sm:$0xff]   ;;  %v2371_v16 = vld [vmem:[%s3251_s12 + $0x60] ss:$16 sps:$4 sm:$0xff]  }
 0x117   : > { %v2372_v17 = vld [vmem:[%s3251_s12 + $0x68] ss:$16 sps:$4 sm:$0xff]   ;;  %v2373_v18 = vld [vmem:[%s3251_s12 + $0x84] ss:$16 sps:$4 sm:$0xff]   ;;  %v2375_v19 = vld [vmem:[%s3251_s12 + $0x8c] ss:$16 sps:$4 sm:$0xff]  }
 0x118   : > { %1246 = vmatpush1.bf16.msra.mxu0 %v2359_v8  ;;  %v2377_v20 = vld [vmem:[%s3251_s12 + $0x80] ss:$16 sps:$4 sm:$0xff]   ;;  %v2378_v21 = vld [vmem:[%s3251_s12 + $0x88] ss:$16 sps:$4 sm:$0xff]   ;;  %v2379_v22 = vld [vmem:[%s3251_s12 + $0xa4] ss:$16 sps:$4 sm:$0xff]  }
 0x119   : > { %1328 = vmatpush1.bf16.msra.mxu1 %v2360_v9  ;;  %1247 = vmatprep.subr.bf16.mxu0 %v2361_v10  ;;  %v2381_v23 = vld [vmem:[%s3251_s12 + $0xac] ss:$16 sps:$4 sm:$0xff]   ;;  %v2383_v24 = vld [vmem:[%s3251_s12 + $0xa0] ss:$16 sps:$4 sm:$0xff]   ;;  %v2384_v25 = vld [vmem:[%s3251_s12 + $0xa8] ss:$16 sps:$4 sm:$0xff]  }
 0x11a   : > { %1329 = vmatprep.subr.bf16.mxu1 %v2363_v11  ;;  %v2385_v26 = vld [vmem:[%s3251_s12 + $0xc4] ss:$16 sps:$4 sm:$0xff]   ;;  %v2387_v27 = vld [vmem:[%s3251_s12 + $0xcc] ss:$16 sps:$4 sm:$0xff]   ;;  %v2389_v28 = vld [vmem:[%s3251_s12 + $0xc0] ss:$16 sps:$4 sm:$0xff]  }
 0x11b   : > { %v2390_v29 = vld [vmem:[%s3251_s12 + $0xc8] ss:$16 sps:$4 sm:$0xff]   ;;  %v2391_v30 = vld [vmem:[%s3251_s12 + $0xe4] ss:$16 sps:$4 sm:$0xff]   ;;  %v2393_v31 = vld [vmem:[%s3251_s12 + $0xec] ss:$16 sps:$4 sm:$0xff]  }
 0x11c   : > { %1248 = vmatpush1.bf16.msra.mxu0 %v2365_v12  ;;  %v2395_v32 = vld [vmem:[%s3251_s12 + $0xe0] ss:$16 sps:$4 sm:$0xff]   ;;  %v2396_v33 = vld [vmem:[%s3251_s12 + $0xe8] ss:$16 sps:$4 sm:$0xff]   ;;  %v2397_v34 = vld [vmem:[%s3251_s12 + $0x104] ss:$16 sps:$4 sm:$0xff]  }
 0x11d   : > { %1330 = vmatpush1.bf16.msra.mxu1 %v2366_v13  ;;  %1249 = vmatprep.subr.bf16.mxu0 %v2367_v14  ;;  %v2399_v35 = vld [vmem:[%s3251_s12 + $0x10c] ss:$16 sps:$4 sm:$0xff]   ;;  %v2401_v36 = vld [vmem:[%s3251_s12 + $0x100] ss:$16 sps:$4 sm:$0xff]   ;;  %v2402_v37 = vld [vmem:[%s3251_s12 + $0x108] ss:$16 sps:$4 sm:$0xff]  }
 0x11e   : > { %1331 = vmatprep.subr.bf16.mxu1 %v2369_v15  ;;  %v2403_v38 = vld [vmem:[%s3251_s12 + $0x124] ss:$16 sps:$4 sm:$0xff]   ;;  %v2405_v39 = vld [vmem:[%s3251_s12 + $0x12c] ss:$16 sps:$4 sm:$0xff]   ;;  %v2407_v40 = vld [vmem:[%s3251_s12 + $0x120] ss:$16 sps:$4 sm:$0xff]  }
 0x11f   : > { %v2408_v41 = vld [vmem:[%s3251_s12 + $0x128] ss:$16 sps:$4 sm:$0xff]   ;;  %v2409_v42 = vld [vmem:[%s3251_s12 + $0x144] ss:$16 sps:$4 sm:$0xff]   ;;  %v2411_v43 = vld [vmem:[%s3251_s12 + $0x14c] ss:$16 sps:$4 sm:$0xff]  }
 0x120   : > { %1250 = vmatpush1.bf16.msra.mxu0 %v2371_v16  ;;  %v2413_v44 = vld [vmem:[%s3251_s12 + $0x140] ss:$16 sps:$4 sm:$0xff]   ;;  %v2414_v45 = vld [vmem:[%s3251_s12 + $0x148] ss:$16 sps:$4 sm:$0xff]   ;;  %v2415_v46 = vld [vmem:[%s3251_s12 + $0x164] ss:$16 sps:$4 sm:$0xff]  }
 0x121   : > { %1332 = vmatpush1.bf16.msra.mxu1 %v2372_v17  ;;  %1251 = vmatprep.subr.bf16.mxu0 %v2373_v18  ;;  %v2417_v47 = vld [vmem:[%s3251_s12 + $0x16c] ss:$16 sps:$4 sm:$0xff]   ;;  %v2419_v48 = vld [vmem:[%s3251_s12 + $0x160] ss:$16 sps:$4 sm:$0xff]   ;;  %v2420_v49 = vld [vmem:[%s3251_s12 + $0x168] ss:$16 sps:$4 sm:$0xff]  }
 0x122   : > { %1333 = vmatprep.subr.bf16.mxu1 %v2375_v19  ;;  %v2421_v50 = vld [vmem:[%s3251_s12 + $0x184] ss:$16 sps:$4 sm:$0xff]   ;;  %v2423_v51 = vld [vmem:[%s3251_s12 + $0x18c] ss:$16 sps:$4 sm:$0xff]   ;;  %v2425_v52 = vld [vmem:[%s3251_s12 + $0x180] ss:$16 sps:$4 sm:$0xff]  }
 0x123   : > { %v2426_v53 = vld [vmem:[%s3251_s12 + $0x188] ss:$16 sps:$4 sm:$0xff]   ;;  %v2427_v54 = vld [vmem:[%s3251_s12 + $0x1a4] ss:$16 sps:$4 sm:$0xff]   ;;  %v2429_v55 = vld [vmem:[%s3251_s12 + $0x1ac] ss:$16 sps:$4 sm:$0xff]  }
 0x124   : > { %1252 = vmatpush1.bf16.msra.mxu0 %v2377_v20  ;;  %v2431_v56 = vld [vmem:[%s3251_s12 + $0x1a0] ss:$16 sps:$4 sm:$0xff]   ;;  %v2432_v57 = vld [vmem:[%s3251_s12 + $0x1a8] ss:$16 sps:$4 sm:$0xff]   ;;  %v2433_v58 = vld [vmem:[%s3251_s12 + $0x1c4] ss:$16 sps:$4 sm:$0xff]  }
 0x125   : > { %1334 = vmatpush1.bf16.msra.mxu1 %v2378_v21  ;;  %1253 = vmatprep.subr.bf16.mxu0 %v2379_v22  ;;  %v2435_v59 = vld [vmem:[%s3251_s12 + $0x1cc] ss:$16 sps:$4 sm:$0xff]   ;;  %v2437_v60 = vld [vmem:[%s3251_s12 + $0x1c0] ss:$16 sps:$4 sm:$0xff]   ;;  %v2438_v61 = vld [vmem:[%s3251_s12 + $0x1c8] ss:$16 sps:$4 sm:$0xff]  }
 0x126   : > { %1335 = vmatprep.subr.bf16.mxu1 %v2381_v23  ;;  %v2439_v62 = vld [vmem:[%s3251_s12 + $0x1e4] ss:$16 sps:$4 sm:$0xff]   ;;  %v2441_v63 = vld [vmem:[%s3251_s12 + $0x1ec] ss:$16 sps:$4 sm:$0xff]   ;;  %v2443_v1 = vld [vmem:[%s3251_s12 + $0x1e0] ss:$16 sps:$4 sm:$0xff]  }
 0x127   : > { %v2444_v2 = vld [vmem:[%s3251_s12 + $0x1e8] ss:$16 sps:$4 sm:$0xff]   ;;  %v2447_v3 = vld [vmem:[%s3251_s12 + $0x204] ss:$16 sps:$4 sm:$0xff]   ;;  %v2450_v4 = vld [vmem:[%s3251_s12 + $0x20c] ss:$16 sps:$4 sm:$0xff]  }
 0x128   : > { %1254 = vmatpush1.bf16.msra.mxu0 %v2383_v24  ;;  %v556_v5 = vld [vmem:[#allocation2] sm:$0x1f]  ;;  %v557_v6 = vld [vmem:[#allocation2 + $0x8] sm:$0x1f]  ;;  %v559_v7 = vld [vmem:[#allocation2 + $0x18] sm:$0x1f] }
 0x129   : > { %1336 = vmatpush1.bf16.msra.mxu1 %v2384_v25  ;;  %1255 = vmatprep.subr.bf16.mxu0 %v2385_v26  ;;  %v560_v8 = vld [vmem:[#allocation2 + $0x20] sm:$0x1f]  ;;  %s2057_s20 = sshll.u32 %s3240_s18, 1  ;;  %s2188_s14 = sshll.u32 %s3054_s17, 5  ;;  %vm1806_vm2 = vcmask 74752  }
 0x12a   : > { %1337 = vmatprep.subr.bf16.mxu1 %v2387_v27  ;;  %s554_s19 = scalar_lea.vmem [#allocation16], %s2057_s20  ;;  %s3530_s5 = sld [smem:[#allocation31_spill]] }
 0x12b   : > { %s1822_s11 = sshll.u32 %s554_s19, 4  ;;  %s1809_s27 = scalar_lea.sflag [#allocation4], %s3240_s18  ;;  %s3428_s11 = int_to_ptr.vmem [resolvable:$true] %s1822_s11 }
 0x12c   : > { %1256 = vmatpush1.bf16.msra.mxu0 %v2389_v28  ;;  %s2763_s24 = scalar_lea.vmem %s3428_s11, 32  ;;  %p3531_p8 = scmp.ne.s32.totalorder %s3514_s10, 0 }
 0x12d   : > { %1338 = vmatpush1.bf16.msra.mxu1 %v2390_v29  ;;  %1257 = vmatprep.subr.bf16.mxu0 %v2391_v30  ;;  %v558_v29 = vld [vmem:[#allocation2 + $0x10] sm:$0x1f]  ;;  %p2764_p12 = scmp.ne.s32.totalorder %s3428_s11, %s2763_s24  ;;  %s2862_s17 = smov [#allocation16]  }
 0x12e   : > { %1339 = vmatprep.subr.bf16.mxu1 %v2393_v31  ;;  %s2767_s3 = sshll.u32 %s2862_s17, 4  ;;  %s2768_s3 = int_to_ptr.vmem [resolvable:$false] %s2767_s3 }
 0x12f   : > { %p2765_p4 = pnand %p2764_p12, %p3531_p8  ;;  %p2770_p0 = scmp.lt.s32.totalorder %s3428_s11, %s2768_s3 }
 0x130   : > { %1258 = vmatpush1.bf16.msra.mxu0 %v2395_v32  ;;  %s3426_s22 = scalar_lea.hbm %s3530_s5, %s2188_s14 }
 0x131   : > { %1340 = vmatpush1.bf16.msra.mxu1 %v2396_v33  ;;  %1259 = vmatprep.subr.bf16.mxu0 %v2397_v34  ;;  %v561_v33 = vld [vmem:[#allocation2 + $0x28] sm:$0x1f]  ;;  %p2766_p13 = pneg %p2765_p4 }
 0x132   : > { %1341 = vmatprep.subr.bf16.mxu1 %v2399_v35 }
 0x134   : > { %1260 = vmatpush1.bf16.msra.mxu0 %v2401_v36 }
 0x135   : > { %1342 = vmatpush1.bf16.msra.mxu1 %v2402_v37  ;;  %1261 = vmatprep.subr.bf16.mxu0 %v2403_v38 }
 0x136   : > { %1343 = vmatprep.subr.bf16.mxu1 %v2405_v39 }
 0x138   : > { %1262 = vmatpush1.bf16.msra.mxu0 %v2407_v40 }
 0x139   : > { %1344 = vmatpush1.bf16.msra.mxu1 %v2408_v41  ;;  %1263 = vmatprep.subr.bf16.mxu0 %v2409_v42 }
 0x13a   : > { %1345 = vmatprep.subr.bf16.mxu1 %v2411_v43 }
 0x13c   : > { %1264 = vmatpush1.bf16.msra.mxu0 %v2413_v44 }
 0x13d   : > { %1346 = vmatpush1.bf16.msra.mxu1 %v2414_v45  ;;  %1265 = vmatprep.subr.bf16.mxu0 %v2415_v46 }
 0x13e   : > { %1347 = vmatprep.subr.bf16.mxu1 %v2417_v47 }
 0x140   : > { %1266 = vmatpush1.bf16.msra.mxu0 %v2419_v48 }
 0x141   : > { %1348 = vmatpush1.bf16.msra.mxu1 %v2420_v49  ;;  %1267 = vmatprep.subr.bf16.mxu0 %v2421_v50 }
 0x142   : > { %1349 = vmatprep.subr.bf16.mxu1 %v2423_v51 }
 0x144   : > { %1268 = vmatpush1.bf16.msra.mxu0 %v2425_v52 }
 0x145   : > { %1350 = vmatpush1.bf16.msra.mxu1 %v2426_v53  ;;  %1269 = vmatprep.subr.bf16.mxu0 %v2427_v54 }
 0x146   : > { %1351 = vmatprep.subr.bf16.mxu1 %v2429_v55 }
 0x148   : > { %1270 = vmatpush1.bf16.msra.mxu0 %v2431_v56 }
 0x149   : > { %1352 = vmatpush1.bf16.msra.mxu1 %v2432_v57  ;;  %1271 = vmatprep.subr.bf16.mxu0 %v2433_v58 }
 0x14a   : > { %1353 = vmatprep.subr.bf16.mxu1 %v2435_v59 }
 0x14c   : > { %1272 = vmatpush1.bf16.msra.mxu0 %v2437_v60 }
 0x14d   : > { %1354 = vmatpush1.bf16.msra.mxu1 %v2438_v61  ;;  %1273 = vmatprep.subr.bf16.mxu0 %v2439_v62  ;;  %v2445_v62 = vld [vmem:[%s3251_s12 + $0x200] ss:$16 sps:$4 sm:$0xff]  }
 0x14e   : > { %1355 = vmatprep.subr.bf16.mxu1 %v2441_v63  ;;  %v2448_v63 = vld [vmem:[%s3251_s12 + $0x208] ss:$16 sps:$4 sm:$0xff]  }
 0x150   : > { %1274 = vmatpush1.bf16.msra.mxu0 %v2443_v1  ;;  %v2453_v1 = vld [vmem:[%s3251_s12 + $0x224] ss:$16 sps:$4 sm:$0xff]  }
 0x151   : > { %1356 = vmatpush1.bf16.msra.mxu1 %v2444_v2  ;;  %1284 = vmatprep.subr.bf16.mxu0 %v2447_v3  ;;  %v2456_v2 = vld [vmem:[%s3251_s12 + $0x22c] ss:$16 sps:$4 sm:$0xff]  }
 0x152   : > { %1366 = vmatprep.subr.bf16.mxu1 %v2450_v4 }
 0x192   : > { %v566_v9 = vpop.permute.xlu0 %565 }
 0x193   : > { %v568_v10 = vmul.f32 %v566_v9, %v556_v5  ;;  %v569_v11 = vmul.f32 %v566_v9, %v557_v6  ;;  %v571_v12 = vmul.f32 %v566_v9, %v559_v7  ;;  %v572_v13 = vmul.f32 %v566_v9, %v560_v8  ;;  %v2451_v5 = vld [vmem:[%s3251_s12 + $0x220] ss:$16 sps:$4 sm:$0xff]   ;;  %v2454_v6 = vld [vmem:[%s3251_s12 + $0x228] ss:$16 sps:$4 sm:$0xff]   ;;  %v2459_v7 = vld [vmem:[%s3251_s12 + $0x244] ss:$16 sps:$4 sm:$0xff]  }
 0x194   : > { %v570_v38 = vmul.f32 %v566_v9, %v558_v29  ;;  %v573_v40 = vmul.f32 %v566_v9, %v561_v33  ;;  %v2462_v8 = vld [vmem:[%s3251_s12 + $0x24c] ss:$16 sps:$4 sm:$0xff]   ;;  %v2478_v29 = vld [vmem:[%s3251_s12 + $0x2a8] ss:$16 sps:$4 sm:$0xff]  }
 0x195   : > { %v575_v14 = vsel %vm574_vm0, %v568_v10, 0.0  ;;  %v582_v15 = vsel %vm574_vm0, %v569_v11, 0.0  ;;  %v596_v16 = vsel %vm574_vm0, %v571_v12, 0.0  ;;  %v603_v20 = vsel %vm574_vm0, %v572_v13, 0.0  ;;  %v2457_v11 = vld [vmem:[%s3251_s12 + $0x240] ss:$16 sps:$4 sm:$0xff]  }
 0x196   : > { %v576_v17 = vrot.slane %v575_v14, 4  ;;  %v583_v18 = vrot.slane %v582_v15, 4  ;;  %v597_v19 = vrot.slane %v596_v16, 4  ;;  %v604_v23 = vrot.slane %v603_v20, 4  ;;  %v2460_v12 = vld [vmem:[%s3251_s12 + $0x248] ss:$16 sps:$4 sm:$0xff]  }
 0x197   : > { %v589_v48 = vsel %vm574_vm0, %v570_v38, 0.0  ;;  %v610_v50 = vsel %vm574_vm0, %v573_v40, 0.0  ;;  %v2465_v13 = vld [vmem:[%s3251_s12 + $0x264] ss:$16 sps:$4 sm:$0xff]   ;;  %v2487_v40 = vld [vmem:[%s3251_s12 + $0x2e0] ss:$16 sps:$4 sm:$0xff]  }
 0x198   : > { %v577_v21 = vadd.f32 %v576_v17, %v575_v14  ;;  %v598_v22 = vadd.f32 %v597_v19, %v596_v16  ;;  %v584_v24 = vadd.f32 %v583_v18, %v582_v15  ;;  %v605_v27 = vadd.f32 %v604_v23, %v603_v20  ;;  %v2468_v14 = vld [vmem:[%s3251_s12 + $0x26c] ss:$16 sps:$4 sm:$0xff]   ;;  %v2463_v17 = vld [vmem:[%s3251_s12 + $0x260] ss:$16 sps:$4 sm:$0xff]   ;;  %v2471_v18 = vld [vmem:[%s3251_s12 + $0x284] ss:$16 sps:$4 sm:$0xff]  }
 0x199   : > { %v590_v57 = vrot.slane %v589_v48, 4  ;;  %v611_v58 = vrot.slane %v610_v50, 4  ;;  %v2474_v19 = vld [vmem:[%s3251_s12 + $0x28c] ss:$16 sps:$4 sm:$0xff]   ;;  %v2472_v23 = vld [vmem:[%s3251_s12 + $0x288] ss:$16 sps:$4 sm:$0xff]  }
 0x19a   : > { %v578_v25 = vrot.slane %v577_v21, 2  ;;  %v599_v26 = vrot.slane %v598_v22, 2  ;;  %v585_v28 = vrot.slane %v584_v24, 2  ;;  %v606_v30 = vrot.slane %v605_v27, 2 }
 0x19b   : > { %v591_v3 = vadd.f32 %v590_v57, %v589_v48  ;;  %v612_v4 = vadd.f32 %v611_v58, %v610_v50  ;;  %v2497_v48 = vld [vmem:[%s3265_s29 + $0x48] sm:$0xff]   ;;  %v2506_v57 = vld [vmem:[%s3265_s29 + $0xd8] sm:$0xff]  }
 0x19c   : > { %v579_v31 = vadd.f32 %v578_v25, %v577_v21  ;;  %v600_v32 = vadd.f32 %v599_v26, %v598_v22  ;;  %v586_v34 = vadd.f32 %v585_v28, %v584_v24  ;;  %v607_v35 = vadd.f32 %v606_v30, %v605_v27  ;;  %v2469_v22 = vld [vmem:[%s3251_s12 + $0x280] ss:$16 sps:$4 sm:$0xff]   ;;  %v2477_v24 = vld [vmem:[%s3251_s12 + $0x2a4] ss:$16 sps:$4 sm:$0xff]   ;;  %v2480_v25 = vld [vmem:[%s3251_s12 + $0x2ac] ss:$16 sps:$4 sm:$0xff]  }
 0x19d   : > { %v592_v9 = vrot.slane %v591_v3, 2  ;;  %v613_v10 = vrot.slane %v612_v4, 2  ;;  %v2475_v28 = vld [vmem:[%s3251_s12 + $0x2a0] ss:$16 sps:$4 sm:$0xff]   ;;  %v2483_v30 = vld [vmem:[%s3251_s12 + $0x2c4] ss:$16 sps:$4 sm:$0xff]  }
 0x19e   : > { %v580_v36 = vrot.slane %v579_v31, 1  ;;  %v601_v37 = vrot.slane %v600_v32, 1  ;;  %v587_v39 = vrot.slane %v586_v34, 1  ;;  %v608_v41 = vrot.slane %v607_v35, 1  ;;  %v2499_v50 = vld [vmem:[%s3265_s29 + $0x8] sm:$0xff]   ;;  %v2507_v58 = vld [vmem:[%s3265_s29 + $0x18] sm:$0xff]  }
 0x19f   : > { %v593_v15 = vadd.f32 %v592_v9, %v591_v3  ;;  %v614_v16 = vadd.f32 %v613_v10, %v612_v4  ;;  %v2515_v3 = vld [vmem:[%s3265_s29 + $0x28] sm:$0xff]   ;;  %v2521_v9 = vld [vmem:[%s3265_s29 + $0x78] sm:$0xff]  }
 0x1a0   : > { %v581_v42 = vadd.f32 %v580_v36, %v579_v31  ;;  %v602_v43 = vadd.f32 %v601_v37, %v600_v32  ;;  %v588_v44 = vadd.f32 %v587_v39, %v586_v34  ;;  %v609_v45 = vadd.f32 %v608_v41, %v607_v35  ;;  %v2486_v31 = vld [vmem:[%s3251_s12 + $0x2cc] ss:$16 sps:$4 sm:$0xff]   ;;  %v2481_v34 = vld [vmem:[%s3251_s12 + $0x2c0] ss:$16 sps:$4 sm:$0xff]   ;;  %v2484_v35 = vld [vmem:[%s3251_s12 + $0x2c8] ss:$16 sps:$4 sm:$0xff]  }
 0x1a1   : > { %v594_v20 = vrot.slane %v593_v15, 1  ;;  %v615_v21 = vrot.slane %v614_v16, 1  ;;  %v2489_v36 = vld [vmem:[%s3251_s12 + $0x2e4] ss:$16 sps:$4 sm:$0xff]   ;;  %v2492_v37 = vld [vmem:[%s3251_s12 + $0x2ec] ss:$16 sps:$4 sm:$0xff]  }
 0x1a2   : > { %v617_v46 = vpack.c.bf16 %v581_v42, %v581_v42  ;;  %v620_v47 = vpack.c.bf16 %v602_v43, %v602_v43  ;;  %v618_v49 = vpack.c.bf16 %v588_v44, %v588_v44  ;;  %v621_v51 = vpack.c.bf16 %v609_v45, %v609_v45  ;;  %v2490_v41 = vld [vmem:[%s3251_s12 + $0x2e8] ss:$16 sps:$4 sm:$0xff]   ;;  %v2516_v4 = vld [vmem:[%s3265_s29 + $0xa8] sm:$0xff]   ;;  %v2522_v10 = vld [vmem:[%s3265_s29 + $0xf8] sm:$0xff]  }
 0x1a3   : > { %v595_v26 = vadd.f32 %v594_v20, %v593_v15  ;;  %v616_v27 = vadd.f32 %v615_v21, %v614_v16  ;;  %v2493_v42 = vld [vmem:[%s3265_s29 + $0x40] sm:$0xff]  }
 0x1a4   : > { %v747_v52 = vunpack.c.l.b16 %v617_v46  ;;  %v750_v53 = vunpack.c.l.b16 %v620_v47  ;;  %v748_v54 = vunpack.c.l.b16 %v618_v49  ;;  %v751_v55 = vunpack.c.l.b16 %v621_v51  ;;  %v2494_v43 = vld [vmem:[%s3265_s29 + $0xc0] sm:$0xff]   ;;  %v2498_v49 = vld [vmem:[%s3265_s29 + $0xc8] sm:$0xff]  }
 0x1a5   : > { %v619_v32 = vpack.c.bf16 %v595_v26, %v595_v26  ;;  %v622_v33 = vpack.c.bf16 %v616_v27, %v616_v27  ;;  %v2495_v45 = vld [vmem:[%s3265_s29] sm:$0xff]   ;;  %v2500_v51 = vld [vmem:[%s3265_s29 + $0x88] sm:$0xff]  }
 0x1a6   : > { %v754_v56 = vsel %vm753_vm1, %v750_v53, %v747_v52  ;;  %v755_v59 = vsel %vm753_vm1, %v751_v55, %v748_v54  ;;  %v2496_v46 = vld [vmem:[%s3265_s29 + $0x80] sm:$0xff]   ;;  %v2501_v52 = vld [vmem:[%s3265_s29 + $0x50] sm:$0xff]  }
 0x1a7   : > { %v757_v60 = vpack.c.b16 %v754_v56, %v754_v56  ;;  %v758_v61 = vpack.c.b16 %v755_v59, %v755_v59  ;;  %v749_v38 = vunpack.c.l.b16 %v619_v32  ;;  %v752_v39 = vunpack.c.l.b16 %v622_v33  ;;  %v2502_v53 = vld [vmem:[%s3265_s29 + $0xd0] sm:$0xff]   ;;  %v2505_v56 = vld [vmem:[%s3265_s29 + $0x58] sm:$0xff]  }
 0x1a8   : > { %v2503_v54 = vld [vmem:[%s3265_s29 + $0x10] sm:$0xff]   ;;  %v2508_v59 = vld [vmem:[%s3265_s29 + $0x98] sm:$0xff]  }
 0x1a9   : > { %1275 = vmatprep.mubr.bf16.mxu0 %v758_v61  ;;  %1357 = vmatprep.mubr.bf16.mxu1 %v758_v61  ;;  %v756_v44 = vsel %vm753_vm1, %v752_v39, %v749_v38  ;;  %v2504_v55 = vld [vmem:[%s3265_s29 + $0x90] sm:$0xff]   ;;  %v2510_v61 = vld [vmem:[%s3265_s29 + $0xe0] sm:$0xff]  }
 0x1aa   : > { %1276 = vmatmul.mubr.bf16.vlgmr.msra.gmra.mrb[0].mxu0 %v757_v60  ;;  %1358 = vmatmul.mubr.bf16.vlgmr.msra.gmra.mrb[0].mxu1 %v757_v60  ;;  %v759_v47 = vpack.c.b16 %v756_v44, %v756_v44  ;;  %v2509_v60 = vld [vmem:[%s3265_s29 + $0x60] sm:$0xff]  }
 0x1ab   : > { %1285 = vmatpush1.bf16.msra.mxu0 %v2445_v62  ;;  %1367 = vmatpush1.bf16.msra.mxu1 %v2448_v63  ;;  %v2511_v62 = vld [vmem:[%s3265_s29 + $0x20] sm:$0xff]  }
 0x1ac   : > { %1286 = vmatprep.subr.bf16.mxu0 %v2453_v1  ;;  %1368 = vmatprep.subr.bf16.mxu1 %v2456_v2  ;;  %v2512_v63 = vld [vmem:[%s3265_s29 + $0xa0] sm:$0xff]   ;;  %v2513_v1 = vld [vmem:[%s3265_s29 + $0x68] sm:$0xff]  }
 0x1ad   : > { %1316 = vmatprep.mubr.bf16.mxu0 %v2861_v0  ;;  %1398 = vmatprep.mubr.bf16.mxu1 %v2861_v0  ;;  %v2466_v0 = vld [vmem:[%s3251_s12 + $0x268] ss:$16 sps:$4 sm:$0xff]   ;;  %v2514_v2 = vld [vmem:[%s3265_s29 + $0xe8] sm:$0xff]   ;;  %s2769_s12 = scalar_lea.vmem %s2768_s3, 64 }
 0x1ae   : > { %p2771_p5 = scmp.lt.s32.totalorder %s2769_s12, %s2763_s24 }
 0x1af   : > { %1287 = vmatpush1.bf16.msra.mxu0 %v2451_v5  ;;  %1369 = vmatpush1.bf16.msra.mxu1 %v2454_v6  ;;  %v2517_v5 = vld [vmem:[%s3265_s29 + $0x70] sm:$0xff]  }
 0x1b0   : > { %1288 = vmatprep.subr.bf16.mxu0 %v2459_v7  ;;  %1370 = vmatprep.subr.bf16.mxu1 %v2462_v8  ;;  %v2518_v6 = vld [vmem:[%s3265_s29 + $0xf0] sm:$0xff]   ;;  %p2772_p6 = por %p2771_p5, %p2770_p0 }
 0x1b1   : > { %v2519_v7 = vld [vmem:[%s3265_s29 + $0x30] sm:$0xff]  }
 0x1b2   : > { %v2520_v8 = vld [vmem:[%s3265_s29 + $0xb0] sm:$0xff]   ;;  %p2773_p3 = pnand %p2772_p6, %p2766_p13 }
 0x1b3   : > { %1289 = vmatpush1.bf16.msra.mxu0 %v2457_v11  ;;  %1371 = vmatpush1.bf16.msra.mxu1 %v2460_v12  ;;  %v2523_v11 = vld [vmem:[%s3265_s29 + $0x38] sm:$0xff]  }
 0x1b4   : > { %1290 = vmatprep.subr.bf16.mxu0 %v2465_v13  ;;  %1372 = vmatprep.subr.bf16.mxu1 %v2468_v14  ;;  %v2524_v12 = vld [vmem:[%s3265_s29 + $0xb8] sm:$0xff]   ;;  %v721_v13 = vlaneseq }
 0x1b6   : > { %v722_v14 = vshrl.u32 %v721_v13, 7 }
 0x1b7   : > { %1291 = vmatpush1.bf16.msra.mxu0 %v2463_v17  ;;  %1373 = vmatpush1.bf16.msra.mxu1 %v2466_v0  ;;  %v719_v17 = vld [vmem:[%s458_s23] sm:$0xf] }
 0x1b8   : > { %1292 = vmatprep.subr.bf16.mxu0 %v2471_v18  ;;  %1374 = vmatprep.subr.bf16.mxu1 %v2474_v19  ;;  %v723_v15 = vsub.s32 0, %v722_v14  ;;  %v731_v16 = vsub.s32 2, %v722_v14  ;;  %v727_v0 = vsub.s32 1, %v722_v14  ;;  %v735_v18 = vsub.s32 3, %v722_v14  ;;  %v1407_v19 = vld [vmem:[%s467_s9] sm:$0xf] }
 0x1ba   : > { %v724_v20 = vrot.slane %v719_v17, %v723_v15  ;;  %v732_v21 = vrot.slane %v719_v17, %v731_v16  ;;  %v1420_v26 = vrot.slane %v1407_v19, %v731_v16 }
 0x1bb   : > { %1293 = vmatpush1.bf16.msra.mxu0 %v2469_v22  ;;  %1375 = vmatpush1.bf16.msra.mxu1 %v2472_v23  ;;  %v1433_v22 = vld [vmem:[%s476_s13] sm:$0xf]  ;;  %v728_v23 = vrot.slane %v719_v17, %v727_v0 }
 0x1bc   : > { %1294 = vmatprep.subr.bf16.mxu0 %v2477_v24  ;;  %1376 = vmatprep.subr.bf16.mxu1 %v2480_v25  ;;  %v736_v24 = vrot.slane %v719_v17, %v735_v18  ;;  %v1412_v25 = vrot.slane %v1407_v19, %v723_v15  ;;  %v1438_v32 = vrot.slane %v1433_v22, %v723_v15 }
 0x1bf   : > { %1295 = vmatpush1.bf16.msra.mxu0 %v2475_v28  ;;  %1377 = vmatpush1.bf16.msra.mxu1 %v2478_v29  ;;  %v1416_v29 = vrot.slane %v1407_v19, %v727_v0 }
 0x1c0   : > { %1296 = vmatprep.subr.bf16.mxu0 %v2483_v30  ;;  %1378 = vmatprep.subr.bf16.mxu1 %v2486_v31  ;;  %v1424_v30 = vrot.slane %v1407_v19, %v735_v18 }
 0x1c3   : > { %1297 = vmatpush1.bf16.msra.mxu0 %v2481_v34  ;;  %1379 = vmatpush1.bf16.msra.mxu1 %v2484_v35  ;;  %v1446_v34 = vrot.slane %v1433_v22, %v731_v16 }
 0x1c4   : > { %1298 = vmatprep.subr.bf16.mxu0 %v2489_v36  ;;  %1380 = vmatprep.subr.bf16.mxu1 %v2492_v37 }
 0x1c7   : > { %1299 = vmatpush1.bf16.msra.mxu0 %v2487_v40  ;;  %1381 = vmatpush1.bf16.msra.mxu1 %v2490_v41  ;;  %v1442_v41 = vrot.slane %v1433_v22, %v727_v0 }
 0x1c8   : > { %2195 = vmatprep.subr.bf16.mxu0 %v2493_v42  ;;  %2217 = vmatprep.subr.bf16.mxu1 %v2494_v43  ;;  %v1450_v42 = vrot.slane %v1433_v22, %v735_v18 }
 0x1ca   : > { %1317 = vmatmul.mubr.bf16.vlgmr.msra.gmra.mrb[0].mxu0 %v759_v47  ;;  %1399 = vmatmul.mubr.bf16.vlgmr.msra.gmra.mrb[0].mxu1 %v759_v47 }
 0x1cb   : > { %2196 = vmatpush3.bf16.msra.mxu0 %v2495_v45  ;;  %2218 = vmatpush3.bf16.msra.mxu1 %v2496_v46 }
 0x1cc   : > { %2197 = vmatprep.subr.bf16.mxu0 %v2497_v48  ;;  %2219 = vmatprep.subr.bf16.mxu1 %v2498_v49 }
 0x1cf   : > { %2198 = vmatpush3.bf16.msra.mxu0 %v2499_v50  ;;  %2220 = vmatpush3.bf16.msra.mxu1 %v2500_v51 }
 0x1d0   : > { %2199 = vmatprep.subr.bf16.mxu0 %v2501_v52  ;;  %2221 = vmatprep.subr.bf16.mxu1 %v2502_v53 }
 0x1d3   : > { %2200 = vmatpush3.bf16.msra.mxu0 %v2503_v54  ;;  %2222 = vmatpush3.bf16.msra.mxu1 %v2504_v55 }
 0x1d4   : > { %2201 = vmatprep.subr.bf16.mxu0 %v2505_v56  ;;  %2223 = vmatprep.subr.bf16.mxu1 %v2506_v57 }
 0x1d7   : > { %2202 = vmatpush3.bf16.msra.mxu0 %v2507_v58  ;;  %2224 = vmatpush3.bf16.msra.mxu1 %v2508_v59  ;;  %v2154_v59 = vld [vmem:[%s493_s1] ss:$0 sm:$0xff] }
 0x1d8   : > { %2203 = vmatprep.subr.bf16.mxu0 %v2509_v60  ;;  %2225 = vmatprep.subr.bf16.mxu1 %v2510_v61 }
 0x1db   : > { %2204 = vmatpush3.bf16.msra.mxu0 %v2511_v62  ;;  %2226 = vmatpush3.bf16.msra.mxu1 %v2512_v63 }
 0x1dc   : > { %2205 = vmatprep.subr.bf16.mxu0 %v2513_v1  ;;  %2227 = vmatprep.subr.bf16.mxu1 %v2514_v2 }
 0x1df   : > { %2206 = vmatpush3.bf16.msra.mxu0 %v2515_v3  ;;  %2228 = vmatpush3.bf16.msra.mxu1 %v2516_v4 }
 0x1e0   : > { %2207 = vmatprep.subr.bf16.mxu0 %v2517_v5  ;;  %2229 = vmatprep.subr.bf16.mxu1 %v2518_v6 }
 0x1e3   : > { %2208 = vmatpush3.bf16.msra.mxu0 %v2519_v7  ;;  %2230 = vmatpush3.bf16.msra.mxu1 %v2520_v8 }
 0x1e4   : > { %2209 = vmatprep.subr.bf16.mxu0 %v2521_v9  ;;  %2231 = vmatprep.subr.bf16.mxu1 %v2522_v10 }
 0x1e7   : > { %2210 = vmatpush3.bf16.msra.mxu0 %v2523_v11  ;;  %2232 = vmatpush3.bf16.msra.mxu1 %v2524_v12 }
 0x29d   : > { %v1318_v27 = vpop.f32.mrb[0].mxu0  ;;  %v1400_v28 = vpop.f32.mrb[0].mxu1 }
 0x29e   : > { %v2239_v31 = vadd.f32 %v1318_v27, %v724_v20  ;;  %v2241_v33 = vadd.f32 %v1400_v28, %v732_v21  ;;  %v1320_v35 = vpop.f32.mrb[1].mxu0  ;;  %v1402_v36 = vpop.f32.mrb[1].mxu1 }
 0x29f   : > { %v2240_v37 = vadd.f32 %v1320_v35, %v728_v23  ;;  %v2242_v38 = vadd.f32 %v1402_v36, %v736_v24  ;;  %v1322_v39 = vpop.f32.mrb[2].mxu0  ;;  %v1404_v40 = vpop.f32.mrb[2].mxu1 }
 0x2a0   : > { %v1429_v43 = vmul.f32 %v2239_v31, %v1412_v25  ;;  %v1431_v44 = vmul.f32 %v2241_v33, %v1420_v26  ;;  %v1323_v45 = vpop.f32.mrb[3].mxu0  ;;  %v1405_v46 = vpop.f32.mrb[3].mxu1 }
 0x2a1   : > { %v1430_v47 = vmul.f32 %v2240_v37, %v1416_v29  ;;  %v1432_v48 = vmul.f32 %v2242_v38, %v1424_v30 }
 0x2a2   : > { %v1455_v49 = vadd.f32 %v1438_v32, %v1429_v43  ;;  %v1457_v50 = vadd.f32 %v1446_v34, %v1431_v44 }
 0x2a3   : > { %v1456_v51 = vadd.f32 %v1442_v41, %v1430_v47  ;;  %v1458_v52 = vadd.f32 %v1450_v42, %v1432_v48 }
 0x2a4   : > { %v1459_v55 = vpack.c.bf16 %v1455_v49, %v1455_v49  ;;  %v1461_v56 = vpack.c.bf16 %v1457_v50, %v1457_v50 }
 0x2a5   : > { %v1460_v53 = vpack.c.bf16 %v1456_v51, %v1456_v51  ;;  %v1462_v54 = vpack.c.bf16 %v1458_v52, %v1458_v52 }
 0x2a7   : > { %1758 = vmatprep.mubr.bf16.mxu0 %v1460_v53  ;;  %1798 = vmatprep.mubr.bf16.mxu1 %v1462_v54 }
 0x2a8   : > { %1759 = vmatmul.mubr.bf16.vlgmr.msra.gmra.mrb[4].mxu0 %v1459_v55  ;;  %1799 = vmatmul.mubr.bf16.vlgmr.msra.gmra.mrb[4].mxu1 %v1461_v56 }
 0x37b   : > { %v2211_v57 = vpop.f32.mrb[4].mxu0  ;;  %v2233_v58 = vpop.f32.mrb[4].mxu1 }
 0x37c   : > { %v2212_v60 = vpop.f32.mrb[5].mxu0  ;;  %v2234_v61 = vpop.f32.mrb[5].mxu1 }
 0x37d   : > { %v2213_v62 = vadd.f32 %v2212_v60, %v2211_v57  ;;  %v2235_v63 = vadd.f32 %v2234_v61, %v2233_v58  ;;  %v2214_v1 = vpop.f32.mrb[6].mxu0  ;;  %v2236_v2 = vpop.f32.mrb[6].mxu1 }
 0x37e   : > { %v2215_v3 = vpop.f32.mrb[7].mxu0  ;;  %v2237_v4 = vpop.f32.mrb[7].mxu1 }
 0x37f   : > { %v1761_v5 = vadd.f32 %v2213_v62, %v2154_v59 }
 0x381   : > { %v1801_v6 = vadd.f32 %v2235_v63, %v1761_v5 }
 0x383   : > { %1807 = vst.msk [vmem:[%s554_s19] sm:$0x3] %vm1806_vm2, %v1801_v6 }
 0x384   : > { %2776 = shalt.err (!%p2773_p3)
}
 0x385   : > { %s2777_s18 = scalar_lea.hbm %s3426_s22, 32  ;;  %s2781_s9 = scalar_lea.hbm %s3530_s5, 128 }
 0x386   : > { %p2778_p7 = scmp.ne.s32.totalorder %s3426_s22, %s2777_s18  ;;  %p2782_p9 = scmp.lt.u32.totalorder %s3426_s22, %s3530_s5 }
 0x387   : > { %p2783_p1 = scmp.lt.u32.totalorder %s2781_s9, %s2777_s18  ;;  %p2785_p12 = scmp.lt.u32.totalorder %s2777_s18, %s3426_s22 }
 0x388   : > { %p2779_p10 = pnand %p2778_p7, %p3531_p8 }
 0x389   : > { %p2784_p11 = por %p2783_p1, %p2782_p9 }
 0x38a   : > { %p2780_p2 = pneg %p2779_p10 }
 0x38b   : > { %p2786_p4 = por %p2785_p12, %p2784_p11 }
 0x38d   : > { %p2787_p13 = pnand %p2786_p4, %p2780_p2 }
 0x38f   : > { %2790 = shalt.err (!%p2787_p13)
}
 0x390   : > { %2272 = dma.vmem_to_hbm [thread:$0]  (%p3531_p8), %s3428_s11, 32, %s3426_s22, %s1809_s27  }
 0x391 PF: > { %s3532_s8 = sld [smem:[#allocation23_spill]]  ;;  %s3533_s29 = sld [smem:[#allocation27_spill]] }
 0x392   : > { %p2307_p0 = scmp.ge.s32.totalorder %s2845_s30, 2 }
 0x397   : > { %s1834_s15 = sand.u32 1, %s3532_s8   ;;  %p3534_p5 = scmp.ne.s32.totalorder %s3533_s29, 0 }
 0x398   : > { %s1835_s1 = scalar_lea.sflag [#allocation4], %s1834_s15 }
 0x399   : > { %p2301_p6 = pnand %p2307_p0, %p3534_p5 }
 0x39b   : > { %2828 = dma.done.wait (!%p2301_p6), %s1835_s1, 32  }
 0x39c   : > { %2830 = vsyncadd (!%p2301_p6), %s1835_s1, 4294967264  ;;  %s3535_s30 = sld [smem:[#allocation25_spill]]  ;;  %s3536_s20 = sld [smem:[#allocation24_spill]] }
 0x39d   : > { %s3537_s29 = sld [smem:[#allocation26_spill]]  ;;  %s3538_s27 = smov %s2837_s28 }
 0x3a2   : > { %p31_p3 = scmp.ge.s32.totalorder %s3535_s30, 6   ;;  %s3539_s28 = smov %s3536_s20 }
 0x3a4   :  { %33 = sbr.rel (!%p31_p3) target bundleno = 17 (0x11), region = 174 }
 0x3ab   :  { %1840 = vsyncpa [#allocation3], 1 }
 0x3ac   :  { %1842 = vsyncpa [#allocation3 + $0x1], 1 }
 0x3ad   :  { %1843 = vsyncpa [#allocation6], 1 }
 0x3ae   :  { %1845 = vsyncpa [#allocation6 + $0x1], 1 }
 0x3af   :  { %1846 = vsyncpa [#allocation9], 1 }
 0x3b0   :  { %1848 = vsyncpa [#allocation9 + $0x1], 1 }
 0x3b1   :  { %1849 = vsyncpa [#allocation12], 1 }
 0x3b2   :  { %1851 = vsyncpa [#allocation12 + $0x1], 1 }
 0x3b3   :  { %1852 = vsyncpa [#allocation15], 1 }
 0x3b4   :  { %1854 = vsyncpa [#allocation15 + $0x1], 1 }
 0x3b5   :  { %1855 = vsyncpa [#allocation4], 1 }
 0x3b6   :  { %1857 = vsyncpa [#allocation4 + $0x1], 1 }

// kernel: fsra_forward.12
= control target key start
LH: loop header
LB: loop body
LE: loop exit
PB: predicated region body
PF: predicated region fallthrough
CT: control target
= control target key end

     0   :  { %12 = vsyncpa [#allocation3], 0  ;;  %s7610_s0 = inlined_call_operand.hbm [shape: f32[10,384], index: 0, kind: input, shape index: {}]   ;;  %s7611_s1 = inlined_call_operand.hbm [shape: f32[1,384], index: 1, kind: input, shape index: {}]   ;;  %s7612_s2 = inlined_call_operand.hbm [shape: f32[1,384], index: 2, kind: input, shape index: {}]   ;;  %s7613_s3 = inlined_call_operand.hbm [shape: bf16[384,1536], index: 3, kind: input, shape index: {}]   ;;  %s7614_s4 = inlined_call_operand.hbm [shape: f32[1,1536], index: 4, kind: input, shape index: {}]   ;;  %s7615_s5 = inlined_call_operand.hbm [shape: bf16[1536,384], index: 5, kind: input, shape index: {}]   ;;  %s7616_s6 = inlined_call_operand.hbm [shape: f32[1,384], index: 6, kind: input, shape index: {}]   ;;  %s7617_s7 = inlined_call_operand.hbm [shape: f32[10,384], index: 7, kind: output, shape index: {}]  }
   0x1   :  { %13 = vsyncpa [#allocation6], 0 }
   0x2   :  { %14 = vsyncpa [#allocation9], 0 }
   0x3   :  { %15 = vsyncpa [#allocation12], 0 }
   0x4   :  { %16 = vsyncpa [#allocation4], 0  ;;  %s7086_s24 = smov [#allocation5]   ;;  %s7087_s26 = smov [#allocation8]  }
   0x5   :  { %s35_s25 = sshll.u32 %s7086_s24, 4  ;;  %s54_s27 = sshll.u32 %s7087_s26, 4  ;;  %s36_s25 = int_to_ptr.vmem [resolvable:$true] %s35_s25  ;;  %s7141_s27 = int_to_ptr.vmem [resolvable:$true] %s54_s27 }
   0x6   :  { %s6900_s30 = scalar_lea.hbm %s7611_s1, 48 }
   0x7   :  { %p6901_p0 = scmp.ne.s32.totalorder %s7611_s1, %s6900_s30  ;;  %p6904_p1 = scmp.lt.u32.totalorder %s6900_s30, %s7611_s1 }
   0x9   :  { %p6906_p2 = pnand %p6904_p1, %p6901_p0 }
   0xb   :  { %6909 = shalt.err (!%p6906_p2)
}
   0xc   :  { %s6910_s12 = scalar_lea.vmem %s36_s25, 48  ;;  %s6914_s13 = scalar_lea.vmem %s36_s25, 64 }
   0xd   :  { %p6911_p3 = scmp.ne.s32.totalorder %s36_s25, %s6910_s12  ;;  %p6915_p4 = scmp.lt.s32.totalorder %s36_s25, %s36_s25 }
   0xe   :  { %p6916_p5 = scmp.lt.s32.totalorder %s6914_s13, %s6910_s12 }
  0x10   :  { %p6917_p6 = por %p6916_p5, %p6915_p4 }
  0x12   :  { %p6918_p7 = pnand %p6917_p6, %p6911_p3 }
  0x14   :  { %6921 = shalt.err (!%p6918_p7)
}
  0x15   :  { %38 = dma.hbm_to_vmem [thread:$0]  %s7611_s1, 48, %s36_s25, [#allocation6]  }
  0x16   :  { %s6922_s18 = scalar_lea.hbm %s7613_s3, 36864 }
  0x17   :  { %p6923_p8 = scmp.ne.s32.totalorder %s7613_s3, %s6922_s18  ;;  %p6926_p9 = scmp.lt.u32.totalorder %s6922_s18, %s7613_s3 }
  0x19   :  { %p6928_p10 = pnand %p6926_p9, %p6923_p8 }
  0x1b   :  { %6931 = shalt.err (!%p6928_p10)
}
  0x1c   :  { %s6932_s23 = scalar_lea.vmem %s7141_s27, 36864  ;;  %p6937_p12 = scmp.lt.s32.totalorder %s7141_s27, %s7141_s27 }
  0x1d   :  { %p6933_p11 = scmp.ne.s32.totalorder %s7141_s27, %s6932_s23  ;;  %p6938_p13 = scmp.lt.s32.totalorder %s6932_s23, %s6932_s23 }
  0x1f   :  { %p6939_p0 = por %p6938_p13, %p6937_p12 }
  0x21   :  { %p6940_p1 = pnand %p6939_p0, %p6933_p11 }
  0x23   :  { %6943 = shalt.err (!%p6940_p1)
}
  0x24   :  { %s7088_s1 = smov 768   ;;  %s7089_s24 = smov 48  }
  0x25   :  { %60 = dma.hbm_to_vmem [thread:$0]  %s7613_s3, 36864, %s7141_s27, [#allocation9], %s7088_s1, %s7088_s1, %s7089_s24  }
  0x26   :  { %s7090_s28 = smov [#allocation11]   ;;  %s6944_s9 = scalar_lea.hbm %s7615_s5, 36864 }
  0x27   :  { %s76_s29 = sshll.u32 %s7090_s28, 4  ;;  %p6945_p2 = scmp.ne.s32.totalorder %s7615_s5, %s6944_s9  ;;  %s77_s29 = int_to_ptr.vmem [resolvable:$true] %s76_s29 }
  0x28   :  { %p6948_p3 = scmp.lt.u32.totalorder %s6944_s9, %s7615_s5 }
  0x2a   :  { %p6950_p4 = pnand %p6948_p3, %p6945_p2 }
  0x2c   :  { %6953 = shalt.err (!%p6950_p4)
}
  0x2d   :  { %s6954_s14 = scalar_lea.vmem %s77_s29, 36864  ;;  %p6959_p6 = scmp.lt.s32.totalorder %s77_s29, %s77_s29 }
  0x2e   :  { %p6955_p5 = scmp.ne.s32.totalorder %s77_s29, %s6954_s14  ;;  %p6960_p7 = scmp.lt.s32.totalorder %s6954_s14, %s6954_s14 }
  0x30   :  { %p6961_p8 = por %p6960_p7, %p6959_p6 }
  0x32   :  { %p6962_p9 = pnand %p6961_p8, %p6955_p5 }
  0x34   :  { %6965 = shalt.err (!%p6962_p9)
}
  0x35   :  { %s7091_s3 = smov 192   ;;  %s7092_s27 = smov 12  }
  0x36   :  { %82 = dma.hbm_to_vmem [thread:$0]  %s7615_s5, 36864, %s77_s29, [#allocation12], %s7091_s3, %s7091_s3, %s7092_s27  }
  0x37   :  { %s7093_s17 = smov [#allocation2]   ;;  %s6966_s21 = scalar_lea.hbm %s7610_s0, 768 }
  0x38   :  { %s22_s18 = sshll.u32 %s7093_s17, 4  ;;  %p6967_p10 = scmp.ne.s32.totalorder %s7610_s0, %s6966_s21  ;;  %s23_s18 = int_to_ptr.vmem [resolvable:$true] %s22_s18 }
  0x39   :  { %p6970_p11 = scmp.lt.u32.totalorder %s6966_s21, %s7610_s0 }
  0x3b   :  { %p6972_p12 = pnand %p6970_p11, %p6967_p10 }
  0x3d   :  { %6975 = shalt.err (!%p6972_p12)
}
  0x3e   :  { %s6976_s25 = scalar_lea.vmem %s23_s18, 768  ;;  %p6981_p0 = scmp.lt.s32.totalorder %s23_s18, %s23_s18 }
  0x3f   :  { %p6977_p13 = scmp.ne.s32.totalorder %s23_s18, %s6976_s25  ;;  %p6982_p1 = scmp.lt.s32.totalorder %s6976_s25, %s6976_s25 }
  0x41   :  { %p6983_p2 = por %p6982_p1, %p6981_p0 }
  0x43   :  { %p6984_p3 = pnand %p6983_p2, %p6977_p13 }
  0x45   :  { %6987 = shalt.err (!%p6984_p3)
}
  0x46   :  { %s7094_s5 = smov 384   ;;  %s7095_s26 = smov 24  }
  0x47   :  { %28 = dma.hbm_to_vmem [thread:$0]  %s7610_s0, 768, %s23_s18, [#allocation3], %s7094_s5, %s7094_s5, %s7095_s26  }
  0x48   :  { %s7096_s30 = smov [#allocation7]   ;;  %s7097_s9 = smov [#allocation10]  }
  0x49   :  { %s45_s8 = sshll.u32 %s7096_s30, 4  ;;  %s67_s10 = sshll.u32 %s7097_s9, 4  ;;  %s46_s8 = int_to_ptr.vmem [resolvable:$true] %s45_s8  ;;  %s68_s10 = int_to_ptr.vmem [resolvable:$true] %s67_s10 }
  0x4a   :  { %s6988_s13 = scalar_lea.hbm %s7612_s2, 48 }
  0x4b   :  { %p6989_p4 = scmp.ne.s32.totalorder %s7612_s2, %s6988_s13  ;;  %p6992_p5 = scmp.lt.u32.totalorder %s6988_s13, %s7612_s2 }
  0x4d   :  { %p6994_p6 = pnand %p6992_p5, %p6989_p4 }
  0x4f   :  { %6997 = shalt.err (!%p6994_p6)
}
  0x50   :  { %s6998_s0 = scalar_lea.vmem %s46_s8, 48  ;;  %s7002_s16 = scalar_lea.vmem %s46_s8, 64 }
  0x51   :  { %p6999_p7 = scmp.ne.s32.totalorder %s46_s8, %s6998_s0  ;;  %p7003_p8 = scmp.lt.s32.totalorder %s46_s8, %s46_s8 }
  0x52   :  { %p7004_p9 = scmp.lt.s32.totalorder %s7002_s16, %s6998_s0 }
  0x54   :  { %p7005_p10 = por %p7004_p9, %p7003_p8 }
  0x56   :  { %p7006_p11 = pnand %p7005_p10, %p6999_p7 }
  0x58   :  { %7009 = shalt.err (!%p7006_p11)
}
  0x59   :  { %48 = dma.hbm_to_vmem [thread:$0]  %s7612_s2, 48, %s46_s8, [#allocation6]  }
  0x5a   :  { %s7010_s21 = scalar_lea.hbm %s7614_s4, 192 }
  0x5b   :  { %p7011_p12 = scmp.ne.s32.totalorder %s7614_s4, %s7010_s21  ;;  %p7014_p13 = scmp.lt.u32.totalorder %s7010_s21, %s7614_s4 }
  0x5d   :  { %p7016_p0 = pnand %p7014_p13, %p7011_p12 }
  0x5f   :  { %7019 = shalt.err (!%p7016_p0)
}
  0x60   :  { %s7020_s25 = scalar_lea.vmem %s68_s10, 192  ;;  %p7025_p2 = scmp.lt.s32.totalorder %s68_s10, %s68_s10 }
  0x61   :  { %p7021_p1 = scmp.ne.s32.totalorder %s68_s10, %s7020_s25  ;;  %p7026_p3 = scmp.lt.s32.totalorder %s7020_s25, %s7020_s25 }
  0x63   :  { %p7027_p4 = por %p7026_p3, %p7025_p2 }
  0x65   :  { %p7028_p5 = pnand %p7027_p4, %p7021_p1 }
  0x67   :  { %7031 = shalt.err (!%p7028_p5)
}
  0x68   :  { %70 = dma.hbm_to_vmem [thread:$0]  %s7614_s4, 192, %s68_s10, [#allocation9]  }
  0x69   :  { %s7098_s29 = smov [#allocation13]   ;;  %s7032_s11 = scalar_lea.hbm %s7616_s6, 48 }
  0x6a   :  { %s89_s30 = sshll.u32 %s7098_s29, 4  ;;  %p7033_p6 = scmp.ne.s32.totalorder %s7616_s6, %s7032_s11  ;;  %s90_s30 = int_to_ptr.vmem [resolvable:$true] %s89_s30 }
  0x6b   :  { %p7036_p7 = scmp.lt.u32.totalorder %s7032_s11, %s7616_s6 }
  0x6d   :  { %p7038_p8 = pnand %p7036_p7, %p7033_p6 }
  0x6f   :  { %7041 = shalt.err (!%p7038_p8)
}
  0x70   :  { %s7042_s27 = scalar_lea.vmem %s90_s30, 48  ;;  %s7046_s4 = scalar_lea.vmem %s90_s30, 64 }
  0x71   :  { %p7043_p9 = scmp.ne.s32.totalorder %s90_s30, %s7042_s27  ;;  %p7047_p10 = scmp.lt.s32.totalorder %s90_s30, %s90_s30 }
  0x72   :  { %p7048_p11 = scmp.lt.s32.totalorder %s7046_s4, %s7042_s27 }
  0x74   :  { %p7049_p12 = por %p7048_p11, %p7047_p10 }
  0x76   :  { %p7050_p13 = pnand %p7049_p12, %p7043_p9 }
  0x78   :  { %7053 = shalt.err (!%p7050_p13)
}
  0x79   :  { %92 = dma.hbm_to_vmem [thread:$0]  %s7616_s6, 48, %s90_s30, [#allocation12]  }
  0x7a   :  { %7076 = dma.done.wait [#allocation3], 768  }
  0x7b   :  { %7077 = vsyncadd [#allocation3], 4294966528 }
  0x7c   :  { %7078 = dma.done.wait [#allocation6], 96  }
  0x7d   :  { %7079 = vsyncadd [#allocation6], 4294967200 }
  0x7e   :  { %7080 = dma.done.wait [#allocation9], 37056  }
  0x7f   :  { %7081 = vsyncadd [#allocation9], 4294930240 }
  0x80   :  { %7082 = dma.done.wait [#allocation12], 36912  }
  0x81   :  { %7083 = vsyncadd [#allocation12], 4294930384  ;;  %vm125_vm0 = vcmask 1041408   ;;  %v7235_v0 = vld [vmem:[#allocation2 + $0x18] sm:$0x3]  ;;  %v7244_v6 = vld [vmem:[#allocation2] sm:$0xff] }
  0x82   :  { %v7237_v1 = vld [vmem:[#allocation2 + $0x20] sm:$0x3]  ;;  %v120_v2 = vld [vmem:[#allocation2 + $0x28] sm:$0x3]  ;;  %v126_v3 = vsel %vm125_vm0, %v7235_v0, 0.0  ;;  %v7248_v8 = vld [vmem:[#allocation2 + $0x10] sm:$0xff] }
  0x83   :  { %v127_v4 = vsel %vm125_vm0, %v7237_v1, 0.0  ;;  %v129_v5 = vsel %vm125_vm0, %v120_v2, 0.0  ;;  %v7246_v7 = vld [vmem:[#allocation2 + $0x8] sm:$0xff]  ;;  %s7100_s6 = smov [#allocation14]  }
  0x84   :  { %v128_v9 = vadd.f32 %v127_v4, %v126_v3  ;;  %v121_v10 = vadd.f32 %v7246_v7, %v7244_v6  ;;  %v6024_v13 = vld [vmem:[#allocation8 + $0x4] ss:$48 sps:$4 sm:$0xff]   ;;  %v6028_v15 = vld [vmem:[#allocation8] ss:$48 sps:$4 sm:$0xff]   ;;  %s5214_s0 = sshll.u32 %s7100_s6, 4  ;;  %s5215_s0 = int_to_ptr.vmem [resolvable:$true] %s5214_s0 }
  0x85   :  { %v6026_v14 = vld [vmem:[#allocation8 + $0x14] ss:$48 sps:$4 sm:$0xff]   ;;  %v6029_v16 = vld [vmem:[#allocation8 + $0x10] ss:$48 sps:$4 sm:$0xff]   ;;  %2012 = vmatprep.subr.bf16.mxu1 %v6024_v13  ;;  %s7054_s16 = scalar_lea.vmem %s5215_s0, 768  ;;  %p7059_p1 = scmp.lt.s32.totalorder %s5215_s0, %s5215_s0 }
  0x86   :  { %v130_v11 = vadd.f32 %v129_v5, %v128_v9  ;;  %v122_v12 = vadd.f32 %v121_v10, %v7248_v8  ;;  %v6030_v17 = vld [vmem:[#allocation8 + $0x64] ss:$48 sps:$4 sm:$0xff]   ;;  %2184 = vmatprep.subr.bf16.mxu0 %v6026_v14  ;;  %2013 = vmatpush1.bf16.msra.mxu1 %v6028_v15  ;;  %v6034_v19 = vld [vmem:[#allocation8 + $0x60] ss:$48 sps:$4 sm:$0xff]   ;;  %p7055_p0 = scmp.ne.s32.totalorder %s5215_s0, %s7054_s16  ;;  %p7060_p2 = scmp.lt.s32.totalorder %s7054_s16, %s7054_s16 }
  0x87   :  { %v6032_v18 = vld [vmem:[#allocation8 + $0x74] ss:$48 sps:$4 sm:$0xff]   ;;  %2185 = vmatpush1.bf16.msra.mxu0 %v6029_v16  ;;  %v6035_v20 = vld [vmem:[#allocation8 + $0x70] ss:$48 sps:$4 sm:$0xff]   ;;  %2014 = vmatprep.subr.bf16.mxu1 %v6030_v17 }
  0x88   :  { %131 = vadd.xlane.f32.xlu0 %v130_v11  ;;  %2186 = vmatprep.subr.bf16.mxu0 %v6032_v18  ;;  %v6036_v21 = vld [vmem:[#allocation8 + $0xc4] ss:$48 sps:$4 sm:$0xff]   ;;  %v6040_v23 = vld [vmem:[#allocation8 + $0xc0] ss:$48 sps:$4 sm:$0xff]   ;;  %p7061_p3 = por %p7060_p2, %p7059_p1 }
  0x89   :  { %v6038_v22 = vld [vmem:[#allocation8 + $0xd4] ss:$48 sps:$4 sm:$0xff]   ;;  %v6041_v24 = vld [vmem:[#allocation8 + $0xd0] ss:$48 sps:$4 sm:$0xff]  }
  0x8a   :  { %2015 = vmatpush1.bf16.msra.mxu1 %v6034_v19  ;;  %v6042_v25 = vld [vmem:[#allocation8 + $0x124] ss:$48 sps:$4 sm:$0xff]   ;;  %v6046_v27 = vld [vmem:[#allocation8 + $0x120] ss:$48 sps:$4 sm:$0xff]   ;;  %p7062_p4 = pnand %p7061_p3, %p7055_p0 }
  0x8b   :  { %2187 = vmatpush1.bf16.msra.mxu0 %v6035_v20  ;;  %2016 = vmatprep.subr.bf16.mxu1 %v6036_v21  ;;  %v6044_v26 = vld [vmem:[#allocation8 + $0x134] ss:$48 sps:$4 sm:$0xff]   ;;  %v6047_v28 = vld [vmem:[#allocation8 + $0x130] ss:$48 sps:$4 sm:$0xff]  }
  0x8c   :  { %123 = vadd.xlane.f32.xlu0 %v122_v12  ;;  %2188 = vmatprep.subr.bf16.mxu0 %v6038_v22  ;;  %v6048_v29 = vld [vmem:[#allocation8 + $0x184] ss:$48 sps:$4 sm:$0xff]   ;;  %v6052_v31 = vld [vmem:[#allocation8 + $0x180] ss:$48 sps:$4 sm:$0xff]  }
  0x8d   :  { %v6050_v30 = vld [vmem:[#allocation8 + $0x194] ss:$48 sps:$4 sm:$0xff]   ;;  %v6053_v32 = vld [vmem:[#allocation8 + $0x190] ss:$48 sps:$4 sm:$0xff]  }
  0x8e   :  { %2017 = vmatpush1.bf16.msra.mxu1 %v6040_v23  ;;  %v6054_v33 = vld [vmem:[#allocation8 + $0x1e4] ss:$48 sps:$4 sm:$0xff]   ;;  %v6058_v35 = vld [vmem:[#allocation8 + $0x1e0] ss:$48 sps:$4 sm:$0xff]  }
  0x8f   :  { %2189 = vmatpush1.bf16.msra.mxu0 %v6041_v24  ;;  %2018 = vmatprep.subr.bf16.mxu1 %v6042_v25  ;;  %v6056_v34 = vld [vmem:[#allocation8 + $0x1f4] ss:$48 sps:$4 sm:$0xff]   ;;  %v6059_v36 = vld [vmem:[#allocation8 + $0x1f0] ss:$48 sps:$4 sm:$0xff]  }
  0x90   :  { %2190 = vmatprep.subr.bf16.mxu0 %v6044_v26  ;;  %v6060_v37 = vld [vmem:[#allocation8 + $0x244] ss:$48 sps:$4 sm:$0xff]   ;;  %v6064_v39 = vld [vmem:[#allocation8 + $0x240] ss:$48 sps:$4 sm:$0xff]  }
  0x91   :  { %v6062_v38 = vld [vmem:[#allocation8 + $0x254] ss:$48 sps:$4 sm:$0xff]   ;;  %v6065_v40 = vld [vmem:[#allocation8 + $0x250] ss:$48 sps:$4 sm:$0xff]  }
  0x92   :  { %2019 = vmatpush1.bf16.msra.mxu1 %v6046_v27  ;;  %v6066_v41 = vld [vmem:[#allocation8 + $0x2a4] ss:$48 sps:$4 sm:$0xff]   ;;  %v6070_v43 = vld [vmem:[#allocation8 + $0x2a0] ss:$48 sps:$4 sm:$0xff]  }
  0x93   :  { %2191 = vmatpush1.bf16.msra.mxu0 %v6047_v28  ;;  %2020 = vmatprep.subr.bf16.mxu1 %v6048_v29  ;;  %v6068_v42 = vld [vmem:[#allocation8 + $0x2b4] ss:$48 sps:$4 sm:$0xff]   ;;  %v6071_v44 = vld [vmem:[#allocation8 + $0x2b0] ss:$48 sps:$4 sm:$0xff]  }
  0x94   :  { %2192 = vmatprep.subr.bf16.mxu0 %v6050_v30  ;;  %v6072_v45 = vld [vmem:[#allocation8 + $0x304] ss:$48 sps:$4 sm:$0xff]   ;;  %v6076_v47 = vld [vmem:[#allocation8 + $0x300] ss:$48 sps:$4 sm:$0xff]  }
  0x95   :  { %v6074_v46 = vld [vmem:[#allocation8 + $0x314] ss:$48 sps:$4 sm:$0xff]   ;;  %v6077_v48 = vld [vmem:[#allocation8 + $0x310] ss:$48 sps:$4 sm:$0xff]  }
  0x96   :  { %2021 = vmatpush1.bf16.msra.mxu1 %v6052_v31  ;;  %v6078_v49 = vld [vmem:[#allocation8 + $0x364] ss:$48 sps:$4 sm:$0xff]   ;;  %v6892_v62 = vld [vmem:[#allocation2 + $0x28] sm:$0x3] }
  0x97   :  { %2193 = vmatpush1.bf16.msra.mxu0 %v6053_v32  ;;  %2022 = vmatprep.subr.bf16.mxu1 %v6054_v33  ;;  %v6080_v50 = vld [vmem:[#allocation8 + $0x374] ss:$48 sps:$4 sm:$0xff]   ;;  %v6082_v11 = vld [vmem:[#allocation8 + $0x360] ss:$48 sps:$4 sm:$0xff]  }
  0x98   :  { %2194 = vmatprep.subr.bf16.mxu0 %v6056_v34  ;;  %v6083_v12 = vld [vmem:[#allocation8 + $0x370] ss:$48 sps:$4 sm:$0xff]   ;;  %v6084_v13 = vld [vmem:[#allocation8 + $0x3c4] ss:$48 sps:$4 sm:$0xff]  }
  0x99   :  { %v6086_v14 = vld [vmem:[#allocation8 + $0x3d4] ss:$48 sps:$4 sm:$0xff]   ;;  %v6088_v15 = vld [vmem:[#allocation8 + $0x3c0] ss:$48 sps:$4 sm:$0xff]  }
  0x9a   :  { %2023 = vmatpush1.bf16.msra.mxu1 %v6058_v35  ;;  %v6089_v16 = vld [vmem:[#allocation8 + $0x3d0] ss:$48 sps:$4 sm:$0xff]   ;;  %v6090_v17 = vld [vmem:[#allocation8 + $0x424] ss:$48 sps:$4 sm:$0xff]  }
  0x9b   :  { %2195 = vmatpush1.bf16.msra.mxu0 %v6059_v36  ;;  %2024 = vmatprep.subr.bf16.mxu1 %v6060_v37  ;;  %v6092_v18 = vld [vmem:[#allocation8 + $0x434] ss:$48 sps:$4 sm:$0xff]   ;;  %v6094_v19 = vld [vmem:[#allocation8 + $0x420] ss:$48 sps:$4 sm:$0xff]  }
  0x9c   :  { %2196 = vmatprep.subr.bf16.mxu0 %v6062_v38  ;;  %v6095_v20 = vld [vmem:[#allocation8 + $0x430] ss:$48 sps:$4 sm:$0xff]   ;;  %v6096_v21 = vld [vmem:[#allocation8 + $0x484] ss:$48 sps:$4 sm:$0xff]  }
  0x9d   :  { %v6098_v22 = vld [vmem:[#allocation8 + $0x494] ss:$48 sps:$4 sm:$0xff]   ;;  %v6100_v23 = vld [vmem:[#allocation8 + $0x480] ss:$48 sps:$4 sm:$0xff]  }
  0x9e   :  { %2025 = vmatpush1.bf16.msra.mxu1 %v6064_v39  ;;  %v6101_v24 = vld [vmem:[#allocation8 + $0x490] ss:$48 sps:$4 sm:$0xff]   ;;  %v6102_v25 = vld [vmem:[#allocation8 + $0x4e4] ss:$48 sps:$4 sm:$0xff]  }
  0x9f   :  { %2197 = vmatpush1.bf16.msra.mxu0 %v6065_v40  ;;  %2026 = vmatprep.subr.bf16.mxu1 %v6066_v41  ;;  %v6104_v26 = vld [vmem:[#allocation8 + $0x4f4] ss:$48 sps:$4 sm:$0xff]   ;;  %v6106_v27 = vld [vmem:[#allocation8 + $0x4e0] ss:$48 sps:$4 sm:$0xff]  }
  0xa0   :  { %2198 = vmatprep.subr.bf16.mxu0 %v6068_v42  ;;  %v6107_v28 = vld [vmem:[#allocation8 + $0x4f0] ss:$48 sps:$4 sm:$0xff]   ;;  %v6108_v29 = vld [vmem:[#allocation8 + $0x544] ss:$48 sps:$4 sm:$0xff]  }
  0xa1   :  { %v6110_v30 = vld [vmem:[#allocation8 + $0x554] ss:$48 sps:$4 sm:$0xff]   ;;  %v6112_v31 = vld [vmem:[#allocation8 + $0x540] ss:$48 sps:$4 sm:$0xff]  }
  0xa2   :  { %2027 = vmatpush1.bf16.msra.mxu1 %v6070_v43  ;;  %v6113_v32 = vld [vmem:[#allocation8 + $0x550] ss:$48 sps:$4 sm:$0xff]   ;;  %v6114_v33 = vld [vmem:[#allocation8 + $0x5a4] ss:$48 sps:$4 sm:$0xff]   ;;  %v173_v43 = vlaneseq }
  0xa3   :  { %2199 = vmatpush1.bf16.msra.mxu0 %v6071_v44  ;;  %2028 = vmatprep.subr.bf16.mxu1 %v6072_v45  ;;  %v6116_v34 = vld [vmem:[#allocation8 + $0x5b4] ss:$48 sps:$4 sm:$0xff]   ;;  %v6118_v35 = vld [vmem:[#allocation8 + $0x5a0] ss:$48 sps:$4 sm:$0xff]  }
  0xa4   :  { %2200 = vmatprep.subr.bf16.mxu0 %v6074_v46  ;;  %v6119_v36 = vld [vmem:[#allocation8 + $0x5b0] ss:$48 sps:$4 sm:$0xff]   ;;  %v6122_v37 = vld [vmem:[#allocation8 + $0x604] ss:$48 sps:$4 sm:$0xff]   ;;  %v7285_v46 = vshrl.u32 %v173_v43, 7 }
  0xa5   :  { %v6125_v38 = vld [vmem:[#allocation8 + $0x614] ss:$48 sps:$4 sm:$0xff]  }
  0xa6   :  { %2029 = vmatpush1.bf16.msra.mxu1 %v6076_v47  ;;  %v7288_v47 = vsub.s32 1, %v7285_v46 }
  0xa7   :  { %2201 = vmatpush1.bf16.msra.mxu0 %v6077_v48  ;;  %2030 = vmatprep.subr.bf16.mxu1 %v6078_v49  ;;  %v7291_v48 = vsub.s32 0, %v7285_v46  ;;  %v7293_v49 = vld [vmem:[#allocation5] sm:$0x7] }
  0xa8   :  { %2202 = vmatprep.subr.bf16.mxu0 %v6080_v50 }
  0xaa   :  { %2031 = vmatpush1.bf16.msra.mxu1 %v6082_v11  ;;  %v6123_v11 = vld [vmem:[#allocation8 + $0x610] ss:$48 sps:$4 sm:$0xff]  }
  0xab   :  { %2203 = vmatpush1.bf16.msra.mxu0 %v6083_v12  ;;  %2032 = vmatprep.subr.bf16.mxu1 %v6084_v13  ;;  %v6128_v13 = vld [vmem:[#allocation8 + $0x664] ss:$48 sps:$4 sm:$0xff]  }
  0xac   :  { %2204 = vmatprep.subr.bf16.mxu0 %v6086_v14  ;;  %v6131_v14 = vld [vmem:[#allocation8 + $0x674] ss:$48 sps:$4 sm:$0xff]  }
  0xae   :  { %2033 = vmatpush1.bf16.msra.mxu1 %v6088_v15  ;;  %v6134_v15 = vld [vmem:[#allocation8 + $0x6c4] ss:$48 sps:$4 sm:$0xff]  }
  0xaf   :  { %2205 = vmatpush1.bf16.msra.mxu0 %v6089_v16  ;;  %2034 = vmatprep.subr.bf16.mxu1 %v6090_v17  ;;  %v6137_v16 = vld [vmem:[#allocation8 + $0x6d4] ss:$48 sps:$4 sm:$0xff]   ;;  %v7099_v17 = vmov 0  }
  0xb0   :  { %2206 = vmatprep.subr.bf16.mxu0 %v6092_v18  ;;  %v6132_v18 = vld [vmem:[#allocation8 + $0x6c0] ss:$48 sps:$4 sm:$0xff]  }
  0xb2   :  { %2035 = vmatpush1.bf16.msra.mxu1 %v6094_v19  ;;  %v6135_v19 = vld [vmem:[#allocation8 + $0x6d0] ss:$48 sps:$4 sm:$0xff]  }
  0xb3   :  { %2207 = vmatpush1.bf16.msra.mxu0 %v6095_v20  ;;  %2036 = vmatprep.subr.bf16.mxu1 %v6096_v21  ;;  %v6140_v20 = vld [vmem:[#allocation8 + $0x724] ss:$48 sps:$4 sm:$0xff]  }
  0xb4   :  { %2208 = vmatprep.subr.bf16.mxu0 %v6098_v22  ;;  %v6143_v21 = vld [vmem:[#allocation8 + $0x734] ss:$48 sps:$4 sm:$0xff]   ;;  %v6138_v22 = vld [vmem:[#allocation8 + $0x720] ss:$48 sps:$4 sm:$0xff]  }
  0xb6   :  { %2037 = vmatpush1.bf16.msra.mxu1 %v6100_v23  ;;  %v6141_v23 = vld [vmem:[#allocation8 + $0x730] ss:$48 sps:$4 sm:$0xff]  }
  0xb7   :  { %2209 = vmatpush1.bf16.msra.mxu0 %v6101_v24  ;;  %2038 = vmatprep.subr.bf16.mxu1 %v6102_v25  ;;  %v6146_v24 = vld [vmem:[#allocation8 + $0x784] ss:$48 sps:$4 sm:$0xff]  }
  0xb8   :  { %2210 = vmatprep.subr.bf16.mxu0 %v6104_v26  ;;  %v6149_v25 = vld [vmem:[#allocation8 + $0x794] ss:$48 sps:$4 sm:$0xff]   ;;  %v6144_v26 = vld [vmem:[#allocation8 + $0x780] ss:$48 sps:$4 sm:$0xff]  }
  0xba   :  { %2039 = vmatpush1.bf16.msra.mxu1 %v6106_v27  ;;  %v6147_v27 = vld [vmem:[#allocation8 + $0x790] ss:$48 sps:$4 sm:$0xff]  }
  0xbb   :  { %2211 = vmatpush1.bf16.msra.mxu0 %v6107_v28  ;;  %2040 = vmatprep.subr.bf16.mxu1 %v6108_v29  ;;  %v6152_v28 = vld [vmem:[#allocation8 + $0x7e4] ss:$48 sps:$4 sm:$0xff]  }
  0xbc   :  { %2212 = vmatprep.subr.bf16.mxu0 %v6110_v30  ;;  %v6155_v29 = vld [vmem:[#allocation8 + $0x7f4] ss:$48 sps:$4 sm:$0xff]   ;;  %v7328_v30 = vsub.s32 2, %v7285_v46 }
  0xbe   :  { %2041 = vmatpush1.bf16.msra.mxu1 %v6112_v31  ;;  %v6150_v31 = vld [vmem:[#allocation8 + $0x7e0] ss:$48 sps:$4 sm:$0xff]  }
  0xbf   :  { %2213 = vmatpush1.bf16.msra.mxu0 %v6113_v32  ;;  %2042 = vmatprep.subr.bf16.mxu1 %v6114_v33  ;;  %v6153_v32 = vld [vmem:[#allocation8 + $0x7f0] ss:$48 sps:$4 sm:$0xff]   ;;  %v6158_v33 = vld [vmem:[#allocation8 + $0x844] ss:$48 sps:$4 sm:$0xff]  }
  0xc0   :  { %2214 = vmatprep.subr.bf16.mxu0 %v6116_v34  ;;  %v6161_v34 = vld [vmem:[#allocation8 + $0x854] ss:$48 sps:$4 sm:$0xff]  }
  0xc2   :  { %2043 = vmatpush1.bf16.msra.mxu1 %v6118_v35 }
  0xc3   :  { %2215 = vmatpush1.bf16.msra.mxu0 %v6119_v36  ;;  %2055 = vmatprep.subr.bf16.mxu1 %v6122_v37  ;;  %v184_v37 = vrot.slane %v7293_v49, %v7328_v30 }
  0xc4   :  { %2227 = vmatprep.subr.bf16.mxu0 %v6125_v38  ;;  %v6156_v38 = vld [vmem:[#allocation8 + $0x840] ss:$48 sps:$4 sm:$0xff]  }
 0x115   :  { %v132_v51 = vpop.xlane.xlu0 %131 }
 0x116   :  { %v135_v52 = vmul.f32 0.0026041667, %v132_v51 }
 0x118   :  { %v7254_v53 = vsub.f32 %v7235_v0, %v135_v52  ;;  %v7257_v54 = vsub.f32 %v7237_v1, %v135_v52  ;;  %v7272_v63 = vsub.f32 %v6892_v62, %v135_v52  ;;  %v180_v52 = vrot.slane %v7293_v49, %v7288_v47 }
 0x119   :  { %v124_v55 = vpop.xlane.xlu0 %123 }
 0x11a   :  { %v134_v56 = vmul.f32 0.0026041667, %v124_v55  ;;  %v145_v57 = vmul.f32 %v7254_v53, %v7254_v53  ;;  %v146_v58 = vmul.f32 %v7257_v54, %v7257_v54  ;;  %v7301_v55 = vld [vmem:[#allocation7] sm:$0x7] }
 0x11b   :  { %v203_v62 = vrot.slane %v7301_v55, %v7288_v47 }
 0x11c   :  { %v7264_v59 = vsub.f32 %v7244_v6, %v134_v56  ;;  %v7267_v60 = vsub.f32 %v7246_v7, %v134_v56  ;;  %v7270_v61 = vsub.f32 %v7248_v8, %v134_v56  ;;  %v152_v2 = vsel %vm125_vm0, %v145_v57, 0.0 }
 0x11d   :  { %v153_v3 = vsel %vm125_vm0, %v146_v58, 0.0  ;;  %v147_v6 = vmul.f32 %v7272_v63, %v7272_v63  ;;  %v176_v57 = vrot.slane %v7293_v49, %v7291_v48  ;;  %v6170_v49 = vld [vmem:[#allocation8 + $0xc] ss:$48 sps:$4 sm:$0xff]  }
 0x11e   :  { %v142_v0 = vmul.f32 %v7264_v59, %v7264_v59  ;;  %v143_v1 = vmul.f32 %v7267_v60, %v7267_v60  ;;  %v144_v4 = vmul.f32 %v7270_v61, %v7270_v61  ;;  %v154_v8 = vadd.f32 %v153_v3, %v152_v2 }
 0x11f   :  { %v155_v9 = vsel %vm125_vm0, %v147_v6, 0.0 }
 0x120   :  { %v148_v5 = vadd.f32 %v143_v1, %v142_v0  ;;  %v156_v10 = vadd.f32 %v155_v9, %v154_v8  ;;  %v199_v0 = vrot.slane %v7301_v55, %v7291_v48 }
 0x122   :  { %v149_v7 = vadd.f32 %v148_v5, %v144_v4 }
 0x124   :  { %150 = vadd.xlane.f32.xlu1 %v149_v7 }
 0x128   :  { %157 = vadd.xlane.f32.xlu1 %v156_v10  ;;  %v6120_v10 = vld [vmem:[#allocation8 + $0x600] ss:$48 sps:$4 sm:$0xff]  }
 0x1b1   :  { %v151_v39 = vpop.xlane.xlu1 %150 }
 0x1b2   :  { %v159_v40 = vmul.f32 0.0026041667, %v151_v39  ;;  %v6159_v39 = vld [vmem:[#allocation8 + $0x850] ss:$48 sps:$4 sm:$0xff]  }
 0x1b4   :  { %v161_v41 = vadd.f32 1e-06, %v159_v40  ;;  %v6164_v40 = vld [vmem:[#allocation8 + $0x8a4] ss:$48 sps:$4 sm:$0xff]  }
 0x1b5   :  { %v158_v42 = vpop.xlane.xlu1 %157 }
 0x1b6   :  { %6840 = vrsqrt.f32 %v161_v41  ;;  %v160_v44 = vmul.f32 0.0026041667, %v158_v42  ;;  %v6167_v41 = vld [vmem:[#allocation8 + $0x8b4] ss:$48 sps:$4 sm:$0xff]  }
 0x1b8   :  { %v162_v45 = vadd.f32 1e-06, %v160_v44  ;;  %v207_v44 = vrot.slane %v7301_v55, %v7328_v30  ;;  %v6179_v55 = vld [vmem:[#allocation8 + $0x84] ss:$48 sps:$4 sm:$0xff]  }
 0x1ba   :  { %6842 = vrsqrt.f32 %v162_v45 }
 0x1c0   :  { %v7295_v50 = vpop.eup %6840 }
 0x1c1   :  { %v166_v51 = vmul.f32 %v7295_v50, %v7267_v60  ;;  %v165_v56 = vmul.f32 %v7295_v50, %v7264_v59  ;;  %v167_v36 = vmul.f32 %v7295_v50, %v7270_v61  ;;  %v6165_v61 = vld [vmem:[#allocation8 + $0x8b0] ss:$48 sps:$4 sm:$0xff]   ;;  %v6173_v50 = vld [vmem:[#allocation8 + $0x24] ss:$48 sps:$4 sm:$0xff]  }
 0x1c3   :  { %v189_v1 = vmul.f32 %v180_v52, %v166_v51  ;;  %v188_v3 = vmul.f32 %v176_v57, %v165_v56  ;;  %v190_v43 = vmul.f32 %v184_v37, %v167_v36  ;;  %v6231_v36 = vld [vmem:[#allocation8 + $0x3e0] ss:$48 sps:$4 sm:$0xff]  }
 0x1c4   :  { %v7307_v58 = vpop.eup %6842 }
 0x1c5   :  { %v169_v60 = vmul.f32 %v7307_v58, %v7257_v54  ;;  %v168_v2 = vmul.f32 %v7307_v58, %v7254_v53  ;;  %v212_v5 = vadd.f32 %v203_v62, %v189_v1  ;;  %v211_v7 = vadd.f32 %v199_v0, %v188_v3  ;;  %v6126_v53 = vld [vmem:[#allocation8 + $0x660] ss:$48 sps:$4 sm:$0xff]   ;;  %v6185_v1 = vld [vmem:[#allocation8 + $0xe4] ss:$48 sps:$4 sm:$0xff]  }
 0x1c6   :  { %v6129_v54 = vld [vmem:[#allocation8 + $0x670] ss:$48 sps:$4 sm:$0xff]   ;;  %v170_v35 = vmul.f32 %v7307_v58, %v7272_v63  ;;  %v213_v51 = vadd.f32 %v207_v44, %v190_v43  ;;  %v6176_v58 = vld [vmem:[#allocation8 + $0x6c] ss:$48 sps:$4 sm:$0xff]   ;;  %v6240_v43 = vld [vmem:[#allocation8 + $0x488] ss:$48 sps:$4 sm:$0xff]  }
 0x1c7   :  { %v192_v59 = vmul.f32 %v180_v52, %v169_v60  ;;  %v191_v4 = vmul.f32 %v176_v57, %v168_v2  ;;  %v6162_v63 = vld [vmem:[#allocation8 + $0x8a0] ss:$48 sps:$4 sm:$0xff]   ;;  %v6168_v52 = vld [vmem:[#allocation8 + $0x8] ss:$48 sps:$4 sm:$0xff]   ;;  %v6182_v60 = vld [vmem:[#allocation8 + $0xcc] ss:$48 sps:$4 sm:$0xff]  }
 0x1c8   :  { %v193_v42 = vmul.f32 %v184_v37, %v170_v35  ;;  %v6171_v57 = vld [vmem:[#allocation8 + $0x20] ss:$48 sps:$4 sm:$0xff]   ;;  %v6180_v2 = vld [vmem:[#allocation8 + $0xc8] ss:$48 sps:$4 sm:$0xff]   ;;  %v6236_v37 = vld [vmem:[#allocation8 + $0x42c] ss:$48 sps:$4 sm:$0xff]  }
 0x1c9   :  { %v215_v6 = vadd.f32 %v203_v62, %v192_v59  ;;  %v214_v8 = vadd.f32 %v199_v0, %v191_v4  ;;  %v6174_v62 = vld [vmem:[#allocation8 + $0x68] ss:$48 sps:$4 sm:$0xff]   ;;  %v6177_v0 = vld [vmem:[#allocation8 + $0x80] ss:$48 sps:$4 sm:$0xff]   ;;  %v6188_v59 = vld [vmem:[#allocation8 + $0x12c] ss:$48 sps:$4 sm:$0xff]  }
 0x1ca   :  { %v216_v45 = vadd.f32 %v207_v44, %v193_v42  ;;  %v6183_v3 = vld [vmem:[#allocation8 + $0xe0] ss:$48 sps:$4 sm:$0xff]   ;;  %v6191_v4 = vld [vmem:[#allocation8 + $0x144] ss:$48 sps:$4 sm:$0xff]   ;;  %v6228_v35 = vld [vmem:[#allocation8 + $0x3c8] ss:$48 sps:$4 sm:$0xff]  }
 0x1cb   :  { %v7317_v9 = vpack.c.bf16 %v215_v6, %v212_v5  ;;  %v7319_v12 = vpack.c.bf16 %v214_v8, %v211_v7  ;;  %v6186_v5 = vld [vmem:[#allocation8 + $0x128] ss:$48 sps:$4 sm:$0xff]   ;;  %v6189_v6 = vld [vmem:[#allocation8 + $0x140] ss:$48 sps:$4 sm:$0xff]   ;;  %v6194_v7 = vld [vmem:[#allocation8 + $0x18c] ss:$48 sps:$4 sm:$0xff]  }
 0x1cc   :  { %v7338_v56 = vpack.c.bf16 %v216_v45, %v213_v51  ;;  %v6197_v8 = vld [vmem:[#allocation8 + $0x1a4] ss:$48 sps:$4 sm:$0xff]   ;;  %v6243_v44 = vld [vmem:[#allocation8 + $0x4a0] ss:$48 sps:$4 sm:$0xff]   ;;  %v6246_v45 = vld [vmem:[#allocation8 + $0x4e8] ss:$48 sps:$4 sm:$0xff]  }
 0x1cd   :  { %2044 = vmatprep.mubr.bf16.mxu1 %v7317_v9  ;;  %2216 = vmatprep.mubr.bf16.mxu0 %v7317_v9  ;;  %v6245_v42 = vld [vmem:[#allocation8 + $0x4a4] ss:$48 sps:$4 sm:$0xff]  }
 0x1ce   :  { %2045 = vmatmul.mubr.bf16.vlgmr.msra.gmra.mrb[0].mxu1 %v7319_v12  ;;  %2217 = vmatmul.mubr.bf16.vlgmr.msra.gmra.mrb[0].mxu0 %v7319_v12  ;;  %v6257_v51 = vld [vmem:[#allocation8 + $0x564] ss:$48 sps:$4 sm:$0xff]  }
 0x1cf   :  { %2056 = vmatpush1.bf16.msra.mxu1 %v6120_v10  ;;  %2228 = vmatpush1.bf16.msra.mxu0 %v6123_v11  ;;  %v6192_v10 = vld [vmem:[#allocation8 + $0x188] ss:$48 sps:$4 sm:$0xff]   ;;  %v6195_v11 = vld [vmem:[#allocation8 + $0x1a0] ss:$48 sps:$4 sm:$0xff]  }
 0x1d0   :  { %2057 = vmatprep.subr.bf16.mxu1 %v6128_v13  ;;  %2229 = vmatprep.subr.bf16.mxu0 %v6131_v14  ;;  %v6200_v13 = vld [vmem:[#allocation8 + $0x1ec] ss:$48 sps:$4 sm:$0xff]   ;;  %v6203_v14 = vld [vmem:[#allocation8 + $0x204] ss:$48 sps:$4 sm:$0xff]  }
 0x1d1   :  { %2087 = vmatprep.mubr.bf16.mxu1 %v7099_v17  ;;  %2259 = vmatprep.mubr.bf16.mxu0 %v7099_v17 }
 0x1d3   :  { %2058 = vmatpush1.bf16.msra.mxu1 %v6126_v53  ;;  %2230 = vmatpush1.bf16.msra.mxu0 %v6129_v54  ;;  %v6198_v53 = vld [vmem:[#allocation8 + $0x1e8] ss:$48 sps:$4 sm:$0xff]   ;;  %v6201_v54 = vld [vmem:[#allocation8 + $0x200] ss:$48 sps:$4 sm:$0xff]  }
 0x1d4   :  { %2059 = vmatprep.subr.bf16.mxu1 %v6134_v15  ;;  %2231 = vmatprep.subr.bf16.mxu0 %v6137_v16  ;;  %v6206_v15 = vld [vmem:[#allocation8 + $0x24c] ss:$48 sps:$4 sm:$0xff]   ;;  %v6209_v16 = vld [vmem:[#allocation8 + $0x264] ss:$48 sps:$4 sm:$0xff]  }
 0x1d7   :  { %2060 = vmatpush1.bf16.msra.mxu1 %v6132_v18  ;;  %2232 = vmatpush1.bf16.msra.mxu0 %v6135_v19  ;;  %v6204_v18 = vld [vmem:[#allocation8 + $0x248] ss:$48 sps:$4 sm:$0xff]   ;;  %v6207_v19 = vld [vmem:[#allocation8 + $0x260] ss:$48 sps:$4 sm:$0xff]  }
 0x1d8   :  { %2061 = vmatprep.subr.bf16.mxu1 %v6140_v20  ;;  %2233 = vmatprep.subr.bf16.mxu0 %v6143_v21  ;;  %v6212_v20 = vld [vmem:[#allocation8 + $0x2ac] ss:$48 sps:$4 sm:$0xff]   ;;  %v6215_v21 = vld [vmem:[#allocation8 + $0x2c4] ss:$48 sps:$4 sm:$0xff]  }
 0x1db   :  { %2062 = vmatpush1.bf16.msra.mxu1 %v6138_v22  ;;  %2234 = vmatpush1.bf16.msra.mxu0 %v6141_v23  ;;  %v6210_v22 = vld [vmem:[#allocation8 + $0x2a8] ss:$48 sps:$4 sm:$0xff]   ;;  %v6213_v23 = vld [vmem:[#allocation8 + $0x2c0] ss:$48 sps:$4 sm:$0xff]  }
 0x1dc   :  { %2063 = vmatprep.subr.bf16.mxu1 %v6146_v24  ;;  %2235 = vmatprep.subr.bf16.mxu0 %v6149_v25  ;;  %v6218_v24 = vld [vmem:[#allocation8 + $0x30c] ss:$48 sps:$4 sm:$0xff]   ;;  %v6221_v25 = vld [vmem:[#allocation8 + $0x324] ss:$48 sps:$4 sm:$0xff]  }
 0x1df   :  { %2064 = vmatpush1.bf16.msra.mxu1 %v6144_v26  ;;  %2236 = vmatpush1.bf16.msra.mxu0 %v6147_v27  ;;  %v6216_v26 = vld [vmem:[#allocation8 + $0x308] ss:$48 sps:$4 sm:$0xff]   ;;  %v6219_v27 = vld [vmem:[#allocation8 + $0x320] ss:$48 sps:$4 sm:$0xff]  }
 0x1e0   :  { %2065 = vmatprep.subr.bf16.mxu1 %v6152_v28  ;;  %2237 = vmatprep.subr.bf16.mxu0 %v6155_v29  ;;  %v6224_v28 = vld [vmem:[#allocation8 + $0x36c] ss:$48 sps:$4 sm:$0xff]   ;;  %v6227_v29 = vld [vmem:[#allocation8 + $0x384] ss:$48 sps:$4 sm:$0xff]  }
 0x1e3   :  { %2066 = vmatpush1.bf16.msra.mxu1 %v6150_v31  ;;  %2238 = vmatpush1.bf16.msra.mxu0 %v6153_v32  ;;  %v6222_v31 = vld [vmem:[#allocation8 + $0x368] ss:$48 sps:$4 sm:$0xff]   ;;  %v6225_v32 = vld [vmem:[#allocation8 + $0x380] ss:$48 sps:$4 sm:$0xff]  }
 0x1e4   :  { %2067 = vmatprep.subr.bf16.mxu1 %v6158_v33  ;;  %2239 = vmatprep.subr.bf16.mxu0 %v6161_v34  ;;  %v6230_v33 = vld [vmem:[#allocation8 + $0x3cc] ss:$48 sps:$4 sm:$0xff]   ;;  %v6233_v34 = vld [vmem:[#allocation8 + $0x3e4] ss:$48 sps:$4 sm:$0xff]  }
 0x1e7   :  { %2068 = vmatpush1.bf16.msra.mxu1 %v6156_v38  ;;  %2240 = vmatpush1.bf16.msra.mxu0 %v6159_v39  ;;  %v6239_v38 = vld [vmem:[#allocation8 + $0x444] ss:$48 sps:$4 sm:$0xff]   ;;  %v6234_v39 = vld [vmem:[#allocation8 + $0x428] ss:$48 sps:$4 sm:$0xff]  }
 0x1e8   :  { %2069 = vmatprep.subr.bf16.mxu1 %v6164_v40  ;;  %2241 = vmatprep.subr.bf16.mxu0 %v6167_v41  ;;  %v6237_v40 = vld [vmem:[#allocation8 + $0x440] ss:$48 sps:$4 sm:$0xff]   ;;  %v6242_v41 = vld [vmem:[#allocation8 + $0x48c] ss:$48 sps:$4 sm:$0xff]  }
 0x1eb   :  { %2070 = vmatpush1.bf16.msra.mxu1 %v6162_v63  ;;  %2242 = vmatpush1.bf16.msra.mxu0 %v6165_v61  ;;  %v6248_v63 = vld [vmem:[#allocation8 + $0x4ec] ss:$48 sps:$4 sm:$0xff]   ;;  %v6251_v61 = vld [vmem:[#allocation8 + $0x504] ss:$48 sps:$4 sm:$0xff]  }
 0x1ec   :  { %2098 = vmatprep.subr.bf16.mxu1 %v6170_v49  ;;  %2356 = vmatprep.subr.bf16.mxu0 %v6173_v50  ;;  %v6249_v49 = vld [vmem:[#allocation8 + $0x500] ss:$48 sps:$4 sm:$0xff]   ;;  %v6254_v50 = vld [vmem:[#allocation8 + $0x54c] ss:$48 sps:$4 sm:$0xff]  }
 0x1ee   :  { %2088 = vmatmul.mubr.bf16.vlgmr.msra.gmra.mrb[0].mxu1 %v7338_v56  ;;  %2260 = vmatmul.mubr.bf16.vlgmr.msra.gmra.mrb[0].mxu0 %v7338_v56 }
 0x1ef   :  { %2099 = vmatpush1.bf16.msra.mxu1 %v6168_v52  ;;  %2130 = vmatprep.mubr.bf16.mxu1 %v7317_v9  ;;  %v6252_v52 = vld [vmem:[#allocation8 + $0x548] ss:$48 sps:$4 sm:$0xff]  }
 0x1f0   :  { %2357 = vmatpush1.bf16.msra.mxu0 %v6171_v57  ;;  %2388 = vmatprep.mubr.bf16.mxu0 %v7317_v9  ;;  %v6255_v57 = vld [vmem:[#allocation8 + $0x560] ss:$48 sps:$4 sm:$0xff]  }
 0x1f1   :  { %2100 = vmatprep.subr.bf16.mxu1 %v6176_v58  ;;  %2358 = vmatprep.subr.bf16.mxu0 %v6179_v55  ;;  %v6260_v58 = vld [vmem:[#allocation8 + $0x5ac] ss:$48 sps:$4 sm:$0xff]   ;;  %v6263_v55 = vld [vmem:[#allocation8 + $0x5c4] ss:$48 sps:$4 sm:$0xff]  }
 0x1f3   :  { %2101 = vmatpush1.bf16.msra.mxu1 %v6174_v62  ;;  %v6258_v62 = vld [vmem:[#allocation8 + $0x5a8] ss:$48 sps:$4 sm:$0xff]  }
 0x1f4   :  { %2359 = vmatpush1.bf16.msra.mxu0 %v6177_v0  ;;  %2102 = vmatprep.subr.bf16.mxu1 %v6182_v60  ;;  %v6261_v0 = vld [vmem:[#allocation8 + $0x5c0] ss:$48 sps:$4 sm:$0xff]   ;;  %v6266_v60 = vld [vmem:[#allocation8 + $0x60c] ss:$48 sps:$4 sm:$0xff]  }
 0x1f5   :  { %2360 = vmatprep.subr.bf16.mxu0 %v6185_v1  ;;  %v6269_v1 = vld [vmem:[#allocation8 + $0x624] ss:$48 sps:$4 sm:$0xff]  }
 0x1f7   :  { %2103 = vmatpush1.bf16.msra.mxu1 %v6180_v2  ;;  %v6264_v2 = vld [vmem:[#allocation8 + $0x608] ss:$48 sps:$4 sm:$0xff]  }
 0x1f8   :  { %2361 = vmatpush1.bf16.msra.mxu0 %v6183_v3  ;;  %2104 = vmatprep.subr.bf16.mxu1 %v6188_v59  ;;  %v6267_v3 = vld [vmem:[#allocation8 + $0x620] ss:$48 sps:$4 sm:$0xff]   ;;  %v6272_v59 = vld [vmem:[#allocation8 + $0x66c] ss:$48 sps:$4 sm:$0xff]  }
 0x1f9   :  { %2362 = vmatprep.subr.bf16.mxu0 %v6191_v4  ;;  %v6275_v4 = vld [vmem:[#allocation8 + $0x684] ss:$48 sps:$4 sm:$0xff]  }
 0x1fb   :  { %2105 = vmatpush1.bf16.msra.mxu1 %v6186_v5  ;;  %v6270_v5 = vld [vmem:[#allocation8 + $0x668] ss:$48 sps:$4 sm:$0xff]  }
 0x1fc   :  { %2363 = vmatpush1.bf16.msra.mxu0 %v6189_v6  ;;  %2106 = vmatprep.subr.bf16.mxu1 %v6194_v7  ;;  %v6273_v6 = vld [vmem:[#allocation8 + $0x680] ss:$48 sps:$4 sm:$0xff]   ;;  %v6278_v7 = vld [vmem:[#allocation8 + $0x6cc] ss:$48 sps:$4 sm:$0xff]  }
 0x1fd   :  { %2364 = vmatprep.subr.bf16.mxu0 %v6197_v8  ;;  %v6281_v8 = vld [vmem:[#allocation8 + $0x6e4] ss:$48 sps:$4 sm:$0xff]  }
 0x1ff   :  { %2107 = vmatpush1.bf16.msra.mxu1 %v6192_v10  ;;  %v6276_v10 = vld [vmem:[#allocation8 + $0x6c8] ss:$48 sps:$4 sm:$0xff]  }
 0x200   :  { %2365 = vmatpush1.bf16.msra.mxu0 %v6195_v11  ;;  %2108 = vmatprep.subr.bf16.mxu1 %v6200_v13  ;;  %v6279_v11 = vld [vmem:[#allocation8 + $0x6e0] ss:$48 sps:$4 sm:$0xff]   ;;  %v6284_v13 = vld [vmem:[#allocation8 + $0x72c] ss:$48 sps:$4 sm:$0xff]  }
 0x201   :  { %2366 = vmatprep.subr.bf16.mxu0 %v6203_v14  ;;  %v6287_v14 = vld [vmem:[#allocation8 + $0x744] ss:$48 sps:$4 sm:$0xff]  }
 0x203   :  { %2109 = vmatpush1.bf16.msra.mxu1 %v6198_v53  ;;  %v6282_v53 = vld [vmem:[#allocation8 + $0x728] ss:$48 sps:$4 sm:$0xff]  }
 0x204   :  { %2367 = vmatpush1.bf16.msra.mxu0 %v6201_v54  ;;  %2110 = vmatprep.subr.bf16.mxu1 %v6206_v15  ;;  %v6285_v54 = vld [vmem:[#allocation8 + $0x740] ss:$48 sps:$4 sm:$0xff]   ;;  %v6290_v15 = vld [vmem:[#allocation8 + $0x78c] ss:$48 sps:$4 sm:$0xff]  }
 0x205   :  { %2368 = vmatprep.subr.bf16.mxu0 %v6209_v16  ;;  %v6293_v16 = vld [vmem:[#allocation8 + $0x7a4] ss:$48 sps:$4 sm:$0xff]  }
 0x207   :  { %2111 = vmatpush1.bf16.msra.mxu1 %v6204_v18  ;;  %v6288_v18 = vld [vmem:[#allocation8 + $0x788] ss:$48 sps:$4 sm:$0xff]  }
 0x208   :  { %2369 = vmatpush1.bf16.msra.mxu0 %v6207_v19  ;;  %2112 = vmatprep.subr.bf16.mxu1 %v6212_v20  ;;  %v6291_v19 = vld [vmem:[#allocation8 + $0x7a0] ss:$48 sps:$4 sm:$0xff]   ;;  %v6296_v20 = vld [vmem:[#allocation8 + $0x7ec] ss:$48 sps:$4 sm:$0xff]  }
 0x209   :  { %2370 = vmatprep.subr.bf16.mxu0 %v6215_v21  ;;  %v6299_v21 = vld [vmem:[#allocation8 + $0x804] ss:$48 sps:$4 sm:$0xff]  }
 0x20b   :  { %2113 = vmatpush1.bf16.msra.mxu1 %v6210_v22  ;;  %v6294_v22 = vld [vmem:[#allocation8 + $0x7e8] ss:$48 sps:$4 sm:$0xff]  }
 0x20c   :  { %2371 = vmatpush1.bf16.msra.mxu0 %v6213_v23  ;;  %2114 = vmatprep.subr.bf16.mxu1 %v6218_v24  ;;  %v6297_v23 = vld [vmem:[#allocation8 + $0x800] ss:$48 sps:$4 sm:$0xff]   ;;  %v6302_v24 = vld [vmem:[#allocation8 + $0x84c] ss:$48 sps:$4 sm:$0xff]  }
 0x20d   :  { %2372 = vmatprep.subr.bf16.mxu0 %v6221_v25  ;;  %v6305_v25 = vld [vmem:[#allocation8 + $0x864] ss:$48 sps:$4 sm:$0xff]  }
 0x20f   :  { %2115 = vmatpush1.bf16.msra.mxu1 %v6216_v26  ;;  %v6300_v26 = vld [vmem:[#allocation8 + $0x848] ss:$48 sps:$4 sm:$0xff]  }
 0x210   :  { %2373 = vmatpush1.bf16.msra.mxu0 %v6219_v27  ;;  %2116 = vmatprep.subr.bf16.mxu1 %v6224_v28  ;;  %v6303_v27 = vld [vmem:[#allocation8 + $0x860] ss:$48 sps:$4 sm:$0xff]   ;;  %v6308_v28 = vld [vmem:[#allocation8 + $0x8ac] ss:$48 sps:$4 sm:$0xff]  }
 0x211   :  { %2374 = vmatprep.subr.bf16.mxu0 %v6227_v29  ;;  %v6311_v29 = vld [vmem:[#allocation8 + $0x8c4] ss:$48 sps:$4 sm:$0xff]  }
 0x213   :  { %2117 = vmatpush1.bf16.msra.mxu1 %v6222_v31  ;;  %v6306_v31 = vld [vmem:[#allocation8 + $0x8a8] ss:$48 sps:$4 sm:$0xff]  }
 0x214   :  { %2375 = vmatpush1.bf16.msra.mxu0 %v6225_v32  ;;  %2118 = vmatprep.subr.bf16.mxu1 %v6230_v33  ;;  %v6309_v32 = vld [vmem:[#allocation8 + $0x8c0] ss:$48 sps:$4 sm:$0xff]   ;;  %v6314_v33 = vld [vmem:[#allocation8 + $0x1c] ss:$48 sps:$4 sm:$0xff]  }
 0x215   :  { %2376 = vmatprep.subr.bf16.mxu0 %v6233_v34  ;;  %v6380_v34 = vld [vmem:[#allocation11 + $0x4] ss:$12 sps:$4 sm:$0xff]  }
 0x217   :  { %2119 = vmatpush1.bf16.msra.mxu1 %v6228_v35  ;;  %v6312_v35 = vld [vmem:[#allocation8 + $0x18] ss:$48 sps:$4 sm:$0xff]  }
 0x218   :  { %2377 = vmatpush1.bf16.msra.mxu0 %v6231_v36  ;;  %2120 = vmatprep.subr.bf16.mxu1 %v6236_v37  ;;  %v6317_v36 = vld [vmem:[#allocation8 + $0x7c] ss:$48 sps:$4 sm:$0xff]  }
 0x219   :  { %2378 = vmatprep.subr.bf16.mxu0 %v6239_v38  ;;  %v6378_v37 = vld [vmem:[#allocation11] ss:$12 sps:$4 sm:$0xff]   ;;  %v6386_v38 = vld [vmem:[#allocation11 + $0x1c] ss:$12 sps:$4 sm:$0xff]  }
 0x21b   :  { %2121 = vmatpush1.bf16.msra.mxu1 %v6234_v39  ;;  %v6315_v39 = vld [vmem:[#allocation8 + $0x78] ss:$48 sps:$4 sm:$0xff]  }
 0x21c   :  { %2379 = vmatpush1.bf16.msra.mxu0 %v6237_v40  ;;  %2122 = vmatprep.subr.bf16.mxu1 %v6242_v41  ;;  %v6320_v40 = vld [vmem:[#allocation8 + $0xdc] ss:$48 sps:$4 sm:$0xff]   ;;  %v6384_v41 = vld [vmem:[#allocation11 + $0x18] ss:$12 sps:$4 sm:$0xff]  }
 0x21d   :  { %2380 = vmatprep.subr.bf16.mxu0 %v6245_v42  ;;  %v6392_v42 = vld [vmem:[#allocation11 + $0x34] ss:$12 sps:$4 sm:$0xff]  }
 0x21f   :  { %2123 = vmatpush1.bf16.msra.mxu1 %v6240_v43  ;;  %v6318_v43 = vld [vmem:[#allocation8 + $0xd8] ss:$48 sps:$4 sm:$0xff]  }
 0x220   :  { %2381 = vmatpush1.bf16.msra.mxu0 %v6243_v44  ;;  %2124 = vmatprep.subr.bf16.mxu1 %v6248_v63  ;;  %v6323_v44 = vld [vmem:[#allocation8 + $0x13c] ss:$48 sps:$4 sm:$0xff]  }
 0x221   :  { %2382 = vmatprep.subr.bf16.mxu0 %v6251_v61  ;;  %v6390_v63 = vld [vmem:[#allocation11 + $0x30] ss:$12 sps:$4 sm:$0xff]   ;;  %v6398_v61 = vld [vmem:[#allocation11 + $0x4c] ss:$12 sps:$4 sm:$0xff]  }
 0x223   :  { %2125 = vmatpush1.bf16.msra.mxu1 %v6246_v45  ;;  %v6321_v45 = vld [vmem:[#allocation8 + $0x138] ss:$48 sps:$4 sm:$0xff]  }
 0x224   :  { %2383 = vmatpush1.bf16.msra.mxu0 %v6249_v49  ;;  %2126 = vmatprep.subr.bf16.mxu1 %v6254_v50  ;;  %v6326_v49 = vld [vmem:[#allocation8 + $0x19c] ss:$48 sps:$4 sm:$0xff]   ;;  %v6396_v50 = vld [vmem:[#allocation11 + $0x48] ss:$12 sps:$4 sm:$0xff]  }
 0x225   :  { %2384 = vmatprep.subr.bf16.mxu0 %v6257_v51  ;;  %v6404_v51 = vld [vmem:[#allocation11 + $0x64] ss:$12 sps:$4 sm:$0xff]  }
 0x227   :  { %2127 = vmatpush1.bf16.msra.mxu1 %v6252_v52  ;;  %v6324_v52 = vld [vmem:[#allocation8 + $0x198] ss:$48 sps:$4 sm:$0xff]  }
 0x228   :  { %2385 = vmatpush1.bf16.msra.mxu0 %v6255_v57  ;;  %2128 = vmatprep.subr.bf16.mxu1 %v6260_v58  ;;  %v6329_v57 = vld [vmem:[#allocation8 + $0x1fc] ss:$48 sps:$4 sm:$0xff]  }
 0x229   :  { %2386 = vmatprep.subr.bf16.mxu0 %v6263_v55  ;;  %v6402_v58 = vld [vmem:[#allocation11 + $0x60] ss:$12 sps:$4 sm:$0xff]   ;;  %v6410_v55 = vld [vmem:[#allocation11 + $0x7c] ss:$12 sps:$4 sm:$0xff]  }
 0x22b   :  { %2129 = vmatpush1.bf16.msra.mxu1 %v6258_v62  ;;  %v6327_v62 = vld [vmem:[#allocation8 + $0x1f8] ss:$48 sps:$4 sm:$0xff]  }
 0x22c   :  { %2387 = vmatpush1.bf16.msra.mxu0 %v6261_v0  ;;  %2141 = vmatprep.subr.bf16.mxu1 %v6266_v60  ;;  %v6332_v0 = vld [vmem:[#allocation8 + $0x25c] ss:$48 sps:$4 sm:$0xff]   ;;  %v6408_v60 = vld [vmem:[#allocation11 + $0x78] ss:$12 sps:$4 sm:$0xff]  }
 0x22d   :  { %2399 = vmatprep.subr.bf16.mxu0 %v6269_v1  ;;  %v6416_v1 = vld [vmem:[#allocation11 + $0x94] ss:$12 sps:$4 sm:$0xff]  }
 0x22e   :  { %2131 = vmatmul.mubr.bf16.vlgmr.msra.gmra.mrb[4].mxu1 %v7319_v12 }
 0x22f   :  { %2389 = vmatmul.mubr.bf16.vlgmr.msra.gmra.mrb[4].mxu0 %v7319_v12  ;;  %2142 = vmatpush1.bf16.msra.mxu1 %v6264_v2  ;;  %v6330_v2 = vld [vmem:[#allocation8 + $0x258] ss:$48 sps:$4 sm:$0xff]  }
 0x230   :  { %2400 = vmatpush1.bf16.msra.mxu0 %v6267_v3  ;;  %2143 = vmatprep.subr.bf16.mxu1 %v6272_v59  ;;  %v6335_v3 = vld [vmem:[#allocation8 + $0x2bc] ss:$48 sps:$4 sm:$0xff]  }
 0x231   :  { %2401 = vmatprep.subr.bf16.mxu0 %v6275_v4  ;;  %2173 = vmatprep.mubr.bf16.mxu1 %v7099_v17  ;;  %v6414_v59 = vld [vmem:[#allocation11 + $0x90] ss:$12 sps:$4 sm:$0xff]   ;;  %v6422_v4 = vld [vmem:[#allocation11 + $0xac] ss:$12 sps:$4 sm:$0xff]  }
 0x232   :  { %2431 = vmatprep.mubr.bf16.mxu0 %v7099_v17 }
 0x233   :  { %2144 = vmatpush1.bf16.msra.mxu1 %v6270_v5  ;;  %v6333_v5 = vld [vmem:[#allocation8 + $0x2b8] ss:$48 sps:$4 sm:$0xff]  }
 0x234   :  { %2402 = vmatpush1.bf16.msra.mxu0 %v6273_v6  ;;  %2145 = vmatprep.subr.bf16.mxu1 %v6278_v7  ;;  %v6338_v6 = vld [vmem:[#allocation8 + $0x31c] ss:$48 sps:$4 sm:$0xff]   ;;  %v6420_v7 = vld [vmem:[#allocation11 + $0xa8] ss:$12 sps:$4 sm:$0xff]  }
 0x235   :  { %2403 = vmatprep.subr.bf16.mxu0 %v6281_v8  ;;  %v6428_v8 = vld [vmem:[#allocation11 + $0xc4] ss:$12 sps:$4 sm:$0xff]  }
 0x237   :  { %2146 = vmatpush1.bf16.msra.mxu1 %v6276_v10  ;;  %v6336_v10 = vld [vmem:[#allocation8 + $0x318] ss:$48 sps:$4 sm:$0xff]  }
 0x238   :  { %2404 = vmatpush1.bf16.msra.mxu0 %v6279_v11  ;;  %2147 = vmatprep.subr.bf16.mxu1 %v6284_v13  ;;  %v6341_v11 = vld [vmem:[#allocation8 + $0x37c] ss:$48 sps:$4 sm:$0xff]  }
 0x239   :  { %2405 = vmatprep.subr.bf16.mxu0 %v6287_v14  ;;  %v6426_v13 = vld [vmem:[#allocation11 + $0xc0] ss:$12 sps:$4 sm:$0xff]   ;;  %v6434_v14 = vld [vmem:[#allocation11 + $0xdc] ss:$12 sps:$4 sm:$0xff]  }
 0x23b   :  { %2148 = vmatpush1.bf16.msra.mxu1 %v6282_v53  ;;  %v6339_v53 = vld [vmem:[#allocation8 + $0x378] ss:$48 sps:$4 sm:$0xff]  }
 0x23c   :  { %2406 = vmatpush1.bf16.msra.mxu0 %v6285_v54  ;;  %2149 = vmatprep.subr.bf16.mxu1 %v6290_v15  ;;  %v6344_v54 = vld [vmem:[#allocation8 + $0x3dc] ss:$48 sps:$4 sm:$0xff]   ;;  %v6432_v15 = vld [vmem:[#allocation11 + $0xd8] ss:$12 sps:$4 sm:$0xff]  }
 0x23d   :  { %2407 = vmatprep.subr.bf16.mxu0 %v6293_v16  ;;  %v6440_v16 = vld [vmem:[#allocation11 + $0xf4] ss:$12 sps:$4 sm:$0xff]  }
 0x23f   :  { %2150 = vmatpush1.bf16.msra.mxu1 %v6288_v18  ;;  %v6342_v18 = vld [vmem:[#allocation8 + $0x3d8] ss:$48 sps:$4 sm:$0xff]  }
 0x240   :  { %2408 = vmatpush1.bf16.msra.mxu0 %v6291_v19  ;;  %2151 = vmatprep.subr.bf16.mxu1 %v6296_v20  ;;  %v6347_v19 = vld [vmem:[#allocation8 + $0x43c] ss:$48 sps:$4 sm:$0xff]  }
 0x241   :  { %2409 = vmatprep.subr.bf16.mxu0 %v6299_v21  ;;  %v6438_v20 = vld [vmem:[#allocation11 + $0xf0] ss:$12 sps:$4 sm:$0xff]   ;;  %v6446_v21 = vld [vmem:[#allocation11 + $0x10c] ss:$12 sps:$4 sm:$0xff]  }
 0x243   :  { %2152 = vmatpush1.bf16.msra.mxu1 %v6294_v22  ;;  %v6345_v22 = vld [vmem:[#allocation8 + $0x438] ss:$48 sps:$4 sm:$0xff]  }
 0x244   :  { %2410 = vmatpush1.bf16.msra.mxu0 %v6297_v23  ;;  %2153 = vmatprep.subr.bf16.mxu1 %v6302_v24  ;;  %v6350_v23 = vld [vmem:[#allocation8 + $0x49c] ss:$48 sps:$4 sm:$0xff]   ;;  %v6444_v24 = vld [vmem:[#allocation11 + $0x108] ss:$12 sps:$4 sm:$0xff]  }
 0x245   :  { %2411 = vmatprep.subr.bf16.mxu0 %v6305_v25  ;;  %v6452_v25 = vld [vmem:[#allocation11 + $0x124] ss:$12 sps:$4 sm:$0xff]  }
 0x247   :  { %2154 = vmatpush1.bf16.msra.mxu1 %v6300_v26  ;;  %v6348_v26 = vld [vmem:[#allocation8 + $0x498] ss:$48 sps:$4 sm:$0xff]  }
 0x248   :  { %2412 = vmatpush1.bf16.msra.mxu0 %v6303_v27  ;;  %2155 = vmatprep.subr.bf16.mxu1 %v6308_v28  ;;  %v6353_v27 = vld [vmem:[#allocation8 + $0x4fc] ss:$48 sps:$4 sm:$0xff]  }
 0x249   :  { %2413 = vmatprep.subr.bf16.mxu0 %v6311_v29  ;;  %v6450_v28 = vld [vmem:[#allocation11 + $0x120] ss:$12 sps:$4 sm:$0xff]   ;;  %v6458_v29 = vld [vmem:[#allocation11 + $0x13c] ss:$12 sps:$4 sm:$0xff]  }
 0x24b   :  { %2156 = vmatpush1.bf16.msra.mxu1 %v6306_v31  ;;  %v6351_v31 = vld [vmem:[#allocation8 + $0x4f8] ss:$48 sps:$4 sm:$0xff]  }
 0x24c   :  { %2414 = vmatpush1.bf16.msra.mxu0 %v6309_v32  ;;  %2270 = vmatprep.subr.bf16.mxu1 %v6314_v33  ;;  %v6356_v32 = vld [vmem:[#allocation8 + $0x55c] ss:$48 sps:$4 sm:$0xff]   ;;  %v6456_v33 = vld [vmem:[#allocation11 + $0x138] ss:$12 sps:$4 sm:$0xff]  }
 0x24d   :  { %4693 = vmatprep.subr.bf16.mxu0 %v6380_v34  ;;  %v6464_v34 = vld [vmem:[#allocation11 + $0x154] ss:$12 sps:$4 sm:$0xff]  }
 0x24e   :  { %2174 = vmatmul.mubr.bf16.vlgmr.msra.gmra.mrb[4].mxu1 %v7338_v56 }
 0x24f   :  { %2432 = vmatmul.mubr.bf16.vlgmr.msra.gmra.mrb[4].mxu0 %v7338_v56  ;;  %2271 = vmatpush1.bf16.msra.mxu1 %v6312_v35  ;;  %v6354_v35 = vld [vmem:[#allocation8 + $0x558] ss:$48 sps:$4 sm:$0xff]  }
 0x250   :  { %2302 = vmatprep.mubr.bf16.mxu1 %v7317_v9  ;;  %2272 = vmatprep.subr.bf16.mxu1 %v6317_v36  ;;  %v6359_v36 = vld [vmem:[#allocation8 + $0x5bc] ss:$48 sps:$4 sm:$0xff]  }
 0x251   :  { %4694 = vmatpush1.bf16.msra.mxu0 %v6378_v37  ;;  %v6462_v37 = vld [vmem:[#allocation11 + $0x150] ss:$12 sps:$4 sm:$0xff]  }
 0x252   :  { %4695 = vmatprep.subr.bf16.mxu0 %v6386_v38  ;;  %v6470_v38 = vld [vmem:[#allocation11 + $0x16c] ss:$12 sps:$4 sm:$0xff]  }
 0x253   :  { %2273 = vmatpush1.bf16.msra.mxu1 %v6315_v39  ;;  %v6357_v39 = vld [vmem:[#allocation8 + $0x5b8] ss:$48 sps:$4 sm:$0xff]  }
 0x254   :  { %2274 = vmatprep.subr.bf16.mxu1 %v6320_v40  ;;  %v6362_v40 = vld [vmem:[#allocation8 + $0x61c] ss:$48 sps:$4 sm:$0xff]  }
 0x255   :  { %4696 = vmatpush1.bf16.msra.mxu0 %v6384_v41  ;;  %v6468_v41 = vld [vmem:[#allocation11 + $0x168] ss:$12 sps:$4 sm:$0xff]  }
 0x256   :  { %4697 = vmatprep.subr.bf16.mxu0 %v6392_v42  ;;  %v6500_v42 = vld [vmem:[#allocation11 + $0x184] ss:$12 sps:$4 sm:$0xff]  }
 0x257   :  { %2275 = vmatpush1.bf16.msra.mxu1 %v6318_v43  ;;  %v6360_v43 = vld [vmem:[#allocation8 + $0x618] ss:$48 sps:$4 sm:$0xff]  }
 0x258   :  { %2276 = vmatprep.subr.bf16.mxu1 %v6323_v44  ;;  %v6365_v44 = vld [vmem:[#allocation8 + $0x67c] ss:$48 sps:$4 sm:$0xff]  }
 0x259   :  { %4698 = vmatpush1.bf16.msra.mxu0 %v6390_v63  ;;  %v6363_v63 = vld [vmem:[#allocation8 + $0x678] ss:$48 sps:$4 sm:$0xff]  }
 0x25a   :  { %4699 = vmatprep.subr.bf16.mxu0 %v6398_v61  ;;  %v6368_v61 = vld [vmem:[#allocation8 + $0x6dc] ss:$48 sps:$4 sm:$0xff]  }
 0x25b   :  { %2277 = vmatpush1.bf16.msra.mxu1 %v6321_v45  ;;  %v6366_v45 = vld [vmem:[#allocation8 + $0x6d8] ss:$48 sps:$4 sm:$0xff]  }
 0x25c   :  { %2278 = vmatprep.subr.bf16.mxu1 %v6326_v49  ;;  %v6371_v49 = vld [vmem:[#allocation8 + $0x73c] ss:$48 sps:$4 sm:$0xff]  }
 0x25d   :  { %4700 = vmatpush1.bf16.msra.mxu0 %v6396_v50  ;;  %v6369_v50 = vld [vmem:[#allocation8 + $0x738] ss:$48 sps:$4 sm:$0xff]  }
 0x25e   :  { %4701 = vmatprep.subr.bf16.mxu0 %v6404_v51  ;;  %v6374_v51 = vld [vmem:[#allocation8 + $0x79c] ss:$48 sps:$4 sm:$0xff]  }
 0x25f   :  { %2279 = vmatpush1.bf16.msra.mxu1 %v6324_v52  ;;  %v6372_v52 = vld [vmem:[#allocation8 + $0x798] ss:$48 sps:$4 sm:$0xff]  }
 0x260   :  { %2280 = vmatprep.subr.bf16.mxu1 %v6329_v57  ;;  %v6377_v57 = vld [vmem:[#allocation8 + $0x7fc] ss:$48 sps:$4 sm:$0xff]  }
 0x261   :  { %4702 = vmatpush1.bf16.msra.mxu0 %v6402_v58  ;;  %v6375_v58 = vld [vmem:[#allocation8 + $0x7f8] ss:$48 sps:$4 sm:$0xff]  }
 0x262   :  { %4703 = vmatprep.subr.bf16.mxu0 %v6410_v55  ;;  %v6383_v55 = vld [vmem:[#allocation8 + $0x85c] ss:$48 sps:$4 sm:$0xff]  }
 0x263   :  { %2281 = vmatpush1.bf16.msra.mxu1 %v6327_v62  ;;  %v6381_v62 = vld [vmem:[#allocation8 + $0x858] ss:$48 sps:$4 sm:$0xff]  }
 0x264   :  { %2282 = vmatprep.subr.bf16.mxu1 %v6332_v0  ;;  %v6389_v0 = vld [vmem:[#allocation8 + $0x8bc] ss:$48 sps:$4 sm:$0xff]  }
 0x265   :  { %4704 = vmatpush1.bf16.msra.mxu0 %v6408_v60  ;;  %v6387_v60 = vld [vmem:[#allocation8 + $0x8b8] ss:$48 sps:$4 sm:$0xff]  }
 0x266   :  { %4705 = vmatprep.subr.bf16.mxu0 %v6416_v1  ;;  %v6395_v1 = vld [vmem:[#allocation8 + $0x2c] ss:$48 sps:$4 sm:$0xff]  }
 0x267   :  { %2283 = vmatpush1.bf16.msra.mxu1 %v6330_v2  ;;  %v6393_v2 = vld [vmem:[#allocation8 + $0x28] ss:$48 sps:$4 sm:$0xff]  }
 0x268   :  { %2284 = vmatprep.subr.bf16.mxu1 %v6335_v3  ;;  %v6401_v3 = vld [vmem:[#allocation8 + $0x8c] ss:$48 sps:$4 sm:$0xff]  }
 0x269   :  { %4706 = vmatpush1.bf16.msra.mxu0 %v6414_v59  ;;  %v6399_v59 = vld [vmem:[#allocation8 + $0x88] ss:$48 sps:$4 sm:$0xff]  }
 0x26a   :  { %4707 = vmatprep.subr.bf16.mxu0 %v6422_v4  ;;  %v6407_v4 = vld [vmem:[#allocation8 + $0xec] ss:$48 sps:$4 sm:$0xff]  }
 0x26b   :  { %2285 = vmatpush1.bf16.msra.mxu1 %v6333_v5  ;;  %v6405_v5 = vld [vmem:[#allocation8 + $0xe8] ss:$48 sps:$4 sm:$0xff]  }
 0x26c   :  { %2286 = vmatprep.subr.bf16.mxu1 %v6338_v6  ;;  %v6413_v6 = vld [vmem:[#allocation8 + $0x14c] ss:$48 sps:$4 sm:$0xff]  }
 0x26d   :  { %4708 = vmatpush1.bf16.msra.mxu0 %v6420_v7  ;;  %v6411_v7 = vld [vmem:[#allocation8 + $0x148] ss:$48 sps:$4 sm:$0xff]  }
 0x26e   :  { %4709 = vmatprep.subr.bf16.mxu0 %v6428_v8  ;;  %v6419_v8 = vld [vmem:[#allocation8 + $0x1ac] ss:$48 sps:$4 sm:$0xff]  }
 0x26f   :  { %2287 = vmatpush1.bf16.msra.mxu1 %v6336_v10  ;;  %v530_v10 = vsub.s32 4, %v7285_v46 }
 0x270   :  { %2288 = vmatprep.subr.bf16.mxu1 %v6341_v11  ;;  %v6417_v11 = vld [vmem:[#allocation8 + $0x1a8] ss:$48 sps:$4 sm:$0xff]  }
 0x271   :  { %4710 = vmatpush1.bf16.msra.mxu0 %v6426_v13  ;;  %v7356_v13 = vld [vmem:[#allocation10] sm:$0xff] }
 0x272   :  { %4711 = vmatprep.subr.bf16.mxu0 %v6434_v14  ;;  %v534_v14 = vsub.s32 5, %v7285_v46 }
 0x273   :  { %2289 = vmatpush1.bf16.msra.mxu1 %v6339_v53  ;;  %v515_v53 = vrot.slane %v7356_v13, %v7291_v48 }
 0x274   :  { %2290 = vmatprep.subr.bf16.mxu1 %v6344_v54  ;;  %v531_v54 = vrot.slane %v7356_v13, %v530_v10 }
 0x275   :  { %4712 = vmatpush1.bf16.msra.mxu0 %v6432_v15  ;;  %v519_v15 = vrot.slane %v7356_v13, %v7288_v47 }
 0x276   :  { %4713 = vmatprep.subr.bf16.mxu0 %v6440_v16  ;;  %v535_v16 = vrot.slane %v7356_v13, %v534_v14  ;;  %v6441_v14 = vld [vmem:[#allocation8 + $0x328] ss:$48 sps:$4 sm:$0xff]  }
 0x277   :  { %2291 = vmatpush1.bf16.msra.mxu1 %v6342_v18  ;;  %v6423_v18 = vld [vmem:[#allocation8 + $0x208] ss:$48 sps:$4 sm:$0xff]  }
 0x278   :  { %2292 = vmatprep.subr.bf16.mxu1 %v6347_v19  ;;  %v6431_v19 = vld [vmem:[#allocation8 + $0x26c] ss:$48 sps:$4 sm:$0xff]  }
 0x279   :  { %4714 = vmatpush1.bf16.msra.mxu0 %v6438_v20 }
 0x27a   :  { %4715 = vmatprep.subr.bf16.mxu0 %v6446_v21 }
 0x27b   :  { %2293 = vmatpush1.bf16.msra.mxu1 %v6345_v22 }
 0x27c   :  { %2294 = vmatprep.subr.bf16.mxu1 %v6350_v23 }
 0x27d   :  { %4716 = vmatpush1.bf16.msra.mxu0 %v6444_v24 }
 0x27e   :  { %4717 = vmatprep.subr.bf16.mxu0 %v6452_v25 }
 0x27f   :  { %2295 = vmatpush1.bf16.msra.mxu1 %v6348_v26 }
 0x280   :  { %2296 = vmatprep.subr.bf16.mxu1 %v6353_v27 }
 0x281   :  { %4718 = vmatpush1.bf16.msra.mxu0 %v6450_v28 }
 0x282   :  { %4719 = vmatprep.subr.bf16.mxu0 %v6458_v29 }
 0x283   :  { %2297 = vmatpush1.bf16.msra.mxu1 %v6351_v31  ;;  %v6429_v31 = vld [vmem:[#allocation8 + $0x268] ss:$48 sps:$4 sm:$0xff]  }
 0x284   :  { %2298 = vmatprep.subr.bf16.mxu1 %v6356_v32 }
 0x285   :  { %4720 = vmatpush1.bf16.msra.mxu0 %v6456_v33 }
 0x286   :  { %4721 = vmatprep.subr.bf16.mxu0 %v6464_v34 }
 0x287   :  { %2299 = vmatpush1.bf16.msra.mxu1 %v6354_v35 }
 0x288   :  { %2300 = vmatprep.subr.bf16.mxu1 %v6359_v36 }
 0x289   :  { %4722 = vmatpush1.bf16.msra.mxu0 %v6462_v37 }
 0x28a   :  { %4723 = vmatprep.subr.bf16.mxu0 %v6470_v38  ;;  %v6437_v38 = vld [vmem:[#allocation8 + $0x2cc] ss:$48 sps:$4 sm:$0xff]  }
 0x28b   :  { %2301 = vmatpush1.bf16.msra.mxu1 %v6357_v39 }
 0x28c   :  { %2313 = vmatprep.subr.bf16.mxu1 %v6362_v40 }
 0x28d   :  { %4724 = vmatpush1.bf16.msra.mxu0 %v6468_v41 }
 0x28e   :  { %2303 = vmatmul.mubr.bf16.vlgmr.msra.gmra.mrb[8].mxu1 %v7319_v12  ;;  %4736 = vmatprep.subr.bf16.mxu0 %v6500_v42 }
 0x28f   :  { %2314 = vmatpush1.bf16.msra.mxu1 %v6360_v43  ;;  %2345 = vmatprep.mubr.bf16.mxu1 %v7099_v17 }
 0x290   :  { %2315 = vmatprep.subr.bf16.mxu1 %v6365_v44 }
 0x293   :  { %2316 = vmatpush1.bf16.msra.mxu1 %v6363_v63 }
 0x294   :  { %2317 = vmatprep.subr.bf16.mxu1 %v6368_v61 }
 0x297   :  { %2318 = vmatpush1.bf16.msra.mxu1 %v6366_v45 }
 0x298   :  { %2319 = vmatprep.subr.bf16.mxu1 %v6371_v49 }
 0x29b   :  { %2320 = vmatpush1.bf16.msra.mxu1 %v6369_v50 }
 0x29c   :  { %2321 = vmatprep.subr.bf16.mxu1 %v6374_v51 }
 0x29f   :  { %2322 = vmatpush1.bf16.msra.mxu1 %v6372_v52  ;;  %v6435_v52 = vld [vmem:[#allocation8 + $0x2c8] ss:$48 sps:$4 sm:$0xff]  }
 0x2a0   :  { %2323 = vmatprep.subr.bf16.mxu1 %v6377_v57 }
 0x2a3   :  { %2324 = vmatpush1.bf16.msra.mxu1 %v6375_v58 }
 0x2a4   :  { %2325 = vmatprep.subr.bf16.mxu1 %v6383_v55 }
 0x2a7   :  { %2326 = vmatpush1.bf16.msra.mxu1 %v6381_v62 }
 0x2a8   :  { %2327 = vmatprep.subr.bf16.mxu1 %v6389_v0  ;;  %v6443_v0 = vld [vmem:[#allocation8 + $0x32c] ss:$48 sps:$4 sm:$0xff]  }
 0x2ab   :  { %2328 = vmatpush1.bf16.msra.mxu1 %v6387_v60 }
 0x2ac   :  { %2442 = vmatprep.subr.bf16.mxu1 %v6395_v1 }
 0x2ae   :  { %2346 = vmatmul.mubr.bf16.vlgmr.msra.gmra.mrb[8].mxu1 %v7338_v56 }
 0x2af   :  { %2443 = vmatpush1.bf16.msra.mxu1 %v6393_v2  ;;  %2474 = vmatprep.mubr.bf16.mxu1 %v7317_v9  ;;  %v6425_v9 = vld [vmem:[#allocation8 + $0x20c] ss:$48 sps:$4 sm:$0xff]  }
 0x2b0   :  { %2444 = vmatprep.subr.bf16.mxu1 %v6401_v3 }
 0x2b3   :  { %2445 = vmatpush1.bf16.msra.mxu1 %v6399_v59 }
 0x2b4   :  { %2446 = vmatprep.subr.bf16.mxu1 %v6407_v4 }
 0x2b7   :  { %2447 = vmatpush1.bf16.msra.mxu1 %v6405_v5 }
 0x2b8   :  { %2448 = vmatprep.subr.bf16.mxu1 %v6413_v6 }
 0x2bb   :  { %2449 = vmatpush1.bf16.msra.mxu1 %v6411_v7 }
 0x2bc   :  { %2450 = vmatprep.subr.bf16.mxu1 %v6419_v8 }
 0x2bf   :  { %2451 = vmatpush1.bf16.msra.mxu1 %v6417_v11 }
 0x2c0   :  { %2452 = vmatprep.subr.bf16.mxu1 %v6425_v9 }
 0x2c1   :  { %v2089_v20 = vpop.f32.mrb[0].mxu1  ;;  %v2261_v21 = vpop.f32.mrb[0].mxu0 }
 0x2c2   :  { %v7365_v22 = vadd.f32 %v2089_v20, %v515_v53  ;;  %v7367_v23 = vadd.f32 %v2261_v21, %v531_v54  ;;  %v2091_v24 = vpop.f32.mrb[1].mxu1  ;;  %v2263_v25 = vpop.f32.mrb[1].mxu0 }
 0x2c3   :  { %v7369_v26 = vadd.f32 %v2091_v24, %v519_v15  ;;  %v7371_v27 = vadd.f32 %v2263_v25, %v535_v16  ;;  %v2093_v28 = vpop.f32.mrb[2].mxu1  ;;  %v2265_v29 = vpop.f32.mrb[2].mxu0  ;;  %2453 = vmatpush1.bf16.msra.mxu1 %v6423_v18 }
 0x2c4   :  { %v2528_v32 = vmul.f32 %v7365_v22, %v7365_v22  ;;  %v2532_v33 = vmul.f32 %v7367_v23, %v7367_v23  ;;  %v7377_v34 = vadd.f32 %v2093_v28, %v515_v53  ;;  %v7379_v35 = vadd.f32 %v2265_v29, %v531_v54  ;;  %v2095_v36 = vpop.f32.mrb[3].mxu1  ;;  %v2267_v37 = vpop.f32.mrb[3].mxu0  ;;  %2454 = vmatprep.subr.bf16.mxu1 %v6431_v19  ;;  %v6447_v28 = vld [vmem:[#allocation8 + $0x388] ss:$48 sps:$4 sm:$0xff]  }
 0x2c5   :  { %v2529_v39 = vmul.f32 %v7369_v26, %v7369_v26  ;;  %v2533_v40 = vmul.f32 %v7371_v27, %v7371_v27  ;;  %v7385_v41 = vadd.f32 %v2095_v36, %v519_v15  ;;  %v7387_v42 = vadd.f32 %v2267_v37, %v535_v16  ;;  %v6449_v16 = vld [vmem:[#allocation8 + $0x38c] ss:$48 sps:$4 sm:$0xff]   ;;  %v6459_v37 = vld [vmem:[#allocation8 + $0x448] ss:$48 sps:$4 sm:$0xff]  }
 0x2c6   :  { %v2552_v43 = vmul.f32 %v7365_v22, %v2528_v32  ;;  %v2556_v44 = vmul.f32 %v7367_v23, %v2532_v33  ;;  %v2540_v63 = vmul.f32 %v7377_v34, %v7377_v34  ;;  %v2544_v61 = vmul.f32 %v7379_v35, %v7379_v35  ;;  %v6453_v33 = vld [vmem:[#allocation8 + $0x3e8] ss:$48 sps:$4 sm:$0xff]   ;;  %v6461_v36 = vld [vmem:[#allocation8 + $0x44c] ss:$48 sps:$4 sm:$0xff]  }
 0x2c7   :  { %v2553_v45 = vmul.f32 %v7369_v26, %v2529_v39  ;;  %v2557_v49 = vmul.f32 %v7371_v27, %v2533_v40  ;;  %v2541_v50 = vmul.f32 %v7385_v41, %v7385_v41  ;;  %v2545_v51 = vmul.f32 %v7387_v42, %v7387_v42  ;;  %2455 = vmatpush1.bf16.msra.mxu1 %v6429_v31  ;;  %v6455_v31 = vld [vmem:[#allocation8 + $0x3ec] ss:$48 sps:$4 sm:$0xff]  }
 0x2c8   :  { %v2576_v57 = vmul.f32 0.044715, %v2552_v43  ;;  %v2580_v58 = vmul.f32 0.044715, %v2556_v44  ;;  %v2564_v55 = vmul.f32 %v7377_v34, %v2540_v63  ;;  %v2568_v62 = vmul.f32 %v7379_v35, %v2544_v61  ;;  %2456 = vmatprep.subr.bf16.mxu1 %v6437_v38  ;;  %v6467_v39 = vld [vmem:[#allocation8 + $0x4ac] ss:$48 sps:$4 sm:$0xff]  }
 0x2c9   :  { %v2577_v60 = vmul.f32 0.044715, %v2553_v45  ;;  %v2581_v1 = vmul.f32 0.044715, %v2557_v49  ;;  %v2565_v2 = vmul.f32 %v7385_v41, %v2541_v50  ;;  %v2569_v3 = vmul.f32 %v7387_v42, %v2545_v51  ;;  %v6465_v45 = vld [vmem:[#allocation8 + $0x4a8] ss:$48 sps:$4 sm:$0xff]  }
 0x2ca   :  { %v2600_v59 = vadd.f32 %v7365_v22, %v2576_v57  ;;  %v2604_v4 = vadd.f32 %v7367_v23, %v2580_v58  ;;  %v2588_v5 = vmul.f32 0.044715, %v2564_v55  ;;  %v2592_v6 = vmul.f32 0.044715, %v2568_v62  ;;  %v6473_v51 = vld [vmem:[#allocation8 + $0x50c] ss:$48 sps:$4 sm:$0xff]  }
 0x2cb   :  { %v2601_v7 = vadd.f32 %v7369_v26, %v2577_v60  ;;  %v2605_v8 = vadd.f32 %v7371_v27, %v2581_v1  ;;  %v2589_v10 = vmul.f32 0.044715, %v2565_v2  ;;  %v2593_v11 = vmul.f32 0.044715, %v2569_v3  ;;  %2457 = vmatpush1.bf16.msra.mxu1 %v6435_v52  ;;  %v6471_v3 = vld [vmem:[#allocation8 + $0x508] ss:$48 sps:$4 sm:$0xff]  }
 0x2cc   :  { %v2624_v9 = vmul.f32 0.7978846, %v2600_v59  ;;  %v2628_v53 = vmul.f32 0.7978846, %v2604_v4  ;;  %v2612_v54 = vadd.f32 %v7377_v34, %v2588_v5  ;;  %v2616_v15 = vadd.f32 %v7379_v35, %v2592_v6  ;;  %2458 = vmatprep.subr.bf16.mxu1 %v6443_v0  ;;  %v6476_v6 = vld [vmem:[#allocation8 + $0x56c] ss:$48 sps:$4 sm:$0xff]  }
 0x2cd   :  { %v2625_v18 = vmul.f32 0.7978846, %v2601_v7  ;;  %v2629_v19 = vmul.f32 0.7978846, %v2605_v8  ;;  %v2613_v20 = vadd.f32 %v7385_v41, %v2589_v10  ;;  %v2617_v21 = vadd.f32 %v7387_v42, %v2593_v11 }
 0x2ce   :  { %6844 = vtanh.f32 %v2624_v9  ;;  %v2636_v24 = vmul.f32 0.7978846, %v2612_v54  ;;  %v2640_v25 = vmul.f32 0.7978846, %v2616_v15 }
 0x2cf   :  { %6846 = vtanh.f32 %v2628_v53  ;;  %2459 = vmatpush1.bf16.msra.mxu1 %v6441_v14  ;;  %v2637_v29 = vmul.f32 0.7978846, %v2613_v20  ;;  %v2641_v32 = vmul.f32 0.7978846, %v2617_v21  ;;  %v6479_v20 = vld [vmem:[#allocation8 + $0x5cc] ss:$48 sps:$4 sm:$0xff]  }
 0x2d0   :  { %6848 = vtanh.f32 %v2625_v18  ;;  %2460 = vmatprep.subr.bf16.mxu1 %v6449_v16 }
 0x2d1   :  { %6850 = vtanh.f32 %v2629_v19  ;;  %v6474_v19 = vld [vmem:[#allocation8 + $0x568] ss:$48 sps:$4 sm:$0xff]  }
 0x2d2   :  { %6852 = vtanh.f32 %v2636_v24  ;;  %v6506_v24 = vld [vmem:[#allocation11 + $0x19c] ss:$12 sps:$4 sm:$0xff]  }
 0x2d3   :  { %6854 = vtanh.f32 %v2640_v25  ;;  %2461 = vmatpush1.bf16.msra.mxu1 %v6447_v28  ;;  %v6480_v28 = vld [vmem:[#allocation8 + $0x628] ss:$48 sps:$4 sm:$0xff]  }
 0x2d4   :  { %6856 = vtanh.f32 %v2637_v29  ;;  %2462 = vmatprep.subr.bf16.mxu1 %v6455_v31  ;;  %v6485_v29 = vld [vmem:[#allocation8 + $0x68c] ss:$48 sps:$4 sm:$0xff]  }
 0x2d5   :  { %6858 = vtanh.f32 %v2641_v32  ;;  %v6510_v31 = vld [vmem:[#allocation11 + $0x1b0] ss:$12 sps:$4 sm:$0xff]   ;;  %v6517_v32 = vld [vmem:[#allocation11 + $0x1cc] ss:$12 sps:$4 sm:$0xff]  }
 0x2d7   :  { %2463 = vmatpush1.bf16.msra.mxu1 %v6453_v33  ;;  %v6483_v33 = vld [vmem:[#allocation8 + $0x688] ss:$48 sps:$4 sm:$0xff]  }
 0x2d8   :  { %v6845_v38 = vpop.eup %6844  ;;  %2464 = vmatprep.subr.bf16.mxu1 %v6461_v36  ;;  %v6488_v36 = vld [vmem:[#allocation8 + $0x6ec] ss:$48 sps:$4 sm:$0xff]  }
 0x2d9   :  { %v6847_v40 = vpop.eup %6846  ;;  %v2672_v43 = vadd.f32 1.0, %v6845_v38  ;;  %v6522_v38 = vld [vmem:[#allocation11 + $0x1e4] ss:$12 sps:$4 sm:$0xff]  }
 0x2da   :  { %v6849_v44 = vpop.eup %6848  ;;  %v2676_v63 = vadd.f32 1.0, %v6847_v40  ;;  %v6491_v40 = vld [vmem:[#allocation8 + $0x74c] ss:$48 sps:$4 sm:$0xff]  }
 0x2db   :  { %v6851_v61 = vpop.eup %6850  ;;  %2465 = vmatpush1.bf16.msra.mxu1 %v6459_v37  ;;  %v2673_v49 = vadd.f32 1.0, %v6849_v44  ;;  %v2696_v58 = vmul.f32 0.5, %v2672_v43  ;;  %v6515_v37 = vld [vmem:[#allocation11 + $0x1c8] ss:$12 sps:$4 sm:$0xff]   ;;  %v6520_v43 = vld [vmem:[#allocation11 + $0x1e0] ss:$12 sps:$4 sm:$0xff]  }
 0x2dc   :  { %v6853_v50 = vpop.eup %6852  ;;  %2466 = vmatprep.subr.bf16.mxu1 %v6467_v39  ;;  %v2677_v52 = vadd.f32 1.0, %v6851_v61  ;;  %v2700_v0 = vmul.f32 0.5, %v2676_v63  ;;  %v6486_v39 = vld [vmem:[#allocation8 + $0x6e8] ss:$48 sps:$4 sm:$0xff]   ;;  %v6494_v63 = vld [vmem:[#allocation8 + $0x7ac] ss:$48 sps:$4 sm:$0xff]  }
 0x2dd   :  { %v6855_v57 = vpop.eup %6854  ;;  %v2684_v55 = vadd.f32 1.0, %v6853_v50  ;;  %v2697_v4 = vmul.f32 0.5, %v2673_v49  ;;  %v2720_v10 = vmul.f32 %v7365_v22, %v2696_v58  ;;  %v6489_v44 = vld [vmem:[#allocation8 + $0x748] ss:$48 sps:$4 sm:$0xff]   ;;  %v6532_v61 = vld [vmem:[#allocation11 + $0x214] ss:$12 sps:$4 sm:$0xff]  }
 0x2de   :  { %v6857_v62 = vpop.eup %6856  ;;  %v2688_v60 = vadd.f32 1.0, %v6855_v57  ;;  %v2701_v8 = vmul.f32 0.5, %v2677_v52  ;;  %v2724_v9 = vmul.f32 %v7367_v23, %v2700_v0  ;;  %v6497_v49 = vld [vmem:[#allocation8 + $0x80c] ss:$48 sps:$4 sm:$0xff]   ;;  %v6495_v52 = vld [vmem:[#allocation8 + $0x808] ss:$48 sps:$4 sm:$0xff]  }
 0x2df   :  { %v6859_v1 = vpop.eup %6858  ;;  %v2708_v2 = vmul.f32 0.5, %v2684_v55  ;;  %2467 = vmatpush1.bf16.msra.mxu1 %v6465_v45  ;;  %v2685_v59 = vadd.f32 1.0, %v6857_v62  ;;  %v2721_v15 = vmul.f32 %v7369_v26, %v2697_v4  ;;  %v6477_v26 = vld [vmem:[#allocation8 + $0x5c8] ss:$48 sps:$4 sm:$0xff]   ;;  %v6503_v57 = vld [vmem:[#allocation8 + $0x86c] ss:$48 sps:$4 sm:$0xff]  }
 0x2e0   :  { %v2712_v5 = vmul.f32 0.5, %v2688_v60  ;;  %2468 = vmatprep.subr.bf16.mxu1 %v6473_v51  ;;  %v2689_v7 = vadd.f32 1.0, %v6859_v1  ;;  %v2725_v22 = vmul.f32 %v7371_v27, %v2701_v8  ;;  %v6504_v27 = vld [vmem:[#allocation11 + $0x198] ss:$12 sps:$4 sm:$0xff]   ;;  %v6492_v45 = vld [vmem:[#allocation8 + $0x7a8] ss:$48 sps:$4 sm:$0xff]  }
 0x2e1   :  { %v2732_v11 = vmul.f32 %v7377_v34, %v2708_v2  ;;  %v2709_v14 = vmul.f32 0.5, %v2685_v59  ;;  %v6530_v50 = vld [vmem:[#allocation11 + $0x210] ss:$12 sps:$4 sm:$0xff]   ;;  %v6537_v51 = vld [vmem:[#allocation11 + $0x22c] ss:$12 sps:$4 sm:$0xff]  }
 0x2e2   :  { %v2736_v53 = vmul.f32 %v7379_v35, %v2712_v5  ;;  %v2713_v54 = vmul.f32 0.5, %v2689_v7  ;;  %v6498_v35 = vld [vmem:[#allocation11 + $0x180] ss:$12 sps:$4 sm:$0xff]   ;;  %v6535_v58 = vld [vmem:[#allocation11 + $0x228] ss:$12 sps:$4 sm:$0xff]  }
 0x2e3   :  { %2469 = vmatpush1.bf16.msra.mxu1 %v6471_v3  ;;  %v2733_v16 = vmul.f32 %v7385_v41, %v2709_v14  ;;  %v7419_v18 = vpack.c.bf16 %v2732_v11, %v2720_v10  ;;  %v6482_v41 = vld [vmem:[#allocation8 + $0x62c] ss:$48 sps:$4 sm:$0xff]   ;;  %v6501_v62 = vld [vmem:[#allocation8 + $0x868] ss:$48 sps:$4 sm:$0xff]   ;;  %v6513_v3 = vld [vmem:[#allocation11 + $0xc8] ss:$12 sps:$4 sm:$0xff]  }
 0x2e4   :  { %2470 = vmatprep.subr.bf16.mxu1 %v6476_v6  ;;  %v2737_v34 = vmul.f32 %v7387_v42, %v2713_v54  ;;  %v7423_v21 = vpack.c.bf16 %v2736_v53, %v2724_v9  ;;  %v6512_v42 = vld [vmem:[#allocation11 + $0x1b4] ss:$12 sps:$4 sm:$0xff]   ;;  %v6542_v55 = vld [vmem:[#allocation11 + $0x244] ss:$12 sps:$4 sm:$0xff]   ;;  %v6547_v1 = vld [vmem:[#allocation11 + $0x25c] ss:$12 sps:$4 sm:$0xff]  }
 0x2e5   :  { %v7425_v23 = vpack.c.bf16 %v2733_v16, %v2721_v15  ;;  %v6509_v0 = vld [vmem:[#allocation8 + $0x8cc] ss:$48 sps:$4 sm:$0xff]   ;;  %v6507_v2 = vld [vmem:[#allocation8 + $0x8c8] ss:$48 sps:$4 sm:$0xff]   ;;  %v6545_v59 = vld [vmem:[#allocation11 + $0x258] ss:$12 sps:$4 sm:$0xff]  }
 0x2e6   :  { %v7427_v25 = vpack.c.bf16 %v2737_v34, %v2725_v22  ;;  %v6540_v60 = vld [vmem:[#allocation11 + $0x240] ss:$12 sps:$4 sm:$0xff]   ;;  %v6514_v5 = vld [vmem:[#allocation11 + $0x8] ss:$12 sps:$4 sm:$0xff]   ;;  %v6550_v7 = vld [vmem:[#allocation11 + $0x270] ss:$12 sps:$4 sm:$0xff]  }
 0x2e7   :  { %4725 = vmatprep.mubr.bf16.mxu0 %v7425_v23  ;;  %2471 = vmatpush1.bf16.msra.mxu1 %v6474_v19  ;;  %v6552_v4 = vld [vmem:[#allocation11 + $0x274] ss:$12 sps:$4 sm:$0xff]   ;;  %v6557_v8 = vld [vmem:[#allocation11 + $0x28c] ss:$12 sps:$4 sm:$0xff]   ;;  %v6562_v9 = vld [vmem:[#allocation11 + $0x2a4] ss:$12 sps:$4 sm:$0xff]  }
 0x2e8   :  { %4726 = vmatmul.mubr.bf16.vlgmr.msra.gmra.mrb[8].mxu0 %v7419_v18  ;;  %2472 = vmatprep.subr.bf16.mxu1 %v6479_v20  ;;  %v6518_v6 = vld [vmem:[#allocation11 + $0xe0] ss:$12 sps:$4 sm:$0xff]   ;;  %v6523_v11 = vld [vmem:[#allocation11 + $0xf8] ss:$12 sps:$4 sm:$0xff]   ;;  %v6555_v14 = vld [vmem:[#allocation11 + $0x288] ss:$12 sps:$4 sm:$0xff]  }
 0x2e9   :  { %4737 = vmatpush1.bf16.msra.mxu0 %v6498_v35  ;;  %v6519_v10 = vld [vmem:[#allocation11 + $0x20] ss:$12 sps:$4 sm:$0xff]   ;;  %v6524_v53 = vld [vmem:[#allocation11 + $0x38] ss:$12 sps:$4 sm:$0xff]   ;;  %v6528_v54 = vld [vmem:[#allocation11 + $0x110] ss:$12 sps:$4 sm:$0xff]  }
 0x2ea   :  { %4738 = vmatprep.subr.bf16.mxu0 %v6506_v24  ;;  %v6560_v15 = vld [vmem:[#allocation11 + $0x2a0] ss:$12 sps:$4 sm:$0xff]   ;;  %v6529_v16 = vld [vmem:[#allocation11 + $0x50] ss:$12 sps:$4 sm:$0xff]   ;;  %v6533_v19 = vld [vmem:[#allocation11 + $0x128] ss:$12 sps:$4 sm:$0xff]  }
 0x2eb   :  { %2473 = vmatpush1.bf16.msra.mxu1 %v6477_v26  ;;  %v6565_v20 = vld [vmem:[#allocation11 + $0x2b8] ss:$12 sps:$4 sm:$0xff]   ;;  %v6572_v22 = vld [vmem:[#allocation11 + $0x2d4] ss:$12 sps:$4 sm:$0xff]   ;;  %v7436_v35 = vld [vmem:[#allocation10 + $0x8] sm:$0xf] }
 0x2ec   :  { %2485 = vmatprep.subr.bf16.mxu1 %v6482_v41  ;;  %v6534_v34 = vld [vmem:[#allocation11 + $0x68] ss:$12 sps:$4 sm:$0xff]   ;;  %v6538_v24 = vld [vmem:[#allocation11 + $0x140] ss:$12 sps:$4 sm:$0xff]   ;;  %v6570_v26 = vld [vmem:[#allocation11 + $0x2d0] ss:$12 sps:$4 sm:$0xff]   ;;  %v523_v41 = vrot.slane %v7356_v13, %v7328_v30 }
 0x2ed   :  { %4739 = vmatpush1.bf16.msra.mxu0 %v6504_v27  ;;  %v6577_v27 = vld [vmem:[#allocation11 + $0x2ec] ss:$12 sps:$4 sm:$0xff]  }
 0x2ee   :  { %2475 = vmatmul.mubr.bf16.vlgmr.msra.gmra.mrb[12].mxu1 %v7319_v12  ;;  %4740 = vmatprep.subr.bf16.mxu0 %v6512_v42  ;;  %v6527_v12 = vld [vmem:[#allocation11 + $0x1fc] ss:$12 sps:$4 sm:$0xff]   ;;  %v547_v42 = vrot.slane %v7436_v35, %v7291_v48 }
 0x2ef   :  { %2486 = vmatpush1.bf16.msra.mxu1 %v6480_v28  ;;  %2517 = vmatprep.mubr.bf16.mxu1 %v7099_v17  ;;  %v6525_v17 = vld [vmem:[#allocation11 + $0x1f8] ss:$12 sps:$4 sm:$0xff]  }
 0x2f0   :  { %2487 = vmatprep.subr.bf16.mxu1 %v6485_v29  ;;  %v6539_v29 = vld [vmem:[#allocation11 + $0x80] ss:$12 sps:$4 sm:$0xff]  }
 0x2f1   :  { %4741 = vmatpush1.bf16.msra.mxu0 %v6510_v31  ;;  %v551_v31 = vrot.slane %v7436_v35, %v7288_v47 }
 0x2f2   :  { %4742 = vmatprep.subr.bf16.mxu0 %v6517_v32  ;;  %v6543_v32 = vld [vmem:[#allocation11 + $0x158] ss:$12 sps:$4 sm:$0xff]  }
 0x2f3   :  { %2488 = vmatpush1.bf16.msra.mxu1 %v6483_v33 }
 0x2f4   :  { %2489 = vmatprep.subr.bf16.mxu1 %v6488_v36  ;;  %v6575_v36 = vld [vmem:[#allocation11 + $0x2e8] ss:$12 sps:$4 sm:$0xff]  }
 0x2f5   :  { %4743 = vmatpush1.bf16.msra.mxu0 %v6515_v37 }
 0x2f6   :  { %4744 = vmatprep.subr.bf16.mxu0 %v6522_v38 }
 0x2f7   :  { %2490 = vmatpush1.bf16.msra.mxu1 %v6486_v39 }
 0x2f8   :  { %2491 = vmatprep.subr.bf16.mxu1 %v6491_v40  ;;  %v6582_v40 = vld [vmem:[#allocation11 + $0x304] ss:$12 sps:$4 sm:$0xff]  }
 0x2f9   :  { %4745 = vmatpush1.bf16.msra.mxu0 %v6520_v43 }
 0x2fa   :  { %4746 = vmatprep.subr.bf16.mxu0 %v6527_v12 }
 0x2fb   :  { %2492 = vmatpush1.bf16.msra.mxu1 %v6489_v44 }
 0x2fc   :  { %2493 = vmatprep.subr.bf16.mxu1 %v6494_v63  ;;  %v6544_v63 = vld [vmem:[#allocation11 + $0x98] ss:$12 sps:$4 sm:$0xff]  }
 0x2fd   :  { %4747 = vmatpush1.bf16.msra.mxu0 %v6525_v17 }
 0x2fe   :  { %4748 = vmatprep.subr.bf16.mxu0 %v6532_v61 }
 0x2ff   :  { %2494 = vmatpush1.bf16.msra.mxu1 %v6492_v45 }
 0x300   :  { %2495 = vmatprep.subr.bf16.mxu1 %v6497_v49 }
 0x301   :  { %4749 = vmatpush1.bf16.msra.mxu0 %v6530_v50 }
 0x302   :  { %4750 = vmatprep.subr.bf16.mxu0 %v6537_v51  ;;  %v6548_v51 = vld [vmem:[#allocation11 + $0x170] ss:$12 sps:$4 sm:$0xff]  }
 0x303   :  { %2496 = vmatpush1.bf16.msra.mxu1 %v6495_v52 }
 0x304   :  { %2497 = vmatprep.subr.bf16.mxu1 %v6503_v57 }
 0x305   :  { %4751 = vmatpush1.bf16.msra.mxu0 %v6535_v58 }
 0x306   :  { %4752 = vmatprep.subr.bf16.mxu0 %v6542_v55 }
 0x307   :  { %2498 = vmatpush1.bf16.msra.mxu1 %v6501_v62 }
 0x308   :  { %2499 = vmatprep.subr.bf16.mxu1 %v6509_v0 }
 0x309   :  { %4753 = vmatpush1.bf16.msra.mxu0 %v6540_v60 }
 0x30a   :  { %4754 = vmatprep.subr.bf16.mxu0 %v6547_v1 }
 0x30b   :  { %2500 = vmatpush1.bf16.msra.mxu1 %v6507_v2 }
 0x30c   :  { %5805 = vmatprep.subr.bf16.mxu1 %v6513_v3 }
 0x30d   :  { %4755 = vmatpush1.bf16.msra.mxu0 %v6545_v59 }
 0x30e   :  { %2518 = vmatmul.mubr.bf16.vlgmr.msra.gmra.mrb[12].mxu1 %v7338_v56  ;;  %4756 = vmatprep.subr.bf16.mxu0 %v6552_v4  ;;  %v6567_v56 = vld [vmem:[#allocation11 + $0x2bc] ss:$12 sps:$4 sm:$0xff]  }
 0x30f   :  { %5806 = vmatpush3.bf16.msra.mxu1 %v6514_v5  ;;  %4983 = vmatprep.mubr.bf16.mxu1 %v7425_v23  ;;  %v526_v23 = vsub.s32 3, %v7285_v46 }
 0x310   :  { %5807 = vmatprep.subr.bf16.mxu1 %v6518_v6  ;;  %v6549_v6 = vld [vmem:[#allocation11 + $0xb0] ss:$12 sps:$4 sm:$0xff]  }
 0x311   :  { %4757 = vmatpush1.bf16.msra.mxu0 %v6550_v7  ;;  %v527_v28 = vrot.slane %v7356_v13, %v526_v23 }
 0x312   :  { %4758 = vmatprep.subr.bf16.mxu0 %v6557_v8 }
 0x313   :  { %5808 = vmatpush3.bf16.msra.mxu1 %v6519_v10 }
 0x314   :  { %5809 = vmatprep.subr.bf16.mxu1 %v6523_v11 }
 0x315   :  { %4759 = vmatpush1.bf16.msra.mxu0 %v6555_v14  ;;  %v6553_v14 = vld [vmem:[#allocation11 + $0x248] ss:$12 sps:$4 sm:$0xff]  }
 0x316   :  { %4760 = vmatprep.subr.bf16.mxu0 %v6562_v9 }
 0x317   :  { %5810 = vmatpush3.bf16.msra.mxu1 %v6524_v53 }
 0x318   :  { %5811 = vmatprep.subr.bf16.mxu1 %v6528_v54 }
 0x319   :  { %4761 = vmatpush1.bf16.msra.mxu0 %v6560_v15 }
 0x31a   :  { %4762 = vmatprep.subr.bf16.mxu0 %v6567_v56 }
 0x31b   :  { %5812 = vmatpush3.bf16.msra.mxu1 %v6529_v16 }
 0x31c   :  { %5813 = vmatprep.subr.bf16.mxu1 %v6533_v19 }
 0x31d   :  { %4763 = vmatpush1.bf16.msra.mxu0 %v6565_v20 }
 0x31e   :  { %4764 = vmatprep.subr.bf16.mxu0 %v6572_v22 }
 0x31f   :  { %5814 = vmatpush3.bf16.msra.mxu1 %v6534_v34 }
 0x320   :  { %5815 = vmatprep.subr.bf16.mxu1 %v6538_v24 }
 0x321   :  { %v2175_v33 = vpop.f32.mrb[4].mxu1  ;;  %4765 = vmatpush1.bf16.msra.mxu0 %v6570_v26 }
 0x322   :  { %v7447_v37 = vadd.f32 %v2175_v33, %v523_v41  ;;  %v2433_v38 = vpop.f32.mrb[4].mxu0  ;;  %v2177_v39 = vpop.f32.mrb[5].mxu1  ;;  %4766 = vmatprep.subr.bf16.mxu0 %v6577_v27 }
 0x323   :  { %v7449_v43 = vadd.f32 %v2433_v38, %v547_v42  ;;  %v7451_v12 = vadd.f32 %v2177_v39, %v527_v28  ;;  %v2435_v13 = vpop.f32.mrb[5].mxu0  ;;  %v2179_v44 = vpop.f32.mrb[6].mxu1  ;;  %5816 = vmatpush3.bf16.msra.mxu1 %v6539_v29 }
 0x324   :  { %v2530_v17 = vmul.f32 %v7447_v37, %v7447_v37  ;;  %v7455_v61 = vadd.f32 %v2435_v13, %v551_v31  ;;  %v7457_v45 = vadd.f32 %v2179_v44, %v523_v41  ;;  %v2437_v49 = vpop.f32.mrb[6].mxu0  ;;  %v2181_v50 = vpop.f32.mrb[7].mxu1  ;;  %5817 = vmatprep.subr.bf16.mxu1 %v6543_v32  ;;  %v6554_v41 = vld [vmem:[#allocation11 + $0x188] ss:$12 sps:$4 sm:$0xff]  }
 0x325   :  { %v2536_v52 = vmul.f32 %v7449_v43, %v7449_v43  ;;  %v2531_v57 = vmul.f32 %v7451_v12, %v7451_v12  ;;  %v7463_v58 = vadd.f32 %v2437_v49, %v547_v42  ;;  %v7465_v55 = vadd.f32 %v2181_v50, %v527_v28  ;;  %v2439_v62 = vpop.f32.mrb[7].mxu0  ;;  %4767 = vmatpush1.bf16.msra.mxu0 %v6575_v36  ;;  %v6563_v49 = vld [vmem:[#allocation11 + $0x278] ss:$12 sps:$4 sm:$0xff]  }
 0x326   :  { %v2554_v0 = vmul.f32 %v7447_v37, %v2530_v17  ;;  %v2537_v60 = vmul.f32 %v7455_v61, %v7455_v61  ;;  %v2542_v1 = vmul.f32 %v7457_v45, %v7457_v45  ;;  %v7472_v2 = vadd.f32 %v2439_v62, %v551_v31  ;;  %4779 = vmatprep.subr.bf16.mxu0 %v6582_v40  ;;  %v6558_v31 = vld [vmem:[#allocation11 + $0x260] ss:$12 sps:$4 sm:$0xff]   ;;  %v6573_v62 = vld [vmem:[#allocation11 + $0x2a8] ss:$12 sps:$4 sm:$0xff]  }
 0x327   :  { %v2560_v3 = vmul.f32 %v7449_v43, %v2536_v52  ;;  %v2555_v59 = vmul.f32 %v7451_v12, %v2531_v57  ;;  %v2548_v4 = vmul.f32 %v7463_v58, %v7463_v58  ;;  %v2543_v5 = vmul.f32 %v7465_v55, %v7465_v55  ;;  %5818 = vmatpush3.bf16.msra.mxu1 %v6544_v63  ;;  %v6559_v63 = vld [vmem:[#allocation11 + $0x1a0] ss:$12 sps:$4 sm:$0xff]   ;;  %v6568_v52 = vld [vmem:[#allocation11 + $0x290] ss:$12 sps:$4 sm:$0xff]  }
 0x328   :  { %v2578_v7 = vmul.f32 0.044715, %v2554_v0  ;;  %v2561_v8 = vmul.f32 %v7455_v61, %v2537_v60  ;;  %v2566_v10 = vmul.f32 %v7457_v45, %v2542_v1  ;;  %v2549_v11 = vmul.f32 %v7472_v2, %v7472_v2  ;;  %5819 = vmatprep.subr.bf16.mxu1 %v6548_v51  ;;  %v6564_v51 = vld [vmem:[#allocation11 + $0x1b8] ss:$12 sps:$4 sm:$0xff]  }
 0x329   :  { %v2584_v9 = vmul.f32 0.044715, %v2560_v3  ;;  %v2579_v53 = vmul.f32 0.044715, %v2555_v59  ;;  %v2572_v54 = vmul.f32 %v7463_v58, %v2548_v4  ;;  %v2567_v15 = vmul.f32 %v7465_v55, %v2543_v5  ;;  %v6574_v4 = vld [vmem:[#allocation11 + $0x1e8] ss:$12 sps:$4 sm:$0xff]  }
 0x32a   :  { %v2602_v56 = vadd.f32 %v7447_v37, %v2578_v7  ;;  %v2585_v16 = vmul.f32 0.044715, %v2561_v8  ;;  %v2590_v19 = vmul.f32 0.044715, %v2566_v10  ;;  %v2573_v20 = vmul.f32 %v7472_v2, %v2549_v11  ;;  %v6578_v7 = vld [vmem:[#allocation11 + $0x2c0] ss:$12 sps:$4 sm:$0xff]  }
 0x32b   :  { %v2608_v22 = vadd.f32 %v7449_v43, %v2584_v9  ;;  %v2603_v34 = vadd.f32 %v7451_v12, %v2579_v53  ;;  %v2596_v24 = vmul.f32 0.044715, %v2572_v54  ;;  %v2591_v26 = vmul.f32 0.044715, %v2567_v15  ;;  %5820 = vmatpush3.bf16.msra.mxu1 %v6549_v6 }
 0x32c   :  { %v2626_v27 = vmul.f32 0.7978846, %v2602_v56  ;;  %v2609_v42 = vadd.f32 %v7455_v61, %v2585_v16  ;;  %v2614_v28 = vadd.f32 %v7457_v45, %v2590_v19  ;;  %v2597_v29 = vmul.f32 0.044715, %v2573_v20  ;;  %5827 = vmatprep.subr.bf16.mxu1 %v6553_v14  ;;  %v6579_v16 = vld [vmem:[#allocation11 + $0x200] ss:$12 sps:$4 sm:$0xff]  }
 0x32d   :  { %v2632_v32 = vmul.f32 0.7978846, %v2608_v22  ;;  %v2627_v33 = vmul.f32 0.7978846, %v2603_v34  ;;  %v2620_v36 = vadd.f32 %v7463_v58, %v2596_v24  ;;  %v2615_v38 = vadd.f32 %v7465_v55, %v2591_v26  ;;  %v6583_v34 = vld [vmem:[#allocation11 + $0x2d8] ss:$12 sps:$4 sm:$0xff]  }
 0x32e   :  { %6860 = vtanh.f32 %v2626_v27  ;;  %v2633_v39 = vmul.f32 0.7978846, %v2609_v42  ;;  %v2638_v40 = vmul.f32 0.7978846, %v2614_v28  ;;  %v2621_v13 = vadd.f32 %v7472_v2, %v2597_v29  ;;  %4984 = vmatmul.mubr.bf16.vlgmr.msra.gmra.mrb[16].mxu1 %v7419_v18  ;;  %v6569_v18 = vld [vmem:[#allocation11 + $0x1d0] ss:$12 sps:$4 sm:$0xff]  }
 0x32f   :  { %6862 = vtanh.f32 %v2632_v32  ;;  %v2644_v44 = vmul.f32 0.7978846, %v2620_v36  ;;  %5828 = vmatpush3.bf16.msra.mxu1 %v6554_v41  ;;  %v2639_v17 = vmul.f32 0.7978846, %v2615_v38  ;;  %v6584_v38 = vld [vmem:[#allocation11 + $0x218] ss:$12 sps:$4 sm:$0xff]  }
 0x330   :  { %6864 = vtanh.f32 %v2627_v33  ;;  %5829 = vmatprep.subr.bf16.mxu1 %v6558_v31  ;;  %v2645_v50 = vmul.f32 0.7978846, %v2621_v13  ;;  %v6580_v13 = vld [vmem:[#allocation11 + $0x300] ss:$12 sps:$4 sm:$0xff]  }
 0x331   :  { %6866 = vtanh.f32 %v2633_v39 }
 0x332   :  { %6868 = vtanh.f32 %v2638_v40 }
 0x333   :  { %6870 = vtanh.f32 %v2644_v44  ;;  %5830 = vmatpush3.bf16.msra.mxu1 %v6559_v63  ;;  %v6588_v44 = vld [vmem:[#allocation11 + $0x2f0] ss:$12 sps:$4 sm:$0xff]   ;;  %v6594_v63 = vld [vmem:[#allocation11 + $0x308] ss:$12 sps:$4 sm:$0xff]  }
 0x334   :  { %6872 = vtanh.f32 %v2639_v17  ;;  %5831 = vmatprep.subr.bf16.mxu1 %v6563_v49  ;;  %v6590_v17 = vld [vmem:[#allocation11 + $0x330] ss:$12 sps:$4 sm:$0xff]   ;;  %v6598_v49 = vld [vmem:[#allocation11 + $0x3e0] ss:$12 sps:$4 sm:$0xff]  }
 0x335   :  { %6874 = vtanh.f32 %v2645_v50  ;;  %v6597_v50 = vld [vmem:[#allocation11 + $0x34c] ss:$12 sps:$4 sm:$0xff]  }
 0x337   :  { %5832 = vmatpush3.bf16.msra.mxu1 %v6564_v51  ;;  %v6599_v51 = vld [vmem:[#allocation11 + $0x320] ss:$12 sps:$4 sm:$0xff]  }
 0x338   :  { %v6861_v57 = vpop.eup %6860  ;;  %5833 = vmatprep.subr.bf16.mxu1 %v6568_v52  ;;  %v6595_v52 = vld [vmem:[#allocation11 + $0x348] ss:$12 sps:$4 sm:$0xff]  }
 0x339   :  { %v6863_v0 = vpop.eup %6862  ;;  %v2674_v60 = vadd.f32 1.0, %v6861_v57  ;;  %v6602_v57 = vld [vmem:[#allocation11 + $0x364] ss:$12 sps:$4 sm:$0xff]  }
 0x33a   :  { %v6865_v1 = vpop.eup %6864  ;;  %v2680_v3 = vadd.f32 1.0, %v6863_v0  ;;  %v6600_v0 = vld [vmem:[#allocation11 + $0x360] ss:$12 sps:$4 sm:$0xff]  }
 0x33b   :  { %v6867_v59 = vpop.eup %6866  ;;  %5834 = vmatpush3.bf16.msra.mxu1 %v6569_v18  ;;  %v2675_v5 = vadd.f32 1.0, %v6865_v1  ;;  %v2698_v11 = vmul.f32 0.5, %v2674_v60  ;;  %v6603_v18 = vld [vmem:[#allocation11 + $0x3f8] ss:$12 sps:$4 sm:$0xff]   ;;  %v6608_v60 = vld [vmem:[#allocation11 + $0x410] ss:$12 sps:$4 sm:$0xff]  }
 0x33c   :  { %v6869_v6 = vpop.eup %6868  ;;  %5835 = vmatprep.subr.bf16.mxu1 %v6573_v62  ;;  %v2681_v8 = vadd.f32 1.0, %v6867_v59  ;;  %v2704_v53 = vmul.f32 0.5, %v2680_v3  ;;  %v6604_v62 = vld [vmem:[#allocation11 + $0x338] ss:$12 sps:$4 sm:$0xff]   ;;  %v6607_v1 = vld [vmem:[#allocation11 + $0x37c] ss:$12 sps:$4 sm:$0xff]  }
 0x33d   :  { %v6871_v10 = vpop.eup %6870  ;;  %v2686_v14 = vadd.f32 1.0, %v6869_v6  ;;  %v2699_v20 = vmul.f32 0.5, %v2675_v5  ;;  %v2722_v41 = vmul.f32 %v7447_v37, %v2698_v11  ;;  %v6609_v3 = vld [vmem:[#allocation11 + $0x350] ss:$12 sps:$4 sm:$0xff]   ;;  %v6605_v59 = vld [vmem:[#allocation11 + $0x378] ss:$12 sps:$4 sm:$0xff]  }
 0x33e   :  { %v6873_v9 = vpop.eup %6872  ;;  %v2692_v54 = vadd.f32 1.0, %v6871_v10  ;;  %v2705_v26 = vmul.f32 0.5, %v2681_v8  ;;  %v2728_v28 = vmul.f32 %v7449_v43, %v2704_v53  ;;  %v6587_v43 = vld [vmem:[#allocation11 + $0x31c] ss:$12 sps:$4 sm:$0xff]   ;;  %v6617_v8 = vld [vmem:[#allocation11 + $0x3ac] ss:$12 sps:$4 sm:$0xff]  }
 0x33f   :  { %v6875_v15 = vpop.eup %6874  ;;  %v2710_v56 = vmul.f32 0.5, %v2686_v14  ;;  %5836 = vmatpush3.bf16.msra.mxu1 %v6574_v4  ;;  %v2687_v19 = vadd.f32 1.0, %v6873_v9  ;;  %v2723_v32 = vmul.f32 %v7451_v12, %v2699_v20  ;;  %v6589_v12 = vld [vmem:[#allocation11 + $0x230] ss:$12 sps:$4 sm:$0xff]   ;;  %v6612_v4 = vld [vmem:[#allocation11 + $0x394] ss:$12 sps:$4 sm:$0xff]  }
 0x340   :  { %v2716_v22 = vmul.f32 0.5, %v2692_v54  ;;  %5837 = vmatprep.subr.bf16.mxu1 %v6578_v7  ;;  %v2693_v24 = vadd.f32 1.0, %v6875_v15  ;;  %v2729_v39 = vmul.f32 %v7455_v61, %v2705_v26  ;;  %v6593_v61 = vld [vmem:[#allocation11 + $0x3c8] ss:$12 sps:$4 sm:$0xff]   ;;  %v6610_v6 = vld [vmem:[#allocation11 + $0x390] ss:$12 sps:$4 sm:$0xff]  }
 0x341   :  { %v2734_v27 = vmul.f32 %v7457_v45, %v2710_v56  ;;  %v2711_v42 = vmul.f32 0.5, %v2687_v19  ;;  %v6614_v5 = vld [vmem:[#allocation11 + $0x368] ss:$12 sps:$4 sm:$0xff]   ;;  %v6618_v7 = vld [vmem:[#allocation11 + $0x440] ss:$12 sps:$4 sm:$0xff]  }
 0x342   :  { %v2740_v29 = vmul.f32 %v7463_v58, %v2716_v22  ;;  %v2717_v31 = vmul.f32 0.5, %v2693_v24  ;;  %v6619_v10 = vld [vmem:[#allocation11 + $0x380] ss:$12 sps:$4 sm:$0xff]   ;;  %v6615_v11 = vld [vmem:[#allocation11 + $0x3a8] ss:$12 sps:$4 sm:$0xff]  }
 0x343   :  { %5838 = vmatpush3.bf16.msra.mxu1 %v6579_v16  ;;  %v2735_v33 = vmul.f32 %v7465_v55, %v2711_v42  ;;  %v2746_v36 = vpack.c.bf16 %v2734_v27, %v2722_v41  ;;  %v6585_v55 = vld [vmem:[#allocation11 + $0x318] ss:$12 sps:$4 sm:$0xff]   ;;  %v6620_v54 = vld [vmem:[#allocation11 + $0x3c0] ss:$12 sps:$4 sm:$0xff]   ;;  %v6628_v15 = vld [vmem:[#allocation11 + $0x470] ss:$12 sps:$4 sm:$0xff]  }
 0x344   :  { %5839 = vmatprep.subr.bf16.mxu1 %v6583_v34  ;;  %v2741_v37 = vmul.f32 %v7472_v2, %v2717_v31  ;;  %v7504_v40 = vpack.c.bf16 %v2740_v29, %v2728_v28  ;;  %v6592_v2 = vld [vmem:[#allocation11 + $0x334] ss:$12 sps:$4 sm:$0xff]   ;;  %v6623_v14 = vld [vmem:[#allocation11 + $0x458] ss:$12 sps:$4 sm:$0xff]   ;;  %v6627_v56 = vld [vmem:[#allocation11 + $0x3dc] ss:$12 sps:$4 sm:$0xff]  }
 0x345   :  { %v2747_v45 = vpack.c.bf16 %v2735_v33, %v2723_v32  ;;  %v6622_v9 = vld [vmem:[#allocation11 + $0x3c4] ss:$12 sps:$4 sm:$0xff]   ;;  %v6651_v20 = vld [vmem:[#allocation11 + $0x548] ss:$12 sps:$4 sm:$0xff]   ;;  %v6656_v26 = vld [vmem:[#allocation11 + $0x560] ss:$12 sps:$4 sm:$0xff]  }
 0x346   :  { %v7506_v58 = vpack.c.bf16 %v2741_v37, %v2729_v39  ;;  %v6624_v53 = vld [vmem:[#allocation11 + $0x398] ss:$12 sps:$4 sm:$0xff]   ;;  %v6629_v16 = vld [vmem:[#allocation11 + $0x3b0] ss:$12 sps:$4 sm:$0xff]   ;;  %v6632_v22 = vld [vmem:[#allocation11 + $0x3f4] ss:$12 sps:$4 sm:$0xff]  }
 0x347   :  { %4768 = vmatprep.mubr.bf16.mxu0 %v2747_v45  ;;  %5024 = vmatprep.mubr.bf16.mxu1 %v2747_v45  ;;  %v6625_v19 = vld [vmem:[#allocation11 + $0x3d8] ss:$12 sps:$4 sm:$0xff]   ;;  %v6652_v34 = vld [vmem:[#allocation11 + $0x488] ss:$12 sps:$4 sm:$0xff]   ;;  %v6630_v24 = vld [vmem:[#allocation11 + $0x3f0] ss:$12 sps:$4 sm:$0xff]  }
 0x348   :  { %4769 = vmatmul.mubr.bf16.vlgmr.msra.gmra.mrb[8].mxu0 %v2746_v36  ;;  %5840 = vmatpush3.bf16.msra.mxu1 %v6584_v38  ;;  %v6635_v41 = vld [vmem:[#allocation11 + $0x40c] ss:$12 sps:$4 sm:$0xff]   ;;  %v6633_v42 = vld [vmem:[#allocation11 + $0x408] ss:$12 sps:$4 sm:$0xff]   ;;  %v6638_v29 = vld [vmem:[#allocation11 + $0x424] ss:$12 sps:$4 sm:$0xff]  }
 0x349   :  { %4780 = vmatpush1.bf16.msra.mxu0 %v6580_v13  ;;  %4811 = vmatprep.mubr.bf16.mxu0 %v7427_v25  ;;  %v6657_v27 = vld [vmem:[#allocation11 + $0x4a0] ss:$12 sps:$4 sm:$0xff]   ;;  %v6661_v28 = vld [vmem:[#allocation11 + $0x578] ss:$12 sps:$4 sm:$0xff]   ;;  %v6666_v33 = vld [vmem:[#allocation11 + $0x590] ss:$12 sps:$4 sm:$0xff]  }
 0x34a   :  { %4781 = vmatprep.subr.bf16.mxu0 %v6587_v43  ;;  %5841 = vmatprep.subr.bf16.mxu1 %v6588_v44  ;;  %v6662_v31 = vld [vmem:[#allocation11 + $0x4b8] ss:$12 sps:$4 sm:$0xff]   ;;  %v6636_v32 = vld [vmem:[#allocation11 + $0x420] ss:$12 sps:$4 sm:$0xff]   ;;  %v6667_v38 = vld [vmem:[#allocation11 + $0x4d0] ss:$12 sps:$4 sm:$0xff]  }
 0x34b   :  { %v6639_v39 = vld [vmem:[#allocation11 + $0x438] ss:$12 sps:$4 sm:$0xff]   ;;  %v6671_v37 = vld [vmem:[#allocation11 + $0x5a8] ss:$12 sps:$4 sm:$0xff]   ;;  %v538_v13 = vsub.s32 6, %v7285_v46  ;;  %v542_v43 = vsub.s32 7, %v7285_v46 }
 0x34c   :  { %5842 = vmatpush3.bf16.msra.mxu1 %v6589_v12  ;;  %v6644_v45 = vld [vmem:[#allocation11 + $0x454] ss:$12 sps:$4 sm:$0xff]   ;;  %v6642_v12 = vld [vmem:[#allocation11 + $0x450] ss:$12 sps:$4 sm:$0xff]  }
 0x34d   :  { %4782 = vmatpush1.bf16.msra.mxu0 %v6585_v55  ;;  %5849 = vmatprep.subr.bf16.mxu1 %v6593_v61  ;;  %v6672_v44 = vld [vmem:[#allocation11 + $0x4e8] ss:$12 sps:$4 sm:$0xff]   ;;  %v6676_v55 = vld [vmem:[#allocation11 + $0x5c0] ss:$12 sps:$4 sm:$0xff]  }
 0x34e   :  { %4783 = vmatprep.subr.bf16.mxu0 %v6592_v2  ;;  %v6647_v61 = vld [vmem:[#allocation11 + $0x46c] ss:$12 sps:$4 sm:$0xff]  }
 0x34f   :  { %5025 = vmatmul.mubr.bf16.vlgmr.msra.gmra.mrb[20].mxu1 %v2746_v36  ;;  %v6641_v36 = vld [vmem:[#allocation11 + $0x43c] ss:$12 sps:$4 sm:$0xff]   ;;  %v6893_v2 = vld [vmem:[#allocation10] sm:$0xff] }
 0x350   :  { %5850 = vmatpush3.bf16.msra.mxu1 %v6594_v63  ;;  %5065 = vmatprep.mubr.bf16.mxu1 %v7427_v25  ;;  %v6613_v25 = vld [vmem:[#allocation11 + $0x428] ss:$12 sps:$4 sm:$0xff]   ;;  %v539_v63 = vrot.slane %v6893_v2, %v538_v13 }
 0x351   :  { %4784 = vmatpush1.bf16.msra.mxu0 %v6590_v17  ;;  %5851 = vmatprep.subr.bf16.mxu1 %v6598_v49  ;;  %v543_v17 = vrot.slane %v6893_v2, %v542_v43  ;;  %v6677_v49 = vld [vmem:[#allocation11 + $0x500] ss:$12 sps:$4 sm:$0xff]  }
 0x352   :  { %4785 = vmatprep.subr.bf16.mxu0 %v6597_v50  ;;  %v6645_v50 = vld [vmem:[#allocation11 + $0x468] ss:$12 sps:$4 sm:$0xff]  }
 0x354   :  { %5852 = vmatpush3.bf16.msra.mxu1 %v6599_v51 }
 0x355   :  { %4786 = vmatpush1.bf16.msra.mxu0 %v6595_v52  ;;  %5853 = vmatprep.subr.bf16.mxu1 %v6603_v18  ;;  %v6681_v52 = vld [vmem:[#allocation11 + $0x5d8] ss:$12 sps:$4 sm:$0xff]  }
 0x356   :  { %4787 = vmatprep.subr.bf16.mxu0 %v6602_v57 }
 0x358   :  { %5854 = vmatpush3.bf16.msra.mxu1 %v6604_v62  ;;  %v6650_v62 = vld [vmem:[#allocation11 + $0x484] ss:$12 sps:$4 sm:$0xff]  }
 0x359   :  { %4788 = vmatpush1.bf16.msra.mxu0 %v6600_v0  ;;  %5855 = vmatprep.subr.bf16.mxu1 %v6608_v60 }
 0x35a   :  { %4789 = vmatprep.subr.bf16.mxu0 %v6607_v1 }
 0x35c   :  { %5856 = vmatpush3.bf16.msra.mxu1 %v6609_v3 }
 0x35d   :  { %4790 = vmatpush1.bf16.msra.mxu0 %v6605_v59  ;;  %5857 = vmatprep.subr.bf16.mxu1 %v6613_v25  ;;  %v6682_v25 = vld [vmem:[#allocation11 + $0x518] ss:$12 sps:$4 sm:$0xff]  }
 0x35e   :  { %4791 = vmatprep.subr.bf16.mxu0 %v6612_v4 }
 0x360   :  { %5858 = vmatpush3.bf16.msra.mxu1 %v6614_v5 }
 0x361   :  { %4792 = vmatpush1.bf16.msra.mxu0 %v6610_v6  ;;  %5859 = vmatprep.subr.bf16.mxu1 %v6618_v7  ;;  %v6648_v6 = vld [vmem:[#allocation11 + $0x480] ss:$12 sps:$4 sm:$0xff]   ;;  %v6686_v7 = vld [vmem:[#allocation11 + $0x5f0] ss:$12 sps:$4 sm:$0xff]  }
 0x362   :  { %4793 = vmatprep.subr.bf16.mxu0 %v6617_v8 }
 0x364   :  { %5860 = vmatpush3.bf16.msra.mxu1 %v6619_v10 }
 0x365   :  { %4794 = vmatpush1.bf16.msra.mxu0 %v6615_v11  ;;  %5861 = vmatprep.subr.bf16.mxu1 %v6623_v14  ;;  %v6655_v11 = vld [vmem:[#allocation11 + $0x49c] ss:$12 sps:$4 sm:$0xff]  }
 0x366   :  { %4795 = vmatprep.subr.bf16.mxu0 %v6622_v9 }
 0x368   :  { %5862 = vmatpush3.bf16.msra.mxu1 %v6624_v53 }
 0x369   :  { %4796 = vmatpush1.bf16.msra.mxu0 %v6620_v54  ;;  %5863 = vmatprep.subr.bf16.mxu1 %v6628_v15  ;;  %v6687_v15 = vld [vmem:[#allocation11 + $0x530] ss:$12 sps:$4 sm:$0xff]  }
 0x36a   :  { %4797 = vmatprep.subr.bf16.mxu0 %v6627_v56 }
 0x36c   :  { %5864 = vmatpush3.bf16.msra.mxu1 %v6629_v16 }
 0x36d   :  { %4798 = vmatpush1.bf16.msra.mxu0 %v6625_v19  ;;  %5871 = vmatprep.subr.bf16.mxu1 %v6651_v20  ;;  %v6653_v19 = vld [vmem:[#allocation11 + $0x498] ss:$12 sps:$4 sm:$0xff]   ;;  %v6691_v20 = vld [vmem:[#allocation11 + $0x6c8] ss:$12 sps:$4 sm:$0xff]  }
 0x36e   :  { %4799 = vmatprep.subr.bf16.mxu0 %v6632_v22 }
 0x36f   :  { %5066 = vmatmul.mubr.bf16.vlgmr.msra.gmra.mrb[24].mxu1 %v7423_v21 }
 0x370   :  { %5872 = vmatpush3.bf16.msra.mxu1 %v6652_v34 }
 0x371   :  { %4800 = vmatpush1.bf16.msra.mxu0 %v6630_v24  ;;  %5873 = vmatprep.subr.bf16.mxu1 %v6656_v26  ;;  %v6660_v24 = vld [vmem:[#allocation11 + $0x4b4] ss:$12 sps:$4 sm:$0xff]  }
 0x372   :  { %4801 = vmatprep.subr.bf16.mxu0 %v6635_v41 }
 0x374   :  { %5874 = vmatpush3.bf16.msra.mxu1 %v6657_v27 }
 0x375   :  { %4802 = vmatpush1.bf16.msra.mxu0 %v6633_v42  ;;  %5875 = vmatprep.subr.bf16.mxu1 %v6661_v28 }
 0x376   :  { %4803 = vmatprep.subr.bf16.mxu0 %v6638_v29  ;;  %v6658_v29 = vld [vmem:[#allocation11 + $0x4b0] ss:$12 sps:$4 sm:$0xff]  }
 0x378   :  { %5876 = vmatpush3.bf16.msra.mxu1 %v6662_v31 }
 0x379   :  { %4804 = vmatpush1.bf16.msra.mxu0 %v6636_v32  ;;  %5877 = vmatprep.subr.bf16.mxu1 %v6666_v33  ;;  %v6665_v32 = vld [vmem:[#allocation11 + $0x4cc] ss:$12 sps:$4 sm:$0xff]  }
 0x37a   :  { %4805 = vmatprep.subr.bf16.mxu0 %v6641_v36  ;;  %v6663_v36 = vld [vmem:[#allocation11 + $0x4c8] ss:$12 sps:$4 sm:$0xff]  }
 0x37c   :  { %5878 = vmatpush3.bf16.msra.mxu1 %v6667_v38  ;;  %v6670_v38 = vld [vmem:[#allocation11 + $0x4e4] ss:$12 sps:$4 sm:$0xff]  }
 0x37d   :  { %4806 = vmatpush1.bf16.msra.mxu0 %v6639_v39  ;;  %5879 = vmatprep.subr.bf16.mxu1 %v6671_v37  ;;  %v6668_v39 = vld [vmem:[#allocation11 + $0x4e0] ss:$12 sps:$4 sm:$0xff]   ;;  %v6675_v37 = vld [vmem:[#allocation11 + $0x4fc] ss:$12 sps:$4 sm:$0xff]  }
 0x37e   :  { %4807 = vmatprep.subr.bf16.mxu0 %v6644_v45 }
 0x380   :  { %5880 = vmatpush3.bf16.msra.mxu1 %v6672_v44  ;;  %v6673_v44 = vld [vmem:[#allocation11 + $0x4f8] ss:$12 sps:$4 sm:$0xff]  }
 0x381   :  { %4808 = vmatpush1.bf16.msra.mxu0 %v6642_v12  ;;  %v2347_v51 = vpop.f32.mrb[8].mxu1  ;;  %5881 = vmatprep.subr.bf16.mxu1 %v6676_v55  ;;  %v6680_v55 = vld [vmem:[#allocation11 + $0x514] ss:$12 sps:$4 sm:$0xff]  }
 0x382   :  { %4809 = vmatprep.subr.bf16.mxu0 %v6647_v61  ;;  %v7513_v18 = vadd.f32 %v2347_v51, %v539_v63  ;;  %v2349_v57 = vpop.f32.mrb[9].mxu1 }
 0x383   :  { %v7515_v0 = vadd.f32 %v2349_v57, %v543_v17  ;;  %v2351_v60 = vpop.f32.mrb[10].mxu1  ;;  %v6685_v57 = vld [vmem:[#allocation11 + $0x52c] ss:$12 sps:$4 sm:$0xff]  }
 0x384   :  { %v2534_v1 = vmul.f32 %v7513_v18, %v7513_v18  ;;  %v7519_v3 = vadd.f32 %v2351_v60, %v539_v63  ;;  %v2353_v59 = vpop.f32.mrb[11].mxu1  ;;  %5882 = vmatpush3.bf16.msra.mxu1 %v6677_v49 }
 0x385   :  { %4810 = vmatpush1.bf16.msra.mxu0 %v6645_v50  ;;  %v2535_v4 = vmul.f32 %v7515_v0, %v7515_v0  ;;  %v7523_v5 = vadd.f32 %v2353_v59, %v543_v17  ;;  %5883 = vmatprep.subr.bf16.mxu1 %v6681_v52  ;;  %v6678_v52 = vld [vmem:[#allocation11 + $0x510] ss:$12 sps:$4 sm:$0xff]  }
 0x386   :  { %v2558_v8 = vmul.f32 %v7513_v18, %v2534_v1  ;;  %v2546_v10 = vmul.f32 %v7519_v3, %v7519_v3  ;;  %4822 = vmatprep.subr.bf16.mxu0 %v6650_v62 }
 0x387   :  { %v2559_v14 = vmul.f32 %v7515_v0, %v2535_v4  ;;  %v2547_v9 = vmul.f32 %v7523_v5, %v7523_v5  ;;  %v6683_v4 = vld [vmem:[#allocation11 + $0x528] ss:$12 sps:$4 sm:$0xff]  }
 0x388   :  { %v2582_v53 = vmul.f32 0.044715, %v2558_v8  ;;  %v2570_v54 = vmul.f32 %v7519_v3, %v2546_v10  ;;  %4812 = vmatmul.mubr.bf16.vlgmr.msra.gmra.mrb[8].mxu0 %v7423_v21  ;;  %5884 = vmatpush3.bf16.msra.mxu1 %v6682_v25  ;;  %v6692_v10 = vld [vmem:[#allocation11 + $0x608] ss:$12 sps:$4 sm:$0xff]  }
 0x389   :  { %v2583_v56 = vmul.f32 0.044715, %v2559_v14  ;;  %v2571_v16 = vmul.f32 %v7523_v5, %v2547_v9  ;;  %4823 = vmatpush1.bf16.msra.mxu0 %v6648_v6  ;;  %5885 = vmatprep.subr.bf16.mxu1 %v6686_v7  ;;  %v6690_v7 = vld [vmem:[#allocation11 + $0x544] ss:$12 sps:$4 sm:$0xff]   ;;  %v6688_v14 = vld [vmem:[#allocation11 + $0x540] ss:$12 sps:$4 sm:$0xff]  }
 0x38a   :  { %v2606_v22 = vadd.f32 %v7513_v18, %v2582_v53  ;;  %v2594_v34 = vmul.f32 0.044715, %v2570_v54  ;;  %4824 = vmatprep.subr.bf16.mxu0 %v6655_v11  ;;  %v6696_v11 = vld [vmem:[#allocation11 + $0x6e0] ss:$12 sps:$4 sm:$0xff]   ;;  %v6702_v53 = vld [vmem:[#allocation11 + $0x638] ss:$12 sps:$4 sm:$0xff]  }
 0x38b   :  { %v2607_v26 = vadd.f32 %v7515_v0, %v2583_v56  ;;  %v2595_v41 = vmul.f32 0.044715, %v2571_v16  ;;  %v6700_v9 = vld [vmem:[#allocation11 + $0x574] ss:$12 sps:$4 sm:$0xff]   ;;  %v6706_v54 = vld [vmem:[#allocation11 + $0x710] ss:$12 sps:$4 sm:$0xff]  }
 0x38c   :  { %v2630_v27 = vmul.f32 0.7978846, %v2606_v22  ;;  %v2618_v21 = vadd.f32 %v7519_v3, %v2594_v34  ;;  %5886 = vmatpush3.bf16.msra.mxu1 %v6687_v15  ;;  %v6698_v15 = vld [vmem:[#allocation11 + $0x570] ss:$12 sps:$4 sm:$0xff]   ;;  %v6705_v56 = vld [vmem:[#allocation11 + $0x58c] ss:$12 sps:$4 sm:$0xff]  }
 0x38d   :  { %v2631_v42 = vmul.f32 0.7978846, %v2607_v26  ;;  %v2619_v28 = vadd.f32 %v7523_v5, %v2595_v41  ;;  %4825 = vmatpush1.bf16.msra.mxu0 %v6653_v19  ;;  %5893 = vmatprep.subr.bf16.mxu1 %v6691_v20  ;;  %v6707_v16 = vld [vmem:[#allocation11 + $0x650] ss:$12 sps:$4 sm:$0xff]   ;;  %v6711_v19 = vld [vmem:[#allocation11 + $0x728] ss:$12 sps:$4 sm:$0xff]  }
 0x38e   :  { %6876 = vtanh.f32 %v2630_v27  ;;  %v2642_v31 = vmul.f32 0.7978846, %v2618_v21  ;;  %4826 = vmatprep.subr.bf16.mxu0 %v6660_v24  ;;  %v6703_v20 = vld [vmem:[#allocation11 + $0x588] ss:$12 sps:$4 sm:$0xff]   ;;  %v6710_v22 = vld [vmem:[#allocation11 + $0x5a4] ss:$12 sps:$4 sm:$0xff]  }
 0x38f   :  { %6878 = vtanh.f32 %v2631_v42  ;;  %v2643_v33 = vmul.f32 0.7978846, %v2619_v28  ;;  %v6712_v34 = vld [vmem:[#allocation11 + $0x668] ss:$12 sps:$4 sm:$0xff]   ;;  %v6716_v24 = vld [vmem:[#allocation11 + $0x740] ss:$12 sps:$4 sm:$0xff]  }
 0x390   :  { %6880 = vtanh.f32 %v2642_v31  ;;  %v6708_v26 = vld [vmem:[#allocation11 + $0x5a0] ss:$12 sps:$4 sm:$0xff]   ;;  %v6715_v41 = vld [vmem:[#allocation11 + $0x5bc] ss:$12 sps:$4 sm:$0xff]   ;;  %v6721_v21 = vld [vmem:[#allocation11 + $0x758] ss:$12 sps:$4 sm:$0xff]  }
 0x391   :  { %6882 = vtanh.f32 %v2643_v33  ;;  %4827 = vmatpush1.bf16.msra.mxu0 %v6658_v29  ;;  %v6717_v27 = vld [vmem:[#allocation11 + $0x680] ss:$12 sps:$4 sm:$0xff]   ;;  %v6713_v42 = vld [vmem:[#allocation11 + $0x5b8] ss:$12 sps:$4 sm:$0xff]   ;;  %v6726_v31 = vld [vmem:[#allocation11 + $0x770] ss:$12 sps:$4 sm:$0xff]  }
 0x392   :  { %4828 = vmatprep.subr.bf16.mxu0 %v6665_v32  ;;  %v6720_v28 = vld [vmem:[#allocation11 + $0x5d4] ss:$12 sps:$4 sm:$0xff]   ;;  %v6722_v29 = vld [vmem:[#allocation11 + $0x698] ss:$12 sps:$4 sm:$0xff]   ;;  %v6718_v32 = vld [vmem:[#allocation11 + $0x5d0] ss:$12 sps:$4 sm:$0xff]  }
 0x393   :  { %v6725_v33 = vld [vmem:[#allocation11 + $0x5ec] ss:$12 sps:$4 sm:$0xff]  }
 0x395   :  { %4829 = vmatpush1.bf16.msra.mxu0 %v6663_v36  ;;  %v6727_v36 = vld [vmem:[#allocation11 + $0x6b0] ss:$12 sps:$4 sm:$0xff]  }
 0x396   :  { %4830 = vmatprep.subr.bf16.mxu0 %v6670_v38  ;;  %v6755_v38 = vld [vmem:[#allocation11 + $0x848] ss:$12 sps:$4 sm:$0xff]  }
 0x398   :  { %v6877_v45 = vpop.eup %6876 }
 0x399   :  { %v6879_v13 = vpop.eup %6878  ;;  %v2678_v43 = vadd.f32 1.0, %v6877_v45  ;;  %4831 = vmatpush1.bf16.msra.mxu0 %v6668_v39  ;;  %v6723_v39 = vld [vmem:[#allocation11 + $0x5e8] ss:$12 sps:$4 sm:$0xff]  }
 0x39a   :  { %v6881_v12 = vpop.eup %6880  ;;  %4832 = vmatprep.subr.bf16.mxu0 %v6675_v37  ;;  %v2679_v61 = vadd.f32 1.0, %v6879_v13  ;;  %v6730_v37 = vld [vmem:[#allocation11 + $0x604] ss:$12 sps:$4 sm:$0xff]   ;;  %v6756_v45 = vld [vmem:[#allocation11 + $0x788] ss:$12 sps:$4 sm:$0xff]  }
 0x39b   :  { %v6883_v2 = vpop.eup %6882  ;;  %v2702_v63 = vmul.f32 0.5, %v2678_v43  ;;  %v2690_v17 = vadd.f32 1.0, %v6881_v12  ;;  %v6760_v13 = vld [vmem:[#allocation11 + $0x860] ss:$12 sps:$4 sm:$0xff]  }
 0x39c   :  { %v2691_v49 = vadd.f32 1.0, %v6883_v2  ;;  %v2703_v50 = vmul.f32 0.5, %v2679_v61  ;;  %v6728_v43 = vld [vmem:[#allocation11 + $0x600] ss:$12 sps:$4 sm:$0xff]   ;;  %v6731_v61 = vld [vmem:[#allocation11 + $0x618] ss:$12 sps:$4 sm:$0xff]  }
 0x39d   :  { %v2714_v51 = vmul.f32 0.5, %v2690_v17  ;;  %4833 = vmatpush1.bf16.msra.mxu0 %v6673_v44  ;;  %v2726_v60 = vmul.f32 %v7513_v18, %v2702_v63  ;;  %v6695_v18 = vld [vmem:[#allocation11 + $0x55c] ss:$12 sps:$4 sm:$0xff]   ;;  %v6761_v12 = vld [vmem:[#allocation11 + $0x7a0] ss:$12 sps:$4 sm:$0xff]  }
 0x39e   :  { %4834 = vmatprep.subr.bf16.mxu0 %v6680_v55  ;;  %v2715_v62 = vmul.f32 0.5, %v2691_v49  ;;  %v2727_v59 = vmul.f32 %v7515_v0, %v2703_v50  ;;  %v6697_v0 = vld [vmem:[#allocation11 + $0x620] ss:$12 sps:$4 sm:$0xff]   ;;  %v6733_v44 = vld [vmem:[#allocation11 + $0x61c] ss:$12 sps:$4 sm:$0xff]  }
 0x39f   :  { %v2738_v1 = vmul.f32 %v7519_v3, %v2714_v51  ;;  %v6701_v3 = vld [vmem:[#allocation11 + $0x6f8] ss:$12 sps:$4 sm:$0xff]   ;;  %v6736_v2 = vld [vmem:[#allocation11 + $0x634] ss:$12 sps:$4 sm:$0xff]   ;;  %v6770_v17 = vld [vmem:[#allocation11 + $0x890] ss:$12 sps:$4 sm:$0xff]  }
 0x3a0   :  { %v2739_v25 = vmul.f32 %v7523_v5, %v2715_v62  ;;  %v6693_v5 = vld [vmem:[#allocation11 + $0x558] ss:$12 sps:$4 sm:$0xff]   ;;  %v6734_v49 = vld [vmem:[#allocation11 + $0x630] ss:$12 sps:$4 sm:$0xff]  }
 0x3a1   :  { %4835 = vmatpush1.bf16.msra.mxu0 %v6678_v52  ;;  %v7542_v6 = vpack.c.bf16 %v2738_v1, %v2726_v60  ;;  %v6765_v55 = vld [vmem:[#allocation11 + $0x878] ss:$12 sps:$4 sm:$0xff]   ;;  %v6771_v51 = vld [vmem:[#allocation11 + $0x7d0] ss:$12 sps:$4 sm:$0xff]   ;;  %v6775_v52 = vld [vmem:[#allocation11 + $0x8a8] ss:$12 sps:$4 sm:$0xff]  }
 0x3a2   :  { %4836 = vmatprep.subr.bf16.mxu0 %v6685_v57  ;;  %v2751_v8 = vpack.c.bf16 %v2739_v25, %v2727_v59  ;;  %v6766_v63 = vld [vmem:[#allocation11 + $0x7b8] ss:$12 sps:$4 sm:$0xff]   ;;  %v6737_v57 = vld [vmem:[#allocation11 + $0x648] ss:$12 sps:$4 sm:$0xff]   ;;  %v6780_v60 = vld [vmem:[#allocation11 + $0x8c0] ss:$12 sps:$4 sm:$0xff]  }
 0x3a3   :  { %v6739_v50 = vld [vmem:[#allocation11 + $0x64c] ss:$12 sps:$4 sm:$0xff]   ;;  %v6742_v62 = vld [vmem:[#allocation11 + $0x664] ss:$12 sps:$4 sm:$0xff]   ;;  %v6745_v59 = vld [vmem:[#allocation11 + $0x67c] ss:$12 sps:$4 sm:$0xff]  }
 0x3a4   :  { %4854 = vmatprep.mubr.bf16.mxu0 %v2751_v8  ;;  %5106 = vmatprep.mubr.bf16.mxu1 %v2751_v8  ;;  %v6740_v1 = vld [vmem:[#allocation11 + $0x660] ss:$12 sps:$4 sm:$0xff]   ;;  %v6786_v8 = vld [vmem:[#allocation11 + $0x818] ss:$12 sps:$4 sm:$0xff]  }
 0x3a5   :  { %4837 = vmatpush1.bf16.msra.mxu0 %v6683_v4  ;;  %5107 = vmatmul.mubr.bf16.vlgmr.msra.gmra.mrb[28].mxu1 %v7542_v6  ;;  %v6781_v25 = vld [vmem:[#allocation11 + $0x800] ss:$12 sps:$4 sm:$0xff]   ;;  %v6785_v4 = vld [vmem:[#allocation11 + $0x8d8] ss:$12 sps:$4 sm:$0xff]  }
 0x3a6   :  { %4838 = vmatprep.subr.bf16.mxu0 %v6690_v7  ;;  %5894 = vmatpush3.bf16.msra.mxu1 %v6692_v10  ;;  %v6748_v7 = vld [vmem:[#allocation11 + $0x694] ss:$12 sps:$4 sm:$0xff]   ;;  %v6790_v10 = vld [vmem:[#allocation11 + $0x8f0] ss:$12 sps:$4 sm:$0xff]  }
 0x3a7   :  { %5147 = vmatprep.mubr.bf16.mxu1 %v7506_v58  ;;  %5895 = vmatprep.subr.bf16.mxu1 %v6696_v11  ;;  %v6746_v11 = vld [vmem:[#allocation11 + $0x690] ss:$12 sps:$4 sm:$0xff]  }
 0x3a9   :  { %4839 = vmatpush1.bf16.msra.mxu0 %v6688_v14  ;;  %v6751_v14 = vld [vmem:[#allocation11 + $0x6ac] ss:$12 sps:$4 sm:$0xff]  }
 0x3aa   :  { %4840 = vmatprep.subr.bf16.mxu0 %v6695_v18  ;;  %5896 = vmatpush3.bf16.msra.mxu1 %v6697_v0  ;;  %v555_v18 = vrot.slane %v7436_v35, %v7328_v30  ;;  %v6791_v0 = vld [vmem:[#allocation11 + $0x830] ss:$12 sps:$4 sm:$0xff]  }
 0x3ab   :  { %5897 = vmatprep.subr.bf16.mxu1 %v6701_v3  ;;  %v559_v3 = vrot.slane %v7436_v35, %v526_v23 }
 0x3ad   :  { %4841 = vmatpush1.bf16.msra.mxu0 %v6693_v5  ;;  %v6749_v5 = vld [vmem:[#allocation11 + $0x6a8] ss:$12 sps:$4 sm:$0xff]  }
 0x3ae   :  { %4842 = vmatprep.subr.bf16.mxu0 %v6700_v9  ;;  %5898 = vmatpush3.bf16.msra.mxu1 %v6702_v53 }
 0x3af   :  { %5899 = vmatprep.subr.bf16.mxu1 %v6706_v54 }
 0x3b1   :  { %4843 = vmatpush1.bf16.msra.mxu0 %v6698_v15  ;;  %v6754_v15 = vld [vmem:[#allocation11 + $0x6c4] ss:$12 sps:$4 sm:$0xff]  }
 0x3b2   :  { %4844 = vmatprep.subr.bf16.mxu0 %v6705_v56  ;;  %5900 = vmatpush3.bf16.msra.mxu1 %v6707_v16 }
 0x3b3   :  { %5901 = vmatprep.subr.bf16.mxu1 %v6711_v19 }
 0x3b5   :  { %4845 = vmatpush1.bf16.msra.mxu0 %v6703_v20 }
 0x3b6   :  { %4846 = vmatprep.subr.bf16.mxu0 %v6710_v22  ;;  %5902 = vmatpush3.bf16.msra.mxu1 %v6712_v34  ;;  %v6752_v22 = vld [vmem:[#allocation11 + $0x6c0] ss:$12 sps:$4 sm:$0xff]  }
 0x3b7   :  { %5903 = vmatprep.subr.bf16.mxu1 %v6716_v24 }
 0x3b9   :  { %4847 = vmatpush1.bf16.msra.mxu0 %v6708_v26  ;;  %v6759_v26 = vld [vmem:[#allocation11 + $0x6dc] ss:$12 sps:$4 sm:$0xff]  }
 0x3ba   :  { %4848 = vmatprep.subr.bf16.mxu0 %v6715_v41  ;;  %5904 = vmatpush3.bf16.msra.mxu1 %v6717_v27 }
 0x3bb   :  { %5905 = vmatprep.subr.bf16.mxu1 %v6721_v21 }
 0x3bd   :  { %4849 = vmatpush1.bf16.msra.mxu0 %v6713_v42 }
 0x3be   :  { %4850 = vmatprep.subr.bf16.mxu0 %v6720_v28  ;;  %5906 = vmatpush3.bf16.msra.mxu1 %v6722_v29 }
 0x3bf   :  { %5907 = vmatprep.subr.bf16.mxu1 %v6726_v31  ;;  %v6757_v31 = vld [vmem:[#allocation11 + $0x6d8] ss:$12 sps:$4 sm:$0xff]  }
 0x3c1   :  { %4851 = vmatpush1.bf16.msra.mxu0 %v6718_v32 }
 0x3c2   :  { %4852 = vmatprep.subr.bf16.mxu0 %v6725_v33  ;;  %5908 = vmatpush3.bf16.msra.mxu1 %v6727_v36  ;;  %v6764_v36 = vld [vmem:[#allocation11 + $0x6f4] ss:$12 sps:$4 sm:$0xff]  }
 0x3c3   :  { %5915 = vmatprep.subr.bf16.mxu1 %v6755_v38 }
 0x3c5   :  { %4853 = vmatpush1.bf16.msra.mxu0 %v6723_v39  ;;  %5148 = vmatmul.mubr.bf16.vlgmr.msra.gmra.mrb[32].mxu1 %v7504_v40 }
 0x3c6   :  { %4865 = vmatprep.subr.bf16.mxu0 %v6730_v37  ;;  %5916 = vmatpush3.bf16.msra.mxu1 %v6756_v45 }
 0x3c7   :  { %5917 = vmatprep.subr.bf16.mxu1 %v6760_v13 }
 0x3c8   :  { %4855 = vmatmul.mubr.bf16.vlgmr.msra.gmra.mrb[8].mxu0 %v7542_v6  ;;  %v6743_v6 = vld [vmem:[#allocation11 + $0x678] ss:$12 sps:$4 sm:$0xff]  }
 0x3c9   :  { %4866 = vmatpush1.bf16.msra.mxu0 %v6728_v43  ;;  %4897 = vmatprep.mubr.bf16.mxu0 %v7506_v58  ;;  %v6776_v58 = vld [vmem:[#allocation11 + $0x7e8] ss:$12 sps:$4 sm:$0xff]  }
 0x3ca   :  { %4867 = vmatprep.subr.bf16.mxu0 %v6733_v44  ;;  %5918 = vmatpush3.bf16.msra.mxu1 %v6761_v12  ;;  %v6762_v44 = vld [vmem:[#allocation11 + $0x6f0] ss:$12 sps:$4 sm:$0xff]  }
 0x3cb   :  { %5919 = vmatprep.subr.bf16.mxu1 %v6765_v55  ;;  %v6769_v55 = vld [vmem:[#allocation11 + $0x70c] ss:$12 sps:$4 sm:$0xff]  }
 0x3cd   :  { %4868 = vmatpush1.bf16.msra.mxu0 %v6731_v61 }
 0x3ce   :  { %4869 = vmatprep.subr.bf16.mxu0 %v6736_v2  ;;  %5920 = vmatpush3.bf16.msra.mxu1 %v6766_v63  ;;  %v6767_v2 = vld [vmem:[#allocation11 + $0x708] ss:$12 sps:$4 sm:$0xff]   ;;  %v6774_v63 = vld [vmem:[#allocation11 + $0x724] ss:$12 sps:$4 sm:$0xff]  }
 0x3cf   :  { %5921 = vmatprep.subr.bf16.mxu1 %v6770_v17  ;;  %v6772_v17 = vld [vmem:[#allocation11 + $0x720] ss:$12 sps:$4 sm:$0xff]  }
 0x3d1   :  { %4870 = vmatpush1.bf16.msra.mxu0 %v6734_v49  ;;  %v6779_v49 = vld [vmem:[#allocation11 + $0x73c] ss:$12 sps:$4 sm:$0xff]  }
 0x3d2   :  { %4871 = vmatprep.subr.bf16.mxu0 %v6739_v50  ;;  %5922 = vmatpush3.bf16.msra.mxu1 %v6771_v51 }
 0x3d3   :  { %5923 = vmatprep.subr.bf16.mxu1 %v6775_v52 }
 0x3d5   :  { %4872 = vmatpush1.bf16.msra.mxu0 %v6737_v57  ;;  %v6777_v57 = vld [vmem:[#allocation11 + $0x738] ss:$12 sps:$4 sm:$0xff]  }
 0x3d6   :  { %4873 = vmatprep.subr.bf16.mxu0 %v6742_v62  ;;  %5924 = vmatpush3.bf16.msra.mxu1 %v6776_v58  ;;  %v6784_v58 = vld [vmem:[#allocation11 + $0x754] ss:$12 sps:$4 sm:$0xff]  }
 0x3d7   :  { %5925 = vmatprep.subr.bf16.mxu1 %v6780_v60 }
 0x3d9   :  { %4874 = vmatpush1.bf16.msra.mxu0 %v6740_v1 }
 0x3da   :  { %4875 = vmatprep.subr.bf16.mxu0 %v6745_v59  ;;  %5926 = vmatpush3.bf16.msra.mxu1 %v6781_v25 }
 0x3db   :  { %5927 = vmatprep.subr.bf16.mxu1 %v6785_v4 }
 0x3dd   :  { %4876 = vmatpush1.bf16.msra.mxu0 %v6743_v6 }
 0x3de   :  { %4877 = vmatprep.subr.bf16.mxu0 %v6748_v7  ;;  %5928 = vmatpush3.bf16.msra.mxu1 %v6786_v8  ;;  %v6782_v8 = vld [vmem:[#allocation11 + $0x750] ss:$12 sps:$4 sm:$0xff]  }
 0x3df   :  { %5929 = vmatprep.subr.bf16.mxu1 %v6790_v10  ;;  %v6789_v10 = vld [vmem:[#allocation11 + $0x76c] ss:$12 sps:$4 sm:$0xff]  }
 0x3e1   :  { %4878 = vmatpush1.bf16.msra.mxu0 %v6746_v11  ;;  %v2519_v9 = vpop.f32.mrb[12].mxu1 }
 0x3e2   :  { %4879 = vmatprep.subr.bf16.mxu0 %v6751_v14  ;;  %v7554_v53 = vadd.f32 %v2519_v9, %v555_v18  ;;  %v2521_v54 = vpop.f32.mrb[13].mxu1  ;;  %5930 = vmatpush3.bf16.msra.mxu1 %v6791_v0 }
 0x3e3   :  { %v7556_v56 = vadd.f32 %v2521_v54, %v559_v3  ;;  %v2523_v16 = vpop.f32.mrb[14].mxu1 }
 0x3e4   :  { %v2538_v19 = vmul.f32 %v7554_v53, %v7554_v53  ;;  %v7560_v20 = vadd.f32 %v2523_v16, %v555_v18  ;;  %v2525_v46 = vpop.f32.mrb[15].mxu1  ;;  %v6794_v16 = vld [vmem:[#allocation11 + $0x784] ss:$12 sps:$4 sm:$0xff]  }
 0x3e5   :  { %4880 = vmatpush1.bf16.msra.mxu0 %v6749_v5  ;;  %v2539_v23 = vmul.f32 %v7556_v56, %v7556_v56  ;;  %v7564_v35 = vadd.f32 %v2525_v46, %v559_v3  ;;  %v6787_v5 = vld [vmem:[#allocation11 + $0x768] ss:$12 sps:$4 sm:$0xff]  }
 0x3e6   :  { %v2562_v34 = vmul.f32 %v7554_v53, %v2538_v19  ;;  %v2550_v24 = vmul.f32 %v7560_v20, %v7560_v20  ;;  %4881 = vmatprep.subr.bf16.mxu0 %v6754_v15 }
 0x3e7   :  { %v2563_v41 = vmul.f32 %v7556_v56, %v2539_v23  ;;  %v2551_v27 = vmul.f32 %v7564_v35, %v7564_v35 }
 0x3e8   :  { %v2586_v21 = vmul.f32 0.044715, %v2562_v34  ;;  %v2574_v42 = vmul.f32 %v7560_v20, %v2550_v24  ;;  %v6800_v34 = vld [vmem:[#allocation11 + $0x7b4] ss:$12 sps:$4 sm:$0xff]   ;;  %v6798_v24 = vld [vmem:[#allocation11 + $0x7b0] ss:$12 sps:$4 sm:$0xff]  }
 0x3e9   :  { %v2587_v28 = vmul.f32 0.044715, %v2563_v41  ;;  %v2575_v29 = vmul.f32 %v7564_v35, %v2551_v27  ;;  %4882 = vmatpush1.bf16.msra.mxu0 %v6752_v22  ;;  %v6801_v41 = vld [vmem:[#allocation11 + $0x7c8] ss:$12 sps:$4 sm:$0xff]   ;;  %v6806_v27 = vld [vmem:[#allocation11 + $0x7e4] ss:$12 sps:$4 sm:$0xff]  }
 0x3ea   :  { %v2610_v32 = vadd.f32 %v7554_v53, %v2586_v21  ;;  %v2598_v33 = vmul.f32 0.044715, %v2574_v42  ;;  %4883 = vmatprep.subr.bf16.mxu0 %v6759_v26  ;;  %v6803_v26 = vld [vmem:[#allocation11 + $0x7cc] ss:$12 sps:$4 sm:$0xff]   ;;  %v6809_v42 = vld [vmem:[#allocation11 + $0x7fc] ss:$12 sps:$4 sm:$0xff]  }
 0x3eb   :  { %v2611_v38 = vadd.f32 %v7556_v56, %v2587_v28  ;;  %v2599_v39 = vmul.f32 0.044715, %v2575_v29  ;;  %v6804_v21 = vld [vmem:[#allocation11 + $0x7e0] ss:$12 sps:$4 sm:$0xff]   ;;  %v6807_v28 = vld [vmem:[#allocation11 + $0x7f8] ss:$12 sps:$4 sm:$0xff]  }
 0x3ec   :  { %v2634_v37 = vmul.f32 0.7978846, %v2610_v32  ;;  %v2622_v45 = vadd.f32 %v7560_v20, %v2598_v33  ;;  %v7586_v29 = vld [vmem:[#allocation13] sm:$0x7]  ;;  %v6815_v32 = vld [vmem:[#allocation11 + $0x82c] ss:$12 sps:$4 sm:$0xff]  }
 0x3ed   :  { %v2635_v13 = vmul.f32 0.7978846, %v2611_v38  ;;  %v2623_v43 = vadd.f32 %v7564_v35, %v2599_v39  ;;  %4884 = vmatpush1.bf16.msra.mxu0 %v6757_v31  ;;  %v6810_v31 = vld [vmem:[#allocation11 + $0x810] ss:$12 sps:$4 sm:$0xff]   ;;  %v3153_v33 = vrot.slane %v7586_v29, %v7328_v30  ;;  %v6819_v30 = vld [vmem:[#allocation11 + $0x858] ss:$12 sps:$4 sm:$0xff]  }
 0x3ee   :  { %6884 = vtanh.f32 %v2634_v37  ;;  %v2646_v12 = vmul.f32 0.7978846, %v2622_v45  ;;  %4885 = vmatprep.subr.bf16.mxu0 %v6764_v36  ;;  %v6813_v36 = vld [vmem:[#allocation11 + $0x828] ss:$12 sps:$4 sm:$0xff]   ;;  %v6818_v39 = vld [vmem:[#allocation11 + $0x844] ss:$12 sps:$4 sm:$0xff]  }
 0x3ef   :  { %6886 = vtanh.f32 %v2635_v13  ;;  %v2647_v61 = vmul.f32 0.7978846, %v2623_v43 }
 0x3f0   :  { %6888 = vtanh.f32 %v2646_v12 }
 0x3f1   :  { %6890 = vtanh.f32 %v2647_v61  ;;  %4886 = vmatpush1.bf16.msra.mxu0 %v6762_v44  ;;  %v6816_v44 = vld [vmem:[#allocation11 + $0x840] ss:$12 sps:$4 sm:$0xff]  }
 0x3f2   :  { %4887 = vmatprep.subr.bf16.mxu0 %v6769_v55 }
 0x3f5   :  { %4888 = vmatpush1.bf16.msra.mxu0 %v6767_v2 }
 0x3f6   :  { %4889 = vmatprep.subr.bf16.mxu0 %v6774_v63  ;;  %v6821_v63 = vld [vmem:[#allocation11 + $0x85c] ss:$12 sps:$4 sm:$0xff]  }
 0x3f8   :  { %v6885_v50 = vpop.eup %6884 }
 0x3f9   :  { %v6887_v51 = vpop.eup %6886  ;;  %v2682_v52 = vadd.f32 1.0, %v6885_v50  ;;  %4890 = vmatpush1.bf16.msra.mxu0 %v6772_v17  ;;  %v6822_v50 = vld [vmem:[#allocation11 + $0x870] ss:$12 sps:$4 sm:$0xff]  }
 0x3fa   :  { %v6889_v62 = vpop.eup %6888  ;;  %4891 = vmatprep.subr.bf16.mxu0 %v6779_v49  ;;  %v2683_v60 = vadd.f32 1.0, %v6887_v51  ;;  %v6824_v49 = vld [vmem:[#allocation11 + $0x874] ss:$12 sps:$4 sm:$0xff]   ;;  %v6827_v51 = vld [vmem:[#allocation11 + $0x88c] ss:$12 sps:$4 sm:$0xff]  }
 0x3fb   :  { %v6891_v1 = vpop.eup %6890  ;;  %v2706_v59 = vmul.f32 0.5, %v2682_v52  ;;  %v2694_v25 = vadd.f32 1.0, %v6889_v62  ;;  %v6825_v52 = vld [vmem:[#allocation11 + $0x888] ss:$12 sps:$4 sm:$0xff]   ;;  %v6828_v62 = vld [vmem:[#allocation11 + $0x8a0] ss:$12 sps:$4 sm:$0xff]  }
 0x3fc   :  { %v2695_v4 = vadd.f32 1.0, %v6891_v1  ;;  %v2707_v6 = vmul.f32 0.5, %v2683_v60  ;;  %v6831_v60 = vld [vmem:[#allocation11 + $0x8b8] ss:$12 sps:$4 sm:$0xff]   ;;  %v6836_v1 = vld [vmem:[#allocation11 + $0x8d4] ss:$12 sps:$4 sm:$0xff]  }
 0x3fd   :  { %v2718_v7 = vmul.f32 0.5, %v2694_v25  ;;  %4892 = vmatpush1.bf16.msra.mxu0 %v6777_v57  ;;  %v2730_v14 = vmul.f32 %v7554_v53, %v2706_v59  ;;  %v6792_v53 = vld [vmem:[#allocation11 + $0x780] ss:$12 sps:$4 sm:$0xff]   ;;  %v6830_v57 = vld [vmem:[#allocation11 + $0x8a4] ss:$12 sps:$4 sm:$0xff]  }
 0x3fe   :  { %4893 = vmatprep.subr.bf16.mxu0 %v6784_v58  ;;  %v2719_v11 = vmul.f32 0.5, %v2695_v4  ;;  %v2731_v0 = vmul.f32 %v7556_v56, %v2707_v6  ;;  %v6797_v56 = vld [vmem:[#allocation11 + $0x79c] ss:$12 sps:$4 sm:$0xff]   ;;  %v6839_v25 = vld [vmem:[#allocation11 + $0x8ec] ss:$12 sps:$4 sm:$0xff]  }
 0x3ff   :  { %v2742_v18 = vmul.f32 %v7560_v20, %v2718_v7  ;;  %v6833_v58 = vld [vmem:[#allocation11 + $0x8bc] ss:$12 sps:$4 sm:$0xff]  }
 0x400   :  { %v2743_v3 = vmul.f32 %v7564_v35, %v2719_v11  ;;  %v6795_v35 = vld [vmem:[#allocation11 + $0x798] ss:$12 sps:$4 sm:$0xff]   ;;  %v6834_v59 = vld [vmem:[#allocation11 + $0x8d0] ss:$12 sps:$4 sm:$0xff]   ;;  %v6837_v4 = vld [vmem:[#allocation11 + $0x8e8] ss:$12 sps:$4 sm:$0xff]  }
 0x401   :  { %4894 = vmatpush1.bf16.msra.mxu0 %v6782_v8  ;;  %v5821_v9 = vpop.f32.mrb[16].mxu1  ;;  %v7582_v54 = vpack.c.bf16 %v2742_v18, %v2730_v14 }
 0x402   :  { %4895 = vmatprep.subr.bf16.mxu0 %v6789_v10  ;;  %v5822_v15 = vpop.f32.mrb[17].mxu1  ;;  %v2755_v19 = vpack.c.bf16 %v2743_v3, %v2731_v0 }
 0x403   :  { %v5823_v46 = vadd.f32 %v5822_v15, %v5821_v9  ;;  %v5824_v23 = vpop.f32.mrb[18].mxu1 }
 0x404   :  { %v5825_v22 = vpop.f32.mrb[19].mxu1  ;;  %5188 = vmatprep.mubr.bf16.mxu1 %v2755_v19 }
 0x405   :  { %4896 = vmatpush1.bf16.msra.mxu0 %v6787_v5  ;;  %v5826_v20 = vadd.f32 %v5825_v22, %v5824_v23  ;;  %5189 = vmatmul.mubr.bf16.vlgmr.msra.gmra.mrb[36].mxu1 %v7582_v54  ;;  %v4986_v45 = vadd.f32 %v5823_v46, %v3153_v33 }
 0x406   :  { %4908 = vmatprep.subr.bf16.mxu0 %v6794_v16 }
 0x407   :  { %v4989_v55 = vadd.f32 %v5826_v20, %v3153_v33 }
 0x408   :  { %4898 = vmatmul.mubr.bf16.vlgmr.msra.gmra.mrb[8].mxu0 %v7504_v40  ;;  %v6812_v40 = vld [vmem:[#allocation11 + $0x814] ss:$12 sps:$4 sm:$0xff]  }
 0x409   :  { %4909 = vmatpush1.bf16.msra.mxu0 %v6792_v53  ;;  %4940 = vmatprep.mubr.bf16.mxu0 %v2755_v19 }
 0x40a   :  { %4910 = vmatprep.subr.bf16.mxu0 %v6797_v56 }
 0x40d   :  { %4911 = vmatpush1.bf16.msra.mxu0 %v6795_v35 }
 0x40e   :  { %4912 = vmatprep.subr.bf16.mxu0 %v6800_v34 }
 0x411   :  { %4913 = vmatpush1.bf16.msra.mxu0 %v6798_v24 }
 0x412   :  { %4914 = vmatprep.subr.bf16.mxu0 %v6803_v26 }
 0x415   :  { %4915 = vmatpush1.bf16.msra.mxu0 %v6801_v41 }
 0x416   :  { %4916 = vmatprep.subr.bf16.mxu0 %v6806_v27 }
 0x419   :  { %4917 = vmatpush1.bf16.msra.mxu0 %v6804_v21 }
 0x41a   :  { %4918 = vmatprep.subr.bf16.mxu0 %v6809_v42 }
 0x41d   :  { %4919 = vmatpush1.bf16.msra.mxu0 %v6807_v28 }
 0x41e   :  { %4920 = vmatprep.subr.bf16.mxu0 %v6812_v40 }
 0x421   :  { %4921 = vmatpush1.bf16.msra.mxu0 %v6810_v31  ;;  %v6894_v31 = vld [vmem:[#allocation2 + $0x10] sm:$0xff] }
 0x422   :  { %4922 = vmatprep.subr.bf16.mxu0 %v6815_v32  ;;  %v5843_v38 = vpop.f32.mrb[20].mxu1 }
 0x423   :  { %v5844_v37 = vpop.f32.mrb[21].mxu1 }
 0x424   :  { %v5845_v13 = vadd.f32 %v5844_v37, %v5843_v38  ;;  %v5846_v43 = vpop.f32.mrb[22].mxu1  ;;  %v3149_v37 = vrot.slane %v7586_v29, %v7288_v47 }
 0x425   :  { %4923 = vmatpush1.bf16.msra.mxu0 %v6813_v36  ;;  %v5847_v12 = vpop.f32.mrb[23].mxu1  ;;  %v6895_v36 = vld [vmem:[#allocation2 + $0x28] sm:$0x3] }
 0x426   :  { %v5027_v61 = vadd.f32 %v5845_v13, %v4986_v45  ;;  %4924 = vmatprep.subr.bf16.mxu0 %v6818_v39  ;;  %v5848_v2 = vadd.f32 %v5847_v12, %v5846_v43  ;;  %v3145_v39 = vrot.slane %v7586_v29, %v7291_v48 }
 0x428   :  { %v5030_v17 = vadd.f32 %v5848_v2, %v4989_v55  ;;  %v6896_v55 = vld [vmem:[#allocation2] sm:$0xff] }
 0x429   :  { %4925 = vmatpush1.bf16.msra.mxu0 %v6816_v44 }
 0x42a   :  { %4926 = vmatprep.subr.bf16.mxu0 %v6821_v63 }
 0x42d   :  { %4927 = vmatpush1.bf16.msra.mxu0 %v6819_v30 }
 0x42e   :  { %4928 = vmatprep.subr.bf16.mxu0 %v6824_v49 }
 0x431   :  { %4929 = vmatpush1.bf16.msra.mxu0 %v6822_v50  ;;  %v6898_v50 = vld [vmem:[#allocation2 + $0x18] sm:$0x3] }
 0x432   :  { %4930 = vmatprep.subr.bf16.mxu0 %v6827_v51  ;;  %v6899_v51 = vld [vmem:[#allocation2 + $0x20] sm:$0x3] }
 0x435   :  { %4931 = vmatpush1.bf16.msra.mxu0 %v6825_v52 }
 0x436   :  { %4932 = vmatprep.subr.bf16.mxu0 %v6830_v57 }
 0x439   :  { %4933 = vmatpush1.bf16.msra.mxu0 %v6828_v62 }
 0x43a   :  { %4934 = vmatprep.subr.bf16.mxu0 %v6833_v58 }
 0x43d   :  { %4935 = vmatpush1.bf16.msra.mxu0 %v6831_v60 }
 0x43e   :  { %4936 = vmatprep.subr.bf16.mxu0 %v6836_v1 }
 0x441   :  { %4937 = vmatpush1.bf16.msra.mxu0 %v6834_v59 }
 0x442   :  { %4938 = vmatprep.subr.bf16.mxu0 %v6839_v25  ;;  %v5865_v6 = vpop.f32.mrb[24].mxu1 }
 0x443   :  { %v5866_v7 = vpop.f32.mrb[25].mxu1 }
 0x444   :  { %v5867_v8 = vadd.f32 %v5866_v7, %v5865_v6  ;;  %v5868_v10 = vpop.f32.mrb[26].mxu1 }
 0x445   :  { %4939 = vmatpush1.bf16.msra.mxu0 %v6837_v4  ;;  %v5869_v11 = vpop.f32.mrb[27].mxu1 }
 0x446   :  { %v5068_v14 = vadd.f32 %v5867_v8, %v5027_v61  ;;  %v5870_v18 = vadd.f32 %v5869_v11, %v5868_v10 }
 0x448   :  { %4941 = vmatmul.mubr.bf16.vlgmr.msra.gmra.mrb[8].mxu0 %v7582_v54  ;;  %v5071_v0 = vadd.f32 %v5870_v18, %v5030_v17  ;;  %v6897_v17 = vld [vmem:[#allocation2 + $0x8] sm:$0xff] }
 0x478   :  { %v5887_v3 = vpop.f32.mrb[28].mxu1 }
 0x479   :  { %v5888_v5 = vpop.f32.mrb[29].mxu1 }
 0x47a   :  { %v5889_v9 = vadd.f32 %v5888_v5, %v5887_v3  ;;  %v5890_v15 = vpop.f32.mrb[30].mxu1 }
 0x47b   :  { %v5891_v16 = vpop.f32.mrb[31].mxu1 }
 0x47c   :  { %v5109_v19 = vadd.f32 %v5889_v9, %v5068_v14  ;;  %v5892_v46 = vadd.f32 %v5891_v16, %v5890_v15 }
 0x47e   :  { %v5112_v23 = vadd.f32 %v5892_v46, %v5071_v0 }
 0x498   :  { %v5909_v22 = vpop.f32.mrb[32].mxu1 }
 0x499   :  { %v5910_v53 = vpop.f32.mrb[33].mxu1 }
 0x49a   :  { %v5911_v20 = vadd.f32 %v5910_v53, %v5909_v22  ;;  %v5912_v56 = vpop.f32.mrb[34].mxu1 }
 0x49b   :  { %v5913_v35 = vpop.f32.mrb[35].mxu1 }
 0x49c   :  { %v5150_v34 = vadd.f32 %v5911_v20, %v5109_v19  ;;  %v5914_v24 = vadd.f32 %v5913_v35, %v5912_v56 }
 0x49e   :  { %v5153_v26 = vadd.f32 %v5914_v24, %v5112_v23 }
 0x4d8   :  { %v5931_v41 = vpop.f32.mrb[36].mxu1 }
 0x4d9   :  { %v5932_v27 = vpop.f32.mrb[37].mxu1 }
 0x4da   :  { %v5933_v54 = vadd.f32 %v5932_v27, %v5931_v41  ;;  %v5934_v21 = vpop.f32.mrb[38].mxu1 }
 0x4db   :  { %v5935_v42 = vpop.f32.mrb[39].mxu1 }
 0x4dc   :  { %v5191_v28 = vadd.f32 %v5933_v54, %v5150_v34  ;;  %v5936_v40 = vadd.f32 %v5935_v42, %v5934_v21 }
 0x4de   :  { %v5199_v32 = vadd.f32 %v6894_v31, %v5191_v28  ;;  %v5194_v33 = vadd.f32 %v5936_v40, %v5153_v26 }
 0x4e0   :  { %5205 = vst [vmem:[#allocation14 + $0x10] sm:$0xff] %v5199_v32  ;;  %v5202_v38 = vadd.f32 %v6895_v36, %v5194_v33 }
 0x4e2   :  { %5208 = vst [vmem:[#allocation14 + $0x28] sm:$0x3] %v5202_v38 }
 0x51b   :  { %v4942_v45 = vpop.f32.mrb[8].mxu0 }
 0x51c   :  { %v5961_v13 = vadd.f32 %v4942_v45, %v3145_v39  ;;  %v4944_v43 = vpop.f32.mrb[9].mxu0 }
 0x51d   :  { %v5962_v44 = vadd.f32 %v4944_v43, %v3149_v37  ;;  %v4946_v12 = vpop.f32.mrb[10].mxu0 }
 0x51e   :  { %v5197_v61 = vadd.f32 %v6896_v55, %v5961_v13  ;;  %v5963_v2 = vadd.f32 %v4946_v12, %v3145_v39  ;;  %v4948_v63 = vpop.f32.mrb[11].mxu0 }
 0x51f   :  { %v5198_v30 = vadd.f32 %v6897_v17, %v5962_v44  ;;  %v5964_v49 = vadd.f32 %v4948_v63, %v3149_v37 }
 0x520   :  { %5203 = vst [vmem:[#allocation14] sm:$0xff] %v5197_v61  ;;  %v5200_v48 = vadd.f32 %v6898_v50, %v5963_v2 }
 0x521   :  { %5204 = vst [vmem:[#allocation14 + $0x8] sm:$0xff] %v5198_v30  ;;  %v5201_v47 = vadd.f32 %v6899_v51, %v5964_v49 }
 0x522   :  { %5206 = vst [vmem:[#allocation14 + $0x18] sm:$0x3] %v5200_v48 }
 0x523   :  { %5207 = vst [vmem:[#allocation14 + $0x20] sm:$0x3] %v5201_v47 }
 0x524   :  { %7065 = shalt.err (!%p7062_p4)
}
 0x525   :  { %s7066_s19 = scalar_lea.hbm %s7617_s7, 768 }
 0x526   :  { %p7067_p5 = scmp.ne.s32.totalorder %s7617_s7, %s7066_s19  ;;  %p7070_p6 = scmp.lt.u32.totalorder %s7066_s19, %s7617_s7 }
 0x528   :  { %p7072_p7 = pnand %p7070_p6, %p7067_p5 }
 0x52a   :  { %7075 = shalt.err (!%p7072_p7)
}
 0x52b   :  { %5220 = dma.vmem_to_hbm [thread:$0]  %s5215_s0, 768, %s7617_s7, [#allocation4], %s7094_s5, %s7094_s5, %s7095_s26  }
 0x52c   :  { %7084 = dma.done.wait [#allocation4], 768  }
 0x52d   :  { %7085 = vsyncadd [#allocation4], 4294966528 }
 0x52e   :  { %5224 = vsyncpa [#allocation3], 1 }
 0x52f   :  { %5225 = vsyncpa [#allocation6], 1 }
 0x530   :  { %5226 = vsyncpa [#allocation9], 1 }
 0x531   :  { %5227 = vsyncpa [#allocation12], 1 }
 0x532   :  { %5228 = vsyncpa [#allocation4], 1 }

</bundles_post_ra>
